<compile_context>
chip_gen: v7x
topology: tpu7x:2x2x1
jax: 0.10.0
libtpu: 0.0.40
codegen_flags: <defaults>
</compile_context>

<pallas_src>
import jax
import jax.numpy as jnp
from jax.experimental import pallas as pl
from jax.experimental.pallas import tpu as pltpu

NGF = 64
LATENT = 100
EPS = 1e-5


def _round_up(x, m):
    return -(-x // m) * m


# ------------------------------------------------------------------ kernels --

def matmul_stats_kernel(a_ref, b_ref, y_ref, sum_ref, sumsq_ref):
    """Single-K-step matmul with fused per-column sum / sum-of-squares.

    grid = (p, j, i): p = phase, j = N tiles, i = M tiles.
    Stats blocks are indexed (p, 0, j) -> resident across i (the "arbitrary" axis).
    nk == 1 by construction, so there is no accumulator scratch: the f32 dot result is
    stored (cast to the output dtype) and reduced for the stats in the same step.
    """
    i = pl.program_id(2)
    y = jnp.dot(a_ref[...], b_ref[...], preferred_element_type=jnp.float32)
    y_ref[...] = y.astype(y_ref.dtype)

    @pl.when(i == 0)
    def _():
        sum_ref[...] = jnp.zeros_like(sum_ref)
        sumsq_ref[...] = jnp.zeros_like(sumsq_ref)

    sum_ref[...] += jnp.sum(y, axis=0, keepdims=True)
    sumsq_ref[...] += jnp.sum(y * y, axis=0, keepdims=True)


def matmul_kernel(a_ref, b_ref, y_ref):
    """Plain single-K-step matmul (no stats outputs at all)."""
    y_ref[...] = jnp.dot(a_ref[...], b_ref[...],
                         preferred_element_type=jnp.float32).astype(y_ref.dtype)


def fused_matmul(a, b, *, with_stats, out_dtype, tm_cap=2048, tn_cap=8192):
    """(P, M, K) @ (P, K, N) -> Y (P, M, N) [+ per-phase column sum / sumsq (P, 1, N)].

    K is always taken as a single tile (nk == 1) for this network, so the kernel never
    needs an accumulator scratch.
    """
    p_dim, m, k_dim = a.shape
    pb, kb, n = b.shape
    assert p_dim == pb and k_dim == kb
    tm, tn = min(m, tm_cap), min(n, tn_cap)
    assert m % tm == 0 and n % tn == 0
    grid = (p_dim, n // tn, m // tm)

    in_specs = [pl.BlockSpec((None, tm, k_dim), lambda p, j, i: (p, i, 0)),
                pl.BlockSpec((None, k_dim, tn), lambda p, j, i: (p, 0, j))]

    if with_stats:
        kernel = matmul_stats_kernel
        out_shape = (jax.ShapeDtypeStruct((p_dim, m, n), out_dtype),
                     jax.ShapeDtypeStruct((p_dim, 1, n), jnp.float32),
                     jax.ShapeDtypeStruct((p_dim, 1, n), jnp.float32))
        out_specs = (pl.BlockSpec((None, tm, tn), lambda p, j, i: (p, i, j)),
                     pl.BlockSpec((None, 1, tn), lambda p, j, i: (p, 0, j)),
                     pl.BlockSpec((None, 1, tn), lambda p, j, i: (p, 0, j)))
        semantics = ("parallel", "parallel", "arbitrary")  # stats resident across i
    else:
        kernel = matmul_kernel
        out_shape = jax.ShapeDtypeStruct((p_dim, m, n), out_dtype)
        out_specs = pl.BlockSpec((None, tm, tn), lambda p, j, i: (p, i, j))
        semantics = ("parallel", "parallel", "parallel")   # fully shardable (v7x megacore)

    return pl.pallas_call(
        kernel,
        out_shape=out_shape,
        grid_spec=pltpu.PrefetchScalarGridSpec(
            num_scalar_prefetch=0,
            grid=grid,
            in_specs=in_specs,
            out_specs=out_specs),
        compiler_params=pltpu.CompilerParams(
            dimension_semantics=semantics,
            vmem_limit_bytes=32 * 1024 * 1024),
    )(a, b)


# ------------------------------------------------------------- glue (XLA) ----

def phase_im2col(x):
    """x: (N, H, W, Cin) post-activation -> A: (4, N*H*W, 4*Cin) bf16 for ConvT(4, 2, 1).

    TODO(synk): fold this zero-pad / 4-tap gather into the matmul (manual halo DMA +
    in-kernel im2col) so the blown-up A is never written to / read back from HBM.
    """
    n, h, w, cin = x.shape
    xp = jnp.pad(x, ((0, 0), (1, 1), (1, 1), (0, 0)))
    phases = []
    for py in range(2):
        for px in range(2):
            taps = [xp[:, py + dy:py + dy + h, px + dx:px + dx + w, :]
                    for dy in range(2) for dx in range(2)]
            phases.append(jnp.concatenate(taps, axis=-1).reshape(n * h * w, 4 * cin))
    return jnp.stack(phases, axis=0).astype(jnp.bfloat16)


def phase_weights(w):
    """w: (Cin, Cout, 4, 4) -> B: (4, 4*Cin, Cout padded to 128) bf16 matching phase_im2col."""
    cin, cout = w.shape[:2]
    coutp = _round_up(cout, 128)
    bs = []
    for py in range(2):
        for px in range(2):
            taps = [w[:, :, 3 - 2 * dy - py, 3 - 2 * dx - px]
                    for dy in range(2) for dx in range(2)]
            bp = jnp.concatenate(taps, axis=0)                 # (4*Cin, Cout)
            bs.append(jnp.pad(bp, ((0, 0), (0, coutp - cout))))
    return jnp.stack(bs, axis=0).astype(jnp.bfloat16)


def phase_depth_to_space(y, n, h, w, cout):
    """y: (4, N*H*W, Coutp) with phase order (py, px) -> (N, 2H, 2W, cout)."""
    z = y[:, :, :cout].reshape(2, 2, n, h, w, cout)
    z = jnp.transpose(z, (2, 3, 0, 4, 1, 5))
    return z.reshape(n, 2 * h, 2 * w, cout)


def bn_scale_bias(s, ss, cnt, gamma, beta, cout):
    """Training-mode (biased) batch-norm scale/bias from fused per-phase column sums."""
    s_tot = s.sum(axis=(0, 1))[:cout]
    ss_tot = ss.sum(axis=(0, 1))[:cout]
    mean = s_tot / cnt
    var = jnp.maximum(ss_tot / cnt - mean * mean, 0.0)    # guard f32 cancellation
    scale = gamma * jax.lax.rsqrt(var + EPS)
    bias = beta - mean * scale
    return scale, bias


def generator_forward(z_nchw, params):
    """DCGAN Generator forward. z_nchw: (N, 100, 1, 1) -> (N, 3, 64, 64) in [-1, 1]."""
    n = z_nchw.shape[0]
    z = z_nchw.reshape(n, LATENT).astype(jnp.float32)

    # ---- layer 0: ConvTranspose2d(100, ngf*8, 4, 1, 0) + BN + ReLU ----------------
    # One wide lane-dense matmul: (Npad, 128) @ (128, 16*512); columns ordered (oy, ox, c).
    w0 = params["w0"]
    cout = w0.shape[1]
    npad = _round_up(max(n, 16), 16)
    a0 = jnp.zeros((1, npad, 128), jnp.bfloat16)
    a0 = a0.at[0, :n, :LATENT].set(z.astype(jnp.bfloat16))
    b0 = jnp.transpose(w0, (0, 2, 3, 1)).reshape(LATENT, 16 * cout)
    b0 = jnp.pad(b0, ((0, 128 - LATENT), (0, 0))).astype(jnp.bfloat16)[None]
    y0, s0, ss0 = fused_matmul(a0, b0, with_stats=True, out_dtype=jnp.bfloat16)

    cnt0 = n * 16                      # padded batch rows contribute exactly 0 to the sums
    s_c = s0.reshape(16, cout).sum(axis=0)
    ss_c = ss0.reshape(16, cout).sum(axis=0)
    mean = s_c / cnt0
    var = jnp.maximum(ss_c / cnt0 - mean * mean, 0.0)
    scale = params["gamma0"] * jax.lax.rsqrt(var + EPS)
    bias = params["beta0"] - mean * scale
    x_raw = y0[0, :n, :].reshape(n, 4, 4, cout)            # (N, 4, 4, ngf*8) bf16
    # BN + ReLU ride inside the XLA fusion that builds the next layer's im2col operand.
    x = jnp.maximum(x_raw.astype(jnp.float32) * scale + bias, 0.0).astype(jnp.bfloat16)

    # ---- layers 1..3: ConvTranspose2d(k=4, s=2, p=1) + BN + ReLU ------------------
    for li in range(1, 4):
        w = params[f"w{li}"]
        cout = w.shape[1]
        _, h, wd, _ = x.shape
        a = phase_im2col(x)                                # (4, N*h*wd, 4*Cin) bf16
        b = phase_weights(w)                               # (4, 4*Cin, Coutp) bf16
        y, s, ss = fused_matmul(a, b, with_stats=True, out_dtype=jnp.bfloat16)
        cnt = 4 * n * h * wd                               # = N * (2h) * (2wd)
        scale, bias = bn_scale_bias(s, ss, cnt,
                                    params[f"gamma{li}"], params[f"beta{li}"], cout)
        x_raw = phase_depth_to_space(y, n, h, wd, cout)    # (N, 2h, 2wd, cout) bf16
        x = jnp.maximum(x_raw.astype(jnp.float32) * scale + bias, 0.0).astype(jnp.bfloat16)

    # ---- layer 4: ConvTranspose2d(ngf, 3, 4, 2, 1) + Tanh -------------------------
    w4 = params["w4"]
    cout = w4.shape[1]
    _, h, wd, _ = x.shape
    a = phase_im2col(x)
    b = phase_weights(w4)
    y = fused_matmul(a, b, with_stats=False, out_dtype=jnp.float32)
    # Tanh only on the 3 real channels (not the 128 padded lanes), on the tiny final map.
    out = jnp.tanh(phase_depth_to_space(y, n, h, wd, cout))
    return jnp.transpose(out, (0, 3, 1, 2))                # NCHW (N, 3, 64, 64), f32


def init_params(key):
    """DCGAN-style deterministic init: conv weights ~ N(0, 0.02), BN gamma ~ N(1, 0.02)."""
    w_shapes = [(LATENT, NGF * 8, 4, 4),
                (NGF * 8, NGF * 4, 4, 4),
                (NGF * 4, NGF * 2, 4, 4),
                (NGF * 2, NGF, 4, 4),
                (NGF, 3, 4, 4)]
    bn_channels = [NGF * 8, NGF * 4, NGF * 2, NGF]
    params = {}
    keys = jax.random.split(key, 9)
    for i, shp in enumerate(w_shapes):
        params[f"w{i}"] = 0.02 * jax.random.normal(keys[i], shp, jnp.float32)
    for i, c in enumerate(bn_channels):
        params[f"gamma{i}"] = 1.0 + 0.02 * jax.random.normal(keys[5 + i], (c,), jnp.float32)
        params[f"beta{i}"] = jnp.zeros((c,), jnp.float32)
    return params


if __name__ == "__main__":
    key = jax.random.PRNGKey(0)
    k_params, k_z = jax.random.split(key)
    params = init_params(k_params)

    batch = 2
    z = jax.random.normal(k_z, (batch, LATENT, 1, 1), jnp.float32)

    fwd = jax.jit(generator_forward)
    out = jax.block_until_ready(fwd(z, params))

    assert out.shape == (batch, 3, 64, 64), out.shape
    assert out.dtype == jnp.float32
    assert bool(jnp.all(jnp.isfinite(out)))
    assert bool(jnp.all(jnp.abs(out) <= 1.0))  # tanh range
    print("KERNEL_OK")
</pallas_src>

<mosaic_0001>
module attributes {stable_mosaic.version = 11 : i64} {
  func.func @matmul_stats_kernel(%arg0: i32, %arg1: i32, %arg2: i32, %arg3: memref<1x16x128xbf16, #tpu.memory_space<vmem>>, %arg4: memref<1x128x8192xbf16, #tpu.memory_space<vmem>>, %arg5: memref<1x16x8192xbf16, #tpu.memory_space<vmem>>, %arg6: memref<1x1x8192xf32, #tpu.memory_space<vmem>>, %arg7: memref<1x1x8192xf32, #tpu.memory_space<vmem>>) attributes {dimension_semantics = [#tpu.dimension_semantics<parallel>, #tpu.dimension_semantics<parallel>, #tpu.dimension_semantics<arbitrary>], iteration_bounds = array<i64: 1, 1, 1>, scalar_prefetch = 0 : i64, scratch_operands = 0 : i64, tpu.core_type = #tpu.core_type<tc>, window_params = [{transform_indices = @transform_0, window_bounds = array<i64: 1, 16, 128>}, {transform_indices = @transform_1, window_bounds = array<i64: 1, 128, 8192>}, {transform_indices = @transform_2, window_bounds = array<i64: 1, 16, 8192>}, {transform_indices = @transform_3, window_bounds = array<i64: 1, 1, 8192>}, {transform_indices = @transform_4, window_bounds = array<i64: 1, 1, 8192>}]} {
    %c0 = arith.constant 0 : index
    %c0_0 = arith.constant 0 : index
    %c0_1 = arith.constant 0 : index
    %0 = vector.load %arg3[%c0, %c0_0, %c0_1] : memref<1x16x128xbf16, #tpu.memory_space<vmem>>, vector<1x16x128xbf16>
    %1 = vector.shape_cast %0 : vector<1x16x128xbf16> to vector<16x128xbf16>
    %c0_2 = arith.constant 0 : index
    %c0_3 = arith.constant 0 : index
    %c0_4 = arith.constant 0 : index
    %2 = vector.load %arg4[%c0_2, %c0_3, %c0_4] : memref<1x128x8192xbf16, #tpu.memory_space<vmem>>, vector<1x128x8192xbf16>
    %3 = vector.shape_cast %2 : vector<1x128x8192xbf16> to vector<128x8192xbf16>
    %cst = arith.constant dense<0.000000e+00> : vector<16x8192xf32>
    %4 = tpu.matmul %1, %3, %cst {dimension_numbers = #tpu.dot_dimension_numbers<[1], [0], [0], [1], [0, 0, 1, 1], [], []>} : vector<16x128xbf16>, vector<128x8192xbf16>, vector<16x8192xf32> -> vector<16x8192xf32>
    %5 = arith.truncf %4 : vector<16x8192xf32> to vector<16x8192xbf16>
    %c0_5 = arith.constant 0 : index
    %c0_6 = arith.constant 0 : index
    %c0_7 = arith.constant 0 : index
    %6 = vector.load %arg5[%c0_5, %c0_6, %c0_7] : memref<1x16x8192xbf16, #tpu.memory_space<vmem>>, vector<1x16x8192xbf16>
    %7 = vector.shape_cast %6 : vector<1x16x8192xbf16> to vector<16x8192xbf16>
    %8 = vector.shape_cast %5 : vector<16x8192xbf16> to vector<1x16x8192xbf16>
    tpu.vector_store %arg5[%c0_5, %c0_6, %c0_7], %8 {strides = array<i32>} : memref<1x16x8192xbf16, #tpu.memory_space<vmem>>, vector<1x16x8192xbf16>,
    %c0_i32 = arith.constant 0 : i32
    %9 = arith.cmpi eq, %arg2, %c0_i32 : i32
    %10 = arith.extui %9 : i1 to i32
    %c0_i32_8 = arith.constant 0 : i32
    %11 = arith.cmpi ne, %10, %c0_i32_8 : i32
    scf.if %11 {
      %cst_23 = arith.constant 0.000000e+00 : f32
      %29 = vector.broadcast %cst_23 : f32 to vector<1x8192xf32>
      %c0_24 = arith.constant 0 : index
      %c0_25 = arith.constant 0 : index
      %c0_26 = arith.constant 0 : index
      %30 = vector.load %arg6[%c0_24, %c0_25, %c0_26] : memref<1x1x8192xf32, #tpu.memory_space<vmem>>, vector<1x1x8192xf32>
      %31 = vector.shape_cast %30 : vector<1x1x8192xf32> to vector<1x8192xf32>
      %32 = vector.shape_cast %29 : vector<1x8192xf32> to vector<1x1x8192xf32>
      tpu.vector_store %arg6[%c0_24, %c0_25, %c0_26], %32 {strides = array<i32>} : memref<1x1x8192xf32, #tpu.memory_space<vmem>>, vector<1x1x8192xf32>,
      %cst_27 = arith.constant 0.000000e+00 : f32
      %33 = vector.broadcast %cst_27 : f32 to vector<1x8192xf32>
      %c0_28 = arith.constant 0 : index
      %c0_29 = arith.constant 0 : index
      %c0_30 = arith.constant 0 : index
      %34 = vector.load %arg7[%c0_28, %c0_29, %c0_30] : memref<1x1x8192xf32, #tpu.memory_space<vmem>>, vector<1x1x8192xf32>
      %35 = vector.shape_cast %34 : vector<1x1x8192xf32> to vector<1x8192xf32>
      %36 = vector.shape_cast %33 : vector<1x8192xf32> to vector<1x1x8192xf32>
      tpu.vector_store %arg7[%c0_28, %c0_29, %c0_30], %36 {strides = array<i32>} : memref<1x1x8192xf32, #tpu.memory_space<vmem>>, vector<1x1x8192xf32>,
    } else {
    }
    %c0_9 = arith.constant 0 : index
    %c0_10 = arith.constant 0 : index
    %c0_11 = arith.constant 0 : index
    %12 = vector.load %arg6[%c0_9, %c0_10, %c0_11] : memref<1x1x8192xf32, #tpu.memory_space<vmem>>, vector<1x1x8192xf32>
    %13 = vector.shape_cast %12 : vector<1x1x8192xf32> to vector<1x8192xf32>
    %cst_12 = arith.constant dense<0.000000e+00> : vector<8192xf32>
    %14 = vector.multi_reduction <add>, %4, %cst_12 [0] : vector<16x8192xf32> to vector<8192xf32>
    %15 = vector.shape_cast %14 : vector<8192xf32> to vector<1x8192xf32>
    %16 = arith.addf %13, %15 : vector<1x8192xf32>
    %c0_13 = arith.constant 0 : index
    %c0_14 = arith.constant 0 : index
    %c0_15 = arith.constant 0 : index
    %17 = vector.load %arg6[%c0_13, %c0_14, %c0_15] : memref<1x1x8192xf32, #tpu.memory_space<vmem>>, vector<1x1x8192xf32>
    %18 = vector.shape_cast %17 : vector<1x1x8192xf32> to vector<1x8192xf32>
    %19 = vector.shape_cast %16 : vector<1x8192xf32> to vector<1x1x8192xf32>
    tpu.vector_store %arg6[%c0_13, %c0_14, %c0_15], %19 {strides = array<i32>} : memref<1x1x8192xf32, #tpu.memory_space<vmem>>, vector<1x1x8192xf32>,
    %c0_16 = arith.constant 0 : index
    %c0_17 = arith.constant 0 : index
    %c0_18 = arith.constant 0 : index
    %20 = vector.load %arg7[%c0_16, %c0_17, %c0_18] : memref<1x1x8192xf32, #tpu.memory_space<vmem>>, vector<1x1x8192xf32>
    %21 = vector.shape_cast %20 : vector<1x1x8192xf32> to vector<1x8192xf32>
    %22 = arith.mulf %4, %4 : vector<16x8192xf32>
    %cst_19 = arith.constant dense<0.000000e+00> : vector<8192xf32>
    %23 = vector.multi_reduction <add>, %22, %cst_19 [0] : vector<16x8192xf32> to vector<8192xf32>
    %24 = vector.shape_cast %23 : vector<8192xf32> to vector<1x8192xf32>
    %25 = arith.addf %21, %24 : vector<1x8192xf32>
    %c0_20 = arith.constant 0 : index
    %c0_21 = arith.constant 0 : index
    %c0_22 = arith.constant 0 : index
    %26 = vector.load %arg7[%c0_20, %c0_21, %c0_22] : memref<1x1x8192xf32, #tpu.memory_space<vmem>>, vector<1x1x8192xf32>
    %27 = vector.shape_cast %26 : vector<1x1x8192xf32> to vector<1x8192xf32>
    %28 = vector.shape_cast %25 : vector<1x8192xf32> to vector<1x1x8192xf32>
    tpu.vector_store %arg7[%c0_20, %c0_21, %c0_22], %28 {strides = array<i32>} : memref<1x1x8192xf32, #tpu.memory_space<vmem>>, vector<1x1x8192xf32>,
    return
  }
  func.func @transform_0(%arg0: i32, %arg1: i32, %arg2: i32) -> (i32, i32, i32) {
    %c0_i32 = arith.constant 0 : i32
    %c0_i32_0 = arith.constant 0 : i32
    return %arg0, %arg2, %c0_i32 : i32, i32, i32
  }
  func.func @transform_1(%arg0: i32, %arg1: i32, %arg2: i32) -> (i32, i32, i32) {
    %c0_i32 = arith.constant 0 : i32
    %c0_i32_0 = arith.constant 0 : i32
    return %arg0, %c0_i32, %arg1 : i32, i32, i32
  }
  func.func @transform_2(%arg0: i32, %arg1: i32, %arg2: i32) -> (i32, i32, i32) {
    %c0_i32 = arith.constant 0 : i32
    return %arg0, %arg2, %arg1 : i32, i32, i32
  }
  func.func @transform_3(%arg0: i32, %arg1: i32, %arg2: i32) -> (i32, i32, i32) {
    %c0_i32 = arith.constant 0 : i32
    %c0_i32_0 = arith.constant 0 : i32
    return %arg0, %c0_i32, %arg1 : i32, i32, i32
  }
  func.func @transform_4(%arg0: i32, %arg1: i32, %arg2: i32) -> (i32, i32, i32) {
    %c0_i32 = arith.constant 0 : i32
    %c0_i32_0 = arith.constant 0 : i32
    return %arg0, %c0_i32, %arg1 : i32, i32, i32
  }
}

module attributes {stable_mosaic.version = 11 : i64} {
  func.func @matmul_stats_kernel(%arg0: i32, %arg1: i32, %arg2: i32, %arg3: memref<1x32x2048xbf16, #tpu.memory_space<vmem>>, %arg4: memref<1x2048x256xbf16, #tpu.memory_space<vmem>>, %arg5: memref<1x32x256xbf16, #tpu.memory_space<vmem>>, %arg6: memref<1x1x256xf32, #tpu.memory_space<vmem>>, %arg7: memref<1x1x256xf32, #tpu.memory_space<vmem>>) attributes {dimension_semantics = [#tpu.dimension_semantics<parallel>, #tpu.dimension_semantics<parallel>, #tpu.dimension_semantics<arbitrary>], iteration_bounds = array<i64: 4, 1, 1>, scalar_prefetch = 0 : i64, scratch_operands = 0 : i64, tpu.core_type = #tpu.core_type<tc>, window_params = [{transform_indices = @transform_0, window_bounds = array<i64: 1, 32, 2048>}, {transform_indices = @transform_1, window_bounds = array<i64: 1, 2048, 256>}, {transform_indices = @transform_2, window_bounds = array<i64: 1, 32, 256>}, {transform_indices = @transform_3, window_bounds = array<i64: 1, 1, 256>}, {transform_indices = @transform_4, window_bounds = array<i64: 1, 1, 256>}]} {
    %c0 = arith.constant 0 : index
    %c0_0 = arith.constant 0 : index
    %c0_1 = arith.constant 0 : index
    %0 = vector.load %arg3[%c0, %c0_0, %c0_1] : memref<1x32x2048xbf16, #tpu.memory_space<vmem>>, vector<1x32x2048xbf16>
    %1 = vector.shape_cast %0 : vector<1x32x2048xbf16> to vector<32x2048xbf16>
    %c0_2 = arith.constant 0 : index
    %c0_3 = arith.constant 0 : index
    %c0_4 = arith.constant 0 : index
    %2 = vector.load %arg4[%c0_2, %c0_3, %c0_4] : memref<1x2048x256xbf16, #tpu.memory_space<vmem>>, vector<1x2048x256xbf16>
    %3 = vector.shape_cast %2 : vector<1x2048x256xbf16> to vector<2048x256xbf16>
    %cst = arith.constant dense<0.000000e+00> : vector<32x256xf32>
    %4 = tpu.matmul %1, %3, %cst {dimension_numbers = #tpu.dot_dimension_numbers<[1], [0], [0], [1], [0, 0, 1, 1], [], []>} : vector<32x2048xbf16>, vector<2048x256xbf16>, vector<32x256xf32> -> vector<32x256xf32>
    %5 = arith.truncf %4 : vector<32x256xf32> to vector<32x256xbf16>
    %c0_5 = arith.constant 0 : index
    %c0_6 = arith.constant 0 : index
    %c0_7 = arith.constant 0 : index
    %6 = vector.load %arg5[%c0_5, %c0_6, %c0_7] : memref<1x32x256xbf16, #tpu.memory_space<vmem>>, vector<1x32x256xbf16>
    %7 = vector.shape_cast %6 : vector<1x32x256xbf16> to vector<32x256xbf16>
    %8 = vector.shape_cast %5 : vector<32x256xbf16> to vector<1x32x256xbf16>
    tpu.vector_store %arg5[%c0_5, %c0_6, %c0_7], %8 {strides = array<i32>} : memref<1x32x256xbf16, #tpu.memory_space<vmem>>, vector<1x32x256xbf16>,
    %c0_i32 = arith.constant 0 : i32
    %9 = arith.cmpi eq, %arg2, %c0_i32 : i32
    %10 = arith.extui %9 : i1 to i32
    %c0_i32_8 = arith.constant 0 : i32
    %11 = arith.cmpi ne, %10, %c0_i32_8 : i32
    scf.if %11 {
      %cst_23 = arith.constant 0.000000e+00 : f32
      %29 = vector.broadcast %cst_23 : f32 to vector<1x256xf32>
      %c0_24 = arith.constant 0 : index
      %c0_25 = arith.constant 0 : index
      %c0_26 = arith.constant 0 : index
      %30 = vector.load %arg6[%c0_24, %c0_25, %c0_26] : memref<1x1x256xf32, #tpu.memory_space<vmem>>, vector<1x1x256xf32>
      %31 = vector.shape_cast %30 : vector<1x1x256xf32> to vector<1x256xf32>
      %32 = vector.shape_cast %29 : vector<1x256xf32> to vector<1x1x256xf32>
      tpu.vector_store %arg6[%c0_24, %c0_25, %c0_26], %32 {strides = array<i32>} : memref<1x1x256xf32, #tpu.memory_space<vmem>>, vector<1x1x256xf32>,
      %cst_27 = arith.constant 0.000000e+00 : f32
      %33 = vector.broadcast %cst_27 : f32 to vector<1x256xf32>
      %c0_28 = arith.constant 0 : index
      %c0_29 = arith.constant 0 : index
      %c0_30 = arith.constant 0 : index
      %34 = vector.load %arg7[%c0_28, %c0_29, %c0_30] : memref<1x1x256xf32, #tpu.memory_space<vmem>>, vector<1x1x256xf32>
      %35 = vector.shape_cast %34 : vector<1x1x256xf32> to vector<1x256xf32>
      %36 = vector.shape_cast %33 : vector<1x256xf32> to vector<1x1x256xf32>
      tpu.vector_store %arg7[%c0_28, %c0_29, %c0_30], %36 {strides = array<i32>} : memref<1x1x256xf32, #tpu.memory_space<vmem>>, vector<1x1x256xf32>,
    } else {
    }
    %c0_9 = arith.constant 0 : index
    %c0_10 = arith.constant 0 : index
    %c0_11 = arith.constant 0 : index
    %12 = vector.load %arg6[%c0_9, %c0_10, %c0_11] : memref<1x1x256xf32, #tpu.memory_space<vmem>>, vector<1x1x256xf32>
    %13 = vector.shape_cast %12 : vector<1x1x256xf32> to vector<1x256xf32>
    %cst_12 = arith.constant dense<0.000000e+00> : vector<256xf32>
    %14 = vector.multi_reduction <add>, %4, %cst_12 [0] : vector<32x256xf32> to vector<256xf32>
    %15 = vector.shape_cast %14 : vector<256xf32> to vector<1x256xf32>
    %16 = arith.addf %13, %15 : vector<1x256xf32>
    %c0_13 = arith.constant 0 : index
    %c0_14 = arith.constant 0 : index
    %c0_15 = arith.constant 0 : index
    %17 = vector.load %arg6[%c0_13, %c0_14, %c0_15] : memref<1x1x256xf32, #tpu.memory_space<vmem>>, vector<1x1x256xf32>
    %18 = vector.shape_cast %17 : vector<1x1x256xf32> to vector<1x256xf32>
    %19 = vector.shape_cast %16 : vector<1x256xf32> to vector<1x1x256xf32>
    tpu.vector_store %arg6[%c0_13, %c0_14, %c0_15], %19 {strides = array<i32>} : memref<1x1x256xf32, #tpu.memory_space<vmem>>, vector<1x1x256xf32>,
    %c0_16 = arith.constant 0 : index
    %c0_17 = arith.constant 0 : index
    %c0_18 = arith.constant 0 : index
    %20 = vector.load %arg7[%c0_16, %c0_17, %c0_18] : memref<1x1x256xf32, #tpu.memory_space<vmem>>, vector<1x1x256xf32>
    %21 = vector.shape_cast %20 : vector<1x1x256xf32> to vector<1x256xf32>
    %22 = arith.mulf %4, %4 : vector<32x256xf32>
    %cst_19 = arith.constant dense<0.000000e+00> : vector<256xf32>
    %23 = vector.multi_reduction <add>, %22, %cst_19 [0] : vector<32x256xf32> to vector<256xf32>
    %24 = vector.shape_cast %23 : vector<256xf32> to vector<1x256xf32>
    %25 = arith.addf %21, %24 : vector<1x256xf32>
    %c0_20 = arith.constant 0 : index
    %c0_21 = arith.constant 0 : index
    %c0_22 = arith.constant 0 : index
    %26 = vector.load %arg7[%c0_20, %c0_21, %c0_22] : memref<1x1x256xf32, #tpu.memory_space<vmem>>, vector<1x1x256xf32>
    %27 = vector.shape_cast %26 : vector<1x1x256xf32> to vector<1x256xf32>
    %28 = vector.shape_cast %25 : vector<1x256xf32> to vector<1x1x256xf32>
    tpu.vector_store %arg7[%c0_20, %c0_21, %c0_22], %28 {strides = array<i32>} : memref<1x1x256xf32, #tpu.memory_space<vmem>>, vector<1x1x256xf32>,
    return
  }
  func.func @transform_0(%arg0: i32, %arg1: i32, %arg2: i32) -> (i32, i32, i32) {
    %c0_i32 = arith.constant 0 : i32
    %c0_i32_0 = arith.constant 0 : i32
    return %arg0, %arg2, %c0_i32 : i32, i32, i32
  }
  func.func @transform_1(%arg0: i32, %arg1: i32, %arg2: i32) -> (i32, i32, i32) {
    %c0_i32 = arith.constant 0 : i32
    %c0_i32_0 = arith.constant 0 : i32
    return %arg0, %c0_i32, %arg1 : i32, i32, i32
  }
  func.func @transform_2(%arg0: i32, %arg1: i32, %arg2: i32) -> (i32, i32, i32) {
    %c0_i32 = arith.constant 0 : i32
    return %arg0, %arg2, %arg1 : i32, i32, i32
  }
  func.func @transform_3(%arg0: i32, %arg1: i32, %arg2: i32) -> (i32, i32, i32) {
    %c0_i32 = arith.constant 0 : i32
    %c0_i32_0 = arith.constant 0 : i32
    return %arg0, %c0_i32, %arg1 : i32, i32, i32
  }
  func.func @transform_4(%arg0: i32, %arg1: i32, %arg2: i32) -> (i32, i32, i32) {
    %c0_i32 = arith.constant 0 : i32
    %c0_i32_0 = arith.constant 0 : i32
    return %arg0, %c0_i32, %arg1 : i32, i32, i32
  }
}

module attributes {stable_mosaic.version = 11 : i64} {
  func.func @matmul_stats_kernel(%arg0: i32, %arg1: i32, %arg2: i32, %arg3: memref<1x128x1024xbf16, #tpu.memory_space<vmem>>, %arg4: memref<1x1024x128xbf16, #tpu.memory_space<vmem>>, %arg5: memref<1x128x128xbf16, #tpu.memory_space<vmem>>, %arg6: memref<1x1x128xf32, #tpu.memory_space<vmem>>, %arg7: memref<1x1x128xf32, #tpu.memory_space<vmem>>) attributes {dimension_semantics = [#tpu.dimension_semantics<parallel>, #tpu.dimension_semantics<parallel>, #tpu.dimension_semantics<arbitrary>], iteration_bounds = array<i64: 4, 1, 1>, scalar_prefetch = 0 : i64, scratch_operands = 0 : i64, tpu.core_type = #tpu.core_type<tc>, window_params = [{transform_indices = @transform_0, window_bounds = array<i64: 1, 128, 1024>}, {transform_indices = @transform_1, window_bounds = array<i64: 1, 1024, 128>}, {transform_indices = @transform_2, window_bounds = array<i64: 1, 128, 128>}, {transform_indices = @transform_3, window_bounds = array<i64: 1, 1, 128>}, {transform_indices = @transform_4, window_bounds = array<i64: 1, 1, 128>}]} {
    %c0 = arith.constant 0 : index
    %c0_0 = arith.constant 0 : index
    %c0_1 = arith.constant 0 : index
    %0 = vector.load %arg3[%c0, %c0_0, %c0_1] : memref<1x128x1024xbf16, #tpu.memory_space<vmem>>, vector<1x128x1024xbf16>
    %1 = vector.shape_cast %0 : vector<1x128x1024xbf16> to vector<128x1024xbf16>
    %c0_2 = arith.constant 0 : index
    %c0_3 = arith.constant 0 : index
    %c0_4 = arith.constant 0 : index
    %2 = vector.load %arg4[%c0_2, %c0_3, %c0_4] : memref<1x1024x128xbf16, #tpu.memory_space<vmem>>, vector<1x1024x128xbf16>
    %3 = vector.shape_cast %2 : vector<1x1024x128xbf16> to vector<1024x128xbf16>
    %cst = arith.constant dense<0.000000e+00> : vector<128x128xf32>
    %4 = tpu.matmul %1, %3, %cst {dimension_numbers = #tpu.dot_dimension_numbers<[1], [0], [0], [1], [0, 0, 1, 1], [], []>} : vector<128x1024xbf16>, vector<1024x128xbf16>, vector<128x128xf32> -> vector<128x128xf32>
    %5 = arith.truncf %4 : vector<128x128xf32> to vector<128x128xbf16>
    %c0_5 = arith.constant 0 : index
    %c0_6 = arith.constant 0 : index
    %c0_7 = arith.constant 0 : index
    %6 = vector.load %arg5[%c0_5, %c0_6, %c0_7] : memref<1x128x128xbf16, #tpu.memory_space<vmem>>, vector<1x128x128xbf16>
    %7 = vector.shape_cast %6 : vector<1x128x128xbf16> to vector<128x128xbf16>
    %8 = vector.shape_cast %5 : vector<128x128xbf16> to vector<1x128x128xbf16>
    tpu.vector_store %arg5[%c0_5, %c0_6, %c0_7], %8 {strides = array<i32>} : memref<1x128x128xbf16, #tpu.memory_space<vmem>>, vector<1x128x128xbf16>,
    %c0_i32 = arith.constant 0 : i32
    %9 = arith.cmpi eq, %arg2, %c0_i32 : i32
    %10 = arith.extui %9 : i1 to i32
    %c0_i32_8 = arith.constant 0 : i32
    %11 = arith.cmpi ne, %10, %c0_i32_8 : i32
    scf.if %11 {
      %cst_23 = arith.constant 0.000000e+00 : f32
      %29 = vector.broadcast %cst_23 : f32 to vector<1x128xf32>
      %c0_24 = arith.constant 0 : index
      %c0_25 = arith.constant 0 : index
      %c0_26 = arith.constant 0 : index
      %30 = vector.load %arg6[%c0_24, %c0_25, %c0_26] : memref<1x1x128xf32, #tpu.memory_space<vmem>>, vector<1x1x128xf32>
      %31 = vector.shape_cast %30 : vector<1x1x128xf32> to vector<1x128xf32>
      %32 = vector.shape_cast %29 : vector<1x128xf32> to vector<1x1x128xf32>
      tpu.vector_store %arg6[%c0_24, %c0_25, %c0_26], %32 {strides = array<i32>} : memref<1x1x128xf32, #tpu.memory_space<vmem>>, vector<1x1x128xf32>,
      %cst_27 = arith.constant 0.000000e+00 : f32
      %33 = vector.broadcast %cst_27 : f32 to vector<1x128xf32>
      %c0_28 = arith.constant 0 : index
      %c0_29 = arith.constant 0 : index
      %c0_30 = arith.constant 0 : index
      %34 = vector.load %arg7[%c0_28, %c0_29, %c0_30] : memref<1x1x128xf32, #tpu.memory_space<vmem>>, vector<1x1x128xf32>
      %35 = vector.shape_cast %34 : vector<1x1x128xf32> to vector<1x128xf32>
      %36 = vector.shape_cast %33 : vector<1x128xf32> to vector<1x1x128xf32>
      tpu.vector_store %arg7[%c0_28, %c0_29, %c0_30], %36 {strides = array<i32>} : memref<1x1x128xf32, #tpu.memory_space<vmem>>, vector<1x1x128xf32>,
    } else {
    }
    %c0_9 = arith.constant 0 : index
    %c0_10 = arith.constant 0 : index
    %c0_11 = arith.constant 0 : index
    %12 = vector.load %arg6[%c0_9, %c0_10, %c0_11] : memref<1x1x128xf32, #tpu.memory_space<vmem>>, vector<1x1x128xf32>
    %13 = vector.shape_cast %12 : vector<1x1x128xf32> to vector<1x128xf32>
    %cst_12 = arith.constant dense<0.000000e+00> : vector<128xf32>
    %14 = vector.multi_reduction <add>, %4, %cst_12 [0] : vector<128x128xf32> to vector<128xf32>
    %15 = vector.shape_cast %14 : vector<128xf32> to vector<1x128xf32>
    %16 = arith.addf %13, %15 : vector<1x128xf32>
    %c0_13 = arith.constant 0 : index
    %c0_14 = arith.constant 0 : index
    %c0_15 = arith.constant 0 : index
    %17 = vector.load %arg6[%c0_13, %c0_14, %c0_15] : memref<1x1x128xf32, #tpu.memory_space<vmem>>, vector<1x1x128xf32>
    %18 = vector.shape_cast %17 : vector<1x1x128xf32> to vector<1x128xf32>
    %19 = vector.shape_cast %16 : vector<1x128xf32> to vector<1x1x128xf32>
    tpu.vector_store %arg6[%c0_13, %c0_14, %c0_15], %19 {strides = array<i32>} : memref<1x1x128xf32, #tpu.memory_space<vmem>>, vector<1x1x128xf32>,
    %c0_16 = arith.constant 0 : index
    %c0_17 = arith.constant 0 : index
    %c0_18 = arith.constant 0 : index
    %20 = vector.load %arg7[%c0_16, %c0_17, %c0_18] : memref<1x1x128xf32, #tpu.memory_space<vmem>>, vector<1x1x128xf32>
    %21 = vector.shape_cast %20 : vector<1x1x128xf32> to vector<1x128xf32>
    %22 = arith.mulf %4, %4 : vector<128x128xf32>
    %cst_19 = arith.constant dense<0.000000e+00> : vector<128xf32>
    %23 = vector.multi_reduction <add>, %22, %cst_19 [0] : vector<128x128xf32> to vector<128xf32>
    %24 = vector.shape_cast %23 : vector<128xf32> to vector<1x128xf32>
    %25 = arith.addf %21, %24 : vector<1x128xf32>
    %c0_20 = arith.constant 0 : index
    %c0_21 = arith.constant 0 : index
    %c0_22 = arith.constant 0 : index
    %26 = vector.load %arg7[%c0_20, %c0_21, %c0_22] : memref<1x1x128xf32, #tpu.memory_space<vmem>>, vector<1x1x128xf32>
    %27 = vector.shape_cast %26 : vector<1x1x128xf32> to vector<1x128xf32>
    %28 = vector.shape_cast %25 : vector<1x128xf32> to vector<1x1x128xf32>
    tpu.vector_store %arg7[%c0_20, %c0_21, %c0_22], %28 {strides = array<i32>} : memref<1x1x128xf32, #tpu.memory_space<vmem>>, vector<1x1x128xf32>,
    return
  }
  func.func @transform_0(%arg0: i32, %arg1: i32, %arg2: i32) -> (i32, i32, i32) {
    %c0_i32 = arith.constant 0 : i32
    %c0_i32_0 = arith.constant 0 : i32
    return %arg0, %arg2, %c0_i32 : i32, i32, i32
  }
  func.func @transform_1(%arg0: i32, %arg1: i32, %arg2: i32) -> (i32, i32, i32) {
    %c0_i32 = arith.constant 0 : i32
    %c0_i32_0 = arith.constant 0 : i32
    return %arg0, %c0_i32, %arg1 : i32, i32, i32
  }
  func.func @transform_2(%arg0: i32, %arg1: i32, %arg2: i32) -> (i32, i32, i32) {
    %c0_i32 = arith.constant 0 : i32
    return %arg0, %arg2, %arg1 : i32, i32, i32
  }
  func.func @transform_3(%arg0: i32, %arg1: i32, %arg2: i32) -> (i32, i32, i32) {
    %c0_i32 = arith.constant 0 : i32
    %c0_i32_0 = arith.constant 0 : i32
    return %arg0, %c0_i32, %arg1 : i32, i32, i32
  }
  func.func @transform_4(%arg0: i32, %arg1: i32, %arg2: i32) -> (i32, i32, i32) {
    %c0_i32 = arith.constant 0 : i32
    %c0_i32_0 = arith.constant 0 : i32
    return %arg0, %c0_i32, %arg1 : i32, i32, i32
  }
}

module attributes {stable_mosaic.version = 11 : i64} {
  func.func @matmul_stats_kernel(%arg0: i32, %arg1: i32, %arg2: i32, %arg3: memref<1x512x512xbf16, #tpu.memory_space<vmem>>, %arg4: memref<1x512x128xbf16, #tpu.memory_space<vmem>>, %arg5: memref<1x512x128xbf16, #tpu.memory_space<vmem>>, %arg6: memref<1x1x128xf32, #tpu.memory_space<vmem>>, %arg7: memref<1x1x128xf32, #tpu.memory_space<vmem>>) attributes {dimension_semantics = [#tpu.dimension_semantics<parallel>, #tpu.dimension_semantics<parallel>, #tpu.dimension_semantics<arbitrary>], iteration_bounds = array<i64: 4, 1, 1>, scalar_prefetch = 0 : i64, scratch_operands = 0 : i64, tpu.core_type = #tpu.core_type<tc>, window_params = [{transform_indices = @transform_0, window_bounds = array<i64: 1, 512, 512>}, {transform_indices = @transform_1, window_bounds = array<i64: 1, 512, 128>}, {transform_indices = @transform_2, window_bounds = array<i64: 1, 512, 128>}, {transform_indices = @transform_3, window_bounds = array<i64: 1, 1, 128>}, {transform_indices = @transform_4, window_bounds = array<i64: 1, 1, 128>}]} {
    %c0 = arith.constant 0 : index
    %c0_0 = arith.constant 0 : index
    %c0_1 = arith.constant 0 : index
    %0 = vector.load %arg3[%c0, %c0_0, %c0_1] : memref<1x512x512xbf16, #tpu.memory_space<vmem>>, vector<1x512x512xbf16>
    %1 = vector.shape_cast %0 : vector<1x512x512xbf16> to vector<512x512xbf16>
    %c0_2 = arith.constant 0 : index
    %c0_3 = arith.constant 0 : index
    %c0_4 = arith.constant 0 : index
    %2 = vector.load %arg4[%c0_2, %c0_3, %c0_4] : memref<1x512x128xbf16, #tpu.memory_space<vmem>>, vector<1x512x128xbf16>
    %3 = vector.shape_cast %2 : vector<1x512x128xbf16> to vector<512x128xbf16>
    %cst = arith.constant dense<0.000000e+00> : vector<512x128xf32>
    %4 = tpu.matmul %1, %3, %cst {dimension_numbers = #tpu.dot_dimension_numbers<[1], [0], [0], [1], [0, 0, 1, 1], [], []>} : vector<512x512xbf16>, vector<512x128xbf16>, vector<512x128xf32> -> vector<512x128xf32>
    %5 = arith.truncf %4 : vector<512x128xf32> to vector<512x128xbf16>
    %c0_5 = arith.constant 0 : index
    %c0_6 = arith.constant 0 : index
    %c0_7 = arith.constant 0 : index
    %6 = vector.load %arg5[%c0_5, %c0_6, %c0_7] : memref<1x512x128xbf16, #tpu.memory_space<vmem>>, vector<1x512x128xbf16>
    %7 = vector.shape_cast %6 : vector<1x512x128xbf16> to vector<512x128xbf16>
    %8 = vector.shape_cast %5 : vector<512x128xbf16> to vector<1x512x128xbf16>
    tpu.vector_store %arg5[%c0_5, %c0_6, %c0_7], %8 {strides = array<i32>} : memref<1x512x128xbf16, #tpu.memory_space<vmem>>, vector<1x512x128xbf16>,
    %c0_i32 = arith.constant 0 : i32
    %9 = arith.cmpi eq, %arg2, %c0_i32 : i32
    %10 = arith.extui %9 : i1 to i32
    %c0_i32_8 = arith.constant 0 : i32
    %11 = arith.cmpi ne, %10, %c0_i32_8 : i32
    scf.if %11 {
      %cst_23 = arith.constant 0.000000e+00 : f32
      %29 = vector.broadcast %cst_23 : f32 to vector<1x128xf32>
      %c0_24 = arith.constant 0 : index
      %c0_25 = arith.constant 0 : index
      %c0_26 = arith.constant 0 : index
      %30 = vector.load %arg6[%c0_24, %c0_25, %c0_26] : memref<1x1x128xf32, #tpu.memory_space<vmem>>, vector<1x1x128xf32>
      %31 = vector.shape_cast %30 : vector<1x1x128xf32> to vector<1x128xf32>
      %32 = vector.shape_cast %29 : vector<1x128xf32> to vector<1x1x128xf32>
      tpu.vector_store %arg6[%c0_24, %c0_25, %c0_26], %32 {strides = array<i32>} : memref<1x1x128xf32, #tpu.memory_space<vmem>>, vector<1x1x128xf32>,
      %cst_27 = arith.constant 0.000000e+00 : f32
      %33 = vector.broadcast %cst_27 : f32 to vector<1x128xf32>
      %c0_28 = arith.constant 0 : index
      %c0_29 = arith.constant 0 : index
      %c0_30 = arith.constant 0 : index
      %34 = vector.load %arg7[%c0_28, %c0_29, %c0_30] : memref<1x1x128xf32, #tpu.memory_space<vmem>>, vector<1x1x128xf32>
      %35 = vector.shape_cast %34 : vector<1x1x128xf32> to vector<1x128xf32>
      %36 = vector.shape_cast %33 : vector<1x128xf32> to vector<1x1x128xf32>
      tpu.vector_store %arg7[%c0_28, %c0_29, %c0_30], %36 {strides = array<i32>} : memref<1x1x128xf32, #tpu.memory_space<vmem>>, vector<1x1x128xf32>,
    } else {
    }
    %c0_9 = arith.constant 0 : index
    %c0_10 = arith.constant 0 : index
    %c0_11 = arith.constant 0 : index
    %12 = vector.load %arg6[%c0_9, %c0_10, %c0_11] : memref<1x1x128xf32, #tpu.memory_space<vmem>>, vector<1x1x128xf32>
    %13 = vector.shape_cast %12 : vector<1x1x128xf32> to vector<1x128xf32>
    %cst_12 = arith.constant dense<0.000000e+00> : vector<128xf32>
    %14 = vector.multi_reduction <add>, %4, %cst_12 [0] : vector<512x128xf32> to vector<128xf32>
    %15 = vector.shape_cast %14 : vector<128xf32> to vector<1x128xf32>
    %16 = arith.addf %13, %15 : vector<1x128xf32>
    %c0_13 = arith.constant 0 : index
    %c0_14 = arith.constant 0 : index
    %c0_15 = arith.constant 0 : index
    %17 = vector.load %arg6[%c0_13, %c0_14, %c0_15] : memref<1x1x128xf32, #tpu.memory_space<vmem>>, vector<1x1x128xf32>
    %18 = vector.shape_cast %17 : vector<1x1x128xf32> to vector<1x128xf32>
    %19 = vector.shape_cast %16 : vector<1x128xf32> to vector<1x1x128xf32>
    tpu.vector_store %arg6[%c0_13, %c0_14, %c0_15], %19 {strides = array<i32>} : memref<1x1x128xf32, #tpu.memory_space<vmem>>, vector<1x1x128xf32>,
    %c0_16 = arith.constant 0 : index
    %c0_17 = arith.constant 0 : index
    %c0_18 = arith.constant 0 : index
    %20 = vector.load %arg7[%c0_16, %c0_17, %c0_18] : memref<1x1x128xf32, #tpu.memory_space<vmem>>, vector<1x1x128xf32>
    %21 = vector.shape_cast %20 : vector<1x1x128xf32> to vector<1x128xf32>
    %22 = arith.mulf %4, %4 : vector<512x128xf32>
    %cst_19 = arith.constant dense<0.000000e+00> : vector<128xf32>
    %23 = vector.multi_reduction <add>, %22, %cst_19 [0] : vector<512x128xf32> to vector<128xf32>
    %24 = vector.shape_cast %23 : vector<128xf32> to vector<1x128xf32>
    %25 = arith.addf %21, %24 : vector<1x128xf32>
    %c0_20 = arith.constant 0 : index
    %c0_21 = arith.constant 0 : index
    %c0_22 = arith.constant 0 : index
    %26 = vector.load %arg7[%c0_20, %c0_21, %c0_22] : memref<1x1x128xf32, #tpu.memory_space<vmem>>, vector<1x1x128xf32>
    %27 = vector.shape_cast %26 : vector<1x1x128xf32> to vector<1x128xf32>
    %28 = vector.shape_cast %25 : vector<1x128xf32> to vector<1x1x128xf32>
    tpu.vector_store %arg7[%c0_20, %c0_21, %c0_22], %28 {strides = array<i32>} : memref<1x1x128xf32, #tpu.memory_space<vmem>>, vector<1x1x128xf32>,
    return
  }
  func.func @transform_0(%arg0: i32, %arg1: i32, %arg2: i32) -> (i32, i32, i32) {
    %c0_i32 = arith.constant 0 : i32
    %c0_i32_0 = arith.constant 0 : i32
    return %arg0, %arg2, %c0_i32 : i32, i32, i32
  }
  func.func @transform_1(%arg0: i32, %arg1: i32, %arg2: i32) -> (i32, i32, i32) {
    %c0_i32 = arith.constant 0 : i32
    %c0_i32_0 = arith.constant 0 : i32
    return %arg0, %c0_i32, %arg1 : i32, i32, i32
  }
  func.func @transform_2(%arg0: i32, %arg1: i32, %arg2: i32) -> (i32, i32, i32) {
    %c0_i32 = arith.constant 0 : i32
    return %arg0, %arg2, %arg1 : i32, i32, i32
  }
  func.func @transform_3(%arg0: i32, %arg1: i32, %arg2: i32) -> (i32, i32, i32) {
    %c0_i32 = arith.constant 0 : i32
    %c0_i32_0 = arith.constant 0 : i32
    return %arg0, %c0_i32, %arg1 : i32, i32, i32
  }
  func.func @transform_4(%arg0: i32, %arg1: i32, %arg2: i32) -> (i32, i32, i32) {
    %c0_i32 = arith.constant 0 : i32
    %c0_i32_0 = arith.constant 0 : i32
    return %arg0, %c0_i32, %arg1 : i32, i32, i32
  }
}

module attributes {stable_mosaic.version = 11 : i64} {
  func.func @matmul_kernel(%arg0: i32, %arg1: i32, %arg2: i32, %arg3: memref<1x2048x256xbf16, #tpu.memory_space<vmem>>, %arg4: memref<1x256x128xbf16, #tpu.memory_space<vmem>>, %arg5: memref<1x2048x128xf32, #tpu.memory_space<vmem>>) attributes {dimension_semantics = [#tpu.dimension_semantics<parallel>, #tpu.dimension_semantics<parallel>, #tpu.dimension_semantics<parallel>], iteration_bounds = array<i64: 4, 1, 1>, scalar_prefetch = 0 : i64, scratch_operands = 0 : i64, tpu.core_type = #tpu.core_type<tc>, window_params = [{transform_indices = @transform_0, window_bounds = array<i64: 1, 2048, 256>}, {transform_indices = @transform_1, window_bounds = array<i64: 1, 256, 128>}, {transform_indices = @transform_2, window_bounds = array<i64: 1, 2048, 128>}]} {
    %c0 = arith.constant 0 : index
    %c0_0 = arith.constant 0 : index
    %c0_1 = arith.constant 0 : index
    %0 = vector.load %arg3[%c0, %c0_0, %c0_1] : memref<1x2048x256xbf16, #tpu.memory_space<vmem>>, vector<1x2048x256xbf16>
    %1 = vector.shape_cast %0 : vector<1x2048x256xbf16> to vector<2048x256xbf16>
    %c0_2 = arith.constant 0 : index
    %c0_3 = arith.constant 0 : index
    %c0_4 = arith.constant 0 : index
    %2 = vector.load %arg4[%c0_2, %c0_3, %c0_4] : memref<1x256x128xbf16, #tpu.memory_space<vmem>>, vector<1x256x128xbf16>
    %3 = vector.shape_cast %2 : vector<1x256x128xbf16> to vector<256x128xbf16>
    %cst = arith.constant dense<0.000000e+00> : vector<2048x128xf32>
    %4 = tpu.matmul %1, %3, %cst {dimension_numbers = #tpu.dot_dimension_numbers<[1], [0], [0], [1], [0, 0, 1, 1], [], []>} : vector<2048x256xbf16>, vector<256x128xbf16>, vector<2048x128xf32> -> vector<2048x128xf32>
    %c0_5 = arith.constant 0 : index
    %c0_6 = arith.constant 0 : index
    %c0_7 = arith.constant 0 : index
    %5 = vector.load %arg5[%c0_5, %c0_6, %c0_7] : memref<1x2048x128xf32, #tpu.memory_space<vmem>>, vector<1x2048x128xf32>
    %6 = vector.shape_cast %5 : vector<1x2048x128xf32> to vector<2048x128xf32>
    %7 = vector.shape_cast %4 : vector<2048x128xf32> to vector<1x2048x128xf32>
    tpu.vector_store %arg5[%c0_5, %c0_6, %c0_7], %7 {strides = array<i32>} : memref<1x2048x128xf32, #tpu.memory_space<vmem>>, vector<1x2048x128xf32>,
    return
  }
  func.func @transform_0(%arg0: i32, %arg1: i32, %arg2: i32) -> (i32, i32, i32) {
    %c0_i32 = arith.constant 0 : i32
    %c0_i32_0 = arith.constant 0 : i32
    return %arg0, %arg2, %c0_i32 : i32, i32, i32
  }
  func.func @transform_1(%arg0: i32, %arg1: i32, %arg2: i32) -> (i32, i32, i32) {
    %c0_i32 = arith.constant 0 : i32
    %c0_i32_0 = arith.constant 0 : i32
    return %arg0, %c0_i32, %arg1 : i32, i32, i32
  }
  func.func @transform_2(%arg0: i32, %arg1: i32, %arg2: i32) -> (i32, i32, i32) {
    %c0_i32 = arith.constant 0 : i32
    return %arg0, %arg2, %arg1 : i32, i32, i32
  }
}

</mosaic_0001>

<bundles_post_ra>
// kernel: generator_forward.5
= control target key start
LH: loop header
LB: loop body
LE: loop exit
PB: predicated region body
PF: predicated region fallthrough
CT: control target
= control target key end

     0   :  { %v10932_v3 = vmov 0   ;;  %s10927_s1 = inlined_call_operand.vmem [shape: bf16[1,128,8192], index: 1, kind: input, shape index: {}]   ;;  %s10928_s0 = inlined_call_operand.vmem [shape: bf16[1,16,128], index: 0, kind: input, shape index: {}]   ;;  %s10929_s2 = inlined_call_operand.vmem [shape: bf16[1,16,8192], index: 2, kind: output, shape index: {0}]   ;;  %s10930_s3 = inlined_call_operand.vmem [shape: f32[1,1,8192], index: 3, kind: output, shape index: {1}]   ;;  %s10931_s4 = inlined_call_operand.vmem [shape: f32[1,1,8192], index: 4, kind: output, shape index: {2}]  }
   0x1   :  { %v17_v0 = vld [vmem:[%s10927_s1] sm:$0xff]  ;;  %v18_v2 = vld [vmem:[%s10927_s1 + $0x8] sm:$0xff]  ;;  %3127 = vmatprep.mubr.bf16.mxu0 %v10932_v3  ;;  %3170 = vmatprep.mubr.bf16.mxu1 %v10932_v3  ;;  %v19_v63 = vld [vmem:[%s10927_s1 + $0x10] sm:$0xff] }
   0x2   :  { %v49_v1 = vld [vmem:[%s10927_s1 + $0x100] sm:$0xff]  ;;  %v50_v5 = vld [vmem:[%s10927_s1 + $0x108] sm:$0xff] }
   0x3   :  { %v6953_v4 = vcombine.high %v17_v0, %v49_v1  ;;  %v6952_v6 = vcombine.low %v17_v0, %v49_v1  ;;  %v81_v7 = vld [vmem:[%s10927_s1 + $0x200] sm:$0xff]  ;;  %v6955_v9 = vcombine.high %v18_v2, %v50_v5  ;;  %v6954_v10 = vcombine.low %v18_v2, %v50_v5  ;;  %v82_v12 = vld [vmem:[%s10927_s1 + $0x208] sm:$0xff]  ;;  %v51_v0 = vld [vmem:[%s10927_s1 + $0x110] sm:$0xff] }
   0x4   :  { %v113_v8 = vld [vmem:[%s10927_s1 + $0x300] sm:$0xff]  ;;  %v114_v13 = vld [vmem:[%s10927_s1 + $0x308] sm:$0xff]  ;;  %v20_v1 = vld [vmem:[%s10927_s1 + $0x18] sm:$0xff] }
   0x5   :  { %v7017_v11 = vcombine.high %v81_v7, %v113_v8  ;;  %v145_v14 = vld [vmem:[%s10927_s1 + $0x400] sm:$0xff]  ;;  %3095 = vmatprep.subr.bf16.mxu0 %v6953_v4  ;;  %v7019_v15 = vcombine.high %v82_v12, %v114_v13  ;;  %v146_v17 = vld [vmem:[%s10927_s1 + $0x408] sm:$0xff]  ;;  %3138 = vmatprep.subr.bf16.mxu1 %v6955_v9  ;;  %v7016_v19 = vcombine.low %v81_v7, %v113_v8  ;;  %v52_v2 = vld [vmem:[%s10927_s1 + $0x118] sm:$0xff] }
   0x6   :  { %v177_v16 = vld [vmem:[%s10927_s1 + $0x500] sm:$0xff]  ;;  %v178_v18 = vld [vmem:[%s10927_s1 + $0x508] sm:$0xff]  ;;  %3096 = vmatpush1.bf16.msra.mxu0 %v6952_v6  ;;  %3139 = vmatpush1.bf16.msra.mxu1 %v6954_v10  ;;  %v7018_v20 = vcombine.low %v82_v12, %v114_v13  ;;  %v6957_v6 = vcombine.high %v19_v63, %v51_v0  ;;  %v6959_v7 = vcombine.high %v20_v1, %v52_v2  ;;  %v83_v8 = vld [vmem:[%s10927_s1 + $0x210] sm:$0xff] }
   0x7   :  { %3097 = vmatprep.subr.bf16.mxu0 %v7017_v11  ;;  %v7081_v21 = vcombine.high %v145_v14, %v177_v16  ;;  %3140 = vmatprep.subr.bf16.mxu1 %v7019_v15  ;;  %v7083_v22 = vcombine.high %v146_v17, %v178_v18  ;;  %v209_v23 = vld [vmem:[%s10927_s1 + $0x600] sm:$0xff]  ;;  %v210_v25 = vld [vmem:[%s10927_s1 + $0x608] sm:$0xff]  ;;  %v7080_v27 = vcombine.low %v145_v14, %v177_v16  ;;  %v115_v9 = vld [vmem:[%s10927_s1 + $0x310] sm:$0xff] }
   0x8   :  { %v241_v24 = vld [vmem:[%s10927_s1 + $0x700] sm:$0xff]  ;;  %v242_v26 = vld [vmem:[%s10927_s1 + $0x708] sm:$0xff]  ;;  %v7082_v28 = vcombine.low %v146_v17, %v178_v18  ;;  %v84_v11 = vld [vmem:[%s10927_s1 + $0x218] sm:$0xff]  ;;  %v6956_v13 = vcombine.low %v19_v63, %v51_v0  ;;  %v6958_v14 = vcombine.low %v20_v1, %v52_v2  ;;  %v7021_v15 = vcombine.high %v83_v8, %v115_v9 }
   0x9   :  { %v7145_v29 = vcombine.high %v209_v23, %v241_v24  ;;  %v7147_v30 = vcombine.high %v210_v25, %v242_v26  ;;  %v273_v31 = vld [vmem:[%s10927_s1 + $0x800] sm:$0xff]  ;;  %v274_v33 = vld [vmem:[%s10927_s1 + $0x808] sm:$0xff]  ;;  %v7144_v35 = vcombine.low %v209_v23, %v241_v24  ;;  %v7146_v36 = vcombine.low %v210_v25, %v242_v26  ;;  %v116_v12 = vld [vmem:[%s10927_s1 + $0x318] sm:$0xff] }
   0xa   :  { %3098 = vmatpush1.bf16.msra.mxu0 %v7016_v19  ;;  %3141 = vmatpush1.bf16.msra.mxu1 %v7018_v20  ;;  %v305_v32 = vld [vmem:[%s10927_s1 + $0x900] sm:$0xff]  ;;  %v306_v34 = vld [vmem:[%s10927_s1 + $0x908] sm:$0xff]  ;;  %v7023_v16 = vcombine.high %v84_v11, %v116_v12  ;;  %v147_v17 = vld [vmem:[%s10927_s1 + $0x410] sm:$0xff] }
   0xb   :  { %3099 = vmatprep.subr.bf16.mxu0 %v7081_v21  ;;  %3142 = vmatprep.subr.bf16.mxu1 %v7083_v22  ;;  %v7209_v37 = vcombine.high %v273_v31, %v305_v32  ;;  %v7211_v38 = vcombine.high %v274_v33, %v306_v34  ;;  %v337_v39 = vld [vmem:[%s10927_s1 + $0xa00] sm:$0xff]  ;;  %v338_v41 = vld [vmem:[%s10927_s1 + $0xa08] sm:$0xff]  ;;  %v7208_v43 = vcombine.low %v273_v31, %v305_v32  ;;  %v179_v18 = vld [vmem:[%s10927_s1 + $0x510] sm:$0xff] }
   0xc   :  { %v369_v40 = vld [vmem:[%s10927_s1 + $0xb00] sm:$0xff]  ;;  %v370_v42 = vld [vmem:[%s10927_s1 + $0xb08] sm:$0xff]  ;;  %v7210_v44 = vcombine.low %v274_v33, %v306_v34  ;;  %v148_v19 = vld [vmem:[%s10927_s1 + $0x418] sm:$0xff]  ;;  %v7020_v21 = vcombine.low %v83_v8, %v115_v9  ;;  %v7022_v22 = vcombine.low %v84_v11, %v116_v12  ;;  %v7085_v23 = vcombine.high %v147_v17, %v179_v18 }
   0xd   :  { %v7273_v45 = vcombine.high %v337_v39, %v369_v40  ;;  %v7275_v46 = vcombine.high %v338_v41, %v370_v42  ;;  %v401_v47 = vld [vmem:[%s10927_s1 + $0xc00] sm:$0xff]  ;;  %v402_v49 = vld [vmem:[%s10927_s1 + $0xc08] sm:$0xff]  ;;  %v7272_v51 = vcombine.low %v337_v39, %v369_v40  ;;  %v7274_v52 = vcombine.low %v338_v41, %v370_v42  ;;  %v180_v20 = vld [vmem:[%s10927_s1 + $0x518] sm:$0xff] }
   0xe   :  { %3100 = vmatpush1.bf16.msra.mxu0 %v7080_v27  ;;  %3143 = vmatpush1.bf16.msra.mxu1 %v7082_v28  ;;  %v433_v48 = vld [vmem:[%s10927_s1 + $0xd00] sm:$0xff]  ;;  %v434_v50 = vld [vmem:[%s10927_s1 + $0xd08] sm:$0xff]  ;;  %v7087_v24 = vcombine.high %v148_v19, %v180_v20  ;;  %v211_v25 = vld [vmem:[%s10927_s1 + $0x610] sm:$0xff] }
   0xf   :  { %3101 = vmatprep.subr.bf16.mxu0 %v7145_v29  ;;  %3144 = vmatprep.subr.bf16.mxu1 %v7147_v30  ;;  %v7337_v53 = vcombine.high %v401_v47, %v433_v48  ;;  %v7339_v54 = vcombine.high %v402_v49, %v434_v50  ;;  %v465_v55 = vld [vmem:[%s10927_s1 + $0xe00] sm:$0xff]  ;;  %v466_v57 = vld [vmem:[%s10927_s1 + $0xe08] sm:$0xff]  ;;  %v7336_v59 = vcombine.low %v401_v47, %v433_v48  ;;  %v243_v26 = vld [vmem:[%s10927_s1 + $0x710] sm:$0xff] }
  0x10   :  { %v497_v56 = vld [vmem:[%s10927_s1 + $0xf00] sm:$0xff]  ;;  %v498_v58 = vld [vmem:[%s10927_s1 + $0xf08] sm:$0xff]  ;;  %v7338_v60 = vcombine.low %v402_v49, %v434_v50  ;;  %v212_v27 = vld [vmem:[%s10927_s1 + $0x618] sm:$0xff]  ;;  %v7084_v29 = vcombine.low %v147_v17, %v179_v18  ;;  %v7086_v30 = vcombine.low %v148_v19, %v180_v20  ;;  %v7149_v31 = vcombine.high %v211_v25, %v243_v26 }
  0x11   :  { %v7401_v61 = vcombine.high %v465_v55, %v497_v56  ;;  %v7403_v62 = vcombine.high %v466_v57, %v498_v58  ;;  %v7400_v4 = vcombine.low %v465_v55, %v497_v56  ;;  %v7402_v5 = vcombine.low %v466_v57, %v498_v58  ;;  %v7746_v10 = vld [vmem:[%s10928_s0] sm:$0xff]   ;;  %v244_v28 = vld [vmem:[%s10927_s1 + $0x718] sm:$0xff]  ;;  %v275_v33 = vld [vmem:[%s10927_s1 + $0x810] sm:$0xff] }
  0x12   :  { %3102 = vmatpush1.bf16.msra.mxu0 %v7144_v35  ;;  %3145 = vmatpush1.bf16.msra.mxu1 %v7146_v36  ;;  %v7151_v32 = vcombine.high %v212_v27, %v244_v28  ;;  %v307_v34 = vld [vmem:[%s10927_s1 + $0x910] sm:$0xff]  ;;  %v276_v35 = vld [vmem:[%s10927_s1 + $0x818] sm:$0xff]  ;;  %v21_v1 = vld [vmem:[%s10927_s1 + $0x20] sm:$0xff] }
  0x13   :  { %3103 = vmatprep.subr.bf16.mxu0 %v7209_v37  ;;  %3146 = vmatprep.subr.bf16.mxu1 %v7211_v38  ;;  %v308_v36 = vld [vmem:[%s10927_s1 + $0x918] sm:$0xff]  ;;  %v7148_v37 = vcombine.low %v211_v25, %v243_v26  ;;  %v7150_v38 = vcombine.low %v212_v27, %v244_v28  ;;  %v7213_v39 = vcombine.high %v275_v33, %v307_v34  ;;  %v339_v41 = vld [vmem:[%s10927_s1 + $0xa10] sm:$0xff]  ;;  %v53_v2 = vld [vmem:[%s10927_s1 + $0x120] sm:$0xff] }
  0x14   :  { %v7215_v40 = vcombine.high %v276_v35, %v308_v36  ;;  %v371_v42 = vld [vmem:[%s10927_s1 + $0xb10] sm:$0xff]  ;;  %v6961_v8 = vcombine.high %v21_v1, %v53_v2  ;;  %v85_v11 = vld [vmem:[%s10927_s1 + $0x220] sm:$0xff] }
  0x15   :  { %v7277_v47 = vcombine.high %v339_v41, %v371_v42  ;;  %v403_v49 = vld [vmem:[%s10927_s1 + $0xc10] sm:$0xff]  ;;  %v117_v12 = vld [vmem:[%s10927_s1 + $0x320] sm:$0xff] }
  0x16   :  { %3104 = vmatpush1.bf16.msra.mxu0 %v7208_v43  ;;  %3147 = vmatpush1.bf16.msra.mxu1 %v7210_v44  ;;  %v340_v43 = vld [vmem:[%s10927_s1 + $0xa18] sm:$0xff]  ;;  %v435_v50 = vld [vmem:[%s10927_s1 + $0xd10] sm:$0xff]  ;;  %v7025_v17 = vcombine.high %v85_v11, %v117_v12  ;;  %v149_v19 = vld [vmem:[%s10927_s1 + $0x420] sm:$0xff] }
  0x17   :  { %3105 = vmatprep.subr.bf16.mxu0 %v7273_v45  ;;  %3148 = vmatprep.subr.bf16.mxu1 %v7275_v46  ;;  %v372_v44 = vld [vmem:[%s10927_s1 + $0xb18] sm:$0xff]  ;;  %v7212_v45 = vcombine.low %v275_v33, %v307_v34  ;;  %v7214_v46 = vcombine.low %v276_v35, %v308_v36  ;;  %v7341_v55 = vcombine.high %v403_v49, %v435_v50  ;;  %v467_v57 = vld [vmem:[%s10927_s1 + $0xe10] sm:$0xff]  ;;  %v181_v20 = vld [vmem:[%s10927_s1 + $0x520] sm:$0xff] }
  0x18   :  { %v7279_v48 = vcombine.high %v340_v43, %v372_v44  ;;  %v499_v58 = vld [vmem:[%s10927_s1 + $0xf10] sm:$0xff]  ;;  %v7089_v25 = vcombine.high %v149_v19, %v181_v20  ;;  %v213_v27 = vld [vmem:[%s10927_s1 + $0x620] sm:$0xff] }
  0x19   :  { %v7405_v63 = vcombine.high %v467_v57, %v499_v58  ;;  %v245_v28 = vld [vmem:[%s10927_s1 + $0x720] sm:$0xff] }
  0x1a   :  { %3106 = vmatpush1.bf16.msra.mxu0 %v7272_v51  ;;  %3149 = vmatpush1.bf16.msra.mxu1 %v7274_v52  ;;  %v404_v51 = vld [vmem:[%s10927_s1 + $0xc18] sm:$0xff]  ;;  %v7153_v33 = vcombine.high %v213_v27, %v245_v28  ;;  %v277_v35 = vld [vmem:[%s10927_s1 + $0x820] sm:$0xff] }
  0x1b   :  { %3107 = vmatprep.subr.bf16.mxu0 %v7337_v53  ;;  %3150 = vmatprep.subr.bf16.mxu1 %v7339_v54  ;;  %v436_v52 = vld [vmem:[%s10927_s1 + $0xd18] sm:$0xff]  ;;  %v7276_v53 = vcombine.low %v339_v41, %v371_v42  ;;  %v7278_v54 = vcombine.low %v340_v43, %v372_v44  ;;  %v309_v36 = vld [vmem:[%s10927_s1 + $0x920] sm:$0xff] }
  0x1c   :  { %v7343_v56 = vcombine.high %v404_v51, %v436_v52  ;;  %v7217_v41 = vcombine.high %v277_v35, %v309_v36  ;;  %v341_v43 = vld [vmem:[%s10927_s1 + $0xa20] sm:$0xff] }
  0x1d   :  { %v373_v44 = vld [vmem:[%s10927_s1 + $0xb20] sm:$0xff] }
  0x1e   :  { %3108 = vmatpush1.bf16.msra.mxu0 %v7336_v59  ;;  %3151 = vmatpush1.bf16.msra.mxu1 %v7338_v60  ;;  %v468_v59 = vld [vmem:[%s10927_s1 + $0xe18] sm:$0xff] }
  0x1f   :  { %3109 = vmatprep.subr.bf16.mxu0 %v7401_v61  ;;  %3152 = vmatprep.subr.bf16.mxu1 %v7403_v62  ;;  %v500_v60 = vld [vmem:[%s10927_s1 + $0xf18] sm:$0xff]  ;;  %v7340_v61 = vcombine.low %v403_v49, %v435_v50  ;;  %v7342_v62 = vcombine.low %v404_v51, %v436_v52  ;;  %v7281_v49 = vcombine.high %v341_v43, %v373_v44  ;;  %v405_v51 = vld [vmem:[%s10927_s1 + $0xc20] sm:$0xff] }
  0x20   :  { %v7407_v0 = vcombine.high %v468_v59, %v500_v60  ;;  %v437_v52 = vld [vmem:[%s10927_s1 + $0xd20] sm:$0xff] }
  0x22   :  { %3110 = vmatpush1.bf16.msra.mxu0 %v7400_v4  ;;  %3153 = vmatpush1.bf16.msra.mxu1 %v7402_v5  ;;  %v22_v4 = vld [vmem:[%s10927_s1 + $0x28] sm:$0xff] }
  0x23   :  { %3181 = vmatprep.subr.bf16.mxu0 %v6957_v6  ;;  %3224 = vmatprep.subr.bf16.mxu1 %v6959_v7  ;;  %v54_v5 = vld [vmem:[%s10927_s1 + $0x128] sm:$0xff]  ;;  %v7404_v6 = vcombine.low %v467_v57, %v499_v58  ;;  %v7406_v7 = vcombine.low %v468_v59, %v500_v60  ;;  %v7345_v57 = vcombine.high %v405_v51, %v437_v52  ;;  %v469_v59 = vld [vmem:[%s10927_s1 + $0xe20] sm:$0xff] }
  0x24   :  { %v6963_v9 = vcombine.high %v22_v4, %v54_v5  ;;  %v501_v60 = vld [vmem:[%s10927_s1 + $0xf20] sm:$0xff] }
  0x25   :  { %3128 = vmatmul.mubr.bf16.vlgmr.msra.gmra.mrb[0].mxu0 %v7746_v10  ;;  %3171 = vmatmul.mubr.bf16.vlgmr.msra.gmra.mrb[0].mxu1 %v7746_v10 }
  0x26   :  { %3182 = vmatpush1.bf16.msra.mxu0 %v6956_v13  ;;  %3225 = vmatpush1.bf16.msra.mxu1 %v6958_v14  ;;  %v86_v13 = vld [vmem:[%s10927_s1 + $0x228] sm:$0xff] }
  0x27   :  { %3183 = vmatprep.subr.bf16.mxu0 %v7021_v15  ;;  %3226 = vmatprep.subr.bf16.mxu1 %v7023_v16  ;;  %v118_v14 = vld [vmem:[%s10927_s1 + $0x328] sm:$0xff]  ;;  %v6960_v15 = vcombine.low %v21_v1, %v53_v2  ;;  %v6962_v16 = vcombine.low %v22_v4, %v54_v5  ;;  %v7409_v1 = vcombine.high %v469_v59, %v501_v60  ;;  %v23_v4 = vld [vmem:[%s10927_s1 + $0x30] sm:$0xff] }
  0x28   :  { %3213 = vmatprep.mubr.bf16.mxu0 %v10932_v3  ;;  %3256 = vmatprep.mubr.bf16.mxu1 %v10932_v3  ;;  %v7027_v18 = vcombine.high %v86_v13, %v118_v14  ;;  %v55_v5 = vld [vmem:[%s10927_s1 + $0x130] sm:$0xff] }
  0x2a   :  { %3184 = vmatpush1.bf16.msra.mxu0 %v7020_v21  ;;  %3227 = vmatpush1.bf16.msra.mxu1 %v7022_v22  ;;  %v150_v21 = vld [vmem:[%s10927_s1 + $0x428] sm:$0xff] }
  0x2b   :  { %3185 = vmatprep.subr.bf16.mxu0 %v7085_v23  ;;  %3228 = vmatprep.subr.bf16.mxu1 %v7087_v24  ;;  %v182_v22 = vld [vmem:[%s10927_s1 + $0x528] sm:$0xff]  ;;  %v7024_v23 = vcombine.low %v85_v11, %v117_v12  ;;  %v7026_v24 = vcombine.low %v86_v13, %v118_v14  ;;  %v6965_v11 = vcombine.high %v23_v4, %v55_v5  ;;  %v87_v13 = vld [vmem:[%s10927_s1 + $0x230] sm:$0xff] }
  0x2c   :  { %v7091_v26 = vcombine.high %v150_v21, %v182_v22  ;;  %v119_v14 = vld [vmem:[%s10927_s1 + $0x330] sm:$0xff] }
  0x2e   :  { %3186 = vmatpush1.bf16.msra.mxu0 %v7084_v29  ;;  %3229 = vmatpush1.bf16.msra.mxu1 %v7086_v30  ;;  %v214_v29 = vld [vmem:[%s10927_s1 + $0x628] sm:$0xff] }
  0x2f   :  { %3187 = vmatprep.subr.bf16.mxu0 %v7149_v31  ;;  %3230 = vmatprep.subr.bf16.mxu1 %v7151_v32  ;;  %v246_v30 = vld [vmem:[%s10927_s1 + $0x728] sm:$0xff]  ;;  %v7088_v31 = vcombine.low %v149_v19, %v181_v20  ;;  %v7090_v32 = vcombine.low %v150_v21, %v182_v22  ;;  %v7029_v19 = vcombine.high %v87_v13, %v119_v14  ;;  %v151_v21 = vld [vmem:[%s10927_s1 + $0x430] sm:$0xff] }
  0x30   :  { %v7155_v34 = vcombine.high %v214_v29, %v246_v30  ;;  %v183_v22 = vld [vmem:[%s10927_s1 + $0x530] sm:$0xff] }
  0x32   :  { %3188 = vmatpush1.bf16.msra.mxu0 %v7148_v37  ;;  %3231 = vmatpush1.bf16.msra.mxu1 %v7150_v38  ;;  %v278_v37 = vld [vmem:[%s10927_s1 + $0x828] sm:$0xff] }
  0x33   :  { %3189 = vmatprep.subr.bf16.mxu0 %v7213_v39  ;;  %3232 = vmatprep.subr.bf16.mxu1 %v7215_v40  ;;  %v310_v38 = vld [vmem:[%s10927_s1 + $0x928] sm:$0xff]  ;;  %v7152_v39 = vcombine.low %v213_v27, %v245_v28  ;;  %v7154_v40 = vcombine.low %v214_v29, %v246_v30  ;;  %v7093_v27 = vcombine.high %v151_v21, %v183_v22  ;;  %v215_v29 = vld [vmem:[%s10927_s1 + $0x630] sm:$0xff] }
  0x34   :  { %v7219_v42 = vcombine.high %v278_v37, %v310_v38  ;;  %v247_v30 = vld [vmem:[%s10927_s1 + $0x730] sm:$0xff] }
  0x36   :  { %3190 = vmatpush1.bf16.msra.mxu0 %v7212_v45  ;;  %3233 = vmatpush1.bf16.msra.mxu1 %v7214_v46  ;;  %v342_v45 = vld [vmem:[%s10927_s1 + $0xa28] sm:$0xff] }
  0x37   :  { %3191 = vmatprep.subr.bf16.mxu0 %v7277_v47  ;;  %3234 = vmatprep.subr.bf16.mxu1 %v7279_v48  ;;  %v374_v46 = vld [vmem:[%s10927_s1 + $0xb28] sm:$0xff]  ;;  %v7216_v47 = vcombine.low %v277_v35, %v309_v36  ;;  %v7218_v48 = vcombine.low %v278_v37, %v310_v38  ;;  %v7157_v35 = vcombine.high %v215_v29, %v247_v30  ;;  %v279_v37 = vld [vmem:[%s10927_s1 + $0x830] sm:$0xff] }
  0x38   :  { %v7283_v50 = vcombine.high %v342_v45, %v374_v46  ;;  %v311_v38 = vld [vmem:[%s10927_s1 + $0x930] sm:$0xff] }
  0x3a   :  { %3192 = vmatpush1.bf16.msra.mxu0 %v7276_v53  ;;  %3235 = vmatpush1.bf16.msra.mxu1 %v7278_v54  ;;  %v406_v53 = vld [vmem:[%s10927_s1 + $0xc28] sm:$0xff] }
  0x3b   :  { %3193 = vmatprep.subr.bf16.mxu0 %v7341_v55  ;;  %3236 = vmatprep.subr.bf16.mxu1 %v7343_v56  ;;  %v438_v54 = vld [vmem:[%s10927_s1 + $0xd28] sm:$0xff]  ;;  %v7280_v55 = vcombine.low %v341_v43, %v373_v44  ;;  %v7282_v56 = vcombine.low %v342_v45, %v374_v46  ;;  %v7221_v43 = vcombine.high %v279_v37, %v311_v38  ;;  %v343_v45 = vld [vmem:[%s10927_s1 + $0xa30] sm:$0xff] }
  0x3c   :  { %v7347_v58 = vcombine.high %v406_v53, %v438_v54  ;;  %v375_v46 = vld [vmem:[%s10927_s1 + $0xb30] sm:$0xff] }
  0x3e   :  { %3194 = vmatpush1.bf16.msra.mxu0 %v7340_v61  ;;  %3237 = vmatpush1.bf16.msra.mxu1 %v7342_v62  ;;  %v470_v61 = vld [vmem:[%s10927_s1 + $0xe28] sm:$0xff] }
  0x3f   :  { %3195 = vmatprep.subr.bf16.mxu0 %v7405_v63  ;;  %3238 = vmatprep.subr.bf16.mxu1 %v7407_v0  ;;  %v502_v62 = vld [vmem:[%s10927_s1 + $0xf28] sm:$0xff]  ;;  %v7344_v63 = vcombine.low %v405_v51, %v437_v52  ;;  %v7346_v0 = vcombine.low %v406_v53, %v438_v54  ;;  %v7285_v51 = vcombine.high %v343_v45, %v375_v46  ;;  %v407_v53 = vld [vmem:[%s10927_s1 + $0xc30] sm:$0xff] }
  0x40   :  { %v7411_v2 = vcombine.high %v470_v61, %v502_v62  ;;  %v439_v54 = vld [vmem:[%s10927_s1 + $0xd30] sm:$0xff] }
  0x42   :  { %3196 = vmatpush1.bf16.msra.mxu0 %v7404_v6  ;;  %3239 = vmatpush1.bf16.msra.mxu1 %v7406_v7  ;;  %v24_v6 = vld [vmem:[%s10927_s1 + $0x38] sm:$0xff] }
  0x43   :  { %3267 = vmatprep.subr.bf16.mxu0 %v6961_v8  ;;  %3310 = vmatprep.subr.bf16.mxu1 %v6963_v9  ;;  %v56_v7 = vld [vmem:[%s10927_s1 + $0x138] sm:$0xff]  ;;  %v7408_v8 = vcombine.low %v469_v59, %v501_v60  ;;  %v7410_v9 = vcombine.low %v470_v61, %v502_v62  ;;  %v7349_v59 = vcombine.high %v407_v53, %v439_v54  ;;  %v471_v61 = vld [vmem:[%s10927_s1 + $0xe30] sm:$0xff] }
  0x44   :  { %v6967_v12 = vcombine.high %v24_v6, %v56_v7  ;;  %v503_v62 = vld [vmem:[%s10927_s1 + $0xf30] sm:$0xff] }
  0x45   :  { %3214 = vmatmul.mubr.bf16.vlgmr.msra.gmra.mrb[4].mxu0 %v7746_v10  ;;  %3257 = vmatmul.mubr.bf16.vlgmr.msra.gmra.mrb[4].mxu1 %v7746_v10 }
  0x46   :  { %3268 = vmatpush1.bf16.msra.mxu0 %v6960_v15  ;;  %3311 = vmatpush1.bf16.msra.mxu1 %v6962_v16  ;;  %v88_v15 = vld [vmem:[%s10927_s1 + $0x238] sm:$0xff] }
  0x47   :  { %3269 = vmatprep.subr.bf16.mxu0 %v7025_v17  ;;  %3312 = vmatprep.subr.bf16.mxu1 %v7027_v18  ;;  %v120_v16 = vld [vmem:[%s10927_s1 + $0x338] sm:$0xff]  ;;  %v6964_v17 = vcombine.low %v23_v4, %v55_v5  ;;  %v6966_v18 = vcombine.low %v24_v6, %v56_v7  ;;  %v7413_v4 = vcombine.high %v471_v61, %v503_v62  ;;  %v25_v6 = vld [vmem:[%s10927_s1 + $0x40] sm:$0xff] }
  0x48   :  { %3299 = vmatprep.mubr.bf16.mxu0 %v10932_v3  ;;  %3342 = vmatprep.mubr.bf16.mxu1 %v10932_v3  ;;  %v7031_v20 = vcombine.high %v88_v15, %v120_v16  ;;  %v57_v7 = vld [vmem:[%s10927_s1 + $0x140] sm:$0xff] }
  0x4a   :  { %3270 = vmatpush1.bf16.msra.mxu0 %v7024_v23  ;;  %3313 = vmatpush1.bf16.msra.mxu1 %v7026_v24  ;;  %v152_v23 = vld [vmem:[%s10927_s1 + $0x438] sm:$0xff] }
  0x4b   :  { %3271 = vmatprep.subr.bf16.mxu0 %v7089_v25  ;;  %3314 = vmatprep.subr.bf16.mxu1 %v7091_v26  ;;  %v184_v24 = vld [vmem:[%s10927_s1 + $0x538] sm:$0xff]  ;;  %v7028_v25 = vcombine.low %v87_v13, %v119_v14  ;;  %v7030_v26 = vcombine.low %v88_v15, %v120_v16  ;;  %v6969_v13 = vcombine.high %v25_v6, %v57_v7  ;;  %v89_v15 = vld [vmem:[%s10927_s1 + $0x240] sm:$0xff] }
  0x4c   :  { %v7095_v28 = vcombine.high %v152_v23, %v184_v24  ;;  %v121_v16 = vld [vmem:[%s10927_s1 + $0x340] sm:$0xff] }
  0x4e   :  { %3272 = vmatpush1.bf16.msra.mxu0 %v7088_v31  ;;  %3315 = vmatpush1.bf16.msra.mxu1 %v7090_v32  ;;  %v216_v31 = vld [vmem:[%s10927_s1 + $0x638] sm:$0xff] }
  0x4f   :  { %3273 = vmatprep.subr.bf16.mxu0 %v7153_v33  ;;  %3316 = vmatprep.subr.bf16.mxu1 %v7155_v34  ;;  %v248_v32 = vld [vmem:[%s10927_s1 + $0x738] sm:$0xff]  ;;  %v7092_v33 = vcombine.low %v151_v21, %v183_v22  ;;  %v7094_v34 = vcombine.low %v152_v23, %v184_v24  ;;  %v7033_v21 = vcombine.high %v89_v15, %v121_v16  ;;  %v153_v23 = vld [vmem:[%s10927_s1 + $0x440] sm:$0xff] }
  0x50   :  { %v7159_v36 = vcombine.high %v216_v31, %v248_v32  ;;  %v185_v24 = vld [vmem:[%s10927_s1 + $0x540] sm:$0xff] }
  0x52   :  { %3274 = vmatpush1.bf16.msra.mxu0 %v7152_v39  ;;  %3317 = vmatpush1.bf16.msra.mxu1 %v7154_v40  ;;  %v280_v39 = vld [vmem:[%s10927_s1 + $0x838] sm:$0xff] }
  0x53   :  { %3275 = vmatprep.subr.bf16.mxu0 %v7217_v41  ;;  %3318 = vmatprep.subr.bf16.mxu1 %v7219_v42  ;;  %v312_v40 = vld [vmem:[%s10927_s1 + $0x938] sm:$0xff]  ;;  %v7156_v41 = vcombine.low %v215_v29, %v247_v30  ;;  %v7158_v42 = vcombine.low %v216_v31, %v248_v32  ;;  %v7097_v29 = vcombine.high %v153_v23, %v185_v24  ;;  %v217_v31 = vld [vmem:[%s10927_s1 + $0x640] sm:$0xff] }
  0x54   :  { %v7223_v44 = vcombine.high %v280_v39, %v312_v40  ;;  %v249_v32 = vld [vmem:[%s10927_s1 + $0x740] sm:$0xff] }
  0x56   :  { %3276 = vmatpush1.bf16.msra.mxu0 %v7216_v47  ;;  %3319 = vmatpush1.bf16.msra.mxu1 %v7218_v48  ;;  %v344_v47 = vld [vmem:[%s10927_s1 + $0xa38] sm:$0xff] }
  0x57   :  { %3277 = vmatprep.subr.bf16.mxu0 %v7281_v49  ;;  %3320 = vmatprep.subr.bf16.mxu1 %v7283_v50  ;;  %v376_v48 = vld [vmem:[%s10927_s1 + $0xb38] sm:$0xff]  ;;  %v7220_v49 = vcombine.low %v279_v37, %v311_v38  ;;  %v7222_v50 = vcombine.low %v280_v39, %v312_v40  ;;  %v7161_v37 = vcombine.high %v217_v31, %v249_v32  ;;  %v281_v39 = vld [vmem:[%s10927_s1 + $0x840] sm:$0xff] }
  0x58   :  { %v7287_v52 = vcombine.high %v344_v47, %v376_v48  ;;  %v313_v40 = vld [vmem:[%s10927_s1 + $0x940] sm:$0xff] }
  0x5a   :  { %3278 = vmatpush1.bf16.msra.mxu0 %v7280_v55  ;;  %3321 = vmatpush1.bf16.msra.mxu1 %v7282_v56  ;;  %v408_v55 = vld [vmem:[%s10927_s1 + $0xc38] sm:$0xff] }
  0x5b   :  { %3279 = vmatprep.subr.bf16.mxu0 %v7345_v57  ;;  %3322 = vmatprep.subr.bf16.mxu1 %v7347_v58  ;;  %v440_v56 = vld [vmem:[%s10927_s1 + $0xd38] sm:$0xff]  ;;  %v7284_v57 = vcombine.low %v343_v45, %v375_v46  ;;  %v7286_v58 = vcombine.low %v344_v47, %v376_v48  ;;  %v7225_v45 = vcombine.high %v281_v39, %v313_v40  ;;  %v345_v47 = vld [vmem:[%s10927_s1 + $0xa40] sm:$0xff] }
  0x5c   :  { %v7351_v60 = vcombine.high %v408_v55, %v440_v56  ;;  %v377_v48 = vld [vmem:[%s10927_s1 + $0xb40] sm:$0xff] }
  0x5e   :  { %3280 = vmatpush1.bf16.msra.mxu0 %v7344_v63  ;;  %3323 = vmatpush1.bf16.msra.mxu1 %v7346_v0  ;;  %v472_v63 = vld [vmem:[%s10927_s1 + $0xe38] sm:$0xff] }
  0x5f   :  { %3281 = vmatprep.subr.bf16.mxu0 %v7409_v1  ;;  %3324 = vmatprep.subr.bf16.mxu1 %v7411_v2  ;;  %v504_v0 = vld [vmem:[%s10927_s1 + $0xf38] sm:$0xff]  ;;  %v7348_v1 = vcombine.low %v407_v53, %v439_v54  ;;  %v7350_v2 = vcombine.low %v408_v55, %v440_v56  ;;  %v7289_v53 = vcombine.high %v345_v47, %v377_v48  ;;  %v409_v55 = vld [vmem:[%s10927_s1 + $0xc40] sm:$0xff] }
  0x60   :  { %v7415_v5 = vcombine.high %v472_v63, %v504_v0  ;;  %v441_v56 = vld [vmem:[%s10927_s1 + $0xd40] sm:$0xff] }
  0x62   :  { %3282 = vmatpush1.bf16.msra.mxu0 %v7408_v8  ;;  %3325 = vmatpush1.bf16.msra.mxu1 %v7410_v9  ;;  %v26_v8 = vld [vmem:[%s10927_s1 + $0x48] sm:$0xff] }
  0x63   :  { %3353 = vmatprep.subr.bf16.mxu0 %v6965_v11  ;;  %3396 = vmatprep.subr.bf16.mxu1 %v6967_v12  ;;  %v58_v9 = vld [vmem:[%s10927_s1 + $0x148] sm:$0xff]  ;;  %v7412_v11 = vcombine.low %v471_v61, %v503_v62  ;;  %v7414_v12 = vcombine.low %v472_v63, %v504_v0  ;;  %v7353_v61 = vcombine.high %v409_v55, %v441_v56  ;;  %v473_v63 = vld [vmem:[%s10927_s1 + $0xe40] sm:$0xff] }
  0x64   :  { %v6971_v14 = vcombine.high %v26_v8, %v58_v9  ;;  %v505_v0 = vld [vmem:[%s10927_s1 + $0xf40] sm:$0xff] }
  0x65   :  { %3300 = vmatmul.mubr.bf16.vlgmr.msra.gmra.mrb[8].mxu0 %v7746_v10  ;;  %3343 = vmatmul.mubr.bf16.vlgmr.msra.gmra.mrb[8].mxu1 %v7746_v10 }
  0x66   :  { %3354 = vmatpush1.bf16.msra.mxu0 %v6964_v17  ;;  %3397 = vmatpush1.bf16.msra.mxu1 %v6966_v18  ;;  %v90_v17 = vld [vmem:[%s10927_s1 + $0x248] sm:$0xff] }
  0x67   :  { %3355 = vmatprep.subr.bf16.mxu0 %v7029_v19  ;;  %3398 = vmatprep.subr.bf16.mxu1 %v7031_v20  ;;  %v122_v18 = vld [vmem:[%s10927_s1 + $0x348] sm:$0xff]  ;;  %v6968_v19 = vcombine.low %v25_v6, %v57_v7  ;;  %v6970_v20 = vcombine.low %v26_v8, %v58_v9  ;;  %v7417_v6 = vcombine.high %v473_v63, %v505_v0  ;;  %v27_v8 = vld [vmem:[%s10927_s1 + $0x50] sm:$0xff] }
  0x68   :  { %3385 = vmatprep.mubr.bf16.mxu0 %v10932_v3  ;;  %3428 = vmatprep.mubr.bf16.mxu1 %v10932_v3  ;;  %v7035_v22 = vcombine.high %v90_v17, %v122_v18  ;;  %v59_v9 = vld [vmem:[%s10927_s1 + $0x150] sm:$0xff] }
  0x6a   :  { %3356 = vmatpush1.bf16.msra.mxu0 %v7028_v25  ;;  %3399 = vmatpush1.bf16.msra.mxu1 %v7030_v26  ;;  %v154_v25 = vld [vmem:[%s10927_s1 + $0x448] sm:$0xff] }
  0x6b   :  { %3357 = vmatprep.subr.bf16.mxu0 %v7093_v27  ;;  %3400 = vmatprep.subr.bf16.mxu1 %v7095_v28  ;;  %v186_v26 = vld [vmem:[%s10927_s1 + $0x548] sm:$0xff]  ;;  %v7032_v27 = vcombine.low %v89_v15, %v121_v16  ;;  %v7034_v28 = vcombine.low %v90_v17, %v122_v18  ;;  %v6973_v15 = vcombine.high %v27_v8, %v59_v9  ;;  %v91_v17 = vld [vmem:[%s10927_s1 + $0x250] sm:$0xff] }
  0x6c   :  { %v7099_v30 = vcombine.high %v154_v25, %v186_v26  ;;  %v123_v18 = vld [vmem:[%s10927_s1 + $0x350] sm:$0xff] }
  0x6e   :  { %3358 = vmatpush1.bf16.msra.mxu0 %v7092_v33  ;;  %3401 = vmatpush1.bf16.msra.mxu1 %v7094_v34  ;;  %v218_v33 = vld [vmem:[%s10927_s1 + $0x648] sm:$0xff] }
  0x6f   :  { %3359 = vmatprep.subr.bf16.mxu0 %v7157_v35  ;;  %3402 = vmatprep.subr.bf16.mxu1 %v7159_v36  ;;  %v250_v34 = vld [vmem:[%s10927_s1 + $0x748] sm:$0xff]  ;;  %v7096_v35 = vcombine.low %v153_v23, %v185_v24  ;;  %v7098_v36 = vcombine.low %v154_v25, %v186_v26  ;;  %v7037_v23 = vcombine.high %v91_v17, %v123_v18  ;;  %v155_v25 = vld [vmem:[%s10927_s1 + $0x450] sm:$0xff] }
  0x70   :  { %v7163_v38 = vcombine.high %v218_v33, %v250_v34  ;;  %v187_v26 = vld [vmem:[%s10927_s1 + $0x550] sm:$0xff] }
  0x72   :  { %3360 = vmatpush1.bf16.msra.mxu0 %v7156_v41  ;;  %3403 = vmatpush1.bf16.msra.mxu1 %v7158_v42  ;;  %v282_v41 = vld [vmem:[%s10927_s1 + $0x848] sm:$0xff] }
  0x73   :  { %3361 = vmatprep.subr.bf16.mxu0 %v7221_v43  ;;  %3404 = vmatprep.subr.bf16.mxu1 %v7223_v44  ;;  %v314_v42 = vld [vmem:[%s10927_s1 + $0x948] sm:$0xff]  ;;  %v7160_v43 = vcombine.low %v217_v31, %v249_v32  ;;  %v7162_v44 = vcombine.low %v218_v33, %v250_v34  ;;  %v7101_v31 = vcombine.high %v155_v25, %v187_v26  ;;  %v219_v33 = vld [vmem:[%s10927_s1 + $0x650] sm:$0xff] }
  0x74   :  { %v7227_v46 = vcombine.high %v282_v41, %v314_v42  ;;  %v251_v34 = vld [vmem:[%s10927_s1 + $0x750] sm:$0xff] }
  0x76   :  { %3362 = vmatpush1.bf16.msra.mxu0 %v7220_v49  ;;  %3405 = vmatpush1.bf16.msra.mxu1 %v7222_v50  ;;  %v346_v49 = vld [vmem:[%s10927_s1 + $0xa48] sm:$0xff] }
  0x77   :  { %3363 = vmatprep.subr.bf16.mxu0 %v7285_v51  ;;  %3406 = vmatprep.subr.bf16.mxu1 %v7287_v52  ;;  %v378_v50 = vld [vmem:[%s10927_s1 + $0xb48] sm:$0xff]  ;;  %v7224_v51 = vcombine.low %v281_v39, %v313_v40  ;;  %v7226_v52 = vcombine.low %v282_v41, %v314_v42  ;;  %v283_v40 = vld [vmem:[%s10927_s1 + $0x850] sm:$0xff]  ;;  %v284_v42 = vld [vmem:[%s10927_s1 + $0x858] sm:$0xff] }
  0x78   :  { %v7291_v54 = vcombine.high %v346_v49, %v378_v50  ;;  %v315_v41 = vld [vmem:[%s10927_s1 + $0x950] sm:$0xff] }
  0x7a   :  { %3364 = vmatpush1.bf16.msra.mxu0 %v7284_v57  ;;  %3407 = vmatpush1.bf16.msra.mxu1 %v7286_v58  ;;  %v410_v57 = vld [vmem:[%s10927_s1 + $0xc48] sm:$0xff] }
  0x7b   :  { %3365 = vmatprep.subr.bf16.mxu0 %v7349_v59  ;;  %3408 = vmatprep.subr.bf16.mxu1 %v7351_v60  ;;  %v442_v58 = vld [vmem:[%s10927_s1 + $0xd48] sm:$0xff]  ;;  %v7288_v59 = vcombine.low %v345_v47, %v377_v48  ;;  %v7290_v60 = vcombine.low %v346_v49, %v378_v50  ;;  %v347_v48 = vld [vmem:[%s10927_s1 + $0xa50] sm:$0xff]  ;;  %v348_v50 = vld [vmem:[%s10927_s1 + $0xa58] sm:$0xff] }
  0x7c   :  { %v7355_v62 = vcombine.high %v410_v57, %v442_v58  ;;  %v379_v49 = vld [vmem:[%s10927_s1 + $0xb50] sm:$0xff] }
  0x7e   :  { %3366 = vmatpush1.bf16.msra.mxu0 %v7348_v1  ;;  %3409 = vmatpush1.bf16.msra.mxu1 %v7350_v2  ;;  %v474_v1 = vld [vmem:[%s10927_s1 + $0xe48] sm:$0xff] }
  0x7f   :  { %3367 = vmatprep.subr.bf16.mxu0 %v7413_v4  ;;  %3410 = vmatprep.subr.bf16.mxu1 %v7415_v5  ;;  %v506_v2 = vld [vmem:[%s10927_s1 + $0xf48] sm:$0xff]  ;;  %v7352_v4 = vcombine.low %v409_v55, %v441_v56  ;;  %v7354_v5 = vcombine.low %v410_v57, %v442_v58  ;;  %v411_v56 = vld [vmem:[%s10927_s1 + $0xc50] sm:$0xff]  ;;  %v412_v58 = vld [vmem:[%s10927_s1 + $0xc58] sm:$0xff] }
  0x80   :  { %v7419_v7 = vcombine.high %v474_v1, %v506_v2  ;;  %v443_v57 = vld [vmem:[%s10927_s1 + $0xd50] sm:$0xff] }
  0x82   :  { %3368 = vmatpush1.bf16.msra.mxu0 %v7412_v11  ;;  %3411 = vmatpush1.bf16.msra.mxu1 %v7414_v12  ;;  %v28_v11 = vld [vmem:[%s10927_s1 + $0x58] sm:$0xff] }
  0x83   :  { %3439 = vmatprep.subr.bf16.mxu0 %v6969_v13  ;;  %3482 = vmatprep.subr.bf16.mxu1 %v6971_v14  ;;  %v60_v12 = vld [vmem:[%s10927_s1 + $0x158] sm:$0xff]  ;;  %v7416_v13 = vcombine.low %v473_v63, %v505_v0  ;;  %v7418_v14 = vcombine.low %v474_v1, %v506_v2  ;;  %v475_v0 = vld [vmem:[%s10927_s1 + $0xe50] sm:$0xff] }
  0x84   :  { %v6975_v16 = vcombine.high %v28_v11, %v60_v12  ;;  %v507_v1 = vld [vmem:[%s10927_s1 + $0xf50] sm:$0xff]  ;;  %v476_v2 = vld [vmem:[%s10927_s1 + $0xe58] sm:$0xff] }
  0x85   :  { %3386 = vmatmul.mubr.bf16.vlgmr.msra.gmra.mrb[12].mxu0 %v7746_v10  ;;  %3429 = vmatmul.mubr.bf16.vlgmr.msra.gmra.mrb[12].mxu1 %v7746_v10 }
  0x86   :  { %3440 = vmatpush1.bf16.msra.mxu0 %v6968_v19  ;;  %3483 = vmatpush1.bf16.msra.mxu1 %v6970_v20  ;;  %v92_v19 = vld [vmem:[%s10927_s1 + $0x258] sm:$0xff] }
  0x87   :  { %3441 = vmatprep.subr.bf16.mxu0 %v7033_v21  ;;  %3484 = vmatprep.subr.bf16.mxu1 %v7035_v22  ;;  %v124_v20 = vld [vmem:[%s10927_s1 + $0x358] sm:$0xff]  ;;  %v6972_v21 = vcombine.low %v27_v8, %v59_v9  ;;  %v6974_v22 = vcombine.low %v28_v11, %v60_v12  ;;  %v29_v9 = vld [vmem:[%s10927_s1 + $0x60] sm:$0xff]  ;;  %v30_v12 = vld [vmem:[%s10927_s1 + $0x68] sm:$0xff] }
  0x88   :  { %3471 = vmatprep.mubr.bf16.mxu0 %v10932_v3  ;;  %3514 = vmatprep.mubr.bf16.mxu1 %v10932_v3  ;;  %v7039_v24 = vcombine.high %v92_v19, %v124_v20  ;;  %v61_v11 = vld [vmem:[%s10927_s1 + $0x160] sm:$0xff] }
  0x8a   :  { %3442 = vmatpush1.bf16.msra.mxu0 %v7032_v27  ;;  %3485 = vmatpush1.bf16.msra.mxu1 %v7034_v28  ;;  %v156_v27 = vld [vmem:[%s10927_s1 + $0x458] sm:$0xff] }
  0x8b   :  { %3443 = vmatprep.subr.bf16.mxu0 %v7097_v29  ;;  %3486 = vmatprep.subr.bf16.mxu1 %v7099_v30  ;;  %v188_v28 = vld [vmem:[%s10927_s1 + $0x558] sm:$0xff]  ;;  %v7036_v29 = vcombine.low %v91_v17, %v123_v18  ;;  %v7038_v30 = vcombine.low %v92_v19, %v124_v20  ;;  %v93_v18 = vld [vmem:[%s10927_s1 + $0x260] sm:$0xff]  ;;  %v94_v20 = vld [vmem:[%s10927_s1 + $0x268] sm:$0xff] }
  0x8c   :  { %v7103_v32 = vcombine.high %v156_v27, %v188_v28  ;;  %v125_v19 = vld [vmem:[%s10927_s1 + $0x360] sm:$0xff] }
  0x8e   :  { %3444 = vmatpush1.bf16.msra.mxu0 %v7096_v35  ;;  %3487 = vmatpush1.bf16.msra.mxu1 %v7098_v36  ;;  %v252_v35 = vld [vmem:[%s10927_s1 + $0x758] sm:$0xff]  ;;  %v7100_v36 = vcombine.low %v155_v25, %v187_v26  ;;  %v157_v26 = vld [vmem:[%s10927_s1 + $0x460] sm:$0xff] }
  0x8f   :  { %3445 = vmatprep.subr.bf16.mxu0 %v7161_v37  ;;  %3488 = vmatprep.subr.bf16.mxu1 %v7163_v38  ;;  %v7102_v37 = vcombine.low %v156_v27, %v188_v28  ;;  %v7165_v38 = vcombine.high %v219_v33, %v251_v34  ;;  %v189_v27 = vld [vmem:[%s10927_s1 + $0x560] sm:$0xff] }
  0x90   :  { %v8263_v28 = vld [vmem:[%s10928_s0] sm:$0xff]  }
  0x92   :  { %3446 = vmatpush1.bf16.msra.mxu0 %v7160_v43  ;;  %3489 = vmatpush1.bf16.msra.mxu1 %v7162_v44  ;;  %v316_v43 = vld [vmem:[%s10927_s1 + $0x958] sm:$0xff]  ;;  %v7164_v44 = vcombine.low %v219_v33, %v251_v34  ;;  %v7105_v33 = vcombine.high %v157_v26, %v189_v27 }
  0x93   :  { %3447 = vmatprep.subr.bf16.mxu0 %v7225_v45  ;;  %3490 = vmatprep.subr.bf16.mxu1 %v7227_v46  ;;  %v7229_v46 = vcombine.high %v283_v40, %v315_v41  ;;  %v7231_v47 = vcombine.high %v284_v42, %v316_v43 }
  0x96   :  { %3448 = vmatpush1.bf16.msra.mxu0 %v7224_v51  ;;  %3491 = vmatpush1.bf16.msra.mxu1 %v7226_v52  ;;  %v380_v51 = vld [vmem:[%s10927_s1 + $0xb58] sm:$0xff]  ;;  %v7228_v52 = vcombine.low %v283_v40, %v315_v41 }
  0x97   :  { %3449 = vmatprep.subr.bf16.mxu0 %v7289_v53  ;;  %3492 = vmatprep.subr.bf16.mxu1 %v7291_v54  ;;  %v7230_v53 = vcombine.low %v284_v42, %v316_v43  ;;  %v7293_v54 = vcombine.high %v347_v48, %v379_v49  ;;  %v7295_v55 = vcombine.high %v348_v50, %v380_v51  ;;  %v285_v42 = vld [vmem:[%s10927_s1 + $0x860] sm:$0xff] }
  0x98   :  { %v317_v43 = vld [vmem:[%s10927_s1 + $0x960] sm:$0xff] }
  0x9a   :  { %3450 = vmatpush1.bf16.msra.mxu0 %v7288_v59  ;;  %3493 = vmatpush1.bf16.msra.mxu1 %v7290_v60  ;;  %v444_v59 = vld [vmem:[%s10927_s1 + $0xd58] sm:$0xff]  ;;  %v7292_v60 = vcombine.low %v347_v48, %v379_v49  ;;  %v7233_v48 = vcombine.high %v285_v42, %v317_v43 }
  0x9b   :  { %3451 = vmatprep.subr.bf16.mxu0 %v7353_v61  ;;  %3494 = vmatprep.subr.bf16.mxu1 %v7355_v62  ;;  %v7294_v61 = vcombine.low %v348_v50, %v380_v51  ;;  %v7357_v62 = vcombine.high %v411_v56, %v443_v57  ;;  %v7359_v63 = vcombine.high %v412_v58, %v444_v59  ;;  %v349_v50 = vld [vmem:[%s10927_s1 + $0xa60] sm:$0xff] }
  0x9c   :  { %v381_v51 = vld [vmem:[%s10927_s1 + $0xb60] sm:$0xff] }
  0x9e   :  { %3452 = vmatpush1.bf16.msra.mxu0 %v7352_v4  ;;  %3495 = vmatpush1.bf16.msra.mxu1 %v7354_v5  ;;  %v508_v4 = vld [vmem:[%s10927_s1 + $0xf58] sm:$0xff]  ;;  %v7356_v5 = vcombine.low %v411_v56, %v443_v57  ;;  %v7297_v56 = vcombine.high %v349_v50, %v381_v51 }
  0x9f   :  { %3453 = vmatprep.subr.bf16.mxu0 %v7417_v6  ;;  %3496 = vmatprep.subr.bf16.mxu1 %v7419_v7  ;;  %v7358_v6 = vcombine.low %v412_v58, %v444_v59  ;;  %v7421_v7 = vcombine.high %v475_v0, %v507_v1  ;;  %v7423_v8 = vcombine.high %v476_v2, %v508_v4  ;;  %v413_v58 = vld [vmem:[%s10927_s1 + $0xc60] sm:$0xff] }
  0xa0   :  { %v445_v59 = vld [vmem:[%s10927_s1 + $0xd60] sm:$0xff] }
  0xa2   :  { %3454 = vmatpush1.bf16.msra.mxu0 %v7416_v13  ;;  %3497 = vmatpush1.bf16.msra.mxu1 %v7418_v14  ;;  %v62_v13 = vld [vmem:[%s10927_s1 + $0x168] sm:$0xff]  ;;  %v7420_v14 = vcombine.low %v475_v0, %v507_v1  ;;  %v7361_v0 = vcombine.high %v413_v58, %v445_v59 }
  0xa3   :  { %3525 = vmatprep.subr.bf16.mxu0 %v6973_v15  ;;  %3568 = vmatprep.subr.bf16.mxu1 %v6975_v16  ;;  %v7422_v15 = vcombine.low %v476_v2, %v508_v4  ;;  %v6977_v16 = vcombine.high %v29_v9, %v61_v11  ;;  %v6979_v17 = vcombine.high %v30_v12, %v62_v13  ;;  %v477_v2 = vld [vmem:[%s10927_s1 + $0xe60] sm:$0xff] }
  0xa4   :  { %v509_v4 = vld [vmem:[%s10927_s1 + $0xf60] sm:$0xff] }
  0xa5   :  { %3472 = vmatmul.mubr.bf16.vlgmr.msra.gmra.mrb[16].mxu0 %v7746_v10  ;;  %3515 = vmatmul.mubr.bf16.vlgmr.msra.gmra.mrb[16].mxu1 %v7746_v10  ;;  %v220_v10 = vld [vmem:[%s10927_s1 + $0x658] sm:$0xff] }
  0xa6   :  { %3526 = vmatpush1.bf16.msra.mxu0 %v6972_v21  ;;  %3569 = vmatpush1.bf16.msra.mxu1 %v6974_v22  ;;  %v7167_v39 = vcombine.high %v220_v10, %v252_v35  ;;  %v7166_v45 = vcombine.low %v220_v10, %v252_v35  ;;  %v126_v21 = vld [vmem:[%s10927_s1 + $0x368] sm:$0xff]  ;;  %v6976_v22 = vcombine.low %v29_v9, %v61_v11  ;;  %v221_v10 = vld [vmem:[%s10927_s1 + $0x660] sm:$0xff] }
  0xa7   :  { %3527 = vmatprep.subr.bf16.mxu0 %v7037_v23  ;;  %3570 = vmatprep.subr.bf16.mxu1 %v7039_v24  ;;  %v6978_v23 = vcombine.low %v30_v12, %v62_v13  ;;  %v7041_v24 = vcombine.high %v93_v18, %v125_v19  ;;  %v7043_v25 = vcombine.high %v94_v20, %v126_v21  ;;  %v253_v35 = vld [vmem:[%s10927_s1 + $0x760] sm:$0xff]  ;;  %v31_v12 = vld [vmem:[%s10927_s1 + $0x70] sm:$0xff] }
  0xa8   :  { %3557 = vmatprep.mubr.bf16.mxu0 %v10932_v3  ;;  %3600 = vmatprep.mubr.bf16.mxu1 %v10932_v3  ;;  %v7169_v40 = vcombine.high %v221_v10, %v253_v35  ;;  %v7425_v9 = vcombine.high %v477_v2, %v509_v4  ;;  %v63_v13 = vld [vmem:[%s10927_s1 + $0x170] sm:$0xff] }
  0xaa   :  { %3528 = vmatpush1.bf16.msra.mxu0 %v7036_v29  ;;  %3571 = vmatpush1.bf16.msra.mxu1 %v7038_v30  ;;  %v158_v29 = vld [vmem:[%s10927_s1 + $0x468] sm:$0xff] }
  0xab   :  { %3529 = vmatprep.subr.bf16.mxu0 %v7101_v31  ;;  %3572 = vmatprep.subr.bf16.mxu1 %v7103_v32  ;;  %v190_v30 = vld [vmem:[%s10927_s1 + $0x568] sm:$0xff]  ;;  %v7040_v31 = vcombine.low %v93_v18, %v125_v19  ;;  %v7042_v32 = vcombine.low %v94_v20, %v126_v21  ;;  %v6981_v18 = vcombine.high %v31_v12, %v63_v13  ;;  %v95_v20 = vld [vmem:[%s10927_s1 + $0x270] sm:$0xff] }
  0xac   :  { %v7107_v34 = vcombine.high %v158_v29, %v190_v30  ;;  %v127_v21 = vld [vmem:[%s10927_s1 + $0x370] sm:$0xff] }
  0xae   :  { %3530 = vmatpush1.bf16.msra.mxu0 %v7100_v36  ;;  %3573 = vmatpush1.bf16.msra.mxu1 %v7102_v37  ;;  %v222_v36 = vld [vmem:[%s10927_s1 + $0x668] sm:$0xff] }
  0xaf   :  { %3531 = vmatprep.subr.bf16.mxu0 %v7165_v38  ;;  %3574 = vmatprep.subr.bf16.mxu1 %v7167_v39  ;;  %v254_v37 = vld [vmem:[%s10927_s1 + $0x768] sm:$0xff]  ;;  %v7104_v38 = vcombine.low %v157_v26, %v189_v27  ;;  %v7106_v39 = vcombine.low %v158_v29, %v190_v30  ;;  %v7045_v26 = vcombine.high %v95_v20, %v127_v21  ;;  %v159_v29 = vld [vmem:[%s10927_s1 + $0x470] sm:$0xff] }
  0xb0   :  { %v7171_v41 = vcombine.high %v222_v36, %v254_v37  ;;  %v191_v30 = vld [vmem:[%s10927_s1 + $0x570] sm:$0xff] }
  0xb2   :  { %3532 = vmatpush1.bf16.msra.mxu0 %v7164_v44  ;;  %3575 = vmatpush1.bf16.msra.mxu1 %v7166_v45  ;;  %v286_v44 = vld [vmem:[%s10927_s1 + $0x868] sm:$0xff] }
  0xb3   :  { %3533 = vmatprep.subr.bf16.mxu0 %v7229_v46  ;;  %3576 = vmatprep.subr.bf16.mxu1 %v7231_v47  ;;  %v318_v45 = vld [vmem:[%s10927_s1 + $0x968] sm:$0xff]  ;;  %v7168_v46 = vcombine.low %v221_v10, %v253_v35  ;;  %v7170_v47 = vcombine.low %v222_v36, %v254_v37  ;;  %v7109_v10 = vcombine.high %v159_v29, %v191_v30  ;;  %v223_v36 = vld [vmem:[%s10927_s1 + $0x670] sm:$0xff] }
  0xb4   :  { %v7235_v49 = vcombine.high %v286_v44, %v318_v45  ;;  %v255_v37 = vld [vmem:[%s10927_s1 + $0x770] sm:$0xff] }
  0xb6   :  { %3534 = vmatpush1.bf16.msra.mxu0 %v7228_v52  ;;  %3577 = vmatpush1.bf16.msra.mxu1 %v7230_v53  ;;  %v350_v52 = vld [vmem:[%s10927_s1 + $0xa68] sm:$0xff] }
  0xb7   :  { %3535 = vmatprep.subr.bf16.mxu0 %v7293_v54  ;;  %3578 = vmatprep.subr.bf16.mxu1 %v7295_v55  ;;  %v382_v53 = vld [vmem:[%s10927_s1 + $0xb68] sm:$0xff]  ;;  %v7232_v54 = vcombine.low %v285_v42, %v317_v43  ;;  %v7234_v55 = vcombine.low %v286_v44, %v318_v45  ;;  %v7173_v42 = vcombine.high %v223_v36, %v255_v37  ;;  %v287_v44 = vld [vmem:[%s10927_s1 + $0x870] sm:$0xff] }
  0xb8   :  { %v7299_v57 = vcombine.high %v350_v52, %v382_v53  ;;  %v319_v45 = vld [vmem:[%s10927_s1 + $0x970] sm:$0xff] }
  0xba   :  { %3536 = vmatpush1.bf16.msra.mxu0 %v7292_v60  ;;  %3579 = vmatpush1.bf16.msra.mxu1 %v7294_v61  ;;  %v414_v60 = vld [vmem:[%s10927_s1 + $0xc68] sm:$0xff] }
  0xbb   :  { %3537 = vmatprep.subr.bf16.mxu0 %v7357_v62  ;;  %3580 = vmatprep.subr.bf16.mxu1 %v7359_v63  ;;  %v446_v61 = vld [vmem:[%s10927_s1 + $0xd68] sm:$0xff]  ;;  %v7296_v62 = vcombine.low %v349_v50, %v381_v51  ;;  %v7298_v63 = vcombine.low %v350_v52, %v382_v53  ;;  %v7237_v50 = vcombine.high %v287_v44, %v319_v45  ;;  %v8402_v51 = vld [vmem:[%s10927_s1 + $0xa70] sm:$0xff] }
  0xbc   :  { %v7363_v1 = vcombine.high %v414_v60, %v446_v61  ;;  %v8407_v53 = vld [vmem:[%s10927_s1 + $0xb70] sm:$0xff] }
  0xbe   :  { %3538 = vmatpush1.bf16.msra.mxu0 %v7356_v5  ;;  %3581 = vmatpush1.bf16.msra.mxu1 %v7358_v6  ;;  %v478_v5 = vld [vmem:[%s10927_s1 + $0xe68] sm:$0xff] }
  0xbf   :  { %3539 = vmatprep.subr.bf16.mxu0 %v7421_v7  ;;  %3582 = vmatprep.subr.bf16.mxu1 %v7423_v8  ;;  %v510_v6 = vld [vmem:[%s10927_s1 + $0xf68] sm:$0xff]  ;;  %v7360_v7 = vcombine.low %v413_v58, %v445_v59  ;;  %v7362_v8 = vcombine.low %v414_v60, %v446_v61  ;;  %v5466_v58 = vlaneseq  ;;  %v8422_v59 = vld [vmem:[%s10927_s1 + $0xc70] sm:$0xff]  ;;  %v8432_v61 = vld [vmem:[%s10927_s1 + $0xc78] sm:$0xff] }
  0xc0   :  { %v7427_v11 = vcombine.high %v478_v5, %v510_v6  ;;  %v8427_v60 = vld [vmem:[%s10927_s1 + $0xd70] sm:$0xff] }
  0xc2   :  { %3540 = vmatpush1.bf16.msra.mxu0 %v7420_v14  ;;  %3583 = vmatpush1.bf16.msra.mxu1 %v7422_v15  ;;  %v32_v14 = vld [vmem:[%s10927_s1 + $0x78] sm:$0xff] }
  0xc3   :  { %3611 = vmatprep.subr.bf16.mxu0 %v6977_v16  ;;  %3654 = vmatprep.subr.bf16.mxu1 %v6979_v17  ;;  %v64_v15 = vld [vmem:[%s10927_s1 + $0x178] sm:$0xff]  ;;  %v7424_v16 = vcombine.low %v477_v2, %v509_v4  ;;  %v7426_v17 = vcombine.low %v478_v5, %v510_v6  ;;  %v7300_v4 = vcombine.low %v8402_v51, %v8407_v53 }
  0xc4   :  { %v6983_v19 = vcombine.high %v32_v14, %v64_v15  ;;  %v7301_v5 = vcombine.high %v8402_v51, %v8407_v53  ;;  %v8456_v6 = vld [vmem:[%s10927_s1 + $0xe78] sm:$0xff] }
  0xc5   :  { %3558 = vmatmul.mubr.bf16.vlgmr.msra.gmra.mrb[20].mxu0 %v8263_v28  ;;  %3601 = vmatmul.mubr.bf16.vlgmr.msra.gmra.mrb[20].mxu1 %v8263_v28 }
  0xc6   :  { %3612 = vmatpush1.bf16.msra.mxu0 %v6976_v22  ;;  %3655 = vmatpush1.bf16.msra.mxu1 %v6978_v23  ;;  %v96_v22 = vld [vmem:[%s10927_s1 + $0x278] sm:$0xff] }
  0xc7   :  { %3613 = vmatprep.subr.bf16.mxu0 %v7041_v24  ;;  %3656 = vmatprep.subr.bf16.mxu1 %v7043_v25  ;;  %v128_v23 = vld [vmem:[%s10927_s1 + $0x378] sm:$0xff]  ;;  %v6980_v24 = vcombine.low %v31_v12, %v63_v13  ;;  %v6982_v25 = vcombine.low %v32_v14, %v64_v15  ;;  %v5467_v13 = vshrl.u32 %v5466_v58, 7  ;;  %v8475_v14 = vld [vmem:[%s10927_s1 + $0x180] sm:$0xff]  ;;  %v8480_v15 = vld [vmem:[%s10927_s1 + $0x88] sm:$0xff] }
  0xc8   :  { %3643 = vmatprep.mubr.bf16.mxu0 %v10932_v3  ;;  %3686 = vmatprep.mubr.bf16.mxu1 %v10932_v3  ;;  %v7047_v27 = vcombine.high %v96_v22, %v128_v23 }
  0xca   :  { %3614 = vmatpush1.bf16.msra.mxu0 %v7040_v31  ;;  %3657 = vmatpush1.bf16.msra.mxu1 %v7042_v32  ;;  %v160_v31 = vld [vmem:[%s10927_s1 + $0x478] sm:$0xff] }
  0xcb   :  { %3615 = vmatprep.subr.bf16.mxu0 %v7105_v33  ;;  %3658 = vmatprep.subr.bf16.mxu1 %v7107_v34  ;;  %v192_v32 = vld [vmem:[%s10927_s1 + $0x578] sm:$0xff]  ;;  %v7044_v33 = vcombine.low %v95_v20, %v127_v21  ;;  %v7046_v34 = vcombine.low %v96_v22, %v128_v23  ;;  %v8498_v21 = vld [vmem:[%s10927_s1 + $0x280] sm:$0xff]  ;;  %v8508_v23 = vld [vmem:[%s10927_s1 + $0x288] sm:$0xff] }
  0xcc   :  { %v7111_v35 = vcombine.high %v160_v31, %v192_v32  ;;  %v8503_v22 = vld [vmem:[%s10927_s1 + $0x380] sm:$0xff] }
  0xce   :  { %3616 = vmatpush1.bf16.msra.mxu0 %v7104_v38  ;;  %3659 = vmatpush1.bf16.msra.mxu1 %v7106_v39  ;;  %v224_v38 = vld [vmem:[%s10927_s1 + $0x678] sm:$0xff] }
  0xcf   :  { %3617 = vmatprep.subr.bf16.mxu0 %v7169_v40  ;;  %3660 = vmatprep.subr.bf16.mxu1 %v7171_v41  ;;  %v256_v39 = vld [vmem:[%s10927_s1 + $0x778] sm:$0xff]  ;;  %v7108_v40 = vcombine.low %v159_v29, %v191_v30  ;;  %v7110_v41 = vcombine.low %v160_v31, %v192_v32  ;;  %v8521_v29 = vld [vmem:[%s10927_s1 + $0x388] sm:$0xff]  ;;  %v8526_v30 = vld [vmem:[%s10927_s1 + $0x480] sm:$0xff] }
  0xd0   :  { %v7175_v43 = vcombine.high %v224_v38, %v256_v39  ;;  %v8531_v31 = vld [vmem:[%s10927_s1 + $0x580] sm:$0xff] }
  0xd2   :  { %3618 = vmatpush1.bf16.msra.mxu0 %v7168_v46  ;;  %3661 = vmatpush1.bf16.msra.mxu1 %v7170_v47  ;;  %v288_v46 = vld [vmem:[%s10927_s1 + $0x878] sm:$0xff] }
  0xd3   :  { %3619 = vmatprep.subr.bf16.mxu0 %v7233_v48  ;;  %3662 = vmatprep.subr.bf16.mxu1 %v7235_v49  ;;  %v320_v47 = vld [vmem:[%s10927_s1 + $0x978] sm:$0xff]  ;;  %v7172_v48 = vcombine.low %v223_v36, %v255_v37  ;;  %v7174_v49 = vcombine.low %v224_v38, %v256_v39  ;;  %v7048_v39 = vcombine.low %v8498_v21, %v8503_v22 }
  0xd4   :  { %v7239_v52 = vcombine.high %v288_v46, %v320_v47  ;;  %v7238_v2 = vcombine.low %v288_v46, %v320_v47 }
  0xd6   :  { %3620 = vmatpush1.bf16.msra.mxu0 %v7232_v54  ;;  %3663 = vmatpush1.bf16.msra.mxu1 %v7234_v55  ;;  %v8412_v54 = vld [vmem:[%s10927_s1 + $0xa78] sm:$0xff] }
  0xd7   :  { %3621 = vmatprep.subr.bf16.mxu0 %v7297_v56  ;;  %3664 = vmatprep.subr.bf16.mxu1 %v7299_v57  ;;  %v8417_v55 = vld [vmem:[%s10927_s1 + $0xb78] sm:$0xff]  ;;  %v7601_v56 = vmov 1966171168  }
  0xd8   :  { %v5464_v57 = vunpack.c.l.s4 %v7601_v56 }
  0xda   :  { %3622 = vmatpush1.bf16.msra.mxu0 %v7296_v62  ;;  %3665 = vmatpush1.bf16.msra.mxu1 %v7298_v63  ;;  %v7236_v62 = vcombine.low %v287_v44, %v319_v45  ;;  %v8437_v63 = vld [vmem:[%s10927_s1 + $0xd78] sm:$0xff]  ;;  %v5465_v12 = vunpack.c.0.s8 %v5464_v57  ;;  %v7050_v44 = vcombine.low %v8508_v23, %v8521_v29  ;;  %v7051_v45 = vcombine.high %v8508_v23, %v8521_v29  ;;  %v321_v23 = vld [vmem:[%s10927_s1 + $0x980] sm:$0xff] }
  0xdb   :  { %3623 = vmatprep.subr.bf16.mxu0 %v7361_v0  ;;  %3666 = vmatprep.subr.bf16.mxu1 %v7363_v1  ;;  %v8442_v0 = vld [vmem:[%s10927_s1 + $0xe70] sm:$0xff]  ;;  %v7367_v20 = vcombine.high %v8432_v61, %v8437_v63 }
  0xdc   :  { %v8447_v1 = vld [vmem:[%s10927_s1 + $0xf70] sm:$0xff]  ;;  %v8549_v37 = vsub.s32 %v5465_v12, %v5467_v13 }
  0xde   :  { %3624 = vmatpush1.bf16.msra.mxu0 %v7360_v7  ;;  %3667 = vmatpush1.bf16.msra.mxu1 %v7362_v8  ;;  %v8461_v7 = vld [vmem:[%s10927_s1 + $0xf78] sm:$0xff]  ;;  %v8466_v8 = vld [vmem:[%s10927_s1 + $0x80] sm:$0xff] }
  0xdf   :  { %3625 = vmatprep.subr.bf16.mxu0 %v7425_v9  ;;  %3668 = vmatprep.subr.bf16.mxu1 %v7427_v11  ;;  %v7302_v9 = vcombine.low %v8412_v54, %v8417_v55  ;;  %v7303_v11 = vcombine.high %v8412_v54, %v8417_v55  ;;  %v6984_v32 = vcombine.low %v8466_v8, %v8475_v14 }
  0xe2   :  { %3626 = vmatpush1.bf16.msra.mxu0 %v7424_v16  ;;  %3669 = vmatpush1.bf16.msra.mxu1 %v7426_v17  ;;  %v8485_v16 = vld [vmem:[%s10927_s1 + $0x188] sm:$0xff]  ;;  %v7364_v17 = vcombine.low %v8422_v59, %v8427_v60 }
  0xe3   :  { %3697 = vmatprep.subr.bf16.mxu0 %v6981_v18  ;;  %3740 = vmatprep.subr.bf16.mxu1 %v6983_v19  ;;  %v7365_v18 = vcombine.high %v8422_v59, %v8427_v60  ;;  %v7366_v19 = vcombine.low %v8432_v61, %v8437_v63  ;;  %v6987_v38 = vcombine.high %v8480_v15, %v8485_v16 }
  0xe5   :  { %3644 = vmatmul.mubr.bf16.vlgmr.msra.gmra.mrb[24].mxu0 %v8263_v28  ;;  %3687 = vmatmul.mubr.bf16.vlgmr.msra.gmra.mrb[24].mxu1 %v8263_v28 }
  0xe6   :  { %3698 = vmatpush1.bf16.msra.mxu0 %v6980_v24  ;;  %3741 = vmatpush1.bf16.msra.mxu1 %v6982_v25  ;;  %v7428_v24 = vcombine.low %v8442_v0, %v8447_v1  ;;  %v7429_v25 = vcombine.high %v8442_v0, %v8447_v1 }
  0xe7   :  { %3699 = vmatprep.subr.bf16.mxu0 %v7045_v26  ;;  %3742 = vmatprep.subr.bf16.mxu1 %v7047_v27  ;;  %v7430_v26 = vcombine.low %v8456_v6, %v8461_v7  ;;  %v7431_v27 = vcombine.high %v8456_v6, %v8461_v7 }
  0xe8   :  { %3729 = vmatprep.mubr.bf16.mxu0 %v10932_v3  ;;  %3772 = vmatprep.mubr.bf16.mxu1 %v10932_v3 }
  0xea   :  { %3700 = vmatpush1.bf16.msra.mxu0 %v7044_v33  ;;  %3743 = vmatpush1.bf16.msra.mxu1 %v7046_v34  ;;  %v6985_v33 = vcombine.high %v8466_v8, %v8475_v14  ;;  %v6986_v34 = vcombine.low %v8480_v15, %v8485_v16  ;;  %v225_v8 = vld [vmem:[%s10927_s1 + $0x680] sm:$0xff] }
  0xeb   :  { %3701 = vmatprep.subr.bf16.mxu0 %v7109_v10  ;;  %3744 = vmatprep.subr.bf16.mxu1 %v7111_v35  ;;  %v8542_v10 = vld [vmem:[%s10927_s1 + $0x488] sm:$0xff]  ;;  %v257_v14 = vld [vmem:[%s10927_s1 + $0x780] sm:$0xff] }
  0xec   :  { %v8547_v35 = vld [vmem:[%s10927_s1 + $0x588] sm:$0xff] }
  0xee   :  { %3702 = vmatpush1.bf16.msra.mxu0 %v7108_v40  ;;  %3745 = vmatpush1.bf16.msra.mxu1 %v7110_v41  ;;  %v7049_v40 = vcombine.high %v8498_v21, %v8503_v22 }
  0xef   :  { %3703 = vmatprep.subr.bf16.mxu0 %v7173_v42  ;;  %3746 = vmatprep.subr.bf16.mxu1 %v7175_v43 }
  0xf2   :  { %3704 = vmatpush1.bf16.msra.mxu0 %v7172_v48  ;;  %3747 = vmatpush1.bf16.msra.mxu1 %v7174_v49 }
  0xf3   :  { %3705 = vmatprep.subr.bf16.mxu0 %v7237_v50  ;;  %3748 = vmatprep.subr.bf16.mxu1 %v7239_v52 }
  0xf6   :  { %3706 = vmatpush1.bf16.msra.mxu0 %v7236_v62  ;;  %3749 = vmatpush1.bf16.msra.mxu1 %v7238_v2 }
  0xf7   :  { %3707 = vmatprep.subr.bf16.mxu0 %v7301_v5  ;;  %3750 = vmatprep.subr.bf16.mxu1 %v7303_v11 }
  0xf8   :  { %v3129_v36 = vpop.f32.mrb[0].mxu0  ;;  %v3172_v42 = vpop.f32.mrb[0].mxu1 }
  0xf9   :  { %v5883_v41 = vmul.f32 %v3129_v36, %v3129_v36  ;;  %v3131_v43 = vpop.f32.mrb[1].mxu0  ;;  %v5885_v47 = vmul.f32 %v3172_v42, %v3172_v42  ;;  %v3174_v50 = vpop.f32.mrb[1].mxu1 }
  0xfa   :  { %v7528_v48 = vpack.c.bf16 %v3131_v43, %v3129_v36  ;;  %v5884_v49 = vmul.f32 %v3131_v43, %v3131_v43  ;;  %v3133_v51 = vpop.f32.mrb[2].mxu0  ;;  %3708 = vmatpush1.bf16.msra.mxu0 %v7300_v4  ;;  %v7529_v53 = vpack.c.bf16 %v3174_v50, %v3172_v42  ;;  %v5886_v54 = vmul.f32 %v3174_v50, %v3174_v50  ;;  %v3176_v57 = vpop.f32.mrb[2].mxu1 }
  0xfb   :  { %v4947_v55 = vadd.f32 %v3133_v51, %v3129_v36  ;;  %v5947_v56 = vmul.f32 %v3133_v51, %v3133_v51  ;;  %3751 = vmatpush1.bf16.msra.mxu1 %v7302_v9  ;;  %v3135_v58 = vpop.f32.mrb[3].mxu0  ;;  %v4961_v62 = vadd.f32 %v3176_v57, %v3172_v42  ;;  %v5949_v2 = vmul.f32 %v3176_v57, %v3176_v57  ;;  %v3178_v12 = vpop.f32.mrb[3].mxu1 }
  0xfc   :  { %4855 = vst [vmem:[%s10929_s2] sm:$0xff] %v7528_v48  ;;  %v7560_v5 = vpack.c.bf16 %v3135_v58, %v3133_v51  ;;  %v4954_v11 = vadd.f32 %v3135_v58, %v3131_v43  ;;  %3709 = vmatprep.subr.bf16.mxu0 %v7365_v18  ;;  %4856 = vst [vmem:[%s10929_s2 + $0x8] sm:$0xff] %v7529_v53  ;;  %v5948_v36 = vmul.f32 %v3135_v58, %v3135_v58 }
  0xfd   :  { %v4948_v4 = vrot.slane %v4947_v55, 4  ;;  %v6011_v13 = vadd.f32 %v5947_v56, %v5883_v41  ;;  %v7561_v52 = vpack.c.bf16 %v3178_v12, %v3176_v57  ;;  %3752 = vmatprep.subr.bf16.mxu1 %v7367_v20  ;;  %v4962_v9 = vrot.slane %v4961_v62, 4 }
  0xfe   :  { %v6025_v46 = vadd.f32 %v5949_v2, %v5885_v47  ;;  %4887 = vst [vmem:[%s10929_s2 + $0x100] sm:$0xff] %v7560_v5  ;;  %v4955_v42 = vrot.slane %v4954_v11, 4  ;;  %v4968_v48 = vadd.f32 %v3178_v12, %v3174_v50  ;;  %3710 = vmatpush1.bf16.msra.mxu0 %v7364_v17  ;;  %v6018_v51 = vadd.f32 %v5948_v36, %v5884_v49 }
  0xff   :  { %v4949_v18 = vadd.f32 %v4948_v4, %v4947_v55  ;;  %v6012_v43 = vrot.slane %v6011_v13, 4  ;;  %4888 = vst [vmem:[%s10929_s2 + $0x108] sm:$0xff] %v7561_v52  ;;  %v5950_v20 = vmul.f32 %v3178_v12, %v3178_v12  ;;  %3753 = vmatpush1.bf16.msra.mxu1 %v7366_v19  ;;  %3711 = vmatprep.subr.bf16.mxu0 %v7429_v25 }
 0x100   :  { %v4963_v41 = vadd.f32 %v4962_v9, %v4961_v62  ;;  %v6026_v47 = vrot.slane %v6025_v46, 4  ;;  %v4956_v59 = vadd.f32 %v4955_v42, %v4954_v11  ;;  %v4969_v60 = vrot.slane %v4968_v48, 4  ;;  %3754 = vmatprep.subr.bf16.mxu1 %v7431_v27 }
 0x101   :  { %v4950_v17 = vrot.slane %v4949_v18, 2  ;;  %v6013_v49 = vadd.f32 %v6012_v43, %v6011_v13  ;;  %v6019_v50 = vrot.slane %v6018_v51, 4  ;;  %v6032_v52 = vadd.f32 %v5950_v20, %v5886_v54 }
 0x102   :  { %v4964_v53 = vrot.slane %v4963_v41, 2  ;;  %v6027_v55 = vadd.f32 %v6026_v47, %v6025_v46  ;;  %v4957_v61 = vrot.slane %v4956_v59, 2  ;;  %v4970_v63 = vadd.f32 %v4969_v60, %v4968_v48  ;;  %3712 = vmatpush1.bf16.msra.mxu0 %v7428_v24 }
 0x103   :  { %v4951_v19 = vadd.f32 %v4950_v17, %v4949_v18  ;;  %v6014_v25 = vrot.slane %v6013_v49, 2  ;;  %v6020_v56 = vadd.f32 %v6019_v50, %v6018_v51  ;;  %v6033_v57 = vrot.slane %v6032_v52, 4  ;;  %3755 = vmatpush1.bf16.msra.mxu1 %v7430_v26  ;;  %3783 = vmatprep.subr.bf16.mxu0 %v6985_v33 }
 0x104   :  { %v4965_v27 = vadd.f32 %v4964_v53, %v4963_v41  ;;  %v6028_v46 = vrot.slane %v6027_v55, 2  ;;  %v4958_v54 = vadd.f32 %v4957_v61, %v4956_v59  ;;  %v4971_v58 = vrot.slane %v4970_v63, 2  ;;  %3826 = vmatprep.subr.bf16.mxu1 %v6987_v38  ;;  %v289_v59 = vld [vmem:[%s10927_s1 + $0x880] sm:$0xff] }
 0x105   :  { %v4952_v0 = vrot.slane %v4951_v19, 1  ;;  %v6015_v1 = vadd.f32 %v6014_v25, %v6013_v49  ;;  %v6021_v24 = vrot.slane %v6020_v56, 2  ;;  %v6034_v62 = vadd.f32 %v6033_v57, %v6032_v52  ;;  %3730 = vmatmul.mubr.bf16.vlgmr.msra.gmra.mrb[28].mxu0 %v8263_v28  ;;  %v8669_v52 = vld [vmem:[%s10927_s1 + $0xa80] sm:$0xff] }
 0x106   :  { %v4966_v6 = vrot.slane %v4965_v27, 1  ;;  %v6029_v7 = vadd.f32 %v6028_v46, %v6027_v55  ;;  %v4959_v26 = vrot.slane %v4958_v54, 1  ;;  %v4972_v2 = vadd.f32 %v4971_v58, %v4970_v63  ;;  %3773 = vmatmul.mubr.bf16.vlgmr.msra.gmra.mrb[28].mxu1 %v8263_v28  ;;  %3784 = vmatpush1.bf16.msra.mxu0 %v6984_v32  ;;  %v8676_v61 = vld [vmem:[%s10927_s1 + $0xb80] sm:$0xff]  ;;  %v8681_v63 = vld [vmem:[%s10927_s1 + $0xa88] sm:$0xff] }
 0x107   :  { %v4953_v33 = vadd.f32 %v4952_v0, %v4951_v19  ;;  %v6016_v5 = vrot.slane %v6015_v1, 1  ;;  %v6022_v11 = vadd.f32 %v6021_v24, %v6020_v56  ;;  %v6035_v38 = vrot.slane %v6034_v62, 2  ;;  %3827 = vmatpush1.bf16.msra.mxu1 %v6986_v34  ;;  %3785 = vmatprep.subr.bf16.mxu0 %v7049_v40  ;;  %v226_v34 = vld [vmem:[%s10927_s1 + $0x688] sm:$0xff]  ;;  %v8694_v56 = vld [vmem:[%s10927_s1 + $0xc80] sm:$0xff] }
 0x108   :  { %v4967_v12 = vadd.f32 %v4966_v6, %v4965_v27  ;;  %v6030_v4 = vrot.slane %v6029_v7, 1  ;;  %v4960_v13 = vadd.f32 %v4959_v26, %v4958_v54  ;;  %v4973_v36 = vrot.slane %v4972_v2, 1  ;;  %3828 = vmatprep.subr.bf16.mxu1 %v7051_v45  ;;  %3815 = vmatprep.mubr.bf16.mxu0 %v10932_v3  ;;  %v258_v40 = vld [vmem:[%s10927_s1 + $0x788] sm:$0xff]  ;;  %v8699_v57 = vld [vmem:[%s10927_s1 + $0xd80] sm:$0xff]  ;;  %v8738_v26 = vld [vmem:[%s10927_s1 + $0x90] sm:$0xff] }
 0x109   :  { %v6017_v15 = vadd.f32 %v6016_v5, %v6015_v1  ;;  %v6023_v16 = vrot.slane %v6022_v11, 1  ;;  %v6036_v32 = vadd.f32 %v6035_v38, %v6034_v62  ;;  %3858 = vmatprep.mubr.bf16.mxu1 %v10932_v3  ;;  %v7112_v42 = vcombine.low %v8526_v30, %v8531_v31  ;;  %v8686_v19 = vld [vmem:[%s10927_s1 + $0xb88] sm:$0xff]  ;;  %v8714_v58 = vld [vmem:[%s10927_s1 + $0xe80] sm:$0xff]  ;;  %v8747_v5 = vld [vmem:[%s10927_s1 + $0x190] sm:$0xff] }
 0x10a   :  { %v5459_v45 = vcombine.low %v4953_v33, %v4960_v13  ;;  %v4974_v9 = vadd.f32 %v4973_v36, %v4972_v2  ;;  %3786 = vmatpush1.bf16.msra.mxu0 %v7048_v39  ;;  %v7114_v48 = vcombine.low %v8542_v10, %v8547_v35  ;;  %v6031_v18 = vadd.f32 %v6030_v4, %v6029_v7  ;;  %v8704_v27 = vld [vmem:[%s10927_s1 + $0xc88] sm:$0xff]  ;;  %v8719_v0 = vld [vmem:[%s10927_s1 + $0xf80] sm:$0xff]  ;;  %v8757_v38 = vld [vmem:[%s10927_s1 + $0x198] sm:$0xff] }
 0x10b   :  { %v6024_v43 = vadd.f32 %v6023_v16, %v6022_v11  ;;  %v6037_v51 = vrot.slane %v6036_v32, 1  ;;  %3829 = vmatpush1.bf16.msra.mxu1 %v7050_v44  ;;  %v10934_v20 = vcombine.high %v8526_v30, %v8531_v31  ;;  %v7177_v41 = vcombine.high %v225_v8, %v257_v14  ;;  %v290_v31 = vld [vmem:[%s10927_s1 + $0x888] sm:$0xff]  ;;  %v8752_v11 = vld [vmem:[%s10927_s1 + $0x98] sm:$0xff] }
 0x10c   :  { %v8643_v21 = vrot.slane %v5459_v45, %v8549_v37  ;;  %v5460_v22 = vcombine.low %v4967_v12, %v4974_v9  ;;  %v10935_v39 = vcombine.high %v8542_v10, %v8547_v35  ;;  %v7179_v47 = vcombine.high %v226_v34, %v258_v40  ;;  %v322_v10 = vld [vmem:[%s10927_s1 + $0x988] sm:$0xff]  ;;  %v8793_v45 = vld [vmem:[%s10927_s1 + $0x398] sm:$0xff]  ;;  %v8798_v9 = vld [vmem:[%s10927_s1 + $0x490] sm:$0xff] }
 0x10d   :  { %3787 = vmatprep.subr.bf16.mxu0 %v10934_v20  ;;  %v6523_v29 = vcombine.low %v6017_v15, %v6024_v43  ;;  %v6038_v30 = vadd.f32 %v6037_v51, %v6036_v32  ;;  %v7176_v44 = vcombine.low %v225_v8, %v257_v14  ;;  %v7178_v60 = vcombine.low %v226_v34, %v258_v40  ;;  %v8709_v54 = vld [vmem:[%s10927_s1 + $0xd88] sm:$0xff]  ;;  %v8770_v8 = vld [vmem:[%s10927_s1 + $0x290] sm:$0xff]  ;;  %v8780_v15 = vld [vmem:[%s10927_s1 + $0x298] sm:$0xff] }
 0x10e   :  { %3830 = vmatprep.subr.bf16.mxu1 %v10935_v39  ;;  %v8661_v35 = vrot.slane %v5460_v22, %v8549_v37  ;;  %3788 = vmatpush1.bf16.msra.mxu0 %v7112_v42  ;;  %v7241_v50 = vcombine.high %v289_v59, %v321_v23  ;;  %v7243_v55 = vcombine.high %v290_v31, %v322_v10  ;;  %v8728_v6 = vld [vmem:[%s10927_s1 + $0xe88] sm:$0xff]  ;;  %v8775_v14 = vld [vmem:[%s10927_s1 + $0x390] sm:$0xff]  ;;  %v8814_v51 = vld [vmem:[%s10927_s1 + $0x498] sm:$0xff] }
 0x10f   :  { %v8664_v17 = vrot.slane %v6523_v29, %v8549_v37  ;;  %v6524_v49 = vcombine.low %v6031_v18, %v6038_v30  ;;  %3831 = vmatpush1.bf16.msra.mxu1 %v7114_v48  ;;  %3789 = vmatprep.subr.bf16.mxu0 %v7177_v41  ;;  %v7240_v46 = vcombine.low %v289_v59, %v321_v23  ;;  %v8733_v7 = vld [vmem:[%s10927_s1 + $0xf88] sm:$0xff]  ;;  %v8803_v42 = vld [vmem:[%s10927_s1 + $0x590] sm:$0xff]  ;;  %v8819_v20 = vld [vmem:[%s10927_s1 + $0x598] sm:$0xff] }
 0x110   :  { %3832 = vmatprep.subr.bf16.mxu1 %v7179_v47  ;;  %v7242_v24 = vcombine.low %v290_v31, %v322_v10  ;;  %v7305_v62 = vcombine.high %v8669_v52, %v8676_v61  ;;  %v7304_v2 = vcombine.low %v8669_v52, %v8676_v61  ;;  %v7307_v33 = vcombine.high %v8681_v63, %v8686_v19 }
 0x111   :  { %v8689_v25 = vrot.slane %v6524_v49, %v8549_v37  ;;  %v7306_v12 = vcombine.low %v8681_v63, %v8686_v19  ;;  %v7368_v4 = vcombine.low %v8694_v56, %v8699_v57  ;;  %v7369_v13 = vcombine.high %v8694_v56, %v8699_v57 }
 0x112   :  { %3790 = vmatpush1.bf16.msra.mxu0 %v7176_v44  ;;  %v7370_v36 = vcombine.low %v8704_v27, %v8709_v54  ;;  %v7371_v16 = vcombine.high %v8704_v27, %v8709_v54  ;;  %v7432_v32 = vcombine.low %v8714_v58, %v8719_v0  ;;  %v7433_v34 = vcombine.high %v8714_v58, %v8719_v0 }
 0x113   :  { %3833 = vmatpush1.bf16.msra.mxu1 %v7178_v60  ;;  %3791 = vmatprep.subr.bf16.mxu0 %v7241_v50  ;;  %v7434_v40 = vcombine.low %v8728_v6, %v8733_v7  ;;  %v7435_v48 = vcombine.high %v8728_v6, %v8733_v7  ;;  %v6988_v18 = vcombine.low %v8738_v26, %v8747_v5 }
 0x114   :  { %3834 = vmatprep.subr.bf16.mxu1 %v7243_v55  ;;  %v6989_v43 = vcombine.high %v8738_v26, %v8747_v5  ;;  %v6990_v22 = vcombine.low %v8752_v11, %v8757_v38  ;;  %v6991_v39 = vcombine.high %v8752_v11, %v8757_v38  ;;  %v7053_v59 = vcombine.high %v8770_v8, %v8775_v14  ;;  %v227_v5 = vld [vmem:[%s10927_s1 + $0x690] sm:$0xff] }
 0x115   :  { %v10936_v26 = vcombine.high %v8780_v15, %v8793_v45  ;;  %v259_v11 = vld [vmem:[%s10927_s1 + $0x790] sm:$0xff]  ;;  %v10937_v38 = vmov 0  }
 0x116   :  { %3792 = vmatpush1.bf16.msra.mxu0 %v7240_v46 }
 0x117   :  { %3835 = vmatpush1.bf16.msra.mxu1 %v7242_v24  ;;  %3793 = vmatprep.subr.bf16.mxu0 %v7305_v62 }
 0x118   :  { %v3215_v41 = vpop.f32.mrb[4].mxu0  ;;  %3836 = vmatprep.subr.bf16.mxu1 %v7307_v33  ;;  %v3258_v29 = vpop.f32.mrb[4].mxu1 }
 0x119   :  { %v5887_v23 = vmul.f32 %v3215_v41, %v3215_v41  ;;  %v3217_v30 = vpop.f32.mrb[5].mxu0  ;;  %v5889_v60 = vmul.f32 %v3258_v29, %v3258_v29  ;;  %v3260_v52 = vpop.f32.mrb[5].mxu1 }
 0x11a   :  { %v7530_v49 = vpack.c.bf16 %v3217_v30, %v3215_v41  ;;  %v5888_v50 = vmul.f32 %v3217_v30, %v3217_v30  ;;  %v3219_v55 = vpop.f32.mrb[6].mxu0  ;;  %3794 = vmatpush1.bf16.msra.mxu0 %v7304_v2  ;;  %v7531_v63 = vpack.c.bf16 %v3260_v52, %v3258_v29  ;;  %v5890_v19 = vmul.f32 %v3260_v52, %v3260_v52  ;;  %v3262_v62 = vpop.f32.mrb[6].mxu1 }
 0x11b   :  { %v4975_v46 = vadd.f32 %v3219_v55, %v3215_v41  ;;  %v5951_v24 = vmul.f32 %v3219_v55, %v3219_v55  ;;  %3837 = vmatpush1.bf16.msra.mxu1 %v7306_v12  ;;  %v3221_v33 = vpop.f32.mrb[7].mxu0  ;;  %v4989_v1 = vadd.f32 %v3262_v62, %v3258_v29  ;;  %v5953_v53 = vmul.f32 %v3262_v62, %v3262_v62  ;;  %v3264_v47 = vpop.f32.mrb[7].mxu1 }
 0x11c   :  { %4857 = vst [vmem:[%s10929_s2 + $0x10] sm:$0xff] %v7530_v49  ;;  %v7562_v44 = vpack.c.bf16 %v3221_v33, %v3219_v55  ;;  %v4982_v31 = vadd.f32 %v3221_v33, %v3217_v30  ;;  %3795 = vmatprep.subr.bf16.mxu0 %v7369_v13  ;;  %4858 = vst [vmem:[%s10929_s2 + $0x18] sm:$0xff] %v7531_v63  ;;  %v5952_v61 = vmul.f32 %v3221_v33, %v3221_v33 }
 0x11d   :  { %v4976_v2 = vrot.slane %v4975_v46, 4  ;;  %v6039_v41 = vadd.f32 %v5951_v24, %v5887_v23  ;;  %v7563_v3 = vpack.c.bf16 %v3264_v47, %v3262_v62  ;;  %3838 = vmatprep.subr.bf16.mxu1 %v7371_v16  ;;  %v4990_v12 = vrot.slane %v4989_v1, 4 }
 0x11e   :  { %v6053_v10 = vadd.f32 %v5953_v53, %v5889_v60  ;;  %4889 = vst [vmem:[%s10929_s2 + $0x110] sm:$0xff] %v7562_v44  ;;  %v4983_v29 = vrot.slane %v4982_v31, 4  ;;  %v4996_v49 = vadd.f32 %v3264_v47, %v3260_v52  ;;  %3796 = vmatpush1.bf16.msra.mxu0 %v7368_v4  ;;  %v6046_v55 = vadd.f32 %v5952_v61, %v5888_v50 }
 0x11f   :  { %v4977_v13 = vadd.f32 %v4976_v2, %v4975_v46  ;;  %v6040_v30 = vrot.slane %v6039_v41, 4  ;;  %4890 = vst [vmem:[%s10929_s2 + $0x118] sm:$0xff] %v7563_v3  ;;  %v5954_v16 = vmul.f32 %v3264_v47, %v3264_v47  ;;  %3839 = vmatpush1.bf16.msra.mxu1 %v7370_v36  ;;  %3797 = vmatprep.subr.bf16.mxu0 %v7433_v34 }
 0x120   :  { %v4991_v53 = vadd.f32 %v4990_v12, %v4989_v1  ;;  %v6054_v23 = vrot.slane %v6053_v10, 4  ;;  %v4984_v44 = vadd.f32 %v4983_v29, %v4982_v31  ;;  %v4997_v60 = vrot.slane %v4996_v49, 4  ;;  %3840 = vmatprep.subr.bf16.mxu1 %v7435_v48  ;;  %v260_v12 = vld [vmem:[%s10927_s1 + $0x798] sm:$0xff] }
 0x121   :  { %v4978_v56 = vrot.slane %v4977_v13, 2  ;;  %v6041_v57 = vadd.f32 %v6040_v30, %v6039_v41  ;;  %v6047_v4 = vrot.slane %v6046_v55, 4  ;;  %v6060_v52 = vadd.f32 %v5954_v16, %v5890_v19  ;;  %v228_v41 = vld [vmem:[%s10927_s1 + $0x698] sm:$0xff] }
 0x122   :  { %v4992_v50 = vrot.slane %v4991_v53, 2  ;;  %v6055_v61 = vadd.f32 %v6054_v23, %v6053_v10  ;;  %v4985_v63 = vrot.slane %v4984_v44, 2  ;;  %v4998_v46 = vadd.f32 %v4997_v60, %v4996_v49  ;;  %3798 = vmatpush1.bf16.msra.mxu0 %v7432_v32 }
 0x123   :  { %v4979_v3 = vadd.f32 %v4978_v56, %v4977_v13  ;;  %v6042_v27 = vrot.slane %v6041_v57, 2  ;;  %v6048_v54 = vadd.f32 %v6047_v4, %v6046_v55  ;;  %v6061_v1 = vrot.slane %v6060_v52, 4  ;;  %3841 = vmatpush1.bf16.msra.mxu1 %v7434_v40  ;;  %3869 = vmatprep.subr.bf16.mxu0 %v6989_v43 }
 0x124   :  { %v4993_v36 = vadd.f32 %v4992_v50, %v4991_v53  ;;  %v6056_v34 = vrot.slane %v6055_v61, 2  ;;  %v4986_v48 = vadd.f32 %v4985_v63, %v4984_v44  ;;  %v4999_v47 = vrot.slane %v4998_v46, 2  ;;  %3912 = vmatprep.subr.bf16.mxu1 %v6991_v39  ;;  %v8932_v63 = vld [vmem:[%s10927_s1 + $0xa90] sm:$0xff] }
 0x125   :  { %v4980_v58 = vrot.slane %v4979_v3, 1  ;;  %v6043_v0 = vadd.f32 %v6042_v27, %v6041_v57  ;;  %v6049_v32 = vrot.slane %v6048_v54, 2  ;;  %v6062_v31 = vadd.f32 %v6061_v1, %v6060_v52  ;;  %3816 = vmatmul.mubr.bf16.vlgmr.msra.gmra.mrb[32].mxu0 %v8263_v28  ;;  %v291_v52 = vld [vmem:[%s10927_s1 + $0x890] sm:$0xff]  ;;  %v8943_v1 = vld [vmem:[%s10927_s1 + $0xa98] sm:$0xff] }
 0x126   :  { %v4994_v6 = vrot.slane %v4993_v36, 1  ;;  %v6057_v7 = vadd.f32 %v6056_v34, %v6055_v61  ;;  %v4987_v40 = vrot.slane %v4986_v48, 1  ;;  %v5000_v10 = vadd.f32 %v4999_v47, %v4998_v46  ;;  %3859 = vmatmul.mubr.bf16.vlgmr.msra.gmra.mrb[32].mxu1 %v8263_v28  ;;  %3870 = vmatpush1.bf16.msra.mxu0 %v6988_v18  ;;  %v8937_v46 = vld [vmem:[%s10927_s1 + $0xb90] sm:$0xff] }
 0x127   :  { %v4981_v43 = vadd.f32 %v4980_v58, %v4979_v3  ;;  %v6044_v19 = vrot.slane %v6043_v0, 1  ;;  %v6050_v24 = vadd.f32 %v6049_v32, %v6048_v54  ;;  %v6063_v39 = vrot.slane %v6062_v31, 2  ;;  %3913 = vmatpush1.bf16.msra.mxu1 %v6990_v22  ;;  %3871 = vmatprep.subr.bf16.mxu0 %v7053_v59  ;;  %v8955_v47 = vld [vmem:[%s10927_s1 + $0xc90] sm:$0xff] }
 0x128   :  { %v4995_v62 = vadd.f32 %v4994_v6, %v4993_v36  ;;  %v6058_v33 = vrot.slane %v6057_v7, 1  ;;  %v4988_v2 = vadd.f32 %v4987_v40, %v4986_v48  ;;  %v5001_v28 = vrot.slane %v5000_v10, 1  ;;  %3914 = vmatprep.subr.bf16.mxu1 %v10936_v26  ;;  %3901 = vmatprep.mubr.bf16.mxu0 %v10937_v38  ;;  %v8948_v36 = vld [vmem:[%s10927_s1 + $0xb98] sm:$0xff]  ;;  %v8960_v58 = vld [vmem:[%s10927_s1 + $0xd90] sm:$0xff] }
 0x129   :  { %v6045_v18 = vadd.f32 %v6044_v19, %v6043_v0  ;;  %v6051_v22 = vrot.slane %v6050_v24, 1  ;;  %v6064_v59 = vadd.f32 %v6063_v39, %v6062_v31  ;;  %3944 = vmatprep.mubr.bf16.mxu1 %v10937_v38  ;;  %v10938_v13 = vcombine.low %v8770_v8, %v8775_v14  ;;  %v8975_v40 = vld [vmem:[%s10927_s1 + $0xd98] sm:$0xff] }
 0x12a   :  { %v5461_v29 = vcombine.low %v4981_v43, %v4988_v2  ;;  %v5002_v49 = vadd.f32 %v5001_v28, %v5000_v10  ;;  %v7116_v30 = vcombine.low %v8798_v9, %v8803_v42  ;;  %v7118_v55 = vcombine.low %v8814_v51, %v8819_v20  ;;  %v9008_v26 = vld [vmem:[%s10927_s1 + $0xf98] sm:$0xff] }
 0x12b   :  { %3872 = vmatpush1.bf16.msra.mxu0 %v10938_v13  ;;  %v6059_v16 = vadd.f32 %v6058_v33, %v6057_v7  ;;  %v6052_v53 = vadd.f32 %v6051_v22, %v6050_v24  ;;  %v6065_v23 = vrot.slane %v6064_v59, 1  ;;  %v10939_v44 = vcombine.low %v8780_v15, %v8793_v45  ;;  %v323_v15 = vld [vmem:[%s10927_s1 + $0x990] sm:$0xff]  ;;  %v8970_v7 = vld [vmem:[%s10927_s1 + $0xc98] sm:$0xff] }
 0x12c   :  { %v10940_v60 = vcombine.high %v8798_v9, %v8803_v42  ;;  %v7181_v56 = vcombine.high %v227_v5, %v259_v11  ;;  %v5483_v8 = vrot.slane %v5461_v29, %v8549_v37  ;;  %v5462_v14 = vcombine.low %v4995_v62, %v5002_v49  ;;  %v8921_v42 = vld [vmem:[%s10927_s1 + $0x898] sm:$0xff]  ;;  %v8989_v62 = vld [vmem:[%s10927_s1 + $0xe90] sm:$0xff]  ;;  %v9034_v29 = vld [vmem:[%s10927_s1 + $0x1a8] sm:$0xff] }
 0x12d   :  { %3915 = vmatpush1.bf16.msra.mxu1 %v10939_v44  ;;  %v10941_v57 = vcombine.high %v8814_v51, %v8819_v20  ;;  %v7183_v4 = vcombine.high %v228_v41, %v260_v12  ;;  %v6525_v45 = vcombine.low %v6045_v18, %v6052_v53  ;;  %v6066_v9 = vadd.f32 %v6065_v23, %v6064_v59  ;;  %v8926_v51 = vld [vmem:[%s10927_s1 + $0x998] sm:$0xff]  ;;  %v8994_v33 = vld [vmem:[%s10927_s1 + $0xf90] sm:$0xff]  ;;  %v9039_v49 = vld [vmem:[%s10927_s1 + $0x2a0] sm:$0xff] }
 0x12e   :  { %3873 = vmatprep.subr.bf16.mxu0 %v10940_v60  ;;  %v5490_v20 = vrot.slane %v5462_v14, %v8549_v37  ;;  %v7180_v50 = vcombine.low %v227_v5, %v259_v11  ;;  %v7182_v61 = vcombine.low %v228_v41, %v260_v12  ;;  %v7245_v54 = vcombine.high %v291_v52, %v323_v15  ;;  %v9013_v5 = vld [vmem:[%s10927_s1 + $0xa0] sm:$0xff]  ;;  %v9029_v12 = vld [vmem:[%s10927_s1 + $0xa8] sm:$0xff] }
 0x12f   :  { %3916 = vmatprep.subr.bf16.mxu1 %v10941_v57  ;;  %3874 = vmatpush1.bf16.msra.mxu0 %v7116_v30  ;;  %v6547_v3 = vrot.slane %v6525_v45, %v8549_v37  ;;  %v6526_v27 = vcombine.low %v6059_v16, %v6066_v9  ;;  %v7247_v48 = vcombine.high %v8921_v42, %v8926_v51  ;;  %v9018_v11 = vld [vmem:[%s10927_s1 + $0x1a0] sm:$0xff]  ;;  %v9058_v44 = vld [vmem:[%s10927_s1 + $0x2a8] sm:$0xff] }
 0x130   :  { %3875 = vmatprep.subr.bf16.mxu0 %v7181_v56  ;;  %v5492_v34 = vcombine.low %v5483_v8, %v5490_v20  ;;  %v7244_v32 = vcombine.low %v291_v52, %v323_v15  ;;  %v7246_v31 = vcombine.low %v8921_v42, %v8926_v51  ;;  %v7309_v6 = vcombine.high %v8932_v63, %v8937_v46  ;;  %v9053_v23 = vld [vmem:[%s10927_s1 + $0x3a0] sm:$0xff]  ;;  %v9088_v15 = vld [vmem:[%s10927_s1 + $0x4a8] sm:$0xff] }
 0x131   :  { %3917 = vmatpush1.bf16.msra.mxu1 %v7118_v55  ;;  %v6554_v0 = vrot.slane %v6526_v27, %v8549_v37  ;;  %v10942_v10 = vcombine.low %v8643_v21, %v8661_v35  ;;  %v7308_v24 = vcombine.low %v8932_v63, %v8937_v46  ;;  %v7310_v39 = vcombine.low %v8943_v1, %v8948_v36  ;;  %v8999_v21 = vld [vmem:[%s10927_s1 + $0xe98] sm:$0xff]  ;;  %v9074_v8 = vld [vmem:[%s10927_s1 + $0x4a0] sm:$0xff]  ;;  %v9093_v45 = vld [vmem:[%s10927_s1 + $0x5a8] sm:$0xff] }
 0x132   :  { %3918 = vmatprep.subr.bf16.mxu1 %v7183_v4  ;;  %v5506_v19 = vrot.slane %v5492_v34, %v8549_v37  ;;  %v7311_v2 = vcombine.high %v8943_v1, %v8948_v36  ;;  %v7373_v28 = vcombine.high %v8955_v47, %v8960_v58  ;;  %v7372_v22 = vcombine.low %v8955_v47, %v8960_v58  ;;  %v9079_v14 = vld [vmem:[%s10927_s1 + $0x5a0] sm:$0xff] }
 0x133   :  { %v5499_v43 = vrot.slane %v10942_v10, %v8549_v37  ;;  %3876 = vmatpush1.bf16.msra.mxu0 %v7180_v50  ;;  %v6556_v35 = vcombine.low %v6547_v3, %v6554_v0  ;;  %v7374_v59 = vcombine.low %v8970_v7, %v8975_v40  ;;  %v7375_v41 = vcombine.high %v8970_v7, %v8975_v40 }
 0x134   :  { %3877 = vmatprep.subr.bf16.mxu0 %v7245_v54  ;;  %v10943_v13 = vcombine.low %v8664_v17, %v8689_v25  ;;  %v7436_v16 = vcombine.low %v8989_v62, %v8994_v33  ;;  %v7437_v53 = vcombine.high %v8989_v62, %v8994_v33  ;;  %v9063_v17 = vld [vmem:[%s10927_s1 + $0x3a8] sm:$0xff]  ;;  %v7438_v25 = vcombine.low %v8999_v21, %v9008_v26 }
 0x135   :  { %3919 = vmatpush1.bf16.msra.mxu1 %v7182_v61  ;;  %v5507_v18 = vcombine.low %v5499_v43, %v5506_v19  ;;  %v6570_v55 = vrot.slane %v6556_v35, %v8549_v37  ;;  %v7439_v60 = vcombine.high %v8999_v21, %v9008_v26  ;;  %v6993_v56 = vcombine.high %v9013_v5, %v9018_v11  ;;  %v9163_v21 = vld [vmem:[%s10928_s0] sm:$0xff]  }
 0x136   :  { %3920 = vmatprep.subr.bf16.mxu1 %v7247_v48  ;;  %v6563_v30 = vrot.slane %v10943_v13, %v8549_v37  ;;  %v6992_v4 = vcombine.low %v9013_v5, %v9018_v11  ;;  %v6994_v52 = vcombine.low %v9029_v12, %v9034_v29  ;;  %v6995_v42 = vcombine.high %v9029_v12, %v9034_v29  ;;  %v229_v5 = vld [vmem:[%s10927_s1 + $0x6a0] sm:$0xff] }
 0x137   :  { %3878 = vmatpush1.bf16.msra.mxu0 %v7244_v32  ;;  %5867 = vst [vmem:[%s10930_s3] sm:$0xff] %v5507_v18  ;;  %v7056_v51 = vcombine.low %v9039_v49, %v9053_v23  ;;  %v7057_v20 = vcombine.high %v9039_v49, %v9053_v23  ;;  %v7058_v50 = vcombine.low %v9058_v44, %v9063_v17  ;;  %v261_v11 = vld [vmem:[%s10927_s1 + $0x7a0] sm:$0xff] }
 0x138   :  { %v6571_v57 = vcombine.low %v6563_v30, %v6570_v55  ;;  %3879 = vmatprep.subr.bf16.mxu0 %v7309_v6  ;;  %v3301_v9 = vpop.f32.mrb[8].mxu0  ;;  %v3344_v63 = vpop.f32.mrb[8].mxu1  ;;  %v7059_v3 = vcombine.high %v9058_v44, %v9063_v17  ;;  %v7121_v27 = vcombine.high %v9074_v8, %v9079_v14  ;;  %v325_v44 = vld [vmem:[%s10927_s1 + $0x9a0] sm:$0xff] }
 0x139   :  { %3921 = vmatpush1.bf16.msra.mxu1 %v7246_v31  ;;  %v5891_v61 = vmul.f32 %v3301_v9, %v3301_v9  ;;  %v3303_v46 = vpop.f32.mrb[9].mxu0  ;;  %v5893_v54 = vmul.f32 %v3344_v63, %v3344_v63  ;;  %v3346_v0 = vpop.f32.mrb[9].mxu1  ;;  %v7123_v31 = vcombine.high %v9088_v15, %v9093_v45 }
 0x13a   :  { %3922 = vmatprep.subr.bf16.mxu1 %v7311_v2  ;;  %v7532_v34 = vpack.c.bf16 %v3303_v46, %v3301_v9  ;;  %v5892_v48 = vmul.f32 %v3303_v46, %v3303_v46  ;;  %v3305_v32 = vpop.f32.mrb[10].mxu0  ;;  %6931 = vst [vmem:[%s10931_s4] sm:$0xff] %v6571_v57  ;;  %v7533_v6 = vpack.c.bf16 %v3346_v0, %v3344_v63  ;;  %v3348_v35 = vpop.f32.mrb[10].mxu1 }
 0x13b   :  { %3880 = vmatpush1.bf16.msra.mxu0 %v7308_v24  ;;  %v5894_v10 = vmul.f32 %v3346_v0, %v3346_v0  ;;  %v5003_v43 = vadd.f32 %v3305_v32, %v3301_v9  ;;  %v5955_v19 = vmul.f32 %v3305_v32, %v3305_v32  ;;  %v3307_v2 = vpop.f32.mrb[11].mxu0  ;;  %v5017_v24 = vadd.f32 %v3348_v35, %v3344_v63  ;;  %v3350_v55 = vpop.f32.mrb[11].mxu1 }
 0x13c   :  { %4859 = vst [vmem:[%s10929_s2 + $0x20] sm:$0xff] %v7532_v34  ;;  %v5957_v18 = vmul.f32 %v3348_v35, %v3348_v35  ;;  %v7564_v13 = vpack.c.bf16 %v3307_v2, %v3305_v32  ;;  %v5010_v30 = vadd.f32 %v3307_v2, %v3303_v46  ;;  %3881 = vmatprep.subr.bf16.mxu0 %v7373_v28  ;;  %4860 = vst [vmem:[%s10929_s2 + $0x28] sm:$0xff] %v7533_v6 }
 0x13d   :  { %3923 = vmatpush1.bf16.msra.mxu1 %v7310_v39  ;;  %v5004_v1 = vrot.slane %v5003_v43, 4  ;;  %v6067_v36 = vadd.f32 %v5955_v19, %v5891_v61  ;;  %v5956_v39 = vmul.f32 %v3307_v2, %v3307_v2  ;;  %v7565_v57 = vpack.c.bf16 %v3350_v55, %v3348_v35 }
 0x13e   :  { %3924 = vmatprep.subr.bf16.mxu1 %v7375_v41  ;;  %v5018_v9 = vrot.slane %v5017_v24, 4  ;;  %v6081_v63 = vadd.f32 %v5957_v18, %v5893_v54  ;;  %4891 = vst [vmem:[%s10929_s2 + $0x120] sm:$0xff] %v7564_v13  ;;  %v5011_v46 = vrot.slane %v5010_v30, 4  ;;  %v5024_v28 = vadd.f32 %v3350_v55, %v3346_v0 }
 0x13f   :  { %3882 = vmatpush1.bf16.msra.mxu0 %v7372_v22  ;;  %v5005_v34 = vadd.f32 %v5004_v1, %v5003_v43  ;;  %v6068_v61 = vrot.slane %v6067_v36, 4  ;;  %v6074_v32 = vadd.f32 %v5956_v39, %v5892_v48  ;;  %4892 = vst [vmem:[%s10929_s2 + $0x128] sm:$0xff] %v7565_v57  ;;  %v5958_v41 = vmul.f32 %v3350_v55, %v3350_v55 }
 0x140   :  { %3883 = vmatprep.subr.bf16.mxu0 %v7437_v53  ;;  %v5019_v54 = vadd.f32 %v5018_v9, %v5017_v24  ;;  %v6082_v0 = vrot.slane %v6081_v63, 4  ;;  %v5012_v47 = vadd.f32 %v5011_v46, %v5010_v30  ;;  %v5025_v58 = vrot.slane %v5024_v28, 4 }
 0x141   :  { %3925 = vmatpush1.bf16.msra.mxu1 %v7374_v59  ;;  %v5006_v22 = vrot.slane %v5005_v34, 2  ;;  %v6069_v48 = vadd.f32 %v6068_v61, %v6067_v36  ;;  %v6075_v6 = vrot.slane %v6074_v32, 4  ;;  %v6088_v43 = vadd.f32 %v5958_v41, %v5894_v10 }
 0x142   :  { %3926 = vmatprep.subr.bf16.mxu1 %v7439_v60  ;;  %v5020_v19 = vrot.slane %v5019_v54, 2  ;;  %v6083_v35 = vadd.f32 %v6082_v0, %v6081_v63  ;;  %v5013_v7 = vrot.slane %v5012_v47, 2  ;;  %v5026_v40 = vadd.f32 %v5025_v58, %v5024_v28 }
 0x143   :  { %3884 = vmatpush1.bf16.msra.mxu0 %v7436_v16  ;;  %v5007_v59 = vadd.f32 %v5006_v22, %v5005_v34  ;;  %v6070_v53 = vrot.slane %v6069_v48, 2  ;;  %v6076_v2 = vadd.f32 %v6075_v6, %v6074_v32  ;;  %v6089_v24 = vrot.slane %v6088_v43, 4 }
 0x144   :  { %3955 = vmatprep.subr.bf16.mxu0 %v6993_v56  ;;  %v5021_v60 = vadd.f32 %v5020_v19, %v5019_v54  ;;  %v6084_v10 = vrot.slane %v6083_v35, 2  ;;  %v5014_v18 = vadd.f32 %v5013_v7, %v5012_v47  ;;  %v5027_v13 = vrot.slane %v5026_v40, 2  ;;  %v293_v47 = vld [vmem:[%s10927_s1 + $0x8a0] sm:$0xff]  ;;  %v9250_v7 = vld [vmem:[%s10927_s1 + $0xba8] sm:$0xff] }
 0x145   :  { %3927 = vmatpush1.bf16.msra.mxu1 %v7438_v25  ;;  %v5008_v62 = vrot.slane %v5007_v59, 1  ;;  %v6071_v33 = vadd.f32 %v6070_v53, %v6069_v48  ;;  %v6077_v16 = vrot.slane %v6076_v2, 2  ;;  %v6090_v30 = vadd.f32 %v6089_v24, %v6088_v43  ;;  %v9233_v48 = vld [vmem:[%s10927_s1 + $0xaa0] sm:$0xff] }
 0x146   :  { %3998 = vmatprep.subr.bf16.mxu1 %v6995_v42  ;;  %3902 = vmatmul.mubr.bf16.vlgmr.msra.gmra.mrb[36].mxu0 %v9163_v21  ;;  %v5022_v26 = vrot.slane %v5021_v60, 1  ;;  %v6085_v25 = vadd.f32 %v6084_v10, %v6083_v35  ;;  %v5015_v56 = vrot.slane %v5014_v18, 1  ;;  %v5028_v55 = vadd.f32 %v5027_v13, %v5026_v40  ;;  %v9240_v19 = vld [vmem:[%s10927_s1 + $0xba0] sm:$0xff]  ;;  %v9245_v35 = vld [vmem:[%s10927_s1 + $0xaa8] sm:$0xff] }
 0x147   :  { %3956 = vmatpush1.bf16.msra.mxu0 %v6992_v4  ;;  %v5009_v42 = vadd.f32 %v5008_v62, %v5007_v59  ;;  %v6072_v1 = vrot.slane %v6071_v33, 1  ;;  %v6078_v36 = vadd.f32 %v6077_v16, %v6076_v2  ;;  %v6091_v39 = vrot.slane %v6090_v30, 2  ;;  %3987 = vmatprep.mubr.bf16.mxu0 %v10937_v38  ;;  %v9258_v59 = vld [vmem:[%s10927_s1 + $0xca0] sm:$0xff]  ;;  %v9268_v2 = vld [vmem:[%s10927_s1 + $0xca8] sm:$0xff] }
 0x148   :  { %3945 = vmatmul.mubr.bf16.vlgmr.msra.gmra.mrb[36].mxu1 %v9163_v21  ;;  %3957 = vmatprep.subr.bf16.mxu0 %v7057_v20  ;;  %v5023_v57 = vadd.f32 %v5022_v26, %v5021_v60  ;;  %v6086_v9 = vrot.slane %v6085_v25, 1  ;;  %v5016_v63 = vadd.f32 %v5015_v56, %v5014_v18  ;;  %v5029_v46 = vrot.slane %v5028_v55, 1  ;;  %v262_v20 = vld [vmem:[%s10927_s1 + $0x7a8] sm:$0xff]  ;;  %v9263_v53 = vld [vmem:[%s10927_s1 + $0xda0] sm:$0xff]  ;;  %v9302_v26 = vld [vmem:[%s10927_s1 + $0xb0] sm:$0xff] }
 0x149   :  { %3999 = vmatpush1.bf16.msra.mxu1 %v6994_v52  ;;  %v6073_v12 = vadd.f32 %v6072_v1, %v6071_v33  ;;  %v6079_v29 = vrot.slane %v6078_v36, 1  ;;  %v6092_v4 = vadd.f32 %v6091_v39, %v6090_v30  ;;  %v230_v52 = vld [vmem:[%s10927_s1 + $0x6a8] sm:$0xff]  ;;  %4030 = vmatprep.mubr.bf16.mxu1 %v10937_v38  ;;  %v7120_v34 = vcombine.low %v9074_v8, %v9079_v14  ;;  %v9278_v10 = vld [vmem:[%s10927_s1 + $0xea0] sm:$0xff]  ;;  %v9321_v1 = vld [vmem:[%s10927_s1 + $0x1b8] sm:$0xff] }
 0x14a   :  { %4000 = vmatprep.subr.bf16.mxu1 %v7059_v3  ;;  %v5508_v3 = vcombine.low %v5009_v42, %v5016_v63  ;;  %v5030_v28 = vadd.f32 %v5029_v46, %v5028_v55  ;;  %v7122_v61 = vcombine.low %v9088_v15, %v9093_v45  ;;  %v6087_v32 = vadd.f32 %v6086_v9, %v6085_v25  ;;  %v294_v14 = vld [vmem:[%s10927_s1 + $0x8a8] sm:$0xff]  ;;  %v9283_v18 = vld [vmem:[%s10927_s1 + $0xfa0] sm:$0xff]  ;;  %v9311_v55 = vld [vmem:[%s10927_s1 + $0x1b0] sm:$0xff] }
 0x14b   :  { %3958 = vmatpush1.bf16.msra.mxu0 %v7056_v51  ;;  %v6080_v41 = vadd.f32 %v6079_v29, %v6078_v36  ;;  %v6093_v54 = vrot.slane %v6092_v4, 1  ;;  %v7185_v0 = vcombine.high %v229_v5, %v261_v11  ;;  %v7187_v51 = vcombine.high %v230_v52, %v262_v20  ;;  %v326_v15 = vld [vmem:[%s10927_s1 + $0x9a8] sm:$0xff]  ;;  %v9316_v42 = vld [vmem:[%s10927_s1 + $0xb8] sm:$0xff]  ;;  %v9334_v63 = vld [vmem:[%s10927_s1 + $0x2b0] sm:$0xff] }
 0x14c   :  { %3959 = vmatprep.subr.bf16.mxu0 %v7121_v27  ;;  %v9207_v49 = vrot.slane %v5508_v3, %v8549_v37  ;;  %v5509_v23 = vcombine.low %v5023_v57, %v5030_v28  ;;  %v7186_v27 = vcombine.low %v230_v52, %v262_v20  ;;  %v7249_v22 = vcombine.high %v293_v47, %v325_v44  ;;  %v9273_v60 = vld [vmem:[%s10927_s1 + $0xda8] sm:$0xff]  ;;  %v9339_v46 = vld [vmem:[%s10927_s1 + $0x3b0] sm:$0xff]  ;;  %v9357_v52 = vld [vmem:[%s10927_s1 + $0x3b8] sm:$0xff] }
 0x14d   :  { %4001 = vmatpush1.bf16.msra.mxu1 %v7058_v50  ;;  %v6572_v17 = vcombine.low %v6073_v12, %v6080_v41  ;;  %v6094_v8 = vadd.f32 %v6093_v54, %v6092_v4  ;;  %v7184_v50 = vcombine.low %v229_v5, %v261_v11  ;;  %v7251_v43 = vcombine.high %v294_v14, %v326_v15  ;;  %v9292_v16 = vld [vmem:[%s10927_s1 + $0xea8] sm:$0xff]  ;;  %v9344_v5 = vld [vmem:[%s10927_s1 + $0x2b8] sm:$0xff]  ;;  %v9362_v20 = vld [vmem:[%s10927_s1 + $0x4b0] sm:$0xff] }
 0x14e   :  { %4002 = vmatprep.subr.bf16.mxu1 %v7123_v31  ;;  %v9225_v45 = vrot.slane %v5509_v23, %v8549_v37  ;;  %v7248_v24 = vcombine.low %v293_v47, %v325_v44  ;;  %v7250_v62 = vcombine.low %v294_v14, %v326_v15  ;;  %v7313_v33 = vcombine.high %v9233_v48, %v9240_v19  ;;  %v9297_v30 = vld [vmem:[%s10927_s1 + $0xfa8] sm:$0xff]  ;;  %v9367_v3 = vld [vmem:[%s10927_s1 + $0x5b0] sm:$0xff]  ;;  %v9383_v41 = vld [vmem:[%s10927_s1 + $0x5b8] sm:$0xff] }
 0x14f   :  { %3960 = vmatpush1.bf16.msra.mxu0 %v7120_v34  ;;  %v9228_v31 = vrot.slane %v6572_v17, %v8549_v37  ;;  %v6573_v58 = vcombine.low %v6087_v32, %v6094_v8  ;;  %v7312_v25 = vcombine.low %v9233_v48, %v9240_v19  ;;  %v7315_v56 = vcombine.high %v9245_v35, %v9250_v7  ;;  %v9378_v32 = vld [vmem:[%s10927_s1 + $0x4b8] sm:$0xff] }
 0x150   :  { %3961 = vmatprep.subr.bf16.mxu0 %v7185_v0  ;;  %v7314_v36 = vcombine.low %v9245_v35, %v9250_v7  ;;  %v7376_v39 = vcombine.low %v9258_v59, %v9263_v53  ;;  %v7377_v57 = vcombine.high %v9258_v59, %v9263_v53  ;;  %v7378_v9 = vcombine.low %v9268_v2, %v9273_v60 }
 0x151   :  { %4003 = vmatpush1.bf16.msra.mxu1 %v7122_v61  ;;  %v9253_v40 = vrot.slane %v6573_v58, %v8549_v37  ;;  %v7379_v11 = vcombine.high %v9268_v2, %v9273_v60  ;;  %v7440_v12 = vcombine.low %v9278_v10, %v9283_v18  ;;  %v7441_v29 = vcombine.high %v9278_v10, %v9283_v18 }
 0x152   :  { %4004 = vmatprep.subr.bf16.mxu1 %v7187_v51  ;;  %v7442_v4 = vcombine.low %v9292_v16, %v9297_v30  ;;  %v7443_v28 = vcombine.high %v9292_v16, %v9297_v30  ;;  %v6996_v34 = vcombine.low %v9302_v26, %v9311_v55  ;;  %v6997_v61 = vcombine.high %v9302_v26, %v9311_v55  ;;  %v231_v55 = vld [vmem:[%s10927_s1 + $0x6b0] sm:$0xff] }
 0x153   :  { %3962 = vmatpush1.bf16.msra.mxu0 %v7184_v50  ;;  %v6998_v0 = vcombine.low %v9316_v42, %v9321_v1  ;;  %v6999_v23 = vcombine.high %v9316_v42, %v9321_v1  ;;  %v10945_v26 = vcombine.high %v9344_v5, %v9357_v52  ;;  %v263_v42 = vld [vmem:[%s10927_s1 + $0x7b0] sm:$0xff] }
 0x154   :  { %3963 = vmatprep.subr.bf16.mxu0 %v7249_v22 }
 0x155   :  { %4005 = vmatpush1.bf16.msra.mxu1 %v7186_v27 }
 0x156   :  { %4006 = vmatprep.subr.bf16.mxu1 %v7251_v43 }
 0x157   :  { %3964 = vmatpush1.bf16.msra.mxu0 %v7248_v24 }
 0x158   :  { %3965 = vmatprep.subr.bf16.mxu0 %v7313_v33  ;;  %v3387_v54 = vpop.f32.mrb[12].mxu0  ;;  %v3430_v17 = vpop.f32.mrb[12].mxu1 }
 0x159   :  { %4007 = vmatpush1.bf16.msra.mxu1 %v7250_v62  ;;  %v5895_v44 = vmul.f32 %v3387_v54, %v3387_v54  ;;  %v3389_v8 = vpop.f32.mrb[13].mxu0  ;;  %v5897_v27 = vmul.f32 %v3430_v17, %v3430_v17  ;;  %v3432_v48 = vpop.f32.mrb[13].mxu1 }
 0x15a   :  { %4008 = vmatprep.subr.bf16.mxu1 %v7315_v56  ;;  %v7534_v58 = vpack.c.bf16 %v3389_v8, %v3387_v54  ;;  %v5896_v22 = vmul.f32 %v3389_v8, %v3389_v8  ;;  %v3391_v43 = vpop.f32.mrb[14].mxu0  ;;  %v7535_v35 = vpack.c.bf16 %v3432_v48, %v3430_v17  ;;  %v5898_v7 = vmul.f32 %v3432_v48, %v3432_v48  ;;  %v3434_v33 = vpop.f32.mrb[14].mxu1 }
 0x15b   :  { %3966 = vmatpush1.bf16.msra.mxu0 %v7312_v25  ;;  %v5031_v24 = vadd.f32 %v3391_v43, %v3387_v54  ;;  %v5959_v62 = vmul.f32 %v3391_v43, %v3391_v43  ;;  %v3393_v56 = vpop.f32.mrb[15].mxu0  ;;  %v5045_v13 = vadd.f32 %v3434_v33, %v3430_v17  ;;  %v5961_v6 = vmul.f32 %v3434_v33, %v3434_v33  ;;  %v3436_v51 = vpop.f32.mrb[15].mxu1 }
 0x15c   :  { %4861 = vst [vmem:[%s10929_s2 + $0x30] sm:$0xff] %v7534_v58  ;;  %v7566_v50 = vpack.c.bf16 %v3393_v56, %v3391_v43  ;;  %v5038_v14 = vadd.f32 %v3393_v56, %v3389_v8  ;;  %3967 = vmatprep.subr.bf16.mxu0 %v7377_v57  ;;  %4862 = vst [vmem:[%s10929_s2 + $0x38] sm:$0xff] %v7535_v35  ;;  %v5960_v19 = vmul.f32 %v3393_v56, %v3393_v56 }
 0x15d   :  { %4009 = vmatpush1.bf16.msra.mxu1 %v7314_v36  ;;  %v5032_v25 = vrot.slane %v5031_v24, 4  ;;  %v6095_v54 = vadd.f32 %v5959_v62, %v5895_v44  ;;  %v7567_v15 = vpack.c.bf16 %v3436_v51, %v3434_v33  ;;  %v5046_v36 = vrot.slane %v5045_v13, 4 }
 0x15e   :  { %4010 = vmatprep.subr.bf16.mxu1 %v7379_v11  ;;  %v6109_v47 = vadd.f32 %v5961_v6, %v5897_v27  ;;  %4893 = vst [vmem:[%s10929_s2 + $0x130] sm:$0xff] %v7566_v50  ;;  %v5039_v17 = vrot.slane %v5038_v14, 4  ;;  %v5052_v58 = vadd.f32 %v3436_v51, %v3432_v48  ;;  %v6102_v43 = vadd.f32 %v5960_v19, %v5896_v22 }
 0x15f   :  { %3968 = vmatpush1.bf16.msra.mxu0 %v7376_v39  ;;  %v5033_v57 = vadd.f32 %v5032_v25, %v5031_v24  ;;  %v6096_v8 = vrot.slane %v6095_v54, 4  ;;  %4894 = vst [vmem:[%s10929_s2 + $0x138] sm:$0xff] %v7567_v15  ;;  %v5962_v11 = vmul.f32 %v3436_v51, %v3436_v51  ;;  %v5047_v6 = vadd.f32 %v5046_v36, %v5045_v13 }
 0x160   :  { %3969 = vmatprep.subr.bf16.mxu0 %v7441_v29  ;;  %v6110_v44 = vrot.slane %v6109_v47, 4  ;;  %v5040_v50 = vadd.f32 %v5039_v17, %v5038_v14  ;;  %v5053_v27 = vrot.slane %v5052_v58, 4  ;;  %v6103_v39 = vrot.slane %v6102_v43, 4  ;;  %v232_v17 = vld [vmem:[%s10927_s1 + $0x6b8] sm:$0xff] }
 0x161   :  { %4011 = vmatpush1.bf16.msra.mxu1 %v7378_v9  ;;  %v5034_v59 = vrot.slane %v5033_v57, 2  ;;  %v6097_v53 = vadd.f32 %v6096_v8, %v6095_v54  ;;  %v6116_v48 = vadd.f32 %v5962_v11, %v5898_v7  ;;  %v5048_v22 = vrot.slane %v5047_v6, 2 }
 0x162   :  { %4012 = vmatprep.subr.bf16.mxu1 %v7443_v28  ;;  %v6111_v19 = vadd.f32 %v6110_v44, %v6109_v47  ;;  %v5041_v35 = vrot.slane %v5040_v50, 2  ;;  %v5054_v24 = vadd.f32 %v5053_v27, %v5052_v58  ;;  %v6104_v9 = vadd.f32 %v6103_v39, %v6102_v43  ;;  %v264_v58 = vld [vmem:[%s10927_s1 + $0x7b8] sm:$0xff] }
 0x163   :  { %3970 = vmatpush1.bf16.msra.mxu0 %v7440_v12  ;;  %v5035_v2 = vadd.f32 %v5034_v59, %v5033_v57  ;;  %v6098_v60 = vrot.slane %v6097_v53, 2  ;;  %v6117_v13 = vrot.slane %v6116_v48, 4  ;;  %v5049_v29 = vadd.f32 %v5048_v22, %v5047_v6 }
 0x164   :  { %4041 = vmatprep.subr.bf16.mxu0 %v6997_v61  ;;  %v6112_v28 = vrot.slane %v6111_v19, 2  ;;  %v5042_v51 = vadd.f32 %v5041_v35, %v5040_v50  ;;  %v5055_v47 = vrot.slane %v5054_v24, 2  ;;  %v6105_v12 = vrot.slane %v6104_v9, 2 }
 0x165   :  { %4013 = vmatpush1.bf16.msra.mxu1 %v7442_v4  ;;  %v5036_v10 = vrot.slane %v5035_v2, 1  ;;  %v6099_v18 = vadd.f32 %v6098_v60, %v6097_v53  ;;  %v6118_v14 = vadd.f32 %v6117_v13, %v6116_v48  ;;  %v5050_v16 = vrot.slane %v5049_v29, 1  ;;  %v9501_v60 = vld [vmem:[%s10927_s1 + $0xbb0] sm:$0xff] }
 0x166   :  { %4084 = vmatprep.subr.bf16.mxu1 %v6999_v23  ;;  %3988 = vmatmul.mubr.bf16.vlgmr.msra.gmra.mrb[40].mxu0 %v9163_v21  ;;  %v6113_v30 = vadd.f32 %v6112_v28, %v6111_v19  ;;  %v5043_v4 = vrot.slane %v5042_v51, 1  ;;  %v5056_v15 = vadd.f32 %v5055_v47, %v5054_v24  ;;  %v6106_v62 = vadd.f32 %v6105_v12, %v6104_v9  ;;  %v295_v19 = vld [vmem:[%s10927_s1 + $0x8b0] sm:$0xff]  ;;  %v9507_v28 = vld [vmem:[%s10927_s1 + $0xab8] sm:$0xff] }
 0x167   :  { %4042 = vmatpush1.bf16.msra.mxu0 %v6996_v34  ;;  %v5037_v61 = vadd.f32 %v5036_v10, %v5035_v2  ;;  %v6100_v7 = vrot.slane %v6099_v18, 1  ;;  %v6119_v23 = vrot.slane %v6118_v14, 2  ;;  %v10944_v33 = vcombine.high %v9334_v63, %v9339_v46  ;;  %4073 = vmatprep.mubr.bf16.mxu0 %v10937_v38  ;;  %v9496_v2 = vld [vmem:[%s10927_s1 + $0xab0] sm:$0xff] }
 0x168   :  { %4031 = vmatmul.mubr.bf16.vlgmr.msra.gmra.mrb[40].mxu1 %v9163_v21  ;;  %v5051_v56 = vadd.f32 %v5050_v16, %v5049_v29  ;;  %v6114_v25 = vrot.slane %v6113_v30, 1  ;;  %v5044_v54 = vadd.f32 %v5043_v4, %v5042_v51  ;;  %v5057_v36 = vrot.slane %v5056_v15, 1  ;;  %v9512_v51 = vld [vmem:[%s10927_s1 + $0xbb8] sm:$0xff]  ;;  %v9524_v12 = vld [vmem:[%s10927_s1 + $0xdb0] sm:$0xff] }
 0x169   :  { %4085 = vmatpush1.bf16.msra.mxu1 %v6998_v0  ;;  %4043 = vmatprep.subr.bf16.mxu0 %v10944_v33  ;;  %v6101_v1 = vadd.f32 %v6100_v7, %v6099_v18  ;;  %v6107_v34 = vrot.slane %v6106_v62, 1  ;;  %v6120_v0 = vadd.f32 %v6119_v23, %v6118_v14  ;;  %v10946_v43 = vcombine.low %v9334_v63, %v9339_v46  ;;  %v9519_v18 = vld [vmem:[%s10927_s1 + $0xcb0] sm:$0xff] }
 0x16a   :  { %4086 = vmatprep.subr.bf16.mxu1 %v10945_v26  ;;  %4116 = vmatprep.mubr.bf16.mxu1 %v10937_v38  ;;  %v5510_v57 = vcombine.low %v5037_v61, %v5044_v54  ;;  %v5058_v8 = vadd.f32 %v5057_v36, %v5056_v15  ;;  %v7124_v11 = vcombine.low %v9362_v20, %v9367_v3  ;;  %v9534_v15 = vld [vmem:[%s10927_s1 + $0xcb8] sm:$0xff]  ;;  %v9558_v54 = vld [vmem:[%s10927_s1 + $0xfb0] sm:$0xff] }
 0x16b   :  { %4044 = vmatpush1.bf16.msra.mxu0 %v10946_v43  ;;  %v7126_v6 = vcombine.low %v9378_v32, %v9383_v41  ;;  %v6115_v44 = vadd.f32 %v6114_v25, %v6113_v30  ;;  %v6108_v50 = vadd.f32 %v6107_v34, %v6106_v62  ;;  %v6121_v27 = vrot.slane %v6120_v0, 1  ;;  %v9539_v61 = vld [vmem:[%s10927_s1 + $0xdb8] sm:$0xff]  ;;  %v9553_v25 = vld [vmem:[%s10927_s1 + $0xeb0] sm:$0xff]  ;;  %v9603_v43 = vld [vmem:[%s10927_s1 + $0x2c0] sm:$0xff] }
 0x16c   :  { %v10947_v59 = vcombine.low %v9344_v5, %v9357_v52  ;;  %v10948_v53 = vcombine.high %v9362_v20, %v9367_v3  ;;  %v7189_v39 = vcombine.high %v231_v55, %v263_v42  ;;  %v5532_v63 = vrot.slane %v5510_v57, %v8549_v37  ;;  %v327_v5 = vld [vmem:[%s10927_s1 + $0x9b0] sm:$0xff]  ;;  %v9485_v3 = vld [vmem:[%s10927_s1 + $0x8b8] sm:$0xff]  ;;  %v9593_v57 = vld [vmem:[%s10927_s1 + $0xc8] sm:$0xff] }
 0x16d   :  { %v5511_v46 = vcombine.low %v5051_v56, %v5058_v8  ;;  %v10949_v48 = vcombine.high %v9378_v32, %v9383_v41  ;;  %v7191_v22 = vcombine.high %v232_v17, %v264_v58  ;;  %v6574_v52 = vcombine.low %v6101_v1, %v6108_v50  ;;  %v9490_v32 = vld [vmem:[%s10927_s1 + $0x9b8] sm:$0xff]  ;;  %v9582_v1 = vld [vmem:[%s10927_s1 + $0x1c0] sm:$0xff]  ;;  %v9598_v8 = vld [vmem:[%s10927_s1 + $0x1c8] sm:$0xff] }
 0x16e   :  { %4087 = vmatpush1.bf16.msra.mxu1 %v10947_v59  ;;  %4045 = vmatprep.subr.bf16.mxu0 %v10948_v53  ;;  %v6122_v20 = vadd.f32 %v6121_v27, %v6120_v0  ;;  %v7188_v35 = vcombine.low %v231_v55, %v263_v42  ;;  %v7190_v24 = vcombine.low %v232_v17, %v264_v58  ;;  %v9572_v55 = vld [vmem:[%s10927_s1 + $0xfb8] sm:$0xff]  ;;  %v9577_v42 = vld [vmem:[%s10927_s1 + $0xc0] sm:$0xff]  ;;  %v9622_v53 = vld [vmem:[%s10927_s1 + $0x2c8] sm:$0xff] }
 0x16f   :  { %4088 = vmatprep.subr.bf16.mxu1 %v10949_v48  ;;  %v5539_v41 = vrot.slane %v5511_v46, %v8549_v37  ;;  %4046 = vmatpush1.bf16.msra.mxu0 %v7124_v11  ;;  %v6596_v9 = vrot.slane %v6574_v52, %v8549_v37  ;;  %v7253_v29 = vcombine.high %v295_v19, %v327_v5  ;;  %v9617_v59 = vld [vmem:[%s10927_s1 + $0x3c0] sm:$0xff]  ;;  %v9652_v52 = vld [vmem:[%s10927_s1 + $0x4c8] sm:$0xff] }
 0x170   :  { %v6575_v13 = vcombine.low %v6115_v44, %v6122_v20  ;;  %4047 = vmatprep.subr.bf16.mxu0 %v7189_v39  ;;  %v7255_v10 = vcombine.high %v9485_v3, %v9490_v32  ;;  %v7252_v16 = vcombine.low %v295_v19, %v327_v5  ;;  %v7254_v30 = vcombine.low %v9485_v3, %v9490_v32  ;;  %v9638_v46 = vld [vmem:[%s10927_s1 + $0x4c0] sm:$0xff]  ;;  %v9657_v20 = vld [vmem:[%s10927_s1 + $0x5c8] sm:$0xff] }
 0x171   :  { %v5541_v47 = vcombine.low %v5532_v63, %v5539_v41  ;;  %v7317_v4 = vcombine.high %v9496_v2, %v9501_v60  ;;  %v10950_v7 = vcombine.low %v9207_v49, %v9225_v45  ;;  %v7316_v33 = vcombine.low %v9496_v2, %v9501_v60  ;;  %v9563_v49 = vld [vmem:[%s10927_s1 + $0xeb8] sm:$0xff]  ;;  %v9643_v48 = vld [vmem:[%s10927_s1 + $0x5c0] sm:$0xff] }
 0x172   :  { %4089 = vmatpush1.bf16.msra.mxu1 %v7126_v6  ;;  %v6603_v14 = vrot.slane %v6575_v13, %v8549_v37  ;;  %v7318_v56 = vcombine.low %v9507_v28, %v9512_v51  ;;  %v7319_v36 = vcombine.high %v9507_v28, %v9512_v51  ;;  %v7380_v26 = vcombine.low %v9519_v18, %v9524_v12 }
 0x173   :  { %4090 = vmatprep.subr.bf16.mxu1 %v7191_v22  ;;  %v5548_v62 = vrot.slane %v10950_v7, %v8549_v37  ;;  %v5555_v23 = vrot.slane %v5541_v47, %v8549_v37  ;;  %4048 = vmatpush1.bf16.msra.mxu0 %v7188_v35  ;;  %v7381_v0 = vcombine.high %v9519_v18, %v9524_v12 }
 0x174   :  { %v6605_v45 = vcombine.low %v6596_v9, %v6603_v14  ;;  %4049 = vmatprep.subr.bf16.mxu0 %v7253_v29  ;;  %v7382_v17 = vcombine.low %v9534_v15, %v9539_v61  ;;  %v7383_v58 = vcombine.high %v9534_v15, %v9539_v61  ;;  %v10951_v11 = vcombine.low %v9228_v31, %v9253_v40  ;;  %v9627_v31 = vld [vmem:[%s10927_s1 + $0x3c8] sm:$0xff] }
 0x175   :  { %v5556_v34 = vcombine.low %v5548_v62, %v5555_v23  ;;  %v7444_v50 = vcombine.low %v9553_v25, %v9558_v54  ;;  %v7445_v27 = vcombine.high %v9553_v25, %v9558_v54  ;;  %v7446_v40 = vcombine.low %v9563_v49, %v9572_v55 }
 0x176   :  { %4091 = vmatpush1.bf16.msra.mxu1 %v7190_v24  ;;  %v6612_v6 = vrot.slane %v10951_v11, %v8549_v37  ;;  %v6619_v44 = vrot.slane %v6605_v45, %v8549_v37  ;;  %v7447_v39 = vcombine.high %v9563_v49, %v9572_v55  ;;  %v7000_v63 = vcombine.low %v9577_v42, %v9582_v1 }
 0x177   :  { %4092 = vmatprep.subr.bf16.mxu1 %v7255_v10  ;;  %4050 = vmatpush1.bf16.msra.mxu0 %v7252_v16  ;;  %v7001_v19 = vcombine.high %v9577_v42, %v9582_v1  ;;  %v7002_v5 = vcombine.low %v9593_v57, %v9598_v8  ;;  %5868 = vst [vmem:[%s10930_s3 + $0x8] sm:$0xff] %v5556_v34  ;;  %v233_v42 = vld [vmem:[%s10927_s1 + $0x6c0] sm:$0xff] }
 0x178   :  { %v6620_v22 = vcombine.low %v6612_v6, %v6619_v44  ;;  %4051 = vmatprep.subr.bf16.mxu0 %v7317_v4  ;;  %v3473_v3 = vpop.f32.mrb[16].mxu0  ;;  %v7003_v32 = vcombine.high %v9593_v57, %v9598_v8  ;;  %v7064_v41 = vcombine.low %v9603_v43, %v9617_v59  ;;  %v7065_v35 = vcombine.high %v9603_v43, %v9617_v59  ;;  %v3516_v60 = vpop.f32.mrb[16].mxu1  ;;  %v265_v1 = vld [vmem:[%s10927_s1 + $0x7c0] sm:$0xff] }
 0x179   :  { %v7066_v24 = vcombine.low %v9622_v53, %v9627_v31  ;;  %v5899_v2 = vmul.f32 %v3473_v3, %v3473_v3  ;;  %v3475_v9 = vpop.f32.mrb[17].mxu0  ;;  %v7067_v13 = vcombine.high %v9622_v53, %v9627_v31  ;;  %v5901_v47 = vmul.f32 %v3516_v60, %v3516_v60  ;;  %v3518_v16 = vpop.f32.mrb[17].mxu1  ;;  %v329_v53 = vld [vmem:[%s10927_s1 + $0x9c0] sm:$0xff] }
 0x17a   :  { %4093 = vmatpush1.bf16.msra.mxu1 %v7254_v30  ;;  %v7536_v10 = vpack.c.bf16 %v3475_v9, %v3473_v3  ;;  %v5900_v14 = vmul.f32 %v3475_v9, %v3475_v9  ;;  %v3477_v30 = vpop.f32.mrb[18].mxu0  ;;  %6932 = vst [vmem:[%s10931_s4 + $0x8] sm:$0xff] %v6620_v22  ;;  %v7537_v7 = vpack.c.bf16 %v3518_v16, %v3516_v60 }
 0x17b   :  { %4094 = vmatprep.subr.bf16.mxu1 %v7319_v36  ;;  %4052 = vmatpush1.bf16.msra.mxu0 %v7316_v33  ;;  %v5902_v62 = vmul.f32 %v3518_v16, %v3518_v16  ;;  %v5059_v23 = vadd.f32 %v3477_v30, %v3473_v3  ;;  %v5963_v45 = vmul.f32 %v3477_v30, %v3477_v30  ;;  %v3520_v36 = vpop.f32.mrb[18].mxu1  ;;  %v3479_v34 = vpop.f32.mrb[19].mxu0 }
 0x17c   :  { %4863 = vst [vmem:[%s10929_s2 + $0x40] sm:$0xff] %v7536_v10  ;;  %v5073_v33 = vadd.f32 %v3520_v36, %v3516_v60  ;;  %v5965_v11 = vmul.f32 %v3520_v36, %v3520_v36  ;;  %v7568_v6 = vpack.c.bf16 %v3479_v34, %v3477_v30  ;;  %v5066_v44 = vadd.f32 %v3479_v34, %v3475_v9  ;;  %v3522_v4 = vpop.f32.mrb[19].mxu1 }
 0x17d   :  { %4053 = vmatprep.subr.bf16.mxu0 %v7381_v0  ;;  %4864 = vst [vmem:[%s10929_s2 + $0x48] sm:$0xff] %v7537_v7  ;;  %v5060_v22 = vrot.slane %v5059_v23, 4  ;;  %v6123_v3 = vadd.f32 %v5963_v45, %v5899_v2  ;;  %v5964_v29 = vmul.f32 %v3479_v34, %v3479_v34  ;;  %v7569_v28 = vpack.c.bf16 %v3522_v4, %v3520_v36 }
 0x17e   :  { %4095 = vmatpush1.bf16.msra.mxu1 %v7318_v56  ;;  %v5074_v51 = vrot.slane %v5073_v33, 4  ;;  %v6137_v56 = vadd.f32 %v5965_v11, %v5901_v47  ;;  %4895 = vst [vmem:[%s10929_s2 + $0x140] sm:$0xff] %v7568_v6  ;;  %v5067_v60 = vrot.slane %v5066_v44, 4  ;;  %v5080_v0 = vadd.f32 %v3522_v4, %v3518_v16 }
 0x17f   :  { %4096 = vmatprep.subr.bf16.mxu1 %v7383_v58  ;;  %4054 = vmatpush1.bf16.msra.mxu0 %v7380_v26  ;;  %v5061_v9 = vadd.f32 %v5060_v22, %v5059_v23  ;;  %v6124_v2 = vrot.slane %v6123_v3, 4  ;;  %v6130_v10 = vadd.f32 %v5964_v29, %v5900_v14  ;;  %4896 = vst [vmem:[%s10929_s2 + $0x148] sm:$0xff] %v7569_v28 }
 0x180   :  { %v5966_v58 = vmul.f32 %v3522_v4, %v3522_v4  ;;  %4055 = vmatprep.subr.bf16.mxu0 %v7445_v27  ;;  %v5075_v47 = vadd.f32 %v5074_v51, %v5073_v33  ;;  %v6138_v16 = vrot.slane %v6137_v56, 4  ;;  %v5068_v18 = vadd.f32 %v5067_v60, %v5066_v44 }
 0x181   :  { %v5081_v12 = vrot.slane %v5080_v0, 4  ;;  %v5062_v26 = vrot.slane %v5061_v9, 2  ;;  %v6125_v29 = vadd.f32 %v6124_v2, %v6123_v3  ;;  %v6131_v14 = vrot.slane %v6130_v10, 4 }
 0x182   :  { %4097 = vmatpush1.bf16.msra.mxu1 %v7382_v17  ;;  %v6144_v30 = vadd.f32 %v5966_v58, %v5902_v62  ;;  %v5076_v4 = vrot.slane %v5075_v47, 2  ;;  %v6139_v7 = vadd.f32 %v6138_v16, %v6137_v56  ;;  %v5069_v15 = vrot.slane %v5068_v18, 2  ;;  %v297_v16 = vld [vmem:[%s10927_s1 + $0x8c0] sm:$0xff] }
 0x183   :  { %4098 = vmatprep.subr.bf16.mxu1 %v7447_v39  ;;  %v5082_v61 = vadd.f32 %v5081_v12, %v5080_v0  ;;  %4056 = vmatpush1.bf16.msra.mxu0 %v7444_v50  ;;  %v5063_v17 = vadd.f32 %v5062_v26, %v5061_v9  ;;  %v6126_v27 = vrot.slane %v6125_v29, 2  ;;  %v6132_v23 = vadd.f32 %v6131_v14, %v6130_v10  ;;  %v9789_v14 = vld [vmem:[%s10927_s1 + $0xac0] sm:$0xff] }
 0x184   :  { %v6145_v45 = vrot.slane %v6144_v30, 4  ;;  %4127 = vmatprep.subr.bf16.mxu0 %v7001_v19  ;;  %v5077_v39 = vadd.f32 %v5076_v4, %v5075_v47  ;;  %v6140_v62 = vrot.slane %v6139_v7, 2  ;;  %v5070_v36 = vadd.f32 %v5069_v15, %v5068_v18  ;;  %v9801_v15 = vld [vmem:[%s10927_s1 + $0xac8] sm:$0xff] }
 0x185   :  { %v5083_v34 = vrot.slane %v5082_v61, 2  ;;  %v5064_v25 = vrot.slane %v5063_v17, 1  ;;  %v6127_v54 = vadd.f32 %v6126_v27, %v6125_v29  ;;  %v6133_v50 = vrot.slane %v6132_v23, 2  ;;  %v9814_v27 = vld [vmem:[%s10927_s1 + $0xcc0] sm:$0xff] }
 0x186   :  { %4099 = vmatpush1.bf16.msra.mxu1 %v7446_v40  ;;  %v6146_v33 = vadd.f32 %v6145_v45, %v6144_v30  ;;  %4074 = vmatmul.mubr.bf16.vlgmr.msra.gmra.mrb[44].mxu0 %v9163_v21  ;;  %v5078_v49 = vrot.slane %v5077_v39, 1  ;;  %v6141_v55 = vadd.f32 %v6140_v62, %v6139_v7  ;;  %v5071_v40 = vrot.slane %v5070_v36, 1  ;;  %v9796_v7 = vld [vmem:[%s10927_s1 + $0xbc0] sm:$0xff]  ;;  %v9824_v45 = vld [vmem:[%s10927_s1 + $0xcc8] sm:$0xff] }
 0x187   :  { %4170 = vmatprep.subr.bf16.mxu1 %v7003_v32  ;;  %v5084_v11 = vadd.f32 %v5083_v34, %v5082_v61  ;;  %4128 = vmatpush1.bf16.msra.mxu0 %v7000_v63  ;;  %v5065_v19 = vadd.f32 %v5064_v25, %v5063_v17  ;;  %v6128_v6 = vrot.slane %v6127_v54, 1  ;;  %v6134_v44 = vadd.f32 %v6133_v50, %v6132_v23  ;;  %v9806_v61 = vld [vmem:[%s10927_s1 + $0xbc8] sm:$0xff]  ;;  %v9819_v23 = vld [vmem:[%s10927_s1 + $0xdc0] sm:$0xff] }
 0x188   :  { %v6147_v32 = vrot.slane %v6146_v33, 2  ;;  %4129 = vmatprep.subr.bf16.mxu0 %v7065_v35  ;;  %v5079_v22 = vadd.f32 %v5078_v49, %v5077_v39  ;;  %v6142_v3 = vrot.slane %v6141_v55, 1  ;;  %v5072_v28 = vadd.f32 %v5071_v40, %v5070_v36  ;;  %4159 = vmatprep.mubr.bf16.mxu0 %v10937_v38  ;;  %v266_v35 = vld [vmem:[%s10927_s1 + $0x7c8] sm:$0xff]  ;;  %v9834_v36 = vld [vmem:[%s10927_s1 + $0xec0] sm:$0xff] }
 0x189   :  { %4117 = vmatmul.mubr.bf16.vlgmr.msra.gmra.mrb[44].mxu1 %v9163_v21  ;;  %v5085_v21 = vrot.slane %v5084_v11, 1  ;;  %v6129_v57 = vadd.f32 %v6128_v6, %v6127_v54  ;;  %v6135_v8 = vrot.slane %v6134_v44, 1  ;;  %v7128_v56 = vcombine.low %v9638_v46, %v9643_v48  ;;  %v9829_v62 = vld [vmem:[%s10927_s1 + $0xdc8] sm:$0xff]  ;;  %v9839_v34 = vld [vmem:[%s10927_s1 + $0xfc0] sm:$0xff]  ;;  %v9872_v6 = vld [vmem:[%s10927_s1 + $0xd8] sm:$0xff] }
 0x18a   :  { %4171 = vmatpush1.bf16.msra.mxu1 %v7002_v5  ;;  %v6148_v63 = vadd.f32 %v6147_v32, %v6146_v33  ;;  %v234_v5 = vld [vmem:[%s10927_s1 + $0x6c8] sm:$0xff]  ;;  %4202 = vmatprep.mubr.bf16.mxu1 %v10937_v38  ;;  %v7130_v60 = vcombine.low %v9652_v52, %v9657_v20  ;;  %v6143_v0 = vadd.f32 %v6142_v3, %v6141_v55  ;;  %v9858_v55 = vld [vmem:[%s10927_s1 + $0xd0] sm:$0xff] }
 0x18b   :  { %4172 = vmatprep.subr.bf16.mxu1 %v7067_v13  ;;  %v5557_v13 = vcombine.low %v5065_v19, %v5072_v28  ;;  %v5086_v51 = vadd.f32 %v5085_v21, %v5084_v11  ;;  %4130 = vmatpush1.bf16.msra.mxu0 %v7064_v41  ;;  %v6136_v9 = vadd.f32 %v6135_v8, %v6134_v44  ;;  %v9848_v33 = vld [vmem:[%s10927_s1 + $0xec8] sm:$0xff]  ;;  %v9867_v19 = vld [vmem:[%s10927_s1 + $0x1d0] sm:$0xff]  ;;  %v9877_v44 = vld [vmem:[%s10927_s1 + $0x1d8] sm:$0xff] }
 0x18c   :  { %v6149_v2 = vrot.slane %v6148_v63, 1  ;;  %v10952_v10 = vcombine.high %v9638_v46, %v9643_v48  ;;  %v7193_v58 = vcombine.high %v233_v42, %v265_v1  ;;  %v10953_v41 = vcombine.high %v9652_v52, %v9657_v20  ;;  %v298_v48 = vld [vmem:[%s10927_s1 + $0x8c8] sm:$0xff]  ;;  %v9890_v21 = vld [vmem:[%s10927_s1 + $0x2d0] sm:$0xff] }
 0x18d   :  { %v9763_v43 = vrot.slane %v5557_v13, %v8549_v37  ;;  %v5558_v59 = vcombine.low %v5079_v22, %v5086_v51  ;;  %v7195_v47 = vcombine.high %v234_v5, %v266_v35  ;;  %v6621_v31 = vcombine.low %v6129_v57, %v6136_v9  ;;  %v330_v52 = vld [vmem:[%s10927_s1 + $0x9c8] sm:$0xff]  ;;  %v9918_v13 = vld [vmem:[%s10927_s1 + $0x4d0] sm:$0xff]  ;;  %v9934_v9 = vld [vmem:[%s10927_s1 + $0x4d8] sm:$0xff] }
 0x18e   :  { %4173 = vmatpush1.bf16.msra.mxu1 %v7066_v24  ;;  %4131 = vmatprep.subr.bf16.mxu0 %v10952_v10  ;;  %v6150_v46 = vadd.f32 %v6149_v2, %v6148_v63  ;;  %v7192_v24 = vcombine.low %v233_v42, %v265_v1  ;;  %v7194_v18 = vcombine.low %v234_v5, %v266_v35  ;;  %v9853_v49 = vld [vmem:[%s10927_s1 + $0xfc8] sm:$0xff]  ;;  %v9895_v42 = vld [vmem:[%s10927_s1 + $0x3d0] sm:$0xff]  ;;  %v9900_v1 = vld [vmem:[%s10927_s1 + $0x2d8] sm:$0xff] }
 0x18f   :  { %4174 = vmatprep.subr.bf16.mxu1 %v10953_v41  ;;  %v9781_v20 = vrot.slane %v5558_v59, %v8549_v37  ;;  %4132 = vmatpush1.bf16.msra.mxu0 %v7128_v56  ;;  %v9784_v12 = vrot.slane %v6621_v31, %v8549_v37  ;;  %v7257_v29 = vcombine.high %v297_v16, %v329_v53  ;;  %v9913_v35 = vld [vmem:[%s10927_s1 + $0x3d8] sm:$0xff]  ;;  %v9923_v51 = vld [vmem:[%s10927_s1 + $0x5d0] sm:$0xff] }
 0x190   :  { %v6622_v26 = vcombine.low %v6143_v0, %v6150_v46  ;;  %4133 = vmatprep.subr.bf16.mxu0 %v7193_v58  ;;  %v7259_v4 = vcombine.high %v298_v48, %v330_v52  ;;  %v7256_v39 = vcombine.low %v297_v16, %v329_v53  ;;  %v7258_v54 = vcombine.low %v298_v48, %v330_v52  ;;  %v9939_v2 = vld [vmem:[%s10927_s1 + $0x5d8] sm:$0xff] }
 0x191   :  { %v7321_v50 = vcombine.high %v9789_v14, %v9796_v7  ;;  %v7320_v40 = vcombine.low %v9789_v14, %v9796_v7  ;;  %v7323_v11 = vcombine.high %v9801_v15, %v9806_v61  ;;  %v7322_v32 = vcombine.low %v9801_v15, %v9806_v61 }
 0x192   :  { %4175 = vmatpush1.bf16.msra.mxu1 %v7130_v60  ;;  %v9809_v17 = vrot.slane %v6622_v26, %v8549_v37  ;;  %v7384_v22 = vcombine.low %v9814_v27, %v9819_v23  ;;  %v7385_v3 = vcombine.high %v9814_v27, %v9819_v23  ;;  %v7386_v28 = vcombine.low %v9824_v45, %v9829_v62 }
 0x193   :  { %4176 = vmatprep.subr.bf16.mxu1 %v7195_v47  ;;  %4134 = vmatpush1.bf16.msra.mxu0 %v7192_v24  ;;  %v7387_v57 = vcombine.high %v9824_v45, %v9829_v62  ;;  %v7448_v8 = vcombine.low %v9834_v36, %v9839_v34  ;;  %v7449_v63 = vcombine.high %v9834_v36, %v9839_v34 }
 0x194   :  { %4135 = vmatprep.subr.bf16.mxu0 %v7257_v29  ;;  %v7450_v5 = vcombine.low %v9848_v33, %v9853_v49  ;;  %v7451_v56 = vcombine.high %v9848_v33, %v9853_v49  ;;  %v7004_v60 = vcombine.low %v9858_v55, %v9867_v19  ;;  %v7005_v0 = vcombine.high %v9858_v55, %v9867_v19  ;;  %v9990_v33 = vld [vmem:[%s10928_s0] sm:$0xff]   ;;  %v235_v19 = vld [vmem:[%s10927_s1 + $0x6d0] sm:$0xff] }
 0x195   :  { %v7006_v58 = vcombine.low %v9872_v6, %v9877_v44  ;;  %v7007_v59 = vcombine.high %v9872_v6, %v9877_v44  ;;  %v7069_v47 = vcombine.high %v9890_v21, %v9895_v42  ;;  %v10954_v55 = vcombine.high %v9900_v1, %v9913_v35  ;;  %v267_v6 = vld [vmem:[%s10927_s1 + $0x7d0] sm:$0xff] }
 0x196   :  { %4177 = vmatpush1.bf16.msra.mxu1 %v7194_v18 }
 0x197   :  { %4178 = vmatprep.subr.bf16.mxu1 %v7259_v4  ;;  %4136 = vmatpush1.bf16.msra.mxu0 %v7256_v39 }
 0x198   :  { %4137 = vmatprep.subr.bf16.mxu0 %v7321_v50  ;;  %v3559_v10 = vpop.f32.mrb[20].mxu0  ;;  %v3602_v53 = vpop.f32.mrb[20].mxu1 }
 0x199   :  { %v5903_v16 = vmul.f32 %v3559_v10, %v3559_v10  ;;  %v3561_v31 = vpop.f32.mrb[21].mxu0  ;;  %v5905_v24 = vmul.f32 %v3602_v53, %v3602_v53  ;;  %v3604_v29 = vpop.f32.mrb[21].mxu1 }
 0x19a   :  { %4179 = vmatpush1.bf16.msra.mxu1 %v7258_v54  ;;  %v7538_v18 = vpack.c.bf16 %v3561_v31, %v3559_v10  ;;  %v5904_v26 = vmul.f32 %v3561_v31, %v3561_v31  ;;  %v3563_v14 = vpop.f32.mrb[22].mxu0  ;;  %v7539_v7 = vpack.c.bf16 %v3604_v29, %v3602_v53  ;;  %v5906_v15 = vmul.f32 %v3604_v29, %v3604_v29  ;;  %v3606_v54 = vpop.f32.mrb[22].mxu1 }
 0x19b   :  { %4180 = vmatprep.subr.bf16.mxu1 %v7323_v11  ;;  %4138 = vmatpush1.bf16.msra.mxu0 %v7320_v40  ;;  %v5087_v61 = vadd.f32 %v3563_v14, %v3559_v10  ;;  %v5967_v39 = vmul.f32 %v3563_v14, %v3563_v14  ;;  %v3565_v50 = vpop.f32.mrb[23].mxu0  ;;  %v5101_v11 = vadd.f32 %v3606_v54, %v3602_v53  ;;  %v3608_v46 = vpop.f32.mrb[23].mxu1 }
 0x19c   :  { %4865 = vst [vmem:[%s10929_s2 + $0x50] sm:$0xff] %v7538_v18  ;;  %v5969_v25 = vmul.f32 %v3606_v54, %v3606_v54  ;;  %v7570_v30 = vpack.c.bf16 %v3565_v50, %v3563_v14  ;;  %v5094_v52 = vadd.f32 %v3565_v50, %v3561_v31  ;;  %4139 = vmatprep.subr.bf16.mxu0 %v7385_v3  ;;  %4866 = vst [vmem:[%s10929_s2 + $0x58] sm:$0xff] %v7539_v7 }
 0x19d   :  { %v5088_v40 = vrot.slane %v5087_v61, 4  ;;  %v6151_v10 = vadd.f32 %v5967_v39, %v5903_v16  ;;  %v5968_v4 = vmul.f32 %v3565_v50, %v3565_v50  ;;  %v7571_v41 = vpack.c.bf16 %v3608_v46, %v3606_v54 }
 0x19e   :  { %4181 = vmatpush1.bf16.msra.mxu1 %v7322_v32  ;;  %v5102_v32 = vrot.slane %v5101_v11, 4  ;;  %v6165_v48 = vadd.f32 %v5969_v25, %v5905_v24  ;;  %4897 = vst [vmem:[%s10929_s2 + $0x150] sm:$0xff] %v7570_v30  ;;  %v5095_v53 = vrot.slane %v5094_v52, 4  ;;  %v5108_v18 = vadd.f32 %v3608_v46, %v3604_v29 }
 0x19f   :  { %4182 = vmatprep.subr.bf16.mxu1 %v7387_v57  ;;  %4140 = vmatpush1.bf16.msra.mxu0 %v7384_v22  ;;  %v5089_v3 = vadd.f32 %v5088_v40, %v5087_v61  ;;  %v6152_v31 = vrot.slane %v6151_v10, 4  ;;  %v6158_v14 = vadd.f32 %v5968_v4, %v5904_v26  ;;  %4898 = vst [vmem:[%s10929_s2 + $0x158] sm:$0xff] %v7571_v41 }
 0x1a0   :  { %v5970_v57 = vmul.f32 %v3608_v46, %v3608_v46  ;;  %4141 = vmatprep.subr.bf16.mxu0 %v7449_v63  ;;  %v5103_v30 = vadd.f32 %v5102_v32, %v5101_v11  ;;  %v6166_v25 = vrot.slane %v6165_v48, 4  ;;  %v5096_v16 = vadd.f32 %v5095_v53, %v5094_v52  ;;  %v268_v53 = vld [vmem:[%s10927_s1 + $0x7d8] sm:$0xff] }
 0x1a1   :  { %v5109_v24 = vrot.slane %v5108_v18, 4  ;;  %v5090_v27 = vrot.slane %v5089_v3, 2  ;;  %v6153_v23 = vadd.f32 %v6152_v31, %v6151_v10  ;;  %v6159_v22 = vrot.slane %v6158_v14, 4 }
 0x1a2   :  { %4183 = vmatpush1.bf16.msra.mxu1 %v7386_v28  ;;  %v6172_v29 = vadd.f32 %v5970_v57, %v5906_v15  ;;  %v5104_v26 = vrot.slane %v5103_v30, 2  ;;  %v6167_v4 = vadd.f32 %v6166_v25, %v6165_v48  ;;  %v5097_v7 = vrot.slane %v5096_v16, 2 }
 0x1a3   :  { %4184 = vmatprep.subr.bf16.mxu1 %v7451_v56  ;;  %v5110_v61 = vadd.f32 %v5109_v24, %v5108_v18  ;;  %4142 = vmatpush1.bf16.msra.mxu0 %v7448_v8  ;;  %v5091_v45 = vadd.f32 %v5090_v27, %v5089_v3  ;;  %v6154_v62 = vrot.slane %v6153_v23, 2  ;;  %v6160_v28 = vadd.f32 %v6159_v22, %v6158_v14 }
 0x1a4   :  { %v6173_v63 = vrot.slane %v6172_v29, 4  ;;  %4213 = vmatprep.subr.bf16.mxu0 %v7005_v0  ;;  %v5105_v56 = vadd.f32 %v5104_v26, %v5103_v30  ;;  %v6168_v41 = vrot.slane %v6167_v4, 2  ;;  %v5098_v46 = vadd.f32 %v5097_v7, %v5096_v16  ;;  %v299_v26 = vld [vmem:[%s10927_s1 + $0x8d0] sm:$0xff] }
 0x1a5   :  { %v5111_v48 = vrot.slane %v5110_v61, 2  ;;  %v5092_v36 = vrot.slane %v5091_v45, 1  ;;  %v6155_v34 = vadd.f32 %v6154_v62, %v6153_v23  ;;  %v6161_v8 = vrot.slane %v6160_v28, 2 }
 0x1a6   :  { %4185 = vmatpush1.bf16.msra.mxu1 %v7450_v5  ;;  %v6174_v52 = vadd.f32 %v6173_v63, %v6172_v29  ;;  %4160 = vmatmul.mubr.bf16.vlgmr.msra.gmra.mrb[48].mxu0 %v9990_v33  ;;  %v5106_v49 = vrot.slane %v5105_v56, 1  ;;  %v6169_v5 = vadd.f32 %v6168_v41, %v6167_v4  ;;  %v5099_v0 = vrot.slane %v5098_v46, 1  ;;  %v10073_v41 = vld [vmem:[%s10927_s1 + $0xbd8] sm:$0xff] }
 0x1a7   :  { %4256 = vmatprep.subr.bf16.mxu1 %v7007_v59  ;;  %v5112_v15 = vadd.f32 %v5111_v48, %v5110_v61  ;;  %4214 = vmatpush1.bf16.msra.mxu0 %v7004_v60  ;;  %v5093_v59 = vadd.f32 %v5092_v36, %v5091_v45  ;;  %v6156_v39 = vrot.slane %v6155_v34, 1  ;;  %v6162_v54 = vadd.f32 %v6161_v8, %v6160_v28  ;;  %v10057_v61 = vld [vmem:[%s10927_s1 + $0xad0] sm:$0xff] }
 0x1a8   :  { %v6175_v50 = vrot.slane %v6174_v52, 2  ;;  %4215 = vmatprep.subr.bf16.mxu0 %v7069_v47  ;;  %v5107_v11 = vadd.f32 %v5106_v49, %v5105_v56  ;;  %v6170_v40 = vrot.slane %v6169_v5, 1  ;;  %v5100_v10 = vadd.f32 %v5099_v0, %v5098_v46  ;;  %4245 = vmatprep.mubr.bf16.mxu0 %v10937_v38  ;;  %v236_v47 = vld [vmem:[%s10927_s1 + $0x6d8] sm:$0xff]  ;;  %v10062_v45 = vld [vmem:[%s10927_s1 + $0xbd0] sm:$0xff] }
 0x1a9   :  { %4203 = vmatmul.mubr.bf16.vlgmr.msra.gmra.mrb[48].mxu1 %v9990_v33  ;;  %v5113_v32 = vrot.slane %v5112_v15, 1  ;;  %v6157_v44 = vadd.f32 %v6156_v39, %v6155_v34  ;;  %v6163_v60 = vrot.slane %v6162_v54, 1  ;;  %v10955_v31 = vcombine.low %v9890_v21, %v9895_v42  ;;  %v10068_v56 = vld [vmem:[%s10927_s1 + $0xad8] sm:$0xff]  ;;  %v10080_v36 = vld [vmem:[%s10927_s1 + $0xcd0] sm:$0xff] }
 0x1aa   :  { %4257 = vmatpush1.bf16.msra.mxu1 %v7006_v58  ;;  %v6176_v58 = vadd.f32 %v6175_v50, %v6174_v52  ;;  %4288 = vmatprep.mubr.bf16.mxu1 %v10937_v38  ;;  %v5559_v18 = vcombine.low %v5093_v59, %v5100_v10  ;;  %v7132_v14 = vcombine.low %v9918_v13, %v9923_v51  ;;  %v10085_v34 = vld [vmem:[%s10927_s1 + $0xdd0] sm:$0xff]  ;;  %v10095_v0 = vld [vmem:[%s10927_s1 + $0xcd8] sm:$0xff] }
 0x1ab   :  { %4258 = vmatprep.subr.bf16.mxu1 %v10954_v55  ;;  %v5114_v3 = vadd.f32 %v5113_v32, %v5112_v15  ;;  %4216 = vmatpush1.bf16.msra.mxu0 %v10955_v31  ;;  %v7134_v57 = vcombine.low %v9934_v9, %v9939_v2  ;;  %v6171_v30 = vadd.f32 %v6170_v40, %v6169_v5  ;;  %v10100_v15 = vld [vmem:[%s10927_s1 + $0xdd8] sm:$0xff]  ;;  %v10114_v40 = vld [vmem:[%s10927_s1 + $0xed0] sm:$0xff]  ;;  %v10164_v31 = vld [vmem:[%s10927_s1 + $0x2e0] sm:$0xff] }
 0x1ac   :  { %v6164_v25 = vadd.f32 %v6163_v60, %v6162_v54  ;;  %v6177_v16 = vrot.slane %v6176_v58, 1  ;;  %v10956_v24 = vcombine.low %v9900_v1, %v9913_v35  ;;  %v10957_v27 = vcombine.high %v9918_v13, %v9923_v51  ;;  %v331_v1 = vld [vmem:[%s10927_s1 + $0x9d0] sm:$0xff]  ;;  %v10046_v51 = vld [vmem:[%s10927_s1 + $0x8d8] sm:$0xff] }
 0x1ad   :  { %v7197_v23 = vcombine.high %v235_v19, %v267_v6  ;;  %v5581_v21 = vrot.slane %v5559_v18, %v8549_v37  ;;  %v5560_v42 = vcombine.low %v5107_v11, %v5114_v3  ;;  %v10958_v22 = vcombine.high %v9934_v9, %v9939_v2  ;;  %v10051_v9 = vld [vmem:[%s10927_s1 + $0x9d8] sm:$0xff]  ;;  %v10119_v10 = vld [vmem:[%s10927_s1 + $0xfd0] sm:$0xff]  ;;  %v10154_v18 = vld [vmem:[%s10927_s1 + $0xe8] sm:$0xff] }
 0x1ae   :  { %4259 = vmatpush1.bf16.msra.mxu1 %v10956_v24  ;;  %4217 = vmatprep.subr.bf16.mxu0 %v10957_v27  ;;  %v7199_v29 = vcombine.high %v236_v47, %v268_v53  ;;  %v6623_v35 = vcombine.low %v6157_v44, %v6164_v25  ;;  %v6178_v13 = vadd.f32 %v6177_v16, %v6176_v58  ;;  %v10143_v44 = vld [vmem:[%s10927_s1 + $0x1e0] sm:$0xff]  ;;  %v10159_v3 = vld [vmem:[%s10927_s1 + $0x1e8] sm:$0xff] }
 0x1af   :  { %4260 = vmatprep.subr.bf16.mxu1 %v10958_v22  ;;  %v5588_v2 = vrot.slane %v5560_v42, %v8549_v37  ;;  %4218 = vmatpush1.bf16.msra.mxu0 %v7132_v14  ;;  %v7196_v4 = vcombine.low %v235_v19, %v267_v6  ;;  %v7198_v7 = vcombine.low %v236_v47, %v268_v53  ;;  %v10133_v19 = vld [vmem:[%s10927_s1 + $0xfd8] sm:$0xff]  ;;  %v10138_v6 = vld [vmem:[%s10927_s1 + $0xe0] sm:$0xff]  ;;  %v10183_v27 = vld [vmem:[%s10927_s1 + $0x2e8] sm:$0xff] }
 0x1b0   :  { %v6645_v62 = vrot.slane %v6623_v35, %v8549_v37  ;;  %v6624_v28 = vcombine.low %v6171_v30, %v6178_v13  ;;  %4219 = vmatprep.subr.bf16.mxu0 %v7197_v23  ;;  %v7261_v63 = vcombine.high %v299_v26, %v331_v1  ;;  %v7263_v48 = vcombine.high %v10046_v51, %v10051_v9  ;;  %v10178_v24 = vld [vmem:[%s10927_s1 + $0x3e0] sm:$0xff]  ;;  %v10213_v35 = vld [vmem:[%s10927_s1 + $0x4e8] sm:$0xff] }
 0x1b1   :  { %v5590_v46 = vcombine.low %v5581_v21, %v5588_v2  ;;  %v7260_v52 = vcombine.low %v299_v26, %v331_v1  ;;  %v7262_v49 = vcombine.low %v10046_v51, %v10051_v9  ;;  %v7325_v5 = vcombine.high %v10057_v61, %v10062_v45  ;;  %v10199_v42 = vld [vmem:[%s10927_s1 + $0x4e0] sm:$0xff]  ;;  %v10218_v13 = vld [vmem:[%s10927_s1 + $0x5e8] sm:$0xff] }
 0x1b2   :  { %4261 = vmatpush1.bf16.msra.mxu1 %v7134_v57  ;;  %v6652_v8 = vrot.slane %v6624_v28, %v8549_v37  ;;  %v10959_v59 = vcombine.low %v9763_v43, %v9781_v20  ;;  %v7324_v50 = vcombine.low %v10057_v61, %v10062_v45  ;;  %v7326_v11 = vcombine.low %v10068_v56, %v10073_v41  ;;  %v10124_v43 = vld [vmem:[%s10927_s1 + $0xed8] sm:$0xff]  ;;  %v10204_v22 = vld [vmem:[%s10927_s1 + $0x5e0] sm:$0xff] }
 0x1b3   :  { %4262 = vmatprep.subr.bf16.mxu1 %v7199_v29  ;;  %v5604_v54 = vrot.slane %v5590_v46, %v8549_v37  ;;  %4220 = vmatpush1.bf16.msra.mxu0 %v7196_v4  ;;  %v7327_v32 = vcombine.high %v10068_v56, %v10073_v41  ;;  %v7388_v55 = vcombine.low %v10080_v36, %v10085_v34 }
 0x1b4   :  { %v5597_v39 = vrot.slane %v10959_v59, %v8549_v37  ;;  %v6654_v20 = vcombine.low %v6645_v62, %v6652_v8  ;;  %4221 = vmatprep.subr.bf16.mxu0 %v7261_v63  ;;  %v7389_v58 = vcombine.high %v10080_v36, %v10085_v34  ;;  %v7390_v47 = vcombine.low %v10095_v0, %v10100_v15 }
 0x1b5   :  { %v7391_v53 = vcombine.high %v10095_v0, %v10100_v15  ;;  %v10960_v14 = vcombine.low %v9784_v12, %v9809_v17  ;;  %v7452_v25 = vcombine.low %v10114_v40, %v10119_v10  ;;  %v7453_v16 = vcombine.high %v10114_v40, %v10119_v10  ;;  %v10188_v12 = vld [vmem:[%s10927_s1 + $0x3e8] sm:$0xff] }
 0x1b6   :  { %4263 = vmatpush1.bf16.msra.mxu1 %v7198_v7  ;;  %v5605_v60 = vcombine.low %v5597_v39, %v5604_v54  ;;  %v6668_v30 = vrot.slane %v6654_v20, %v8549_v37  ;;  %v7454_v17 = vcombine.low %v10124_v43, %v10133_v19  ;;  %v7455_v23 = vcombine.high %v10124_v43, %v10133_v19 }
 0x1b7   :  { %4264 = vmatprep.subr.bf16.mxu1 %v7263_v48  ;;  %v6661_v57 = vrot.slane %v10960_v14, %v8549_v37  ;;  %4222 = vmatpush1.bf16.msra.mxu0 %v7260_v52  ;;  %v7008_v21 = vcombine.low %v10138_v6, %v10143_v44  ;;  %v7009_v26 = vcombine.high %v10138_v6, %v10143_v44  ;;  %v237_v6 = vld [vmem:[%s10927_s1 + $0x6e0] sm:$0xff] }
 0x1b8   :  { %4223 = vmatprep.subr.bf16.mxu0 %v7325_v5  ;;  %v7010_v1 = vcombine.low %v10154_v18, %v10159_v3  ;;  %5869 = vst [vmem:[%s10930_s3 + $0x10] sm:$0xff] %v5605_v60  ;;  %v3645_v51 = vpop.f32.mrb[24].mxu0  ;;  %v7011_v9 = vcombine.high %v10154_v18, %v10159_v3  ;;  %v7072_v2 = vcombine.low %v10164_v31, %v10178_v24  ;;  %v3688_v45 = vpop.f32.mrb[24].mxu1  ;;  %v269_v44 = vld [vmem:[%s10927_s1 + $0x7e0] sm:$0xff] }
 0x1b9   :  { %v6669_v29 = vcombine.low %v6661_v57, %v6668_v30  ;;  %v7073_v4 = vcombine.high %v10164_v31, %v10178_v24  ;;  %v7074_v7 = vcombine.low %v10183_v27, %v10188_v12  ;;  %v5907_v61 = vmul.f32 %v3645_v51, %v3645_v51  ;;  %v3647_v62 = vpop.f32.mrb[25].mxu0  ;;  %v3690_v52 = vpop.f32.mrb[25].mxu1 }
 0x1ba   :  { %4265 = vmatpush1.bf16.msra.mxu1 %v7262_v49  ;;  %v7075_v28 = vcombine.high %v10183_v27, %v10188_v12  ;;  %v5909_v46 = vmul.f32 %v3688_v45, %v3688_v45  ;;  %v7540_v48 = vpack.c.bf16 %v3647_v62, %v3645_v51  ;;  %v5908_v8 = vmul.f32 %v3647_v62, %v3647_v62  ;;  %v3649_v49 = vpop.f32.mrb[26].mxu0  ;;  %v333_v27 = vld [vmem:[%s10927_s1 + $0x9e0] sm:$0xff] }
 0x1bb   :  { %4266 = vmatprep.subr.bf16.mxu1 %v7327_v32  ;;  %4224 = vmatpush1.bf16.msra.mxu0 %v7324_v50  ;;  %6933 = vst [vmem:[%s10931_s4 + $0x10] sm:$0xff] %v6669_v29  ;;  %v7541_v59 = vpack.c.bf16 %v3690_v52, %v3688_v45  ;;  %v5910_v39 = vmul.f32 %v3690_v52, %v3690_v52  ;;  %v3692_v32 = vpop.f32.mrb[26].mxu1  ;;  %v3651_v60 = vpop.f32.mrb[27].mxu0 }
 0x1bc   :  { %v5115_v54 = vadd.f32 %v3649_v49, %v3645_v51  ;;  %v5971_v20 = vmul.f32 %v3649_v49, %v3649_v49  ;;  %4867 = vst [vmem:[%s10929_s2 + $0x60] sm:$0xff] %v7540_v48  ;;  %v5129_v50 = vadd.f32 %v3692_v32, %v3688_v45  ;;  %v5973_v14 = vmul.f32 %v3692_v32, %v3692_v32  ;;  %v3694_v5 = vpop.f32.mrb[27].mxu1 }
 0x1bd   :  { %v7572_v57 = vpack.c.bf16 %v3651_v60, %v3649_v49  ;;  %v5122_v30 = vadd.f32 %v3651_v60, %v3647_v62  ;;  %4225 = vmatprep.subr.bf16.mxu0 %v7389_v58  ;;  %4868 = vst [vmem:[%s10929_s2 + $0x68] sm:$0xff] %v7541_v59  ;;  %v5972_v63 = vmul.f32 %v3651_v60, %v3651_v60 }
 0x1be   :  { %4267 = vmatpush1.bf16.msra.mxu1 %v7326_v11  ;;  %v5116_v29 = vrot.slane %v5115_v54, 4  ;;  %v6179_v51 = vadd.f32 %v5971_v20, %v5907_v61  ;;  %v7573_v56 = vpack.c.bf16 %v3694_v5, %v3692_v32  ;;  %v5130_v41 = vrot.slane %v5129_v50, 4 }
 0x1bf   :  { %4268 = vmatprep.subr.bf16.mxu1 %v7391_v53  ;;  %v6193_v11 = vadd.f32 %v5973_v14, %v5909_v46  ;;  %4899 = vst [vmem:[%s10929_s2 + $0x160] sm:$0xff] %v7572_v57  ;;  %v5123_v45 = vrot.slane %v5122_v30, 4  ;;  %v5136_v58 = vadd.f32 %v3694_v5, %v3690_v52  ;;  %4226 = vmatpush1.bf16.msra.mxu0 %v7388_v55 }
 0x1c0   :  { %v5117_v62 = vadd.f32 %v5116_v29, %v5115_v54  ;;  %v6180_v61 = vrot.slane %v6179_v51, 4  ;;  %v6186_v48 = vadd.f32 %v5972_v63, %v5908_v8  ;;  %4900 = vst [vmem:[%s10929_s2 + $0x168] sm:$0xff] %v7573_v56  ;;  %v5974_v53 = vmul.f32 %v3694_v5, %v3694_v5  ;;  %4227 = vmatprep.subr.bf16.mxu0 %v7453_v16 }
 0x1c1   :  { %v5131_v46 = vadd.f32 %v5130_v41, %v5129_v50  ;;  %v6194_v52 = vrot.slane %v6193_v11, 4  ;;  %v5124_v36 = vadd.f32 %v5123_v45, %v5122_v30  ;;  %v5137_v34 = vrot.slane %v5136_v58, 4 }
 0x1c2   :  { %4269 = vmatpush1.bf16.msra.mxu1 %v7390_v47  ;;  %v5118_v55 = vrot.slane %v5117_v62, 2  ;;  %v6181_v63 = vadd.f32 %v6180_v61, %v6179_v51  ;;  %v6187_v8 = vrot.slane %v6186_v48, 4  ;;  %v6200_v49 = vadd.f32 %v5974_v53, %v5910_v39 }
 0x1c3   :  { %4270 = vmatprep.subr.bf16.mxu1 %v7455_v23  ;;  %v5132_v5 = vrot.slane %v5131_v46, 2  ;;  %v6195_v59 = vadd.f32 %v6194_v52, %v6193_v11  ;;  %v5125_v0 = vrot.slane %v5124_v36, 2  ;;  %v5138_v15 = vadd.f32 %v5137_v34, %v5136_v58  ;;  %4228 = vmatpush1.bf16.msra.mxu0 %v7452_v25 }
 0x1c4   :  { %v5119_v47 = vadd.f32 %v5118_v55, %v5117_v62  ;;  %v6182_v16 = vrot.slane %v6181_v63, 2  ;;  %v6188_v54 = vadd.f32 %v6187_v8, %v6186_v48  ;;  %v6201_v20 = vrot.slane %v6200_v49, 4  ;;  %4299 = vmatprep.subr.bf16.mxu0 %v7009_v26 }
 0x1c5   :  { %v5133_v23 = vadd.f32 %v5132_v5, %v5131_v46  ;;  %v6196_v39 = vrot.slane %v6195_v59, 2  ;;  %v5126_v32 = vadd.f32 %v5125_v0, %v5124_v36  ;;  %v5139_v60 = vrot.slane %v5138_v15, 2  ;;  %v301_v36 = vld [vmem:[%s10927_s1 + $0x8e0] sm:$0xff] }
 0x1c6   :  { %4271 = vmatpush1.bf16.msra.mxu1 %v7454_v17  ;;  %v5120_v40 = vrot.slane %v5119_v47, 1  ;;  %v6183_v10 = vadd.f32 %v6182_v16, %v6181_v63  ;;  %v6189_v25 = vrot.slane %v6188_v54, 2  ;;  %v6202_v50 = vadd.f32 %v6201_v20, %v6200_v49  ;;  %4246 = vmatmul.mubr.bf16.vlgmr.msra.gmra.mrb[52].mxu0 %v9990_v33  ;;  %v10350_v49 = vld [vmem:[%s10927_s1 + $0xae0] sm:$0xff] }
 0x1c7   :  { %4342 = vmatprep.subr.bf16.mxu1 %v7011_v9  ;;  %v5134_v43 = vrot.slane %v5133_v23, 1  ;;  %v6197_v19 = vadd.f32 %v6196_v39, %v6195_v59  ;;  %v5127_v17 = vrot.slane %v5126_v32, 1  ;;  %v5140_v14 = vadd.f32 %v5139_v60, %v5138_v15  ;;  %4300 = vmatpush1.bf16.msra.mxu0 %v7008_v21  ;;  %v10357_v0 = vld [vmem:[%s10927_s1 + $0xbe0] sm:$0xff]  ;;  %v10362_v15 = vld [vmem:[%s10927_s1 + $0xae8] sm:$0xff] }
 0x1c8   :  { %v5121_v26 = vadd.f32 %v5120_v40, %v5119_v47  ;;  %v6184_v57 = vrot.slane %v6183_v10, 1  ;;  %v6190_v30 = vadd.f32 %v6189_v25, %v6188_v54  ;;  %v6203_v9 = vrot.slane %v6202_v50, 2  ;;  %4301 = vmatprep.subr.bf16.mxu0 %v7073_v4  ;;  %4331 = vmatprep.mubr.bf16.mxu0 %v10937_v38  ;;  %v270_v4 = vld [vmem:[%s10927_s1 + $0x7e8] sm:$0xff]  ;;  %v10375_v54 = vld [vmem:[%s10927_s1 + $0xce0] sm:$0xff] }
 0x1c9   :  { %4289 = vmatmul.mubr.bf16.vlgmr.msra.gmra.mrb[52].mxu1 %v9990_v33  ;;  %v5135_v29 = vadd.f32 %v5134_v43, %v5133_v23  ;;  %v6198_v51 = vrot.slane %v6197_v19, 1  ;;  %v5128_v56 = vadd.f32 %v5127_v17, %v5126_v32  ;;  %v5141_v41 = vrot.slane %v5140_v14, 1  ;;  %v10367_v47 = vld [vmem:[%s10927_s1 + $0xbe8] sm:$0xff]  ;;  %v10380_v20 = vld [vmem:[%s10927_s1 + $0xde0] sm:$0xff]  ;;  %v10419_v17 = vld [vmem:[%s10927_s1 + $0xf0] sm:$0xff] }
 0x1ca   :  { %4343 = vmatpush1.bf16.msra.mxu1 %v7010_v1  ;;  %v6185_v18 = vadd.f32 %v6184_v57, %v6183_v10  ;;  %v6191_v3 = vrot.slane %v6190_v30, 1  ;;  %v6204_v21 = vadd.f32 %v6203_v9, %v6202_v50  ;;  %v238_v1 = vld [vmem:[%s10927_s1 + $0x6e8] sm:$0xff]  ;;  %4374 = vmatprep.mubr.bf16.mxu1 %v10937_v38  ;;  %v7136_v45 = vcombine.low %v10199_v42, %v10204_v22  ;;  %v10395_v60 = vld [vmem:[%s10927_s1 + $0xee0] sm:$0xff]  ;;  %v10428_v57 = vld [vmem:[%s10927_s1 + $0x1f0] sm:$0xff] }
 0x1cb   :  { %4344 = vmatprep.subr.bf16.mxu1 %v7075_v28  ;;  %v5606_v28 = vcombine.low %v5121_v26, %v5128_v56  ;;  %v5142_v11 = vadd.f32 %v5141_v41, %v5140_v14  ;;  %4302 = vmatpush1.bf16.msra.mxu0 %v7072_v2  ;;  %v7138_v58 = vcombine.low %v10213_v35, %v10218_v13  ;;  %v10385_v23 = vld [vmem:[%s10927_s1 + $0xce8] sm:$0xff]  ;;  %v10400_v40 = vld [vmem:[%s10927_s1 + $0xfe0] sm:$0xff]  ;;  %v10438_v9 = vld [vmem:[%s10927_s1 + $0x1f8] sm:$0xff] }
 0x1cc   :  { %v6199_v62 = vadd.f32 %v6198_v51, %v6197_v19  ;;  %v6192_v61 = vadd.f32 %v6191_v3, %v6190_v30  ;;  %v6205_v48 = vrot.slane %v6204_v21, 1  ;;  %v10961_v53 = vcombine.high %v10199_v42, %v10204_v22  ;;  %v302_v22 = vld [vmem:[%s10927_s1 + $0x8e8] sm:$0xff]  ;;  %v10433_v30 = vld [vmem:[%s10927_s1 + $0xf8] sm:$0xff] }
 0x1cd   :  { %v7201_v46 = vcombine.high %v237_v6, %v269_v44  ;;  %v10324_v31 = vrot.slane %v5606_v28, %v8549_v37  ;;  %v5607_v24 = vcombine.low %v5135_v29, %v5142_v11  ;;  %v10962_v2 = vcombine.high %v10213_v35, %v10218_v13  ;;  %v334_v35 = vld [vmem:[%s10927_s1 + $0x9e8] sm:$0xff]  ;;  %v10474_v28 = vld [vmem:[%s10927_s1 + $0x3f8] sm:$0xff]  ;;  %v10479_v11 = vld [vmem:[%s10927_s1 + $0x4f0] sm:$0xff] }
 0x1ce   :  { %4345 = vmatpush1.bf16.msra.mxu1 %v7074_v7  ;;  %4303 = vmatprep.subr.bf16.mxu0 %v10961_v53  ;;  %v7203_v52 = vcombine.high %v238_v1, %v270_v4  ;;  %v6670_v12 = vcombine.low %v6185_v18, %v6192_v61  ;;  %v6206_v42 = vadd.f32 %v6205_v48, %v6204_v21  ;;  %v10390_v32 = vld [vmem:[%s10927_s1 + $0xde8] sm:$0xff]  ;;  %v10461_v18 = vld [vmem:[%s10927_s1 + $0x2f8] sm:$0xff] }
 0x1cf   :  { %4346 = vmatprep.subr.bf16.mxu1 %v10962_v2  ;;  %v10342_v13 = vrot.slane %v5607_v24, %v8549_v37  ;;  %4304 = vmatpush1.bf16.msra.mxu0 %v7136_v45  ;;  %v7200_v7 = vcombine.low %v237_v6, %v269_v44  ;;  %v7202_v34 = vcombine.low %v238_v1, %v270_v4  ;;  %v10409_v43 = vld [vmem:[%s10927_s1 + $0xee8] sm:$0xff]  ;;  %v10451_v6 = vld [vmem:[%s10927_s1 + $0x2f0] sm:$0xff]  ;;  %v10495_v48 = vld [vmem:[%s10927_s1 + $0x4f8] sm:$0xff] }
 0x1d0   :  { %v10345_v55 = vrot.slane %v6670_v12, %v8549_v37  ;;  %v6671_v63 = vcombine.low %v6199_v62, %v6206_v42  ;;  %4305 = vmatprep.subr.bf16.mxu0 %v7201_v46  ;;  %v7265_v8 = vcombine.high %v301_v36, %v333_v27  ;;  %v7267_v59 = vcombine.high %v302_v22, %v334_v35  ;;  %v10414_v19 = vld [vmem:[%s10927_s1 + $0xfe8] sm:$0xff]  ;;  %v10456_v44 = vld [vmem:[%s10927_s1 + $0x3f0] sm:$0xff]  ;;  %v10500_v53 = vld [vmem:[%s10927_s1 + $0x5f8] sm:$0xff] }
 0x1d1   :  { %v7264_v39 = vcombine.low %v301_v36, %v333_v27  ;;  %v7266_v25 = vcombine.low %v302_v22, %v334_v35  ;;  %v7329_v50 = vcombine.high %v10350_v49, %v10357_v0  ;;  %v7328_v14 = vcombine.low %v10350_v49, %v10357_v0  ;;  %v10484_v45 = vld [vmem:[%s10927_s1 + $0x5f0] sm:$0xff] }
 0x1d2   :  { %4347 = vmatpush1.bf16.msra.mxu1 %v7138_v58  ;;  %v10370_v16 = vrot.slane %v6671_v63, %v8549_v37  ;;  %v7331_v26 = vcombine.high %v10362_v15, %v10367_v47  ;;  %v7330_v29 = vcombine.low %v10362_v15, %v10367_v47  ;;  %v7392_v51 = vcombine.low %v10375_v54, %v10380_v20 }
 0x1d3   :  { %4348 = vmatprep.subr.bf16.mxu1 %v7203_v52  ;;  %4306 = vmatpush1.bf16.msra.mxu0 %v7200_v7  ;;  %v7393_v56 = vcombine.high %v10375_v54, %v10380_v20  ;;  %v7394_v41 = vcombine.low %v10385_v23, %v10390_v32  ;;  %v7395_v3 = vcombine.high %v10385_v23, %v10390_v32 }
 0x1d4   :  { %4307 = vmatprep.subr.bf16.mxu0 %v7265_v8  ;;  %v7456_v21 = vcombine.low %v10395_v60, %v10400_v40  ;;  %v7457_v1 = vcombine.high %v10395_v60, %v10400_v40  ;;  %v7458_v4 = vcombine.low %v10409_v43, %v10414_v19  ;;  %v7459_v58 = vcombine.high %v10409_v43, %v10414_v19 }
 0x1d5   :  { %v7012_v62 = vcombine.low %v10419_v17, %v10428_v57  ;;  %v7013_v61 = vcombine.high %v10419_v17, %v10428_v57  ;;  %v7014_v24 = vcombine.low %v10433_v30, %v10438_v9  ;;  %v7015_v2 = vcombine.high %v10433_v30, %v10438_v9  ;;  %v239_v57 = vld [vmem:[%s10927_s1 + $0x6f0] sm:$0xff] }
 0x1d6   :  { %4349 = vmatpush1.bf16.msra.mxu1 %v7202_v34  ;;  %v10964_v17 = vcombine.high %v10461_v18, %v10474_v28  ;;  %v271_v30 = vld [vmem:[%s10927_s1 + $0x7f0] sm:$0xff] }
 0x1d7   :  { %4350 = vmatprep.subr.bf16.mxu1 %v7267_v59  ;;  %4308 = vmatpush1.bf16.msra.mxu0 %v7264_v39 }
 0x1d8   :  { %4309 = vmatprep.subr.bf16.mxu0 %v7329_v50  ;;  %v3731_v46 = vpop.f32.mrb[28].mxu0 }
 0x1d9   :  { %v5911_v27 = vmul.f32 %v3731_v46, %v3731_v46  ;;  %v3774_v12 = vpop.f32.mrb[28].mxu1  ;;  %v3733_v42 = vpop.f32.mrb[29].mxu0 }
 0x1da   :  { %4351 = vmatpush1.bf16.msra.mxu1 %v7266_v25  ;;  %v5913_v34 = vmul.f32 %v3774_v12, %v3774_v12  ;;  %v7542_v63 = vpack.c.bf16 %v3733_v42, %v3731_v46  ;;  %v5912_v8 = vmul.f32 %v3733_v42, %v3733_v42  ;;  %v3776_v49 = vpop.f32.mrb[29].mxu1  ;;  %v3735_v59 = vpop.f32.mrb[30].mxu0 }
 0x1db   :  { %4352 = vmatprep.subr.bf16.mxu1 %v7331_v26  ;;  %4310 = vmatpush1.bf16.msra.mxu0 %v7328_v14  ;;  %v7543_v15 = vpack.c.bf16 %v3776_v49, %v3774_v12  ;;  %v5914_v47 = vmul.f32 %v3776_v49, %v3776_v49  ;;  %v5143_v39 = vadd.f32 %v3735_v59, %v3731_v46  ;;  %v3778_v50 = vpop.f32.mrb[30].mxu1  ;;  %v3737_v26 = vpop.f32.mrb[31].mxu0 }
 0x1dc   :  { %v5975_v25 = vmul.f32 %v3735_v59, %v3735_v59  ;;  %4869 = vst [vmem:[%s10929_s2 + $0x70] sm:$0xff] %v7542_v63  ;;  %v5157_v10 = vadd.f32 %v3778_v50, %v3774_v12  ;;  %v5977_v5 = vmul.f32 %v3778_v50, %v3778_v50  ;;  %v7574_v7 = vpack.c.bf16 %v3737_v26, %v3735_v59  ;;  %v3780_v52 = vpop.f32.mrb[31].mxu1 }
 0x1dd   :  { %v5150_v22 = vadd.f32 %v3737_v26, %v3733_v42  ;;  %4311 = vmatprep.subr.bf16.mxu0 %v7393_v56  ;;  %4870 = vst [vmem:[%s10929_s2 + $0x78] sm:$0xff] %v7543_v15  ;;  %v5144_v14 = vrot.slane %v5143_v39, 4  ;;  %v5976_v0 = vmul.f32 %v3737_v26, %v3737_v26  ;;  %v7575_v35 = vpack.c.bf16 %v3780_v52, %v3778_v50 }
 0x1de   :  { %4353 = vmatpush1.bf16.msra.mxu1 %v7330_v29  ;;  %v6207_v46 = vadd.f32 %v5975_v25, %v5911_v27  ;;  %v5158_v29 = vrot.slane %v5157_v10, 4  ;;  %v6221_v36 = vadd.f32 %v5977_v5, %v5913_v34  ;;  %4901 = vst [vmem:[%s10929_s2 + $0x170] sm:$0xff] %v7574_v7  ;;  %v5164_v63 = vadd.f32 %v3780_v52, %v3776_v49 }
 0x1df   :  { %4354 = vmatprep.subr.bf16.mxu1 %v7395_v3  ;;  %v5151_v12 = vrot.slane %v5150_v22, 4  ;;  %4312 = vmatpush1.bf16.msra.mxu0 %v7392_v51  ;;  %v5145_v56 = vadd.f32 %v5144_v14, %v5143_v39  ;;  %v6214_v59 = vadd.f32 %v5976_v0, %v5912_v8  ;;  %4902 = vst [vmem:[%s10929_s2 + $0x178] sm:$0xff] %v7575_v35 }
 0x1e0   :  { %v6208_v42 = vrot.slane %v6207_v46, 4  ;;  %v5978_v3 = vmul.f32 %v3780_v52, %v3780_v52  ;;  %4313 = vmatprep.subr.bf16.mxu0 %v7457_v1  ;;  %v5159_v5 = vadd.f32 %v5158_v29, %v5157_v10  ;;  %v6222_v27 = vrot.slane %v6221_v36, 4  ;;  %v240_v29 = vld [vmem:[%s10927_s1 + $0x6f8] sm:$0xff] }
 0x1e1   :  { %v5152_v7 = vadd.f32 %v5151_v12, %v5150_v22  ;;  %v5165_v34 = vrot.slane %v5164_v63, 4  ;;  %v5146_v54 = vrot.slane %v5145_v56, 2  ;;  %v6215_v51 = vrot.slane %v6214_v59, 4  ;;  %v272_v12 = vld [vmem:[%s10927_s1 + $0x7f8] sm:$0xff] }
 0x1e2   :  { %4355 = vmatpush1.bf16.msra.mxu1 %v7394_v41  ;;  %v6209_v20 = vadd.f32 %v6208_v42, %v6207_v46  ;;  %v6228_v49 = vadd.f32 %v5978_v3, %v5914_v47  ;;  %v5160_v8 = vrot.slane %v5159_v5, 2  ;;  %v6223_v0 = vadd.f32 %v6222_v27, %v6221_v36 }
 0x1e3   :  { %4356 = vmatprep.subr.bf16.mxu1 %v7459_v58  ;;  %v5153_v15 = vrot.slane %v5152_v7, 2  ;;  %v5166_v39 = vadd.f32 %v5165_v34, %v5164_v63  ;;  %4314 = vmatpush1.bf16.msra.mxu0 %v7456_v21  ;;  %v5147_v23 = vadd.f32 %v5146_v54, %v5145_v56  ;;  %v6216_v41 = vadd.f32 %v6215_v51, %v6214_v59 }
 0x1e4   :  { %v6210_v32 = vrot.slane %v6209_v20, 2  ;;  %v6229_v10 = vrot.slane %v6228_v49, 4  ;;  %4385 = vmatprep.subr.bf16.mxu0 %v7013_v61  ;;  %v5161_v1 = vadd.f32 %v5160_v8, %v5159_v5  ;;  %v6224_v58 = vrot.slane %v6223_v0, 2 }
 0x1e5   :  { %v5154_v52 = vadd.f32 %v5153_v15, %v5152_v7  ;;  %v5167_v36 = vrot.slane %v5166_v39, 2  ;;  %v5148_v60 = vrot.slane %v5147_v23, 1  ;;  %v6217_v21 = vrot.slane %v6216_v41, 2 }
 0x1e6   :  { %4357 = vmatpush1.bf16.msra.mxu1 %v7458_v4  ;;  %v6211_v40 = vadd.f32 %v6210_v32, %v6209_v20  ;;  %v6230_v22 = vadd.f32 %v6229_v10, %v6228_v49  ;;  %4332 = vmatmul.mubr.bf16.vlgmr.msra.gmra.mrb[56].mxu0 %v9990_v33  ;;  %v5162_v43 = vrot.slane %v5161_v1, 1  ;;  %v6225_v19 = vadd.f32 %v6224_v58, %v6223_v0  ;;  %v303_v49 = vld [vmem:[%s10927_s1 + $0x8f0] sm:$0xff] }
 0x1e7   :  { %4428 = vmatprep.subr.bf16.mxu1 %v7015_v2  ;;  %v5155_v4 = vrot.slane %v5154_v52, 1  ;;  %v5168_v35 = vadd.f32 %v5167_v36, %v5166_v39  ;;  %4386 = vmatpush1.bf16.msra.mxu0 %v7012_v62  ;;  %v5149_v61 = vadd.f32 %v5148_v60, %v5147_v23  ;;  %v6218_v25 = vadd.f32 %v6217_v21, %v6216_v41  ;;  %v367_v10 = vld [vmem:[%s10927_s1 + $0xaf0] sm:$0xff]  ;;  %v400_v36 = vld [vmem:[%s10927_s1 + $0xbf8] sm:$0xff] }
 0x1e8   :  { %v6212_v47 = vrot.slane %v6211_v40, 1  ;;  %v6231_v2 = vrot.slane %v6230_v22, 2  ;;  %v10963_v50 = vcombine.high %v10451_v6, %v10456_v44  ;;  %v5163_v26 = vadd.f32 %v5162_v43, %v5161_v1  ;;  %4417 = vmatprep.mubr.bf16.mxu0 %v10937_v38  ;;  %v399_v1 = vld [vmem:[%s10927_s1 + $0xbf0] sm:$0xff] }
 0x1e9   :  { %4375 = vmatmul.mubr.bf16.vlgmr.msra.gmra.mrb[56].mxu1 %v9990_v33  ;;  %v6226_v14 = vrot.slane %v6225_v19, 1  ;;  %v5156_v46 = vadd.f32 %v5155_v4, %v5154_v52  ;;  %v5169_v33 = vrot.slane %v5168_v35, 1  ;;  %v6219_v62 = vrot.slane %v6218_v25, 1  ;;  %v368_v52 = vld [vmem:[%s10927_s1 + $0xaf8] sm:$0xff] }
 0x1ea   :  { %4429 = vmatpush1.bf16.msra.mxu1 %v7014_v24  ;;  %4387 = vmatprep.subr.bf16.mxu0 %v10963_v50  ;;  %v6213_v9 = vadd.f32 %v6212_v47, %v6211_v40  ;;  %v6232_v24 = vadd.f32 %v6231_v2, %v6230_v22  ;;  %v10965_v42 = vcombine.low %v10451_v6, %v10456_v44  ;;  %v431_v47 = vld [vmem:[%s10927_s1 + $0xcf0] sm:$0xff] }
 0x1eb   :  { %4430 = vmatprep.subr.bf16.mxu1 %v10964_v17  ;;  %4460 = vmatprep.mubr.bf16.mxu1 %v10937_v38  ;;  %v5608_v63 = vcombine.low %v5149_v61, %v5156_v46  ;;  %v5170_v56 = vadd.f32 %v5169_v33, %v5168_v35  ;;  %v7140_v59 = vcombine.low %v10479_v11, %v10484_v45  ;;  %v10654_v46 = vld [vmem:[%s10927_s1 + $0xff0] sm:$0xff]  ;;  %v10664_v33 = vld [vmem:[%s10927_s1 + $0xff8] sm:$0xff] }
 0x1ec   :  { %4388 = vmatpush1.bf16.msra.mxu0 %v10965_v42  ;;  %v7142_v3 = vcombine.low %v10495_v48, %v10500_v53  ;;  %v6227_v5 = vadd.f32 %v6226_v14, %v6225_v19  ;;  %v6220_v27 = vadd.f32 %v6219_v62, %v6218_v25  ;;  %v6233_v7 = vrot.slane %v6232_v24, 1  ;;  %v10649_v14 = vld [vmem:[%s10927_s1 + $0xef0] sm:$0xff] }
 0x1ed   :  { %v10966_v34 = vcombine.low %v10461_v18, %v10474_v28  ;;  %v10967_v38 = vcombine.high %v10479_v11, %v10484_v45  ;;  %v7205_v54 = vcombine.high %v239_v57, %v271_v30  ;;  %v5630_v6 = vrot.slane %v5608_v63, %v8549_v37  ;;  %v335_v18 = vld [vmem:[%s10927_s1 + $0x9f0] sm:$0xff]  ;;  %v304_v45 = vld [vmem:[%s10927_s1 + $0x8f8] sm:$0xff] }
 0x1ee   :  { %v5609_v44 = vcombine.low %v5163_v26, %v5170_v56  ;;  %v10968_v20 = vcombine.high %v10495_v48, %v10500_v53  ;;  %v7207_v51 = vcombine.high %v240_v29, %v272_v12  ;;  %v6672_v28 = vcombine.low %v6213_v9, %v6220_v27  ;;  %v336_v48 = vld [vmem:[%s10927_s1 + $0x9f8] sm:$0xff] }
 0x1ef   :  { %4431 = vmatpush1.bf16.msra.mxu1 %v10966_v34  ;;  %4389 = vmatprep.subr.bf16.mxu0 %v10967_v38  ;;  %v6234_v11 = vadd.f32 %v6233_v7, %v6232_v24  ;;  %v7204_v8 = vcombine.low %v239_v57, %v271_v30  ;;  %v7206_v0 = vcombine.low %v240_v29, %v272_v12  ;;  %v10644_v26 = vld [vmem:[%s10927_s1 + $0xdf8] sm:$0xff] }
 0x1f0   :  { %4432 = vmatprep.subr.bf16.mxu1 %v10968_v20  ;;  %v5637_v53 = vrot.slane %v5609_v44, %v8549_v37  ;;  %4390 = vmatpush1.bf16.msra.mxu0 %v7140_v59  ;;  %v6694_v15 = vrot.slane %v6672_v28, %v8549_v37  ;;  %v7269_v23 = vcombine.high %v303_v49, %v335_v18 }
 0x1f1   :  { %v6673_v39 = vcombine.low %v6227_v5, %v6234_v11  ;;  %4391 = vmatprep.subr.bf16.mxu0 %v7205_v54  ;;  %v7271_v41 = vcombine.high %v304_v45, %v336_v48  ;;  %v10969_v60 = vcombine.low %v10324_v31, %v10342_v13  ;;  %v7268_v22 = vcombine.low %v303_v49, %v335_v18  ;;  %v463_v31 = vld [vmem:[%s10927_s1 + $0xdf0] sm:$0xff]  ;;  %v10634_v13 = vld [vmem:[%s10927_s1 + $0xcf8] sm:$0xff] }
 0x1f2   :  { %v5639_v32 = vcombine.low %v5630_v6, %v5637_v53  ;;  %v7270_v19 = vcombine.low %v304_v45, %v336_v48  ;;  %v7333_v4 = vcombine.high %v367_v10, %v399_v1  ;;  %v7335_v61 = vcombine.high %v368_v52, %v400_v36 }
 0x1f3   :  { %4433 = vmatpush1.bf16.msra.mxu1 %v7142_v3  ;;  %v6701_v58 = vrot.slane %v6673_v39, %v8549_v37  ;;  %v5646_v40 = vrot.slane %v10969_v60, %v8549_v37  ;;  %v10970_v25 = vcombine.low %v10345_v55, %v10370_v16  ;;  %v7332_v55 = vcombine.low %v367_v10, %v399_v1  ;;  %v10659_v16 = vld [vmem:[%s10927_s1 + $0xef8] sm:$0xff] }
 0x1f4   :  { %4434 = vmatprep.subr.bf16.mxu1 %v7207_v51  ;;  %v5653_v21 = vrot.slane %v5639_v32, %v8549_v37  ;;  %4392 = vmatpush1.bf16.msra.mxu0 %v7204_v8  ;;  %v7334_v57 = vcombine.low %v368_v52, %v400_v36  ;;  %v7396_v30 = vcombine.low %v431_v47, %v463_v31 }
 0x1f5   :  { %v6703_v43 = vcombine.low %v6694_v15, %v6701_v58  ;;  %4393 = vmatprep.subr.bf16.mxu0 %v7269_v23  ;;  %v6710_v2 = vrot.slane %v10970_v25, %v8549_v37  ;;  %v7397_v62 = vcombine.high %v431_v47, %v463_v31  ;;  %v7398_v24 = vcombine.low %v10634_v13, %v10644_v26 }
 0x1f6   :  { %v5654_v35 = vcombine.low %v5646_v40, %v5653_v21  ;;  %v7399_v29 = vcombine.high %v10634_v13, %v10644_v26  ;;  %v7460_v12 = vcombine.low %v10649_v14, %v10654_v46  ;;  %v7461_v59 = vcombine.high %v10649_v14, %v10654_v46 }
 0x1f7   :  { %4435 = vmatpush1.bf16.msra.mxu1 %v7206_v0  ;;  %v6717_v50 = vrot.slane %v6703_v43, %v8549_v37  ;;  %v7462_v3 = vcombine.low %v10659_v16, %v10664_v33  ;;  %v7463_v54 = vcombine.high %v10659_v16, %v10664_v33 }
 0x1f8   :  { %4436 = vmatprep.subr.bf16.mxu1 %v7271_v41  ;;  %4394 = vmatpush1.bf16.msra.mxu0 %v7268_v22  ;;  %5870 = vst [vmem:[%s10930_s3 + $0x18] sm:$0xff] %v5654_v35  ;;  %v3817_v9 = vpop.f32.mrb[32].mxu0 }
 0x1f9   :  { %v6718_v17 = vcombine.low %v6710_v2, %v6717_v50  ;;  %4395 = vmatprep.subr.bf16.mxu0 %v7333_v4  ;;  %v5915_v63 = vmul.f32 %v3817_v9, %v3817_v9  ;;  %v3860_v56 = vpop.f32.mrb[32].mxu1  ;;  %v3819_v42 = vpop.f32.mrb[33].mxu0 }
 0x1fa   :  { %v5917_v5 = vmul.f32 %v3860_v56, %v3860_v56  ;;  %v7544_v27 = vpack.c.bf16 %v3819_v42, %v3817_v9  ;;  %v5916_v7 = vmul.f32 %v3819_v42, %v3819_v42  ;;  %v3862_v34 = vpop.f32.mrb[33].mxu1  ;;  %v3821_v38 = vpop.f32.mrb[34].mxu0 }
 0x1fb   :  { %4437 = vmatpush1.bf16.msra.mxu1 %v7270_v19  ;;  %6934 = vst [vmem:[%s10931_s4 + $0x18] sm:$0xff] %v6718_v17  ;;  %v7545_v6 = vpack.c.bf16 %v3862_v34, %v3860_v56  ;;  %v5918_v44 = vmul.f32 %v3862_v34, %v3862_v34  ;;  %v5171_v20 = vadd.f32 %v3821_v38, %v3817_v9  ;;  %v3864_v49 = vpop.f32.mrb[34].mxu1  ;;  %v3823_v18 = vpop.f32.mrb[35].mxu0  ;;  %v7599_v9 = vld [vmem:[%s10928_s0] sm:$0xff]  }
 0x1fc   :  { %4438 = vmatprep.subr.bf16.mxu1 %v7335_v61  ;;  %4396 = vmatpush1.bf16.msra.mxu0 %v7332_v55  ;;  %v5979_v51 = vmul.f32 %v3821_v38, %v3821_v38  ;;  %4871 = vst [vmem:[%s10929_s2 + $0x80] sm:$0xff] %v7544_v27  ;;  %v5185_v28 = vadd.f32 %v3864_v49, %v3860_v56  ;;  %v3866_v53 = vpop.f32.mrb[35].mxu1 }
 0x1fd   :  { %v5981_v11 = vmul.f32 %v3864_v49, %v3864_v49  ;;  %v7576_v45 = vpack.c.bf16 %v3823_v18, %v3821_v38  ;;  %v5178_v48 = vadd.f32 %v3823_v18, %v3819_v42  ;;  %4397 = vmatprep.subr.bf16.mxu0 %v7397_v62  ;;  %4872 = vst [vmem:[%s10929_s2 + $0x88] sm:$0xff] %v7545_v6  ;;  %v5172_v8 = vrot.slane %v5171_v20, 4 }
 0x1fe   :  { %v6235_v0 = vadd.f32 %v5979_v51, %v5915_v63  ;;  %v5980_v15 = vmul.f32 %v3823_v18, %v3823_v18  ;;  %v7577_v39 = vpack.c.bf16 %v3866_v53, %v3864_v49  ;;  %v5186_v23 = vrot.slane %v5185_v28, 4 }
 0x1ff   :  { %4439 = vmatpush1.bf16.msra.mxu1 %v7334_v57  ;;  %v6249_v32 = vadd.f32 %v5981_v11, %v5917_v5  ;;  %4903 = vst [vmem:[%s10929_s2 + $0x180] sm:$0xff] %v7576_v45  ;;  %v5179_v41 = vrot.slane %v5178_v48, 4  ;;  %v5192_v10 = vadd.f32 %v3866_v53, %v3862_v34  ;;  %v5173_v1 = vadd.f32 %v5172_v8, %v5171_v20 }
 0x200   :  { %4440 = vmatprep.subr.bf16.mxu1 %v7399_v29  ;;  %4398 = vmatpush1.bf16.msra.mxu0 %v7396_v30  ;;  %v6236_v58 = vrot.slane %v6235_v0, 4  ;;  %v6242_v52 = vadd.f32 %v5980_v15, %v5916_v7  ;;  %4904 = vst [vmem:[%s10929_s2 + $0x188] sm:$0xff] %v7577_v39  ;;  %v5982_v36 = vmul.f32 %v3866_v53, %v3866_v53 }
 0x201   :  { %4399 = vmatprep.subr.bf16.mxu0 %v7461_v59  ;;  %v5187_v60 = vadd.f32 %v5186_v23, %v5185_v28  ;;  %v6250_v40 = vrot.slane %v6249_v32, 4  ;;  %v5180_v21 = vadd.f32 %v5179_v41, %v5178_v48  ;;  %v5193_v22 = vrot.slane %v5192_v10, 4 }
 0x202   :  { %v5174_v43 = vrot.slane %v5173_v1, 2  ;;  %v6237_v19 = vadd.f32 %v6236_v58, %v6235_v0  ;;  %v6243_v4 = vrot.slane %v6242_v52, 4  ;;  %v6256_v35 = vadd.f32 %v5982_v36, %v5918_v44 }
 0x203   :  { %4441 = vmatpush1.bf16.msra.mxu1 %v7398_v24  ;;  %v5188_v61 = vrot.slane %v5187_v60, 2  ;;  %v6251_v47 = vadd.f32 %v6250_v40, %v6249_v32  ;;  %v5181_v31 = vrot.slane %v5180_v21, 2  ;;  %v5194_v13 = vadd.f32 %v5193_v22, %v5192_v10 }
 0x204   :  { %4442 = vmatprep.subr.bf16.mxu1 %v7463_v54  ;;  %4400 = vmatpush1.bf16.msra.mxu0 %v7460_v12  ;;  %v5175_v25 = vadd.f32 %v5174_v43, %v5173_v1  ;;  %v6238_v2 = vrot.slane %v6237_v19, 2  ;;  %v6244_v50 = vadd.f32 %v6243_v4, %v6242_v52  ;;  %v6257_v26 = vrot.slane %v6256_v35, 4 }
 0x205   :  { %v5189_v14 = vadd.f32 %v5188_v61, %v5187_v60  ;;  %v6252_v46 = vrot.slane %v6251_v47, 2  ;;  %v5182_v55 = vadd.f32 %v5181_v31, %v5180_v21  ;;  %v5195_v16 = vrot.slane %v5194_v13, 2 }
 0x206   :  { %v5176_v33 = vrot.slane %v5175_v25, 1  ;;  %v6239_v17 = vadd.f32 %v6238_v2, %v6237_v19  ;;  %v6245_v57 = vrot.slane %v6244_v50, 2  ;;  %v6258_v30 = vadd.f32 %v6257_v26, %v6256_v35 }
 0x207   :  { %4443 = vmatpush1.bf16.msra.mxu1 %v7462_v3  ;;  %4418 = vmatmul.mubr.bf16.vlgmr.msra.gmra.mrb[60].mxu0 %v7599_v9  ;;  %v5190_v62 = vrot.slane %v5189_v14, 1  ;;  %v6253_v24 = vadd.f32 %v6252_v46, %v6251_v47  ;;  %v5183_v29 = vrot.slane %v5182_v55, 1  ;;  %v5196_v12 = vadd.f32 %v5195_v16, %v5194_v13 }
 0x208   :  { %v5177_v63 = vadd.f32 %v5176_v33, %v5175_v25  ;;  %v6240_v56 = vrot.slane %v6239_v17, 1  ;;  %v6246_v42 = vadd.f32 %v6245_v57, %v6244_v50  ;;  %v6259_v59 = vrot.slane %v6258_v30, 2 }
 0x209   :  { %v5191_v3 = vadd.f32 %v5190_v62, %v5189_v14  ;;  %v6254_v5 = vrot.slane %v6253_v24, 1  ;;  %v5184_v27 = vadd.f32 %v5183_v29, %v5182_v55  ;;  %v5197_v7 = vrot.slane %v5196_v12, 1 }
 0x20a   :  { %4461 = vmatmul.mubr.bf16.vlgmr.msra.gmra.mrb[60].mxu1 %v7599_v9  ;;  %v6241_v34 = vadd.f32 %v6240_v56, %v6239_v17  ;;  %v6247_v38 = vrot.slane %v6246_v42, 1  ;;  %v6260_v54 = vadd.f32 %v6259_v59, %v6258_v30 }
 0x20b   :  { %v5655_v6 = vcombine.low %v5177_v63, %v5184_v27  ;;  %v5198_v44 = vadd.f32 %v5197_v7, %v5196_v12  ;;  %v6255_v20 = vadd.f32 %v6254_v5, %v6253_v24 }
 0x20c   :  { %v6248_v51 = vadd.f32 %v6247_v38, %v6246_v42  ;;  %v6261_v49 = vrot.slane %v6260_v54, 1 }
 0x20d   :  { %v10700_v18 = vrot.slane %v5655_v6, %v8549_v37  ;;  %v5656_v28 = vcombine.low %v5191_v3, %v5198_v44 }
 0x20e   :  { %v6719_v11 = vcombine.low %v6241_v34, %v6248_v51  ;;  %v6262_v45 = vadd.f32 %v6261_v49, %v6260_v54 }
 0x20f   :  { %v10703_v48 = vrot.slane %v5656_v28, %v8549_v37 }
 0x210   :  { %v10706_v53 = vrot.slane %v6719_v11, %v8549_v37  ;;  %v6720_v8 = vcombine.low %v6255_v20, %v6262_v45 }
 0x211   :  { %v5687_v0 = vcombine.low %v10700_v18, %v10703_v48 }
 0x212   :  { %v10711_v15 = vrot.slane %v6720_v8, %v8549_v37 }
 0x214   :  { %v6751_v39 = vcombine.low %v10706_v53, %v10711_v15 }
 0x219   :  { %v3903_v23 = vpop.f32.mrb[36].mxu0 }
 0x21a   :  { %v5919_v32 = vmul.f32 %v3903_v23, %v3903_v23  ;;  %v3905_v10 = vpop.f32.mrb[37].mxu0 }
 0x21b   :  { %v3946_v41 = vpop.f32.mrb[36].mxu1  ;;  %v7546_v58 = vpack.c.bf16 %v3905_v10, %v3903_v23  ;;  %v5920_v52 = vmul.f32 %v3905_v10, %v3905_v10  ;;  %v3907_v60 = vpop.f32.mrb[38].mxu0 }
 0x21c   :  { %v5921_v1 = vmul.f32 %v3946_v41, %v3946_v41  ;;  %v3948_v36 = vpop.f32.mrb[37].mxu1  ;;  %v5199_v22 = vadd.f32 %v3907_v60, %v3903_v23  ;;  %v5983_v43 = vmul.f32 %v3907_v60, %v3907_v60  ;;  %v3909_v4 = vpop.f32.mrb[39].mxu0 }
 0x21d   :  { %v7547_v40 = vpack.c.bf16 %v3948_v36, %v3946_v41  ;;  %v5922_v21 = vmul.f32 %v3948_v36, %v3948_v36  ;;  %v3950_v19 = vpop.f32.mrb[38].mxu1  ;;  %4873 = vst [vmem:[%s10929_s2 + $0x90] sm:$0xff] %v7546_v58  ;;  %v7578_v47 = vpack.c.bf16 %v3909_v4, %v3907_v60  ;;  %v5206_v31 = vadd.f32 %v3909_v4, %v3905_v10 }
 0x21e   :  { %v5213_v35 = vadd.f32 %v3950_v19, %v3946_v41  ;;  %v5985_v61 = vmul.f32 %v3950_v19, %v3950_v19  ;;  %v3952_v13 = vpop.f32.mrb[39].mxu1  ;;  %v5200_v25 = vrot.slane %v5199_v22, 4  ;;  %v6263_v2 = vadd.f32 %v5983_v43, %v5919_v32 }
 0x21f   :  { %4874 = vst [vmem:[%s10929_s2 + $0x98] sm:$0xff] %v7547_v40  ;;  %v5984_v50 = vmul.f32 %v3909_v4, %v3909_v4  ;;  %v7579_v26 = vpack.c.bf16 %v3952_v13, %v3950_v19  ;;  %4905 = vst [vmem:[%s10929_s2 + $0x190] sm:$0xff] %v7578_v47  ;;  %v5207_v55 = vrot.slane %v5206_v31, 4  ;;  %v5220_v16 = vadd.f32 %v3952_v13, %v3948_v36 }
 0x220   :  { %v5214_v14 = vrot.slane %v5213_v35, 4  ;;  %v6277_v46 = vadd.f32 %v5985_v61, %v5921_v1  ;;  %v5201_v33 = vadd.f32 %v5200_v25, %v5199_v22  ;;  %v6264_v17 = vrot.slane %v6263_v2, 4 }
 0x221   :  { %v6270_v57 = vadd.f32 %v5984_v50, %v5920_v52  ;;  %4906 = vst [vmem:[%s10929_s2 + $0x198] sm:$0xff] %v7579_v26  ;;  %v5986_v30 = vmul.f32 %v3952_v13, %v3952_v13  ;;  %v5208_v24 = vadd.f32 %v5207_v55, %v5206_v31  ;;  %v5221_v29 = vrot.slane %v5220_v16, 4 }
 0x222   :  { %v5215_v9 = vadd.f32 %v5214_v14, %v5213_v35  ;;  %v6278_v62 = vrot.slane %v6277_v46, 4  ;;  %v5202_v12 = vrot.slane %v5201_v33, 2  ;;  %v6265_v63 = vadd.f32 %v6264_v17, %v6263_v2 }
 0x223   :  { %v6271_v56 = vrot.slane %v6270_v57, 4  ;;  %v6284_v42 = vadd.f32 %v5986_v30, %v5922_v21  ;;  %v5209_v5 = vrot.slane %v5208_v24, 2  ;;  %v5222_v27 = vadd.f32 %v5221_v29, %v5220_v16 }
 0x224   :  { %v5216_v59 = vrot.slane %v5215_v9, 2  ;;  %v6279_v3 = vadd.f32 %v6278_v62, %v6277_v46  ;;  %v5203_v7 = vadd.f32 %v5202_v12, %v5201_v33  ;;  %v6266_v34 = vrot.slane %v6265_v63, 2 }
 0x225   :  { %v6272_v38 = vadd.f32 %v6271_v56, %v6270_v57  ;;  %v6285_v54 = vrot.slane %v6284_v42, 4  ;;  %v5210_v20 = vadd.f32 %v5209_v5, %v5208_v24  ;;  %v5223_v51 = vrot.slane %v5222_v27, 2 }
 0x226   :  { %v5217_v6 = vadd.f32 %v5216_v59, %v5215_v9  ;;  %v6280_v44 = vrot.slane %v6279_v3, 2  ;;  %v5204_v49 = vrot.slane %v5203_v7, 1  ;;  %v6267_v28 = vadd.f32 %v6266_v34, %v6265_v63 }
 0x227   :  { %v6273_v11 = vrot.slane %v6272_v38, 2  ;;  %v6286_v45 = vadd.f32 %v6285_v54, %v6284_v42  ;;  %v5211_v32 = vrot.slane %v5210_v20, 1  ;;  %v5224_v41 = vadd.f32 %v5223_v51, %v5222_v27 }
 0x228   :  { %v5218_v8 = vrot.slane %v5217_v6, 1  ;;  %v6281_v23 = vadd.f32 %v6280_v44, %v6279_v3  ;;  %v5205_v10 = vadd.f32 %v5204_v49, %v5203_v7  ;;  %v6268_v1 = vrot.slane %v6267_v28, 1 }
 0x229   :  { %v6274_v58 = vadd.f32 %v6273_v11, %v6272_v38  ;;  %v6287_v52 = vrot.slane %v6286_v45, 2  ;;  %v5212_v40 = vadd.f32 %v5211_v32, %v5210_v20  ;;  %v5225_v21 = vrot.slane %v5224_v41, 1 }
 0x22a   :  { %v5219_v36 = vadd.f32 %v5218_v8, %v5217_v6  ;;  %v6282_v60 = vrot.slane %v6281_v23, 1  ;;  %v6269_v22 = vadd.f32 %v6268_v1, %v6267_v28  ;;  %v5695_v33 = vrot.slane %v5687_v0, %v8549_v37 }
 0x22b   :  { %v6275_v43 = vrot.slane %v6274_v58, 1  ;;  %v6288_v19 = vadd.f32 %v6287_v52, %v6286_v45  ;;  %v5657_v4 = vcombine.low %v5205_v10, %v5212_v40  ;;  %v5226_v35 = vadd.f32 %v5225_v21, %v5224_v41 }
 0x22c   :  { %v6283_v61 = vadd.f32 %v6282_v60, %v6281_v23  ;;  %v6759_v9 = vrot.slane %v6751_v39, %v8549_v37 }
 0x22d   :  { %v6276_v47 = vadd.f32 %v6275_v43, %v6274_v58  ;;  %v6289_v31 = vrot.slane %v6288_v19, 1  ;;  %v5679_v13 = vrot.slane %v5657_v4, %v8549_v37  ;;  %v5658_v25 = vcombine.low %v5219_v36, %v5226_v35 }
 0x22f   :  { %v6721_v2 = vcombine.low %v6269_v22, %v6276_v47  ;;  %v6290_v50 = vadd.f32 %v6289_v31, %v6288_v19  ;;  %v5686_v26 = vrot.slane %v5658_v25, %v8549_v37 }
 0x231   :  { %v6743_v14 = vrot.slane %v6721_v2, %v8549_v37  ;;  %v6722_v46 = vcombine.low %v6283_v61, %v6290_v50  ;;  %v5688_v55 = vcombine.low %v5679_v13, %v5686_v26 }
 0x233   :  { %v6750_v16 = vrot.slane %v6722_v46, %v8549_v37  ;;  %v5702_v17 = vrot.slane %v5688_v55, %v8549_v37 }
 0x235   :  { %v6752_v57 = vcombine.low %v6743_v14, %v6750_v16  ;;  %v5703_v30 = vcombine.low %v5695_v33, %v5702_v17 }
 0x237   :  { %v6766_v62 = vrot.slane %v6752_v57, %v8549_v37  ;;  %5871 = vst [vmem:[%s10930_s3 + $0x20] sm:$0xff] %v5703_v30 }
 0x239   :  { %v6767_v24 = vcombine.low %v6759_v9, %v6766_v62  ;;  %v3989_v29 = vpop.f32.mrb[40].mxu0 }
 0x23a   :  { %v5923_v12 = vmul.f32 %v3989_v29, %v3989_v29  ;;  %v3991_v48 = vpop.f32.mrb[41].mxu0 }
 0x23b   :  { %v4032_v18 = vpop.f32.mrb[40].mxu1  ;;  %v7548_v63 = vpack.c.bf16 %v3991_v48, %v3989_v29  ;;  %v5924_v56 = vmul.f32 %v3991_v48, %v3991_v48  ;;  %v3993_v59 = vpop.f32.mrb[42].mxu0  ;;  %6935 = vst [vmem:[%s10931_s4 + $0x20] sm:$0xff] %v6767_v24 }
 0x23c   :  { %v5925_v0 = vmul.f32 %v4032_v18, %v4032_v18  ;;  %v4034_v42 = vpop.f32.mrb[41].mxu1  ;;  %v5227_v39 = vadd.f32 %v3993_v59, %v3989_v29  ;;  %v5987_v3 = vmul.f32 %v3993_v59, %v3993_v59  ;;  %v3995_v27 = vpop.f32.mrb[43].mxu0 }
 0x23d   :  { %v7549_v53 = vpack.c.bf16 %v4034_v42, %v4032_v18  ;;  %v5926_v15 = vmul.f32 %v4034_v42, %v4034_v42  ;;  %v4036_v5 = vpop.f32.mrb[42].mxu1  ;;  %4875 = vst [vmem:[%s10929_s2 + $0xa0] sm:$0xff] %v7548_v63  ;;  %v7580_v38 = vpack.c.bf16 %v3995_v27, %v3993_v59  ;;  %v5234_v54 = vadd.f32 %v3995_v27, %v3991_v48 }
 0x23e   :  { %v5241_v7 = vadd.f32 %v4036_v5, %v4032_v18  ;;  %v5989_v34 = vmul.f32 %v4036_v5, %v4036_v5  ;;  %v4038_v6 = vpop.f32.mrb[43].mxu1  ;;  %v5228_v44 = vrot.slane %v5227_v39, 4  ;;  %v6291_v20 = vadd.f32 %v5987_v3, %v5923_v12 }
 0x23f   :  { %4876 = vst [vmem:[%s10929_s2 + $0xa8] sm:$0xff] %v7549_v53  ;;  %v5988_v51 = vmul.f32 %v3995_v27, %v3995_v27  ;;  %v7581_v49 = vpack.c.bf16 %v4038_v6, %v4036_v5  ;;  %4907 = vst [vmem:[%s10929_s2 + $0x1a0] sm:$0xff] %v7580_v38  ;;  %v5235_v45 = vrot.slane %v5234_v54, 4  ;;  %v5248_v8 = vadd.f32 %v4038_v6, %v4034_v42 }
 0x240   :  { %v5242_v28 = vrot.slane %v5241_v7, 4  ;;  %v6305_v11 = vadd.f32 %v5989_v34, %v5925_v0  ;;  %v5229_v23 = vadd.f32 %v5228_v44, %v5227_v39  ;;  %v6292_v32 = vrot.slane %v6291_v20, 4 }
 0x241   :  { %v6298_v41 = vadd.f32 %v5988_v51, %v5924_v56  ;;  %4908 = vst [vmem:[%s10929_s2 + $0x1a8] sm:$0xff] %v7581_v49  ;;  %v5990_v10 = vmul.f32 %v4038_v6, %v4038_v6  ;;  %v5236_v52 = vadd.f32 %v5235_v45, %v5234_v54  ;;  %v5249_v36 = vrot.slane %v5248_v8, 4 }
 0x242   :  { %v5243_v1 = vadd.f32 %v5242_v28, %v5241_v7  ;;  %v6306_v58 = vrot.slane %v6305_v11, 4  ;;  %v5230_v60 = vrot.slane %v5229_v23, 2  ;;  %v6293_v40 = vadd.f32 %v6292_v32, %v6291_v20 }
 0x243   :  { %v6299_v21 = vrot.slane %v6298_v41, 4  ;;  %v6312_v22 = vadd.f32 %v5990_v10, %v5926_v15  ;;  %v5237_v4 = vrot.slane %v5236_v52, 2  ;;  %v5250_v35 = vadd.f32 %v5249_v36, %v5248_v8 }
 0x244   :  { %v5244_v43 = vrot.slane %v5243_v1, 2  ;;  %v6307_v19 = vadd.f32 %v6306_v58, %v6305_v11  ;;  %v5231_v61 = vadd.f32 %v5230_v60, %v5229_v23  ;;  %v6294_v47 = vrot.slane %v6293_v40, 2 }
 0x245   :  { %v6300_v31 = vadd.f32 %v6299_v21, %v6298_v41  ;;  %v6313_v13 = vrot.slane %v6312_v22, 4  ;;  %v5238_v50 = vadd.f32 %v5237_v4, %v5236_v52  ;;  %v5251_v26 = vrot.slane %v5250_v35, 2 }
 0x246   :  { %v5245_v25 = vadd.f32 %v5244_v43, %v5243_v1  ;;  %v6308_v2 = vrot.slane %v6307_v19, 2  ;;  %v5232_v14 = vrot.slane %v5231_v61, 1  ;;  %v6295_v46 = vadd.f32 %v6294_v47, %v6293_v40 }
 0x247   :  { %v6301_v55 = vrot.slane %v6300_v31, 2  ;;  %v6314_v16 = vadd.f32 %v6313_v13, %v6312_v22  ;;  %v5239_v57 = vrot.slane %v5238_v50, 1  ;;  %v5252_v30 = vadd.f32 %v5251_v26, %v5250_v35 }
 0x248   :  { %v5246_v33 = vrot.slane %v5245_v25, 1  ;;  %v6309_v17 = vadd.f32 %v6308_v2, %v6307_v19  ;;  %v5233_v9 = vadd.f32 %v5232_v14, %v5231_v61  ;;  %v6296_v62 = vrot.slane %v6295_v46, 1 }
 0x249   :  { %v6302_v24 = vadd.f32 %v6301_v55, %v6300_v31  ;;  %v6315_v29 = vrot.slane %v6314_v16, 2  ;;  %v5240_v48 = vadd.f32 %v5239_v57, %v5238_v50  ;;  %v5253_v0 = vrot.slane %v5252_v30, 1 }
 0x24a   :  { %v5247_v12 = vadd.f32 %v5246_v33, %v5245_v25  ;;  %v6310_v18 = vrot.slane %v6309_v17, 1  ;;  %v6297_v63 = vadd.f32 %v6296_v62, %v6295_v46 }
 0x24b   :  { %v6303_v56 = vrot.slane %v6302_v24, 1  ;;  %v6316_v42 = vadd.f32 %v6315_v29, %v6314_v16  ;;  %v5704_v59 = vcombine.low %v5233_v9, %v5240_v48  ;;  %v5254_v53 = vadd.f32 %v5253_v0, %v5252_v30 }
 0x24c   :  { %v6311_v15 = vadd.f32 %v6310_v18, %v6309_v17 }
 0x24d   :  { %v6304_v39 = vadd.f32 %v6303_v56, %v6302_v24  ;;  %v6317_v3 = vrot.slane %v6316_v42, 1  ;;  %v10760_v5 = vrot.slane %v5704_v59, %v8549_v37  ;;  %v5705_v27 = vcombine.low %v5247_v12, %v5254_v53 }
 0x24f   :  { %v6768_v7 = vcombine.low %v6297_v63, %v6304_v39  ;;  %v6318_v34 = vadd.f32 %v6317_v3, %v6316_v42  ;;  %v10763_v38 = vrot.slane %v5705_v27, %v8549_v37 }
 0x251   :  { %v10766_v54 = vrot.slane %v6768_v7, %v8549_v37  ;;  %v6769_v6 = vcombine.low %v6311_v15, %v6318_v34  ;;  %v5736_v44 = vcombine.low %v10760_v5, %v10763_v38 }
 0x253   :  { %v10771_v20 = vrot.slane %v6769_v6, %v8549_v37 }
 0x255   :  { %v6800_v51 = vcombine.low %v10766_v54, %v10771_v20 }
 0x259   :  { %v4075_v49 = vpop.f32.mrb[44].mxu0 }
 0x25a   :  { %v5927_v28 = vmul.f32 %v4075_v49, %v4075_v49  ;;  %v4077_v45 = vpop.f32.mrb[45].mxu0 }
 0x25b   :  { %v7550_v23 = vpack.c.bf16 %v4077_v45, %v4075_v49  ;;  %v5928_v32 = vmul.f32 %v4077_v45, %v4077_v45  ;;  %v4079_v10 = vpop.f32.mrb[46].mxu0 }
 0x25c   :  { %v4118_v11 = vpop.f32.mrb[44].mxu1  ;;  %v5255_v52 = vadd.f32 %v4079_v10, %v4075_v49  ;;  %v5991_v36 = vmul.f32 %v4079_v10, %v4079_v10  ;;  %v4081_v40 = vpop.f32.mrb[47].mxu0 }
 0x25d   :  { %v5929_v8 = vmul.f32 %v4118_v11, %v4118_v11  ;;  %v4120_v41 = vpop.f32.mrb[45].mxu1  ;;  %4877 = vst [vmem:[%s10929_s2 + $0xb0] sm:$0xff] %v7550_v23  ;;  %v7582_v43 = vpack.c.bf16 %v4081_v40, %v4079_v10  ;;  %v5262_v19 = vadd.f32 %v4081_v40, %v4077_v45  ;;  %v5992_v47 = vmul.f32 %v4081_v40, %v4081_v40 }
 0x25e   :  { %v7551_v1 = vpack.c.bf16 %v4120_v41, %v4118_v11  ;;  %v5930_v58 = vmul.f32 %v4120_v41, %v4120_v41  ;;  %v4122_v60 = vpop.f32.mrb[46].mxu1  ;;  %v5256_v35 = vrot.slane %v5255_v52, 4  ;;  %v6319_v61 = vadd.f32 %v5991_v36, %v5927_v28 }
 0x25f   :  { %v5269_v21 = vadd.f32 %v4122_v60, %v4118_v11  ;;  %v5993_v22 = vmul.f32 %v4122_v60, %v4122_v60  ;;  %v4124_v4 = vpop.f32.mrb[47].mxu1  ;;  %4909 = vst [vmem:[%s10929_s2 + $0x1b0] sm:$0xff] %v7582_v43  ;;  %v5263_v2 = vrot.slane %v5262_v19, 4  ;;  %v6326_v46 = vadd.f32 %v5992_v47, %v5928_v32 }
 0x260   :  { %4878 = vst [vmem:[%s10929_s2 + $0xb8] sm:$0xff] %v7551_v1  ;;  %v7583_v31 = vpack.c.bf16 %v4124_v4, %v4122_v60  ;;  %v5276_v50 = vadd.f32 %v4124_v4, %v4120_v41  ;;  %v5257_v26 = vadd.f32 %v5256_v35, %v5255_v52  ;;  %v6320_v14 = vrot.slane %v6319_v61, 4 }
 0x261   :  { %v5270_v13 = vrot.slane %v5269_v21, 4  ;;  %v6333_v25 = vadd.f32 %v5993_v22, %v5929_v8  ;;  %v5994_v55 = vmul.f32 %v4124_v4, %v4124_v4  ;;  %v5264_v17 = vadd.f32 %v5263_v2, %v5262_v19 }
 0x262   :  { %4910 = vst [vmem:[%s10929_s2 + $0x1b8] sm:$0xff] %v7583_v31  ;;  %v5277_v57 = vrot.slane %v5276_v50, 4  ;;  %v5258_v30 = vrot.slane %v5257_v26, 2  ;;  %v6321_v9 = vadd.f32 %v6320_v14, %v6319_v61  ;;  %v6327_v62 = vrot.slane %v6326_v46, 4 }
 0x263   :  { %v5271_v16 = vadd.f32 %v5270_v13, %v5269_v21  ;;  %v6334_v33 = vrot.slane %v6333_v25, 4  ;;  %v6340_v24 = vadd.f32 %v5994_v55, %v5930_v58  ;;  %v5265_v18 = vrot.slane %v5264_v17, 2 }
 0x264   :  { %v5278_v48 = vadd.f32 %v5277_v57, %v5276_v50  ;;  %v5259_v0 = vadd.f32 %v5258_v30, %v5257_v26  ;;  %v6322_v63 = vrot.slane %v6321_v9, 2  ;;  %v6328_v56 = vadd.f32 %v6327_v62, %v6326_v46 }
 0x265   :  { %v5272_v29 = vrot.slane %v5271_v16, 2  ;;  %v6335_v12 = vadd.f32 %v6334_v33, %v6333_v25  ;;  %v6341_v42 = vrot.slane %v6340_v24, 4  ;;  %v5266_v15 = vadd.f32 %v5265_v18, %v5264_v17 }
 0x266   :  { %v5279_v39 = vrot.slane %v5278_v48, 2  ;;  %v5260_v3 = vrot.slane %v5259_v0, 1  ;;  %v6323_v27 = vadd.f32 %v6322_v63, %v6321_v9  ;;  %v6329_v7 = vrot.slane %v6328_v56, 2 }
 0x267   :  { %v5273_v59 = vadd.f32 %v5272_v29, %v5271_v16  ;;  %v6336_v53 = vrot.slane %v6335_v12, 2  ;;  %v6342_v34 = vadd.f32 %v6341_v42, %v6340_v24  ;;  %v5267_v28 = vrot.slane %v5266_v15, 1 }
 0x268   :  { %v5280_v11 = vadd.f32 %v5279_v39, %v5278_v48  ;;  %v5261_v45 = vadd.f32 %v5260_v3, %v5259_v0  ;;  %v6324_v8 = vrot.slane %v6323_v27, 1  ;;  %v6330_v23 = vadd.f32 %v6329_v7, %v6328_v56 }
 0x269   :  { %v5274_v6 = vrot.slane %v5273_v59, 1  ;;  %v6337_v49 = vadd.f32 %v6336_v53, %v6335_v12  ;;  %v6343_v32 = vrot.slane %v6342_v34, 2  ;;  %v5268_v1 = vadd.f32 %v5267_v28, %v5266_v15 }
 0x26a   :  { %v5281_v58 = vrot.slane %v5280_v11, 1  ;;  %v6325_v52 = vadd.f32 %v6324_v8, %v6323_v27  ;;  %v6331_v36 = vrot.slane %v6330_v23, 1  ;;  %v5744_v26 = vrot.slane %v5736_v44, %v8549_v37 }
 0x26b   :  { %v5275_v41 = vadd.f32 %v5274_v6, %v5273_v59  ;;  %v6338_v10 = vrot.slane %v6337_v49, 1  ;;  %v6344_v60 = vadd.f32 %v6343_v32, %v6342_v34  ;;  %v5706_v40 = vcombine.low %v5261_v45, %v5268_v1 }
 0x26c   :  { %v5282_v21 = vadd.f32 %v5281_v58, %v5280_v11  ;;  %v6332_v43 = vadd.f32 %v6331_v36, %v6330_v23  ;;  %v6808_v16 = vrot.slane %v6800_v51, %v8549_v37 }
 0x26d   :  { %v6339_v22 = vadd.f32 %v6338_v10, %v6337_v49  ;;  %v6345_v19 = vrot.slane %v6344_v60, 1  ;;  %v5728_v4 = vrot.slane %v5706_v40, %v8549_v37 }
 0x26e   :  { %v5707_v35 = vcombine.low %v5275_v41, %v5282_v21  ;;  %v6770_v61 = vcombine.low %v6325_v52, %v6332_v43 }
 0x26f   :  { %v6346_v47 = vadd.f32 %v6345_v19, %v6344_v60 }
 0x270   :  { %v5735_v31 = vrot.slane %v5707_v35, %v8549_v37  ;;  %v6792_v13 = vrot.slane %v6770_v61, %v8549_v37 }
 0x271   :  { %v6771_v25 = vcombine.low %v6339_v22, %v6346_v47 }
 0x272   :  { %v5737_v2 = vcombine.low %v5728_v4, %v5735_v31 }
 0x273   :  { %v6799_v50 = vrot.slane %v6771_v25, %v8549_v37 }
 0x274   :  { %v5751_v14 = vrot.slane %v5737_v2, %v8549_v37 }
 0x275   :  { %v6801_v46 = vcombine.low %v6792_v13, %v6799_v50 }
 0x276   :  { %v5752_v55 = vcombine.low %v5744_v26, %v5751_v14 }
 0x277   :  { %v6815_v33 = vrot.slane %v6801_v46, %v8549_v37 }
 0x278   :  { %5872 = vst [vmem:[%s10930_s3 + $0x28] sm:$0xff] %v5752_v55 }
 0x279   :  { %v6816_v17 = vcombine.low %v6808_v16, %v6815_v33  ;;  %v4161_v57 = vpop.f32.mrb[48].mxu0 }
 0x27a   :  { %v5931_v30 = vmul.f32 %v4161_v57, %v4161_v57  ;;  %v4163_v38 = vpop.f32.mrb[49].mxu0 }
 0x27b   :  { %v7552_v9 = vpack.c.bf16 %v4163_v38, %v4161_v57  ;;  %v5932_v62 = vmul.f32 %v4163_v38, %v4163_v38  ;;  %v4165_v29 = vpop.f32.mrb[50].mxu0  ;;  %6936 = vst [vmem:[%s10931_s4 + $0x28] sm:$0xff] %v6816_v17 }
 0x27c   :  { %v4204_v5 = vpop.f32.mrb[48].mxu1  ;;  %v5283_v51 = vadd.f32 %v4165_v29, %v4161_v57  ;;  %v5995_v12 = vmul.f32 %v4165_v29, %v4165_v29  ;;  %v4167_v48 = vpop.f32.mrb[51].mxu0 }
 0x27d   :  { %v5933_v44 = vmul.f32 %v4204_v5, %v4204_v5  ;;  %v4206_v24 = vpop.f32.mrb[49].mxu1  ;;  %4879 = vst [vmem:[%s10929_s2 + $0xc0] sm:$0xff] %v7552_v9  ;;  %v7584_v56 = vpack.c.bf16 %v4167_v48, %v4165_v29  ;;  %v5290_v42 = vadd.f32 %v4167_v48, %v4163_v38  ;;  %v5996_v39 = vmul.f32 %v4167_v48, %v4167_v48 }
 0x27e   :  { %v7553_v54 = vpack.c.bf16 %v4206_v24, %v4204_v5  ;;  %v5934_v20 = vmul.f32 %v4206_v24, %v4206_v24  ;;  %v4208_v18 = vpop.f32.mrb[50].mxu1  ;;  %v5284_v53 = vrot.slane %v5283_v51, 4  ;;  %v6347_v15 = vadd.f32 %v5995_v12, %v5931_v30 }
 0x27f   :  { %v5297_v0 = vadd.f32 %v4208_v18, %v4204_v5  ;;  %v5997_v63 = vmul.f32 %v4208_v18, %v4208_v18  ;;  %v4210_v59 = vpop.f32.mrb[51].mxu1  ;;  %4911 = vst [vmem:[%s10929_s2 + $0x1c0] sm:$0xff] %v7584_v56  ;;  %v5291_v34 = vrot.slane %v5290_v42, 4  ;;  %v6354_v11 = vadd.f32 %v5996_v39, %v5932_v62 }
 0x280   :  { %4880 = vst [vmem:[%s10929_s2 + $0xc8] sm:$0xff] %v7553_v54  ;;  %v7585_v3 = vpack.c.bf16 %v4210_v59, %v4208_v18  ;;  %v5304_v6 = vadd.f32 %v4210_v59, %v4206_v24  ;;  %v5285_v49 = vadd.f32 %v5284_v53, %v5283_v51  ;;  %v6348_v28 = vrot.slane %v6347_v15, 4 }
 0x281   :  { %v5298_v27 = vrot.slane %v5297_v0, 4  ;;  %v6361_v7 = vadd.f32 %v5997_v63, %v5933_v44  ;;  %v5998_v45 = vmul.f32 %v4210_v59, %v4210_v59  ;;  %v5292_v32 = vadd.f32 %v5291_v34, %v5290_v42 }
 0x282   :  { %4912 = vst [vmem:[%s10929_s2 + $0x1c8] sm:$0xff] %v7585_v3  ;;  %v5305_v41 = vrot.slane %v5304_v6, 4  ;;  %v5286_v10 = vrot.slane %v5285_v49, 2  ;;  %v6349_v1 = vadd.f32 %v6348_v28, %v6347_v15  ;;  %v6355_v58 = vrot.slane %v6354_v11, 4 }
 0x283   :  { %v5299_v8 = vadd.f32 %v5298_v27, %v5297_v0  ;;  %v6362_v23 = vrot.slane %v6361_v7, 4  ;;  %v6368_v52 = vadd.f32 %v5998_v45, %v5934_v20  ;;  %v5293_v40 = vrot.slane %v5292_v32, 2 }
 0x284   :  { %v5306_v21 = vadd.f32 %v5305_v41, %v5304_v6  ;;  %v5287_v22 = vadd.f32 %v5286_v10, %v5285_v49  ;;  %v6350_v43 = vrot.slane %v6349_v1, 2  ;;  %v6356_v19 = vadd.f32 %v6355_v58, %v6354_v11 }
 0x285   :  { %v5300_v36 = vrot.slane %v5299_v8, 2  ;;  %v6363_v60 = vadd.f32 %v6362_v23, %v6361_v7  ;;  %v6369_v4 = vrot.slane %v6368_v52, 4  ;;  %v5294_v47 = vadd.f32 %v5293_v40, %v5292_v32 }
 0x286   :  { %v5307_v31 = vrot.slane %v5306_v21, 2  ;;  %v5288_v13 = vrot.slane %v5287_v22, 1  ;;  %v6351_v25 = vadd.f32 %v6350_v43, %v6349_v1  ;;  %v6357_v2 = vrot.slane %v6356_v19, 2 }
 0x287   :  { %v5301_v35 = vadd.f32 %v5300_v36, %v5299_v8  ;;  %v6364_v61 = vrot.slane %v6363_v60, 2  ;;  %v6370_v50 = vadd.f32 %v6369_v4, %v6368_v52  ;;  %v5295_v46 = vrot.slane %v5294_v47, 1 }
 0x288   :  { %v5308_v55 = vadd.f32 %v5307_v31, %v5306_v21  ;;  %v5289_v16 = vadd.f32 %v5288_v13, %v5287_v22  ;;  %v6352_v33 = vrot.slane %v6351_v25, 1  ;;  %v6358_v17 = vadd.f32 %v6357_v2, %v6356_v19 }
 0x289   :  { %v5302_v26 = vrot.slane %v5301_v35, 1  ;;  %v6365_v14 = vadd.f32 %v6364_v61, %v6363_v60  ;;  %v6371_v57 = vrot.slane %v6370_v50, 2  ;;  %v5296_v38 = vadd.f32 %v5295_v46, %v5294_v47 }
 0x28a   :  { %v5309_v44 = vrot.slane %v5308_v55, 1  ;;  %v6353_v9 = vadd.f32 %v6352_v33, %v6351_v25  ;;  %v6359_v62 = vrot.slane %v6358_v17, 1 }
 0x28b   :  { %v5303_v30 = vadd.f32 %v5302_v26, %v5301_v35  ;;  %v6366_v5 = vrot.slane %v6365_v14, 1  ;;  %v6372_v24 = vadd.f32 %v6371_v57, %v6370_v50  ;;  %v5753_v29 = vcombine.low %v5289_v16, %v5296_v38 }
 0x28c   :  { %v5310_v54 = vadd.f32 %v5309_v44, %v5308_v55  ;;  %v6360_v51 = vadd.f32 %v6359_v62, %v6358_v17 }
 0x28d   :  { %v6367_v20 = vadd.f32 %v6366_v5, %v6365_v14  ;;  %v6373_v12 = vrot.slane %v6372_v24, 1  ;;  %v10820_v18 = vrot.slane %v5753_v29, %v8549_v37 }
 0x28e   :  { %v5754_v48 = vcombine.low %v5303_v30, %v5310_v54  ;;  %v6817_v0 = vcombine.low %v6353_v9, %v6360_v51 }
 0x28f   :  { %v6374_v63 = vadd.f32 %v6373_v12, %v6372_v24 }
 0x290   :  { %v10823_v56 = vrot.slane %v5754_v48, %v8549_v37  ;;  %v10826_v42 = vrot.slane %v6817_v0, %v8549_v37 }
 0x291   :  { %v6818_v59 = vcombine.low %v6367_v20, %v6374_v63 }
 0x292   :  { %v5785_v53 = vcombine.low %v10820_v18, %v10823_v56 }
 0x293   :  { %v10831_v15 = vrot.slane %v6818_v59, %v8549_v37 }
 0x295   :  { %v6849_v39 = vcombine.low %v10826_v42, %v10831_v15 }
 0x299   :  { %v4247_v3 = vpop.f32.mrb[52].mxu0 }
 0x29a   :  { %v5935_v27 = vmul.f32 %v4247_v3, %v4247_v3  ;;  %v4249_v34 = vpop.f32.mrb[53].mxu0 }
 0x29b   :  { %v7554_v49 = vpack.c.bf16 %v4249_v34, %v4247_v3  ;;  %v5936_v28 = vmul.f32 %v4249_v34, %v4249_v34  ;;  %v4251_v45 = vpop.f32.mrb[54].mxu0 }
 0x29c   :  { %v4290_v7 = vpop.f32.mrb[52].mxu1  ;;  %v5311_v32 = vadd.f32 %v4251_v45, %v4247_v3  ;;  %v5999_v41 = vmul.f32 %v4251_v45, %v4251_v45  ;;  %v4253_v1 = vpop.f32.mrb[55].mxu0 }
 0x29d   :  { %v5937_v6 = vmul.f32 %v4290_v7, %v4290_v7  ;;  %v4292_v11 = vpop.f32.mrb[53].mxu1  ;;  %4881 = vst [vmem:[%s10929_s2 + $0xd0] sm:$0xff] %v7554_v49  ;;  %v7586_v36 = vpack.c.bf16 %v4253_v1, %v4251_v45  ;;  %v5318_v60 = vadd.f32 %v4253_v1, %v4249_v34  ;;  %v6000_v43 = vmul.f32 %v4253_v1, %v4253_v1 }
 0x29e   :  { %v7555_v8 = vpack.c.bf16 %v4292_v11, %v4290_v7  ;;  %v5938_v23 = vmul.f32 %v4292_v11, %v4292_v11  ;;  %v4294_v10 = vpop.f32.mrb[54].mxu1  ;;  %v5312_v21 = vrot.slane %v5311_v32, 4  ;;  %v6375_v22 = vadd.f32 %v5999_v41, %v5935_v27 }
 0x29f   :  { %v5325_v58 = vadd.f32 %v4294_v10, %v4290_v7  ;;  %v6001_v52 = vmul.f32 %v4294_v10, %v4294_v10  ;;  %v4296_v40 = vpop.f32.mrb[55].mxu1  ;;  %4913 = vst [vmem:[%s10929_s2 + $0x1d0] sm:$0xff] %v7586_v36  ;;  %v5319_v61 = vrot.slane %v5318_v60, 4  ;;  %v6382_v25 = vadd.f32 %v6000_v43, %v5936_v28 }
 0x2a0   :  { %4882 = vst [vmem:[%s10929_s2 + $0xd8] sm:$0xff] %v7555_v8  ;;  %v7587_v19 = vpack.c.bf16 %v4296_v40, %v4294_v10  ;;  %v5332_v47 = vadd.f32 %v4296_v40, %v4292_v11  ;;  %v5313_v31 = vadd.f32 %v5312_v21, %v5311_v32  ;;  %v6376_v13 = vrot.slane %v6375_v22, 4 }
 0x2a1   :  { %v5326_v4 = vrot.slane %v5325_v58, 4  ;;  %v6389_v35 = vadd.f32 %v6001_v52, %v5937_v6  ;;  %v6002_v2 = vmul.f32 %v4296_v40, %v4296_v40  ;;  %v5320_v14 = vadd.f32 %v5319_v61, %v5318_v60 }
 0x2a2   :  { %4914 = vst [vmem:[%s10929_s2 + $0x1d8] sm:$0xff] %v7587_v19  ;;  %v5333_v46 = vrot.slane %v5332_v47, 4  ;;  %v5314_v55 = vrot.slane %v5313_v31, 2  ;;  %v6377_v16 = vadd.f32 %v6376_v13, %v6375_v22  ;;  %v6383_v33 = vrot.slane %v6382_v25, 4 }
 0x2a3   :  { %v5327_v50 = vadd.f32 %v5326_v4, %v5325_v58  ;;  %v6390_v26 = vrot.slane %v6389_v35, 4  ;;  %v6396_v17 = vadd.f32 %v6002_v2, %v5938_v23  ;;  %v5321_v5 = vrot.slane %v5320_v14, 2 }
 0x2a4   :  { %v5334_v38 = vadd.f32 %v5333_v46, %v5332_v47  ;;  %v5315_v44 = vadd.f32 %v5314_v55, %v5313_v31  ;;  %v6378_v9 = vrot.slane %v6377_v16, 2  ;;  %v6384_v62 = vadd.f32 %v6383_v33, %v6382_v25 }
 0x2a5   :  { %v5328_v57 = vrot.slane %v5327_v50, 2  ;;  %v6391_v30 = vadd.f32 %v6390_v26, %v6389_v35  ;;  %v6397_v24 = vrot.slane %v6396_v17, 4  ;;  %v5322_v20 = vadd.f32 %v5321_v5, %v5320_v14 }
 0x2a6   :  { %v5335_v51 = vrot.slane %v5334_v38, 2  ;;  %v5316_v12 = vrot.slane %v5315_v44, 1  ;;  %v6379_v48 = vadd.f32 %v6378_v9, %v6377_v16  ;;  %v6385_v0 = vrot.slane %v6384_v62, 2 }
 0x2a7   :  { %v5329_v29 = vadd.f32 %v5328_v57, %v5327_v50  ;;  %v6392_v54 = vrot.slane %v6391_v30, 2  ;;  %v6398_v63 = vadd.f32 %v6397_v24, %v6396_v17  ;;  %v5323_v27 = vrot.slane %v5322_v20, 1 }
 0x2a8   :  { %v5336_v7 = vadd.f32 %v5335_v51, %v5334_v38  ;;  %v5317_v34 = vadd.f32 %v5316_v12, %v5315_v44  ;;  %v6380_v6 = vrot.slane %v6379_v48, 1  ;;  %v6386_v49 = vadd.f32 %v6385_v0, %v6384_v62 }
 0x2a9   :  { %v5330_v59 = vrot.slane %v5329_v29, 1  ;;  %v6393_v3 = vadd.f32 %v6392_v54, %v6391_v30  ;;  %v6399_v28 = vrot.slane %v6398_v63, 2  ;;  %v5324_v8 = vadd.f32 %v5323_v27, %v5322_v20 }
 0x2aa   :  { %v5337_v23 = vrot.slane %v5336_v7, 1  ;;  %v6381_v32 = vadd.f32 %v6380_v6, %v6379_v48  ;;  %v6387_v41 = vrot.slane %v6386_v49, 1  ;;  %v5793_v31 = vrot.slane %v5785_v53, %v8549_v37 }
 0x2ab   :  { %v5331_v11 = vadd.f32 %v5330_v59, %v5329_v29  ;;  %v6394_v45 = vrot.slane %v6393_v3, 1  ;;  %v6400_v10 = vadd.f32 %v6399_v28, %v6398_v63  ;;  %v5755_v1 = vcombine.low %v5317_v34, %v5324_v8 }
 0x2ac   :  { %v5338_v58 = vadd.f32 %v5337_v23, %v5336_v7  ;;  %v6388_v36 = vadd.f32 %v6387_v41, %v6386_v49  ;;  %v6857_v50 = vrot.slane %v6849_v39, %v8549_v37 }
 0x2ad   :  { %v6395_v52 = vadd.f32 %v6394_v45, %v6393_v3  ;;  %v6401_v60 = vrot.slane %v6400_v10, 1  ;;  %v5777_v40 = vrot.slane %v5755_v1, %v8549_v37 }
 0x2ae   :  { %v5756_v21 = vcombine.low %v5331_v11, %v5338_v58  ;;  %v6819_v22 = vcombine.low %v6381_v32, %v6388_v36 }
 0x2af   :  { %v6402_v43 = vadd.f32 %v6401_v60, %v6400_v10 }
 0x2b0   :  { %v5784_v19 = vrot.slane %v5756_v21, %v8549_v37  ;;  %v6841_v4 = vrot.slane %v6819_v22, %v8549_v37 }
 0x2b1   :  { %v6820_v35 = vcombine.low %v6395_v52, %v6402_v43 }
 0x2b2   :  { %v5786_v61 = vcombine.low %v5777_v40, %v5784_v19 }
 0x2b3   :  { %v6848_v47 = vrot.slane %v6820_v35, %v8549_v37 }
 0x2b4   :  { %v5800_v13 = vrot.slane %v5786_v61, %v8549_v37 }
 0x2b5   :  { %v6850_v25 = vcombine.low %v6841_v4, %v6848_v47 }
 0x2b6   :  { %v5801_v2 = vcombine.low %v5793_v31, %v5800_v13 }
 0x2b7   :  { %v6864_v26 = vrot.slane %v6850_v25, %v8549_v37 }
 0x2b8   :  { %5873 = vst [vmem:[%s10930_s3 + $0x30] sm:$0xff] %v5801_v2 }
 0x2b9   :  { %v6865_v14 = vcombine.low %v6857_v50, %v6864_v26  ;;  %v4333_v46 = vpop.f32.mrb[56].mxu0 }
 0x2ba   :  { %v5939_v55 = vmul.f32 %v4333_v46, %v4333_v46  ;;  %v4335_v56 = vpop.f32.mrb[57].mxu0 }
 0x2bb   :  { %v7556_v16 = vpack.c.bf16 %v4335_v56, %v4333_v46  ;;  %v5940_v33 = vmul.f32 %v4335_v56, %v4335_v56  ;;  %v4337_v57 = vpop.f32.mrb[58].mxu0  ;;  %6937 = vst [vmem:[%s10931_s4 + $0x30] sm:$0xff] %v6865_v14 }
 0x2bc   :  { %v4376_v18 = vpop.f32.mrb[56].mxu1  ;;  %v5339_v39 = vadd.f32 %v4337_v57, %v4333_v46  ;;  %v6003_v30 = vmul.f32 %v4337_v57, %v4337_v57  ;;  %v4339_v38 = vpop.f32.mrb[59].mxu0 }
 0x2bd   :  { %v5941_v53 = vmul.f32 %v4376_v18, %v4376_v18  ;;  %v4378_v17 = vpop.f32.mrb[57].mxu1  ;;  %4883 = vst [vmem:[%s10929_s2 + $0xe0] sm:$0xff] %v7556_v16  ;;  %v7588_v62 = vpack.c.bf16 %v4339_v38, %v4337_v57  ;;  %v5346_v24 = vadd.f32 %v4339_v38, %v4335_v56  ;;  %v6004_v51 = vmul.f32 %v4339_v38, %v4339_v38 }
 0x2be   :  { %v7557_v42 = vpack.c.bf16 %v4378_v17, %v4376_v18  ;;  %v5942_v15 = vmul.f32 %v4378_v17, %v4378_v17  ;;  %v4380_v5 = vpop.f32.mrb[58].mxu1  ;;  %v5340_v54 = vrot.slane %v5339_v39, 4  ;;  %v6403_v20 = vadd.f32 %v6003_v30, %v5939_v55 }
 0x2bf   :  { %v5353_v44 = vadd.f32 %v4380_v5, %v4376_v18  ;;  %v6005_v9 = vmul.f32 %v4380_v5, %v4380_v5  ;;  %v4382_v29 = vpop.f32.mrb[59].mxu1  ;;  %4915 = vst [vmem:[%s10929_s2 + $0x1e0] sm:$0xff] %v7588_v62  ;;  %v5347_v63 = vrot.slane %v5346_v24, 4  ;;  %v6410_v7 = vadd.f32 %v6004_v51, %v5940_v33 }
 0x2c0   :  { %4884 = vst [vmem:[%s10929_s2 + $0xe8] sm:$0xff] %v7557_v42  ;;  %v7589_v12 = vpack.c.bf16 %v4382_v29, %v4380_v5  ;;  %v5360_v59 = vadd.f32 %v4382_v29, %v4378_v17  ;;  %v5341_v3 = vadd.f32 %v5340_v54, %v5339_v39  ;;  %v6404_v27 = vrot.slane %v6403_v20, 4 }
 0x2c1   :  { %v5354_v48 = vrot.slane %v5353_v44, 4  ;;  %v6417_v0 = vadd.f32 %v6005_v9, %v5941_v53  ;;  %v6006_v34 = vmul.f32 %v4382_v29, %v4382_v29  ;;  %v5348_v28 = vadd.f32 %v5347_v63, %v5346_v24 }
 0x2c2   :  { %4916 = vst [vmem:[%s10929_s2 + $0x1e8] sm:$0xff] %v7589_v12  ;;  %v5361_v11 = vrot.slane %v5360_v59, 4  ;;  %v5342_v45 = vrot.slane %v5341_v3, 2  ;;  %v6405_v8 = vadd.f32 %v6404_v27, %v6403_v20  ;;  %v6411_v23 = vrot.slane %v6410_v7, 4 }
 0x2c3   :  { %v5355_v6 = vadd.f32 %v5354_v48, %v5353_v44  ;;  %v6418_v49 = vrot.slane %v6417_v0, 4  ;;  %v6424_v32 = vadd.f32 %v6006_v34, %v5942_v15  ;;  %v5349_v1 = vrot.slane %v5348_v28, 2 }
 0x2c4   :  { %v5362_v58 = vadd.f32 %v5361_v11, %v5360_v59  ;;  %v5343_v52 = vadd.f32 %v5342_v45, %v5341_v3  ;;  %v6406_v36 = vrot.slane %v6405_v8, 2  ;;  %v6412_v60 = vadd.f32 %v6411_v23, %v6410_v7 }
 0x2c5   :  { %v5356_v41 = vrot.slane %v5355_v6, 2  ;;  %v6419_v10 = vadd.f32 %v6418_v49, %v6417_v0  ;;  %v6425_v40 = vrot.slane %v6424_v32, 4  ;;  %v5350_v43 = vadd.f32 %v5349_v1, %v5348_v28 }
 0x2c6   :  { %v5363_v19 = vrot.slane %v5362_v58, 2  ;;  %v5344_v4 = vrot.slane %v5343_v52, 1  ;;  %v6407_v35 = vadd.f32 %v6406_v36, %v6405_v8  ;;  %v6413_v61 = vrot.slane %v6412_v60, 2 }
 0x2c7   :  { %v5357_v21 = vadd.f32 %v5356_v41, %v5355_v6  ;;  %v6420_v22 = vrot.slane %v6419_v10, 2  ;;  %v6426_v47 = vadd.f32 %v6425_v40, %v6424_v32  ;;  %v5351_v25 = vrot.slane %v5350_v43, 1 }
 0x2c8   :  { %v5364_v2 = vadd.f32 %v5363_v19, %v5362_v58  ;;  %v5345_v50 = vadd.f32 %v5344_v4, %v5343_v52  ;;  %v6408_v26 = vrot.slane %v6407_v35, 1  ;;  %v6414_v14 = vadd.f32 %v6413_v61, %v6412_v60 }
 0x2c9   :  { %v5358_v31 = vrot.slane %v5357_v21, 1  ;;  %v6421_v13 = vadd.f32 %v6420_v22, %v6419_v10  ;;  %v6427_v46 = vrot.slane %v6426_v47, 2  ;;  %v5352_v56 = vadd.f32 %v5351_v25, %v5350_v43 }
 0x2ca   :  { %v5365_v53 = vrot.slane %v5364_v2, 1  ;;  %v6409_v16 = vadd.f32 %v6408_v26, %v6407_v35  ;;  %v6415_v33 = vrot.slane %v6414_v14, 1 }
 0x2cb   :  { %v5359_v55 = vadd.f32 %v5358_v31, %v5357_v21  ;;  %v6422_v18 = vrot.slane %v6421_v13, 1  ;;  %v6428_v17 = vadd.f32 %v6427_v46, %v6426_v47  ;;  %v5802_v57 = vcombine.low %v5345_v50, %v5352_v56 }
 0x2cc   :  { %v5366_v42 = vadd.f32 %v5365_v53, %v5364_v2  ;;  %v6416_v39 = vadd.f32 %v6415_v33, %v6414_v14 }
 0x2cd   :  { %v6423_v15 = vadd.f32 %v6422_v18, %v6421_v13  ;;  %v6429_v30 = vrot.slane %v6428_v17, 1  ;;  %v10880_v5 = vrot.slane %v5802_v57, %v8549_v37 }
 0x2ce   :  { %v5803_v38 = vcombine.low %v5359_v55, %v5366_v42  ;;  %v6866_v44 = vcombine.low %v6409_v16, %v6416_v39 }
 0x2cf   :  { %v6430_v9 = vadd.f32 %v6429_v30, %v6428_v17 }
 0x2d0   :  { %v10883_v62 = vrot.slane %v5803_v38, %v8549_v37  ;;  %v10886_v24 = vrot.slane %v6866_v44, %v8549_v37 }
 0x2d1   :  { %v6867_v29 = vcombine.low %v6423_v15, %v6430_v9 }
 0x2d2   :  { %v5834_v54 = vcombine.low %v10880_v5, %v10883_v62 }
 0x2d3   :  { %v10891_v20 = vrot.slane %v6867_v29, %v8549_v37 }
 0x2d5   :  { %v6898_v51 = vcombine.low %v10886_v24, %v10891_v20 }
 0x2da   :  { %v4419_v12 = vpop.f32.mrb[60].mxu0 }
 0x2db   :  { %v4421_v0 = vpop.f32.mrb[61].mxu0  ;;  %v5943_v63 = vmul.f32 %v4419_v12, %v4419_v12 }
 0x2dc   :  { %v7558_v3 = vpack.c.bf16 %v4421_v0, %v4419_v12  ;;  %v5944_v27 = vmul.f32 %v4421_v0, %v4421_v0  ;;  %v4423_v34 = vpop.f32.mrb[62].mxu0 }
 0x2dd   :  { %v4462_v48 = vpop.f32.mrb[60].mxu1  ;;  %v5367_v28 = vadd.f32 %v4423_v34, %v4419_v12  ;;  %v6007_v11 = vmul.f32 %v4423_v34, %v4423_v34  ;;  %v4425_v8 = vpop.f32.mrb[63].mxu0 }
 0x2de   :  { %v5945_v59 = vmul.f32 %v4462_v48, %v4462_v48  ;;  %v4464_v7 = vpop.f32.mrb[61].mxu1  ;;  %4885 = vst [vmem:[%s10929_s2 + $0xf0] sm:$0xff] %v7558_v3  ;;  %v7590_v41 = vpack.c.bf16 %v4425_v8, %v4423_v34  ;;  %v5374_v10 = vadd.f32 %v4425_v8, %v4421_v0  ;;  %v6008_v36 = vmul.f32 %v4425_v8, %v4425_v8 }
 0x2df   :  { %v7559_v6 = vpack.c.bf16 %v4464_v7, %v4462_v48  ;;  %v5946_v49 = vmul.f32 %v4464_v7, %v4464_v7  ;;  %v4466_v45 = vpop.f32.mrb[62].mxu1  ;;  %v5368_v58 = vrot.slane %v5367_v28, 4  ;;  %v6431_v52 = vadd.f32 %v6007_v11, %v5943_v63 }
 0x2e0   :  { %v5381_v23 = vadd.f32 %v4466_v45, %v4462_v48  ;;  %v6009_v32 = vmul.f32 %v4466_v45, %v4466_v45  ;;  %v4468_v1 = vpop.f32.mrb[63].mxu1  ;;  %4917 = vst [vmem:[%s10929_s2 + $0x1f0] sm:$0xff] %v7590_v41  ;;  %v5375_v22 = vrot.slane %v5374_v10, 4  ;;  %v6438_v35 = vadd.f32 %v6008_v36, %v5944_v27 }
 0x2e1   :  { %4886 = vst [vmem:[%s10929_s2 + $0xf8] sm:$0xff] %v7559_v6  ;;  %v7591_v60 = vpack.c.bf16 %v4468_v1, %v4466_v45  ;;  %v5388_v43 = vadd.f32 %v4468_v1, %v4464_v7  ;;  %v5369_v19 = vadd.f32 %v5368_v58, %v5367_v28  ;;  %v6432_v4 = vrot.slane %v6431_v52, 4 }
 0x2e2   :  { %v5382_v40 = vrot.slane %v5381_v23, 4  ;;  %v6445_v21 = vadd.f32 %v6009_v32, %v5945_v59  ;;  %v6010_v61 = vmul.f32 %v4468_v1, %v4468_v1  ;;  %v5376_v13 = vadd.f32 %v5375_v22, %v5374_v10 }
 0x2e3   :  { %4918 = vst [vmem:[%s10929_s2 + $0x1f8] sm:$0xff] %v7591_v60  ;;  %v5389_v25 = vrot.slane %v5388_v43, 4  ;;  %v5370_v2 = vrot.slane %v5369_v19, 2  ;;  %v6433_v50 = vadd.f32 %v6432_v4, %v6431_v52  ;;  %v6439_v26 = vrot.slane %v6438_v35, 4 }
 0x2e4   :  { %v5383_v47 = vadd.f32 %v5382_v40, %v5381_v23  ;;  %v6446_v31 = vrot.slane %v6445_v21, 4  ;;  %v6452_v14 = vadd.f32 %v6010_v61, %v5946_v49  ;;  %v5377_v18 = vrot.slane %v5376_v13, 2 }
 0x2e5   :  { %v5390_v56 = vadd.f32 %v5389_v25, %v5388_v43  ;;  %v5371_v53 = vadd.f32 %v5370_v2, %v5369_v19  ;;  %v6434_v16 = vrot.slane %v6433_v50, 2  ;;  %v6440_v33 = vadd.f32 %v6439_v26, %v6438_v35 }
 0x2e6   :  { %v5384_v46 = vrot.slane %v5383_v47, 2  ;;  %v6447_v55 = vadd.f32 %v6446_v31, %v6445_v21  ;;  %v6453_v17 = vrot.slane %v6452_v14, 4  ;;  %v5378_v15 = vadd.f32 %v5377_v18, %v5376_v13 }
 0x2e7   :  { %v5391_v39 = vrot.slane %v5390_v56, 2  ;;  %v5372_v30 = vrot.slane %v5371_v53, 1  ;;  %v6435_v38 = vadd.f32 %v6434_v16, %v6433_v50  ;;  %v6441_v44 = vrot.slane %v6440_v33, 2 }
 0x2e8   :  { %v5385_v57 = vadd.f32 %v5384_v46, %v5383_v47  ;;  %v6448_v42 = vrot.slane %v6447_v55, 2  ;;  %v6454_v9 = vadd.f32 %v6453_v17, %v6452_v14  ;;  %v5379_v48 = vrot.slane %v5378_v15, 1 }
 0x2e9   :  { %v5392_v0 = vadd.f32 %v5391_v39, %v5390_v56  ;;  %v5373_v63 = vadd.f32 %v5372_v30, %v5371_v53  ;;  %v6436_v59 = vrot.slane %v6435_v38, 1  ;;  %v6442_v3 = vadd.f32 %v6441_v44, %v6440_v33 }
 0x2ea   :  { %v5386_v29 = vrot.slane %v5385_v57, 1  ;;  %v6449_v12 = vadd.f32 %v6448_v42, %v6447_v55  ;;  %v6455_v27 = vrot.slane %v6454_v9, 2  ;;  %v5380_v6 = vadd.f32 %v5379_v48, %v5378_v15 }
 0x2eb   :  { %v5393_v49 = vrot.slane %v5392_v0, 1  ;;  %v6437_v28 = vadd.f32 %v6436_v59, %v6435_v38  ;;  %v6443_v11 = vrot.slane %v6442_v3, 1  ;;  %v5842_v19 = vrot.slane %v5834_v54, %v8549_v37 }
 0x2ec   :  { %v5387_v7 = vadd.f32 %v5386_v29, %v5385_v57  ;;  %v6450_v34 = vrot.slane %v6449_v12, 1  ;;  %v6456_v45 = vadd.f32 %v6455_v27, %v6454_v9  ;;  %v5804_v8 = vcombine.low %v5373_v63, %v5380_v6 }
 0x2ed   :  { %v5394_v23 = vadd.f32 %v5393_v49, %v5392_v0  ;;  %v6444_v41 = vadd.f32 %v6443_v11, %v6442_v3  ;;  %v6906_v47 = vrot.slane %v6898_v51, %v8549_v37 }
 0x2ee   :  { %v6451_v32 = vadd.f32 %v6450_v34, %v6449_v12  ;;  %v6457_v10 = vrot.slane %v6456_v45, 1  ;;  %v5826_v1 = vrot.slane %v5804_v8, %v8549_v37 }
 0x2ef   :  { %v5805_v58 = vcombine.low %v5387_v7, %v5394_v23  ;;  %v6868_v52 = vcombine.low %v6437_v28, %v6444_v41 }
 0x2f0   :  { %v6458_v36 = vadd.f32 %v6457_v10, %v6456_v45 }
 0x2f1   :  { %v5833_v60 = vrot.slane %v5805_v58, %v8549_v37  ;;  %v6890_v40 = vrot.slane %v6868_v52, %v8549_v37 }
 0x2f2   :  { %v6869_v21 = vcombine.low %v6451_v32, %v6458_v36 }
 0x2f3   :  { %v5835_v22 = vcombine.low %v5826_v1, %v5833_v60 }
 0x2f4   :  { %v6897_v43 = vrot.slane %v6869_v21, %v8549_v37 }
 0x2f5   :  { %v5849_v4 = vrot.slane %v5835_v22, %v8549_v37 }
 0x2f6   :  { %v6899_v35 = vcombine.low %v6890_v40, %v6897_v43 }
 0x2f7   :  { %v5850_v61 = vcombine.low %v5842_v19, %v5849_v4 }
 0x2f8   :  { %v6913_v31 = vrot.slane %v6899_v35, %v8549_v37 }
 0x2f9   :  { %5874 = vst [vmem:[%s10930_s3 + $0x38] sm:$0xff] %v5850_v61 }
 0x2fa   :  { %v6914_v13 = vcombine.low %v6906_v47, %v6913_v31 }
 0x2fc   :  { %6938 = vst [vmem:[%s10931_s4 + $0x38] sm:$0xff] %v6914_v13 }

// kernel: generator_forward.6
= control target key start
LH: loop header
LB: loop body
LE: loop exit
PB: predicated region body
PF: predicated region fallthrough
CT: control target
= control target key end

     0   :  { %s3668_s15 = smov 0   ;;  %s3670_s16 = smov 0   ;;  %s4086_s0 = inlined_call_operand.vmem [shape: bf16[4,32,2048], index: 0, kind: input, shape index: {}]   ;;  %s4087_s1 = inlined_call_operand.vmem [shape: bf16[4,2048,256], index: 1, kind: input, shape index: {}]   ;;  %s4088_s2 = inlined_call_operand.vmem [shape: bf16[4,32,256], index: 2, kind: output, shape index: {0}]   ;;  %s4089_s3 = inlined_call_operand.vmem [shape: f32[4,1,256], index: 3, kind: output, shape index: {1}]   ;;  %s4090_s4 = inlined_call_operand.vmem [shape: f32[4,1,256], index: 4, kind: output, shape index: {2}]  }
   0x1   :  { %s3672_s17 = smov 0  }
   0x2 LB: > { %s34_s18 = sadd.s32 1, %s3635_s16  ;;  %p2841_p0 = scmp.ge.s32.totalorder %s3639_s17, 1  ;;  %s3639_s17 = sphi %s3672_s17, %s15_s17   ;;  %s3635_s16 = sphi %s3670_s16, %s4094_s16   ;;  %s3631_s15 = sphi %s3668_s15, %s4093_s15  }
   0x3   : > { %p36_p1 = scmp.ge.s32.totalorder %s34_s18, 4  ;;  %p219_p2 = scmp.lt.s32.totalorder %s3639_s17, 5 }
   0x5   : > { %s4096_s18 = smov (%p36_p1, %s34_s18), 0  ;;  %p220_p3 = pnand %p2841_p0, %p219_p2 }
   0x6   : > { %p285_p4 = scmp.lt.s32.totalorder (!%p220_p3), %s3631_s15, 3 }
   0x7   : > { %223 = sbr.rel (%p220_p3) target bundleno = 525 (0x20d), region = 28 }
   0xe   : > { %s4098_s15 = smov (!%p285_p4, %s3631_s15), 3 }
   0xf   : > { %s3145_s19 = sshll.u32 %s4098_s15, 11  ;;  %s3144_s23 = sshll.u32 %s4098_s15, 8 }
  0x10   : > { %s3692_s22 = scalar_lea.vmem %s4087_s1, %s3145_s19  ;;  %s3742_s26 = scalar_lea.vmem %s4086_s0, %s3144_s23 }
  0x11   : > { %v3233_v0 = vld [vmem:[%s3692_s22 + $0x4] ss:$8 sps:$4 sm:$0xff]   ;;  %v3237_v2 = vld [vmem:[%s3692_s22] ss:$8 sps:$4 sm:$0xff]   ;;  %v3239_v4 = vld [vmem:[%s3692_s22 + $0x14] ss:$8 sps:$4 sm:$0xff]  }
  0x12   : > { %v3235_v1 = vld [vmem:[%s3692_s22 + $0x404] ss:$8 sps:$4 sm:$0xff]   ;;  %2067 = vmatprep.subr.bf16.mxu1 %v3233_v0  ;;  %v3238_v3 = vld [vmem:[%s3692_s22 + $0x400] ss:$8 sps:$4 sm:$0xff]   ;;  %v3241_v5 = vld [vmem:[%s3692_s22 + $0x414] ss:$8 sps:$4 sm:$0xff]  }
  0x13   : > { %2279 = vmatprep.subr.bf16.mxu0 %v3235_v1  ;;  %2068 = vmatpush1.bf16.msra.mxu1 %v3237_v2  ;;  %v3243_v6 = vld [vmem:[%s3692_s22 + $0x10] ss:$8 sps:$4 sm:$0xff]   ;;  %v3245_v8 = vld [vmem:[%s3692_s22 + $0x24] ss:$8 sps:$4 sm:$0xff]   ;;  %v3249_v10 = vld [vmem:[%s3692_s22 + $0x20] ss:$8 sps:$4 sm:$0xff]  }
  0x14   : > { %2280 = vmatpush1.bf16.msra.mxu0 %v3238_v3  ;;  %2069 = vmatprep.subr.bf16.mxu1 %v3239_v4  ;;  %v3244_v7 = vld [vmem:[%s3692_s22 + $0x410] ss:$8 sps:$4 sm:$0xff]   ;;  %v3247_v9 = vld [vmem:[%s3692_s22 + $0x424] ss:$8 sps:$4 sm:$0xff]   ;;  %v3250_v11 = vld [vmem:[%s3692_s22 + $0x420] ss:$8 sps:$4 sm:$0xff]  }
  0x15   : > { %2281 = vmatprep.subr.bf16.mxu0 %v3241_v5  ;;  %v3251_v12 = vld [vmem:[%s3692_s22 + $0x34] ss:$8 sps:$4 sm:$0xff]   ;;  %v3255_v14 = vld [vmem:[%s3692_s22 + $0x30] ss:$8 sps:$4 sm:$0xff]   ;;  %v3257_v16 = vld [vmem:[%s3692_s22 + $0x44] ss:$8 sps:$4 sm:$0xff]  }
  0x16   : > { %v3253_v13 = vld [vmem:[%s3692_s22 + $0x434] ss:$8 sps:$4 sm:$0xff]   ;;  %v3256_v15 = vld [vmem:[%s3692_s22 + $0x430] ss:$8 sps:$4 sm:$0xff]   ;;  %v3259_v17 = vld [vmem:[%s3692_s22 + $0x444] ss:$8 sps:$4 sm:$0xff]  }
  0x17   : > { %2070 = vmatpush1.bf16.msra.mxu1 %v3243_v6  ;;  %v3261_v18 = vld [vmem:[%s3692_s22 + $0x40] ss:$8 sps:$4 sm:$0xff]   ;;  %v3263_v20 = vld [vmem:[%s3692_s22 + $0x54] ss:$8 sps:$4 sm:$0xff]   ;;  %v3267_v22 = vld [vmem:[%s3692_s22 + $0x50] ss:$8 sps:$4 sm:$0xff]  }
  0x18   : > { %2282 = vmatpush1.bf16.msra.mxu0 %v3244_v7  ;;  %2071 = vmatprep.subr.bf16.mxu1 %v3245_v8  ;;  %v3262_v19 = vld [vmem:[%s3692_s22 + $0x440] ss:$8 sps:$4 sm:$0xff]   ;;  %v3265_v21 = vld [vmem:[%s3692_s22 + $0x454] ss:$8 sps:$4 sm:$0xff]   ;;  %v3268_v23 = vld [vmem:[%s3692_s22 + $0x450] ss:$8 sps:$4 sm:$0xff]  }
  0x19   : > { %2283 = vmatprep.subr.bf16.mxu0 %v3247_v9  ;;  %v3269_v24 = vld [vmem:[%s3692_s22 + $0x64] ss:$8 sps:$4 sm:$0xff]   ;;  %v3273_v26 = vld [vmem:[%s3692_s22 + $0x60] ss:$8 sps:$4 sm:$0xff]   ;;  %v3275_v28 = vld [vmem:[%s3692_s22 + $0x74] ss:$8 sps:$4 sm:$0xff]  }
  0x1a   : > { %v3271_v25 = vld [vmem:[%s3692_s22 + $0x464] ss:$8 sps:$4 sm:$0xff]   ;;  %v3274_v27 = vld [vmem:[%s3692_s22 + $0x460] ss:$8 sps:$4 sm:$0xff]   ;;  %v3277_v29 = vld [vmem:[%s3692_s22 + $0x474] ss:$8 sps:$4 sm:$0xff]  }
  0x1b   : > { %2072 = vmatpush1.bf16.msra.mxu1 %v3249_v10  ;;  %v3279_v30 = vld [vmem:[%s3692_s22 + $0x70] ss:$8 sps:$4 sm:$0xff]   ;;  %v3281_v32 = vld [vmem:[%s3692_s22 + $0x84] ss:$8 sps:$4 sm:$0xff]   ;;  %v3285_v34 = vld [vmem:[%s3692_s22 + $0x80] ss:$8 sps:$4 sm:$0xff]  }
  0x1c   : > { %2284 = vmatpush1.bf16.msra.mxu0 %v3250_v11  ;;  %2073 = vmatprep.subr.bf16.mxu1 %v3251_v12  ;;  %v3280_v31 = vld [vmem:[%s3692_s22 + $0x470] ss:$8 sps:$4 sm:$0xff]   ;;  %v3283_v33 = vld [vmem:[%s3692_s22 + $0x484] ss:$8 sps:$4 sm:$0xff]   ;;  %v3286_v35 = vld [vmem:[%s3692_s22 + $0x480] ss:$8 sps:$4 sm:$0xff]  }
  0x1d   : > { %2285 = vmatprep.subr.bf16.mxu0 %v3253_v13  ;;  %v3287_v36 = vld [vmem:[%s3692_s22 + $0x94] ss:$8 sps:$4 sm:$0xff]   ;;  %v3291_v38 = vld [vmem:[%s3692_s22 + $0x90] ss:$8 sps:$4 sm:$0xff]   ;;  %v3293_v40 = vld [vmem:[%s3692_s22 + $0xa4] ss:$8 sps:$4 sm:$0xff]  }
  0x1e   : > { %v3289_v37 = vld [vmem:[%s3692_s22 + $0x494] ss:$8 sps:$4 sm:$0xff]   ;;  %v3292_v39 = vld [vmem:[%s3692_s22 + $0x490] ss:$8 sps:$4 sm:$0xff]   ;;  %v3295_v41 = vld [vmem:[%s3692_s22 + $0x4a4] ss:$8 sps:$4 sm:$0xff]  }
  0x1f   : > { %2074 = vmatpush1.bf16.msra.mxu1 %v3255_v14  ;;  %v3297_v42 = vld [vmem:[%s3692_s22 + $0xa0] ss:$8 sps:$4 sm:$0xff]   ;;  %v3299_v44 = vld [vmem:[%s3692_s22 + $0xb4] ss:$8 sps:$4 sm:$0xff]   ;;  %v3303_v46 = vld [vmem:[%s3692_s22 + $0xb0] ss:$8 sps:$4 sm:$0xff]  }
  0x20   : > { %2286 = vmatpush1.bf16.msra.mxu0 %v3256_v15  ;;  %2075 = vmatprep.subr.bf16.mxu1 %v3257_v16  ;;  %v3298_v43 = vld [vmem:[%s3692_s22 + $0x4a0] ss:$8 sps:$4 sm:$0xff]   ;;  %v3301_v45 = vld [vmem:[%s3692_s22 + $0x4b4] ss:$8 sps:$4 sm:$0xff]   ;;  %v3304_v47 = vld [vmem:[%s3692_s22 + $0x4b0] ss:$8 sps:$4 sm:$0xff]  }
  0x21   : > { %2287 = vmatprep.subr.bf16.mxu0 %v3259_v17  ;;  %v339_v48 = vld [vmem:[%s3742_s26] sm:$0xff]  ;;  %v3311_v58 = vld [vmem:[%s3692_s22 + $0xd4] ss:$8 sps:$4 sm:$0xff]   ;;  %v3315_v60 = vld [vmem:[%s3692_s22 + $0xd0] ss:$8 sps:$4 sm:$0xff]   ;;  %s2848_s27 = sshll.u32 %s4098_s15, 1 }
  0x22   : > { %v347_v49 = vld [vmem:[%s3742_s26 + $0x40] sm:$0xff]  ;;  %v3313_v59 = vld [vmem:[%s3692_s22 + $0x4d4] ss:$8 sps:$4 sm:$0xff]   ;;  %v3316_v61 = vld [vmem:[%s3692_s22 + $0x4d0] ss:$8 sps:$4 sm:$0xff]   ;;  %s4040_s30 = scalar_lea.vmem %s4089_s3, %s2848_s27  ;;  %s4053_s7 = scalar_lea.vmem %s4090_s4, %s2848_s27 }
  0x23   : > { %2076 = vmatpush1.bf16.msra.mxu1 %v3261_v18  ;;  %v3305_v50 = vld [vmem:[%s3692_s22 + $0xc4] ss:$8 sps:$4 sm:$0xff]   ;;  %v2851_v52 = vcombine.high %v339_v48, %v347_v49  ;;  %v3309_v56 = vld [vmem:[%s3692_s22 + $0xc0] ss:$8 sps:$4 sm:$0xff]   ;;  %v3323_v2 = vld [vmem:[%s3692_s22 + $0xf4] ss:$8 sps:$4 sm:$0xff]   ;;  %v2850_v8 = vcombine.low %v339_v48, %v347_v49 }
  0x24   : > { %2288 = vmatpush1.bf16.msra.mxu0 %v3262_v19  ;;  %2077 = vmatprep.subr.bf16.mxu1 %v3263_v20  ;;  %v3307_v51 = vld [vmem:[%s3692_s22 + $0x4c4] ss:$8 sps:$4 sm:$0xff]   ;;  %v3310_v57 = vld [vmem:[%s3692_s22 + $0x4c0] ss:$8 sps:$4 sm:$0xff]   ;;  %v3325_v3 = vld [vmem:[%s3692_s22 + $0x4f4] ss:$8 sps:$4 sm:$0xff]  }
  0x25   : > { %2289 = vmatprep.subr.bf16.mxu0 %v3265_v21  ;;  %v343_v53 = vld [vmem:[%s3742_s26 + $0x20] sm:$0xff]  ;;  %2099 = vmatprep.mubr.bf16.mxu1 %v2851_v52  ;;  %v3327_v4 = vld [vmem:[%s3692_s22 + $0xf0] ss:$8 sps:$4 sm:$0xff]   ;;  %v3337_v12 = vld [vmem:[%s3692_s22 + $0x114] ss:$8 sps:$4 sm:$0xff]   ;;  %s3146_s8 = sshll.u32 %s4098_s15, 5 }
  0x26   : > { %v351_v54 = vld [vmem:[%s3742_s26 + $0x60] sm:$0xff]  ;;  %v3328_v5 = vld [vmem:[%s3692_s22 + $0x4f0] ss:$8 sps:$4 sm:$0xff]   ;;  %v3340_v13 = vld [vmem:[%s3692_s22 + $0x514] ss:$8 sps:$4 sm:$0xff]   ;;  %s4062_s11 = scalar_lea.vmem %s4088_s2, %s3146_s8 }
  0x27   : > { %2078 = vmatpush1.bf16.msra.mxu1 %v3267_v22  ;;  %v2859_v55 = vcombine.high %v343_v53, %v351_v54  ;;  %v3317_v62 = vld [vmem:[%s3692_s22 + $0xe4] ss:$8 sps:$4 sm:$0xff]   ;;  %v3321_v0 = vld [vmem:[%s3692_s22 + $0xe0] ss:$8 sps:$4 sm:$0xff]   ;;  %v2858_v10 = vcombine.low %v343_v53, %v351_v54  ;;  %v3335_v14 = vld [vmem:[%s3692_s22 + $0x110] ss:$8 sps:$4 sm:$0xff]  }
  0x28   : > { %2290 = vmatpush1.bf16.msra.mxu0 %v3268_v23  ;;  %2079 = vmatprep.subr.bf16.mxu1 %v3269_v24  ;;  %v3319_v63 = vld [vmem:[%s3692_s22 + $0x4e4] ss:$8 sps:$4 sm:$0xff]   ;;  %v3322_v1 = vld [vmem:[%s3692_s22 + $0x4e0] ss:$8 sps:$4 sm:$0xff]   ;;  %v3338_v15 = vld [vmem:[%s3692_s22 + $0x510] ss:$8 sps:$4 sm:$0xff]  }
  0x29   : > { %2291 = vmatprep.subr.bf16.mxu0 %v3271_v25  ;;  %2311 = vmatprep.mubr.bf16.mxu0 %v2859_v55  ;;  %v3331_v6 = vld [vmem:[%s3692_s22 + $0x104] ss:$8 sps:$4 sm:$0xff]   ;;  %v3329_v9 = vld [vmem:[%s3692_s22 + $0x100] ss:$8 sps:$4 sm:$0xff]   ;;  %v3349_v20 = vld [vmem:[%s3692_s22 + $0x134] ss:$8 sps:$4 sm:$0xff]  }
  0x2a   : > { %v3334_v7 = vld [vmem:[%s3692_s22 + $0x504] ss:$8 sps:$4 sm:$0xff]   ;;  %v3332_v11 = vld [vmem:[%s3692_s22 + $0x500] ss:$8 sps:$4 sm:$0xff]   ;;  %v3352_v21 = vld [vmem:[%s3692_s22 + $0x534] ss:$8 sps:$4 sm:$0xff]  }
  0x2b   : > { %2080 = vmatpush1.bf16.msra.mxu1 %v3273_v26  ;;  %v3343_v16 = vld [vmem:[%s3692_s22 + $0x124] ss:$8 sps:$4 sm:$0xff]   ;;  %v3341_v18 = vld [vmem:[%s3692_s22 + $0x120] ss:$8 sps:$4 sm:$0xff]   ;;  %v3347_v22 = vld [vmem:[%s3692_s22 + $0x130] ss:$8 sps:$4 sm:$0xff]  }
  0x2c   : > { %2292 = vmatpush1.bf16.msra.mxu0 %v3274_v27  ;;  %2081 = vmatprep.subr.bf16.mxu1 %v3275_v28  ;;  %v3346_v17 = vld [vmem:[%s3692_s22 + $0x524] ss:$8 sps:$4 sm:$0xff]   ;;  %v3344_v19 = vld [vmem:[%s3692_s22 + $0x520] ss:$8 sps:$4 sm:$0xff]   ;;  %v3350_v23 = vld [vmem:[%s3692_s22 + $0x530] ss:$8 sps:$4 sm:$0xff]  }
  0x2d   : > { %2293 = vmatprep.subr.bf16.mxu0 %v3277_v29  ;;  %v3355_v24 = vld [vmem:[%s3692_s22 + $0x144] ss:$8 sps:$4 sm:$0xff]   ;;  %v3353_v26 = vld [vmem:[%s3692_s22 + $0x140] ss:$8 sps:$4 sm:$0xff]   ;;  %v3361_v28 = vld [vmem:[%s3692_s22 + $0x154] ss:$8 sps:$4 sm:$0xff]  }
  0x2e   : > { %v3358_v25 = vld [vmem:[%s3692_s22 + $0x544] ss:$8 sps:$4 sm:$0xff]   ;;  %v3356_v27 = vld [vmem:[%s3692_s22 + $0x540] ss:$8 sps:$4 sm:$0xff]   ;;  %v3364_v29 = vld [vmem:[%s3692_s22 + $0x554] ss:$8 sps:$4 sm:$0xff]  }
  0x2f   : > { %2082 = vmatpush1.bf16.msra.mxu1 %v3279_v30  ;;  %v355_v30 = vld [vmem:[%s3742_s26 + $0x80] sm:$0xff]  ;;  %v3811_v49 = vld [vmem:[%s3742_s26 + $0x28] sm:$0xff]  ;;  %v3374_v52 = vld [vmem:[%s3692_s22 + $0x570] ss:$8 sps:$4 sm:$0xff]  }
  0x30   : > { %2294 = vmatpush1.bf16.msra.mxu0 %v3280_v31  ;;  %2083 = vmatprep.subr.bf16.mxu1 %v3281_v32  ;;  %v363_v31 = vld [vmem:[%s3742_s26 + $0xc0] sm:$0xff]  ;;  %v3359_v32 = vld [vmem:[%s3692_s22 + $0x150] ss:$8 sps:$4 sm:$0xff]  }
  0x31   : > { %2295 = vmatprep.subr.bf16.mxu0 %v3283_v33  ;;  %v2867_v33 = vcombine.high %v355_v30, %v363_v31  ;;  %v3379_v54 = vld [vmem:[%s3692_s22 + $0x184] ss:$8 sps:$4 sm:$0xff]  }
  0x32   : > { %v3382_v55 = vld [vmem:[%s3692_s22 + $0x584] ss:$8 sps:$4 sm:$0xff]  }
  0x33   : > { %2084 = vmatpush1.bf16.msra.mxu1 %v3285_v34  ;;  %v3362_v34 = vld [vmem:[%s3692_s22 + $0x550] ss:$8 sps:$4 sm:$0xff]  }
  0x34   : > { %2296 = vmatpush1.bf16.msra.mxu0 %v3286_v35  ;;  %2085 = vmatprep.subr.bf16.mxu1 %v3287_v36  ;;  %v359_v35 = vld [vmem:[%s3742_s26 + $0xa0] sm:$0xff] }
  0x35   : > { %2297 = vmatprep.subr.bf16.mxu0 %v3289_v37  ;;  %v367_v36 = vld [vmem:[%s3742_s26 + $0xe0] sm:$0xff]  ;;  %v2866_v37 = vcombine.low %v355_v30, %v363_v31  ;;  %v3433_v30 = vld [vmem:[%s3692_s22 + $0x214] ss:$8 sps:$4 sm:$0xff]  }
  0x36   : > { %v3436_v31 = vld [vmem:[%s3692_s22 + $0x614] ss:$8 sps:$4 sm:$0xff]  }
  0x37   : > { %2086 = vmatpush1.bf16.msra.mxu1 %v3291_v38  ;;  %v3367_v38 = vld [vmem:[%s3692_s22 + $0x164] ss:$8 sps:$4 sm:$0xff]  }
  0x38   : > { %2298 = vmatpush1.bf16.msra.mxu0 %v3292_v39  ;;  %2087 = vmatprep.subr.bf16.mxu1 %v3293_v40  ;;  %v2875_v39 = vcombine.high %v359_v35, %v367_v36  ;;  %v2874_v40 = vcombine.low %v359_v35, %v367_v36  ;;  %v3431_v36 = vld [vmem:[%s3692_s22 + $0x210] ss:$8 sps:$4 sm:$0xff]  }
  0x39   : > { %2299 = vmatprep.subr.bf16.mxu0 %v3295_v41  ;;  %v3370_v41 = vld [vmem:[%s3692_s22 + $0x564] ss:$8 sps:$4 sm:$0xff]  }
  0x3b   : > { %2088 = vmatpush1.bf16.msra.mxu1 %v3297_v42  ;;  %v3365_v42 = vld [vmem:[%s3692_s22 + $0x160] ss:$8 sps:$4 sm:$0xff]  }
  0x3c   : > { %2300 = vmatpush1.bf16.msra.mxu0 %v3298_v43  ;;  %2089 = vmatprep.subr.bf16.mxu1 %v3299_v44  ;;  %v3368_v43 = vld [vmem:[%s3692_s22 + $0x560] ss:$8 sps:$4 sm:$0xff]  }
  0x3d   : > { %2301 = vmatprep.subr.bf16.mxu0 %v3301_v45  ;;  %v3801_v44 = vld [vmem:[%s3742_s26 + $0x8] sm:$0xff] }
  0x3e   : > { %v3804_v45 = vld [vmem:[%s3742_s26 + $0x48] sm:$0xff] }
  0x3f   : > { %2090 = vmatpush1.bf16.msra.mxu1 %v3303_v46  ;;  %v3373_v46 = vld [vmem:[%s3692_s22 + $0x174] ss:$8 sps:$4 sm:$0xff]   ;;  %v2853_v48 = vcombine.high %v3801_v44, %v3804_v45 }
  0x40   : > { %2302 = vmatpush1.bf16.msra.mxu0 %v3304_v47  ;;  %2091 = vmatprep.subr.bf16.mxu1 %v3305_v50  ;;  %v3376_v47 = vld [vmem:[%s3692_s22 + $0x574] ss:$8 sps:$4 sm:$0xff]   ;;  %v3814_v50 = vld [vmem:[%s3742_s26 + $0x68] sm:$0xff] }
  0x41   : > { %2303 = vmatprep.subr.bf16.mxu0 %v3307_v51  ;;  %v3371_v51 = vld [vmem:[%s3692_s22 + $0x170] ss:$8 sps:$4 sm:$0xff]   ;;  %v2861_v53 = vcombine.high %v3811_v49, %v3814_v50 }
  0x43   : > { %2092 = vmatpush1.bf16.msra.mxu1 %v3309_v56  ;;  %v3377_v56 = vld [vmem:[%s3692_s22 + $0x180] ss:$8 sps:$4 sm:$0xff]  }
  0x44   : > { %2304 = vmatpush1.bf16.msra.mxu0 %v3310_v57  ;;  %2093 = vmatprep.subr.bf16.mxu1 %v3311_v58  ;;  %v3380_v57 = vld [vmem:[%s3692_s22 + $0x580] ss:$8 sps:$4 sm:$0xff]   ;;  %v3385_v58 = vld [vmem:[%s3692_s22 + $0x194] ss:$8 sps:$4 sm:$0xff]  }
  0x45   : > { %2305 = vmatprep.subr.bf16.mxu0 %v3313_v59  ;;  %v3388_v59 = vld [vmem:[%s3692_s22 + $0x594] ss:$8 sps:$4 sm:$0xff]  }
  0x47   : > { %2094 = vmatpush1.bf16.msra.mxu1 %v3315_v60  ;;  %v3383_v60 = vld [vmem:[%s3692_s22 + $0x190] ss:$8 sps:$4 sm:$0xff]  }
  0x48   : > { %2306 = vmatpush1.bf16.msra.mxu0 %v3316_v61  ;;  %2095 = vmatprep.subr.bf16.mxu1 %v3317_v62  ;;  %v3386_v61 = vld [vmem:[%s3692_s22 + $0x590] ss:$8 sps:$4 sm:$0xff]   ;;  %v3391_v62 = vld [vmem:[%s3692_s22 + $0x1a4] ss:$8 sps:$4 sm:$0xff]  }
  0x49   : > { %2307 = vmatprep.subr.bf16.mxu0 %v3319_v63  ;;  %v3394_v63 = vld [vmem:[%s3692_s22 + $0x5a4] ss:$8 sps:$4 sm:$0xff]  }
  0x4b   : > { %2096 = vmatpush1.bf16.msra.mxu1 %v3321_v0  ;;  %v3389_v0 = vld [vmem:[%s3692_s22 + $0x1a0] ss:$8 sps:$4 sm:$0xff]  }
  0x4c   : > { %2308 = vmatpush1.bf16.msra.mxu0 %v3322_v1  ;;  %2097 = vmatprep.subr.bf16.mxu1 %v3323_v2  ;;  %v3392_v1 = vld [vmem:[%s3692_s22 + $0x5a0] ss:$8 sps:$4 sm:$0xff]   ;;  %v3397_v2 = vld [vmem:[%s3692_s22 + $0x1b4] ss:$8 sps:$4 sm:$0xff]  }
  0x4d   : > { %2309 = vmatprep.subr.bf16.mxu0 %v3325_v3  ;;  %v3400_v3 = vld [vmem:[%s3692_s22 + $0x5b4] ss:$8 sps:$4 sm:$0xff]  }
  0x4f   : > { %2098 = vmatpush1.bf16.msra.mxu1 %v3327_v4  ;;  %v3395_v4 = vld [vmem:[%s3692_s22 + $0x1b0] ss:$8 sps:$4 sm:$0xff]  }
  0x50   : > { %2310 = vmatpush1.bf16.msra.mxu0 %v3328_v5  ;;  %2120 = vmatprep.subr.bf16.mxu1 %v3331_v6  ;;  %v3398_v5 = vld [vmem:[%s3692_s22 + $0x5b0] ss:$8 sps:$4 sm:$0xff]   ;;  %v3403_v6 = vld [vmem:[%s3692_s22 + $0x1c4] ss:$8 sps:$4 sm:$0xff]  }
  0x51   : > { %2332 = vmatprep.subr.bf16.mxu0 %v3334_v7  ;;  %v3406_v7 = vld [vmem:[%s3692_s22 + $0x5c4] ss:$8 sps:$4 sm:$0xff]  }
  0x52   : > { %2100 = vmatmul.mubr.bf16.vlgmr.msra.gmra.mrb[0].mxu1 %v2850_v8  ;;  %v3401_v8 = vld [vmem:[%s3692_s22 + $0x1c0] ss:$8 sps:$4 sm:$0xff]  }
  0x53   : > { %2312 = vmatmul.mubr.bf16.vlgmr.msra.gmra.mrb[0].mxu0 %v2858_v10  ;;  %2121 = vmatpush1.bf16.msra.mxu1 %v3329_v9  ;;  %v3404_v9 = vld [vmem:[%s3692_s22 + $0x5c0] ss:$8 sps:$4 sm:$0xff]   ;;  %v3409_v10 = vld [vmem:[%s3692_s22 + $0x1d4] ss:$8 sps:$4 sm:$0xff]  }
  0x54   : > { %2333 = vmatpush1.bf16.msra.mxu0 %v3332_v11  ;;  %2122 = vmatprep.subr.bf16.mxu1 %v3337_v12  ;;  %v3412_v11 = vld [vmem:[%s3692_s22 + $0x5d4] ss:$8 sps:$4 sm:$0xff]   ;;  %v3407_v12 = vld [vmem:[%s3692_s22 + $0x1d0] ss:$8 sps:$4 sm:$0xff]  }
  0x55   : > { %2334 = vmatprep.subr.bf16.mxu0 %v3340_v13  ;;  %2109 = vmatprep.mubr.bf16.mxu1 %v2867_v33  ;;  %v3410_v13 = vld [vmem:[%s3692_s22 + $0x5d0] ss:$8 sps:$4 sm:$0xff]   ;;  %v368_v33 = vld [vmem:[%s3742_s26 + $0xe8] sm:$0xff] }
  0x56   : > { %2321 = vmatprep.mubr.bf16.mxu0 %v2875_v39  ;;  %v3442_v39 = vld [vmem:[%s3692_s22 + $0x624] ss:$8 sps:$4 sm:$0xff]  }
  0x57   : > { %2123 = vmatpush1.bf16.msra.mxu1 %v3335_v14  ;;  %v3415_v14 = vld [vmem:[%s3692_s22 + $0x1e4] ss:$8 sps:$4 sm:$0xff]  }
  0x58   : > { %2335 = vmatpush1.bf16.msra.mxu0 %v3338_v15  ;;  %2124 = vmatprep.subr.bf16.mxu1 %v3343_v16  ;;  %v3418_v15 = vld [vmem:[%s3692_s22 + $0x5e4] ss:$8 sps:$4 sm:$0xff]   ;;  %v3413_v16 = vld [vmem:[%s3692_s22 + $0x1e0] ss:$8 sps:$4 sm:$0xff]  }
  0x59   : > { %2336 = vmatprep.subr.bf16.mxu0 %v3346_v17  ;;  %v3416_v17 = vld [vmem:[%s3692_s22 + $0x5e0] ss:$8 sps:$4 sm:$0xff]  }
  0x5a   : > { %2110 = vmatmul.mubr.bf16.gmra.mrb[4].mxu1 %v2866_v37  ;;  %v3434_v37 = vld [vmem:[%s3692_s22 + $0x610] ss:$8 sps:$4 sm:$0xff]  }
  0x5b   : > { %2125 = vmatpush1.bf16.msra.mxu1 %v3341_v18  ;;  %2322 = vmatmul.mubr.bf16.gmra.mrb[4].mxu0 %v2874_v40  ;;  %v3421_v18 = vld [vmem:[%s3692_s22 + $0x1f4] ss:$8 sps:$4 sm:$0xff]   ;;  %v3437_v40 = vld [vmem:[%s3692_s22 + $0x220] ss:$8 sps:$4 sm:$0xff]  }
  0x5c   : > { %2337 = vmatpush1.bf16.msra.mxu0 %v3344_v19  ;;  %2126 = vmatprep.subr.bf16.mxu1 %v3349_v20  ;;  %v3424_v19 = vld [vmem:[%s3692_s22 + $0x5f4] ss:$8 sps:$4 sm:$0xff]   ;;  %v3419_v20 = vld [vmem:[%s3692_s22 + $0x1f0] ss:$8 sps:$4 sm:$0xff]  }
  0x5d   : > { %2338 = vmatprep.subr.bf16.mxu0 %v3352_v21  ;;  %2152 = vmatprep.mubr.bf16.mxu1 %v2853_v48  ;;  %v3422_v21 = vld [vmem:[%s3692_s22 + $0x5f0] ss:$8 sps:$4 sm:$0xff]   ;;  %v3445_v48 = vld [vmem:[%s3692_s22 + $0x234] ss:$8 sps:$4 sm:$0xff]  }
  0x5e   : > { %2364 = vmatprep.mubr.bf16.mxu0 %v2861_v53  ;;  %v3446_v53 = vld [vmem:[%s3692_s22 + $0x630] ss:$8 sps:$4 sm:$0xff]  }
  0x5f   : > { %2127 = vmatpush1.bf16.msra.mxu1 %v3347_v22  ;;  %v3427_v22 = vld [vmem:[%s3692_s22 + $0x204] ss:$8 sps:$4 sm:$0xff]  }
  0x60   : > { %2339 = vmatpush1.bf16.msra.mxu0 %v3350_v23  ;;  %2128 = vmatprep.subr.bf16.mxu1 %v3355_v24  ;;  %v3430_v23 = vld [vmem:[%s3692_s22 + $0x604] ss:$8 sps:$4 sm:$0xff]   ;;  %v3425_v24 = vld [vmem:[%s3692_s22 + $0x200] ss:$8 sps:$4 sm:$0xff]  }
  0x61   : > { %2340 = vmatprep.subr.bf16.mxu0 %v3358_v25  ;;  %v3428_v25 = vld [vmem:[%s3692_s22 + $0x600] ss:$8 sps:$4 sm:$0xff]  }
  0x63   : > { %2129 = vmatpush1.bf16.msra.mxu1 %v3353_v26  ;;  %v356_v26 = vld [vmem:[%s3742_s26 + $0x88] sm:$0xff] }
  0x64   : > { %2341 = vmatpush1.bf16.msra.mxu0 %v3356_v27  ;;  %2130 = vmatprep.subr.bf16.mxu1 %v3361_v28  ;;  %v2852_v27 = vcombine.low %v3801_v44, %v3804_v45  ;;  %v2860_v28 = vcombine.low %v3811_v49, %v3814_v50  ;;  %v3876_v45 = vld [vmem:[%s3742_s26 + $0x50] sm:$0xff] }
  0x65   : > { %2342 = vmatprep.subr.bf16.mxu0 %v3364_v29  ;;  %v364_v29 = vld [vmem:[%s3742_s26 + $0xc8] sm:$0xff]  ;;  %v3448_v49 = vld [vmem:[%s3692_s22 + $0x634] ss:$8 sps:$4 sm:$0xff]  }
  0x67   : > { %2131 = vmatpush1.bf16.msra.mxu1 %v3359_v32  ;;  %v360_v32 = vld [vmem:[%s3742_s26 + $0xa8] sm:$0xff] }
  0x68   : > { %2343 = vmatpush1.bf16.msra.mxu0 %v3362_v34  ;;  %2132 = vmatprep.subr.bf16.mxu1 %v3367_v38  ;;  %v2869_v34 = vcombine.high %v356_v26, %v364_v29  ;;  %v2877_v35 = vcombine.high %v360_v32, %v368_v33  ;;  %v3439_v38 = vld [vmem:[%s3692_s22 + $0x224] ss:$8 sps:$4 sm:$0xff]   ;;  %v2876_v44 = vcombine.low %v360_v32, %v368_v33  ;;  %v3509_v32 = vld [vmem:[%s3692_s22 + $0x2e0] ss:$8 sps:$4 sm:$0xff]  }
  0x69   : > { %2344 = vmatprep.subr.bf16.mxu0 %v3370_v41  ;;  %v3440_v41 = vld [vmem:[%s3692_s22 + $0x620] ss:$8 sps:$4 sm:$0xff]  }
  0x6a   : > { %v3512_v33 = vld [vmem:[%s3692_s22 + $0x6e0] ss:$8 sps:$4 sm:$0xff]  }
  0x6b   : > { %2133 = vmatpush1.bf16.msra.mxu1 %v3365_v42  ;;  %v3873_v42 = vld [vmem:[%s3742_s26 + $0x10] sm:$0xff] }
  0x6c   : > { %2345 = vmatpush1.bf16.msra.mxu0 %v3368_v43  ;;  %2134 = vmatprep.subr.bf16.mxu1 %v3373_v46  ;;  %v2868_v43 = vcombine.low %v356_v26, %v364_v29  ;;  %v3879_v46 = vld [vmem:[%s3742_s26 + $0x30] sm:$0xff]  ;;  %v2855_v50 = vcombine.high %v3873_v42, %v3876_v45 }
  0x6d   : > { %2346 = vmatprep.subr.bf16.mxu0 %v3376_v47  ;;  %v3882_v47 = vld [vmem:[%s3742_s26 + $0x70] sm:$0xff] }
  0x6e   : > { %v3505_v26 = vld [vmem:[%s3692_s22 + $0x2d4] ss:$8 sps:$4 sm:$0xff]   ;;  %v3506_v29 = vld [vmem:[%s3692_s22 + $0x6d0] ss:$8 sps:$4 sm:$0xff]  }
  0x6f   : > { %2135 = vmatpush1.bf16.msra.mxu1 %v3371_v51  ;;  %v2863_v51 = vcombine.high %v3879_v46, %v3882_v47 }
  0x70   : > { %2347 = vmatpush1.bf16.msra.mxu0 %v3374_v52  ;;  %2136 = vmatprep.subr.bf16.mxu1 %v3379_v54  ;;  %v3443_v52 = vld [vmem:[%s3692_s22 + $0x230] ss:$8 sps:$4 sm:$0xff]   ;;  %v3451_v54 = vld [vmem:[%s3692_s22 + $0x244] ss:$8 sps:$4 sm:$0xff]  }
  0x71   : > { %2348 = vmatprep.subr.bf16.mxu0 %v3382_v55  ;;  %v3454_v55 = vld [vmem:[%s3692_s22 + $0x644] ss:$8 sps:$4 sm:$0xff]  }
  0x73   : > { %2137 = vmatpush1.bf16.msra.mxu1 %v3377_v56  ;;  %v3449_v56 = vld [vmem:[%s3692_s22 + $0x240] ss:$8 sps:$4 sm:$0xff]  }
  0x74   : > { %2349 = vmatpush1.bf16.msra.mxu0 %v3380_v57  ;;  %2138 = vmatprep.subr.bf16.mxu1 %v3385_v58  ;;  %v3452_v57 = vld [vmem:[%s3692_s22 + $0x640] ss:$8 sps:$4 sm:$0xff]   ;;  %v3457_v58 = vld [vmem:[%s3692_s22 + $0x254] ss:$8 sps:$4 sm:$0xff]  }
  0x75   : > { %2350 = vmatprep.subr.bf16.mxu0 %v3388_v59  ;;  %v3460_v59 = vld [vmem:[%s3692_s22 + $0x654] ss:$8 sps:$4 sm:$0xff]  }
  0x77   : > { %2139 = vmatpush1.bf16.msra.mxu1 %v3383_v60  ;;  %v3455_v60 = vld [vmem:[%s3692_s22 + $0x250] ss:$8 sps:$4 sm:$0xff]  }
  0x78   : > { %2351 = vmatpush1.bf16.msra.mxu0 %v3386_v61  ;;  %2140 = vmatprep.subr.bf16.mxu1 %v3391_v62  ;;  %v3458_v61 = vld [vmem:[%s3692_s22 + $0x650] ss:$8 sps:$4 sm:$0xff]   ;;  %v3463_v62 = vld [vmem:[%s3692_s22 + $0x264] ss:$8 sps:$4 sm:$0xff]  }
  0x79   : > { %2352 = vmatprep.subr.bf16.mxu0 %v3394_v63  ;;  %v3466_v63 = vld [vmem:[%s3692_s22 + $0x664] ss:$8 sps:$4 sm:$0xff]  }
  0x7b   : > { %2141 = vmatpush1.bf16.msra.mxu1 %v3389_v0  ;;  %v3461_v0 = vld [vmem:[%s3692_s22 + $0x260] ss:$8 sps:$4 sm:$0xff]  }
  0x7c   : > { %2353 = vmatpush1.bf16.msra.mxu0 %v3392_v1  ;;  %2142 = vmatprep.subr.bf16.mxu1 %v3397_v2  ;;  %v3464_v1 = vld [vmem:[%s3692_s22 + $0x660] ss:$8 sps:$4 sm:$0xff]   ;;  %v3469_v2 = vld [vmem:[%s3692_s22 + $0x274] ss:$8 sps:$4 sm:$0xff]  }
  0x7d   : > { %2354 = vmatprep.subr.bf16.mxu0 %v3400_v3  ;;  %v3472_v3 = vld [vmem:[%s3692_s22 + $0x674] ss:$8 sps:$4 sm:$0xff]  }
  0x7f   : > { %2143 = vmatpush1.bf16.msra.mxu1 %v3395_v4  ;;  %v3467_v4 = vld [vmem:[%s3692_s22 + $0x270] ss:$8 sps:$4 sm:$0xff]  }
  0x80   : > { %2355 = vmatpush1.bf16.msra.mxu0 %v3398_v5  ;;  %2144 = vmatprep.subr.bf16.mxu1 %v3403_v6  ;;  %v3470_v5 = vld [vmem:[%s3692_s22 + $0x670] ss:$8 sps:$4 sm:$0xff]   ;;  %v3475_v6 = vld [vmem:[%s3692_s22 + $0x284] ss:$8 sps:$4 sm:$0xff]  }
  0x81   : > { %2356 = vmatprep.subr.bf16.mxu0 %v3406_v7  ;;  %v3478_v7 = vld [vmem:[%s3692_s22 + $0x684] ss:$8 sps:$4 sm:$0xff]  }
  0x83   : > { %2145 = vmatpush1.bf16.msra.mxu1 %v3401_v8  ;;  %v3473_v8 = vld [vmem:[%s3692_s22 + $0x280] ss:$8 sps:$4 sm:$0xff]  }
  0x84   : > { %2357 = vmatpush1.bf16.msra.mxu0 %v3404_v9  ;;  %2146 = vmatprep.subr.bf16.mxu1 %v3409_v10  ;;  %v3476_v9 = vld [vmem:[%s3692_s22 + $0x680] ss:$8 sps:$4 sm:$0xff]   ;;  %v3481_v10 = vld [vmem:[%s3692_s22 + $0x294] ss:$8 sps:$4 sm:$0xff]  }
  0x85   : > { %2358 = vmatprep.subr.bf16.mxu0 %v3412_v11  ;;  %v3484_v11 = vld [vmem:[%s3692_s22 + $0x694] ss:$8 sps:$4 sm:$0xff]  }
  0x87   : > { %2147 = vmatpush1.bf16.msra.mxu1 %v3407_v12  ;;  %v3479_v12 = vld [vmem:[%s3692_s22 + $0x290] ss:$8 sps:$4 sm:$0xff]  }
  0x88   : > { %2359 = vmatpush1.bf16.msra.mxu0 %v3410_v13  ;;  %2148 = vmatprep.subr.bf16.mxu1 %v3415_v14  ;;  %v3482_v13 = vld [vmem:[%s3692_s22 + $0x690] ss:$8 sps:$4 sm:$0xff]   ;;  %v3487_v14 = vld [vmem:[%s3692_s22 + $0x2a4] ss:$8 sps:$4 sm:$0xff]  }
  0x89   : > { %2360 = vmatprep.subr.bf16.mxu0 %v3418_v15  ;;  %v3490_v15 = vld [vmem:[%s3692_s22 + $0x6a4] ss:$8 sps:$4 sm:$0xff]  }
  0x8b   : > { %2149 = vmatpush1.bf16.msra.mxu1 %v3413_v16  ;;  %v3485_v16 = vld [vmem:[%s3692_s22 + $0x2a0] ss:$8 sps:$4 sm:$0xff]  }
  0x8c   : > { %2361 = vmatpush1.bf16.msra.mxu0 %v3416_v17  ;;  %2150 = vmatprep.subr.bf16.mxu1 %v3421_v18  ;;  %v3488_v17 = vld [vmem:[%s3692_s22 + $0x6a0] ss:$8 sps:$4 sm:$0xff]   ;;  %v3493_v18 = vld [vmem:[%s3692_s22 + $0x2b4] ss:$8 sps:$4 sm:$0xff]  }
  0x8d   : > { %2362 = vmatprep.subr.bf16.mxu0 %v3424_v19  ;;  %v3496_v19 = vld [vmem:[%s3692_s22 + $0x6b4] ss:$8 sps:$4 sm:$0xff]  }
  0x8f   : > { %2151 = vmatpush1.bf16.msra.mxu1 %v3419_v20  ;;  %v3491_v20 = vld [vmem:[%s3692_s22 + $0x2b0] ss:$8 sps:$4 sm:$0xff]  }
  0x90   : > { %2363 = vmatpush1.bf16.msra.mxu0 %v3422_v21  ;;  %2173 = vmatprep.subr.bf16.mxu1 %v3427_v22  ;;  %v3494_v21 = vld [vmem:[%s3692_s22 + $0x6b0] ss:$8 sps:$4 sm:$0xff]   ;;  %v3499_v22 = vld [vmem:[%s3692_s22 + $0x2c4] ss:$8 sps:$4 sm:$0xff]  }
  0x91   : > { %2385 = vmatprep.subr.bf16.mxu0 %v3430_v23  ;;  %v3502_v23 = vld [vmem:[%s3692_s22 + $0x6c4] ss:$8 sps:$4 sm:$0xff]  }
  0x92   : > { %2153 = vmatmul.mubr.bf16.vlgmr.msra.gmra.mrb[0].mxu1 %v2852_v27  ;;  %v3508_v27 = vld [vmem:[%s3692_s22 + $0x6d4] ss:$8 sps:$4 sm:$0xff]  }
  0x93   : > { %2365 = vmatmul.mubr.bf16.vlgmr.msra.gmra.mrb[0].mxu0 %v2860_v28  ;;  %2174 = vmatpush1.bf16.msra.mxu1 %v3425_v24  ;;  %v3497_v24 = vld [vmem:[%s3692_s22 + $0x2c0] ss:$8 sps:$4 sm:$0xff]   ;;  %v3503_v28 = vld [vmem:[%s3692_s22 + $0x2d0] ss:$8 sps:$4 sm:$0xff]  }
  0x94   : > { %2386 = vmatpush1.bf16.msra.mxu0 %v3428_v25  ;;  %2175 = vmatprep.subr.bf16.mxu1 %v3433_v30  ;;  %v3500_v25 = vld [vmem:[%s3692_s22 + $0x6c0] ss:$8 sps:$4 sm:$0xff]   ;;  %v3511_v30 = vld [vmem:[%s3692_s22 + $0x2e4] ss:$8 sps:$4 sm:$0xff]  }
  0x95   : > { %2387 = vmatprep.subr.bf16.mxu0 %v3436_v31  ;;  %2162 = vmatprep.mubr.bf16.mxu1 %v2869_v34  ;;  %v3514_v31 = vld [vmem:[%s3692_s22 + $0x6e4] ss:$8 sps:$4 sm:$0xff]   ;;  %v3517_v34 = vld [vmem:[%s3692_s22 + $0x2f4] ss:$8 sps:$4 sm:$0xff]  }
  0x96   : > { %2374 = vmatprep.mubr.bf16.mxu0 %v2877_v35  ;;  %v3520_v35 = vld [vmem:[%s3692_s22 + $0x6f4] ss:$8 sps:$4 sm:$0xff]  }
  0x97   : > { %2176 = vmatpush1.bf16.msra.mxu1 %v3431_v36  ;;  %v3515_v36 = vld [vmem:[%s3692_s22 + $0x2f0] ss:$8 sps:$4 sm:$0xff]  }
  0x98   : > { %2388 = vmatpush1.bf16.msra.mxu0 %v3434_v37  ;;  %2177 = vmatprep.subr.bf16.mxu1 %v3439_v38  ;;  %v3518_v37 = vld [vmem:[%s3692_s22 + $0x6f0] ss:$8 sps:$4 sm:$0xff]   ;;  %v3523_v38 = vld [vmem:[%s3692_s22 + $0x304] ss:$8 sps:$4 sm:$0xff]  }
  0x99   : > { %2389 = vmatprep.subr.bf16.mxu0 %v3442_v39  ;;  %v3526_v39 = vld [vmem:[%s3692_s22 + $0x704] ss:$8 sps:$4 sm:$0xff]  }
  0x9a   : > { %2163 = vmatmul.mubr.bf16.gmra.mrb[4].mxu1 %v2868_v43  ;;  %v2862_v43 = vcombine.low %v3879_v46, %v3882_v47  ;;  %v3527_v46 = vld [vmem:[%s3692_s22 + $0x310] ss:$8 sps:$4 sm:$0xff]  }
  0x9b   : > { %2375 = vmatmul.mubr.bf16.gmra.mrb[4].mxu0 %v2876_v44  ;;  %2178 = vmatpush1.bf16.msra.mxu1 %v3437_v40  ;;  %v357_v40 = vld [vmem:[%s3742_s26 + $0x90] sm:$0xff] }
  0x9c   : > { %2390 = vmatpush1.bf16.msra.mxu0 %v3440_v41  ;;  %2179 = vmatprep.subr.bf16.mxu1 %v3445_v48  ;;  %v2854_v41 = vcombine.low %v3873_v42, %v3876_v45  ;;  %v365_v44 = vld [vmem:[%s3742_s26 + $0xd0] sm:$0xff] }
  0x9d   : > { %2391 = vmatprep.subr.bf16.mxu0 %v3448_v49  ;;  %2205 = vmatprep.mubr.bf16.mxu1 %v2855_v50  ;;  %v361_v48 = vld [vmem:[%s3742_s26 + $0xb0] sm:$0xff]  ;;  %v3521_v50 = vld [vmem:[%s3692_s22 + $0x300] ss:$8 sps:$4 sm:$0xff]   ;;  %v2871_v42 = vcombine.high %v357_v40, %v365_v44 }
  0x9e   : > { %2417 = vmatprep.mubr.bf16.mxu0 %v2863_v51  ;;  %v369_v49 = vld [vmem:[%s3742_s26 + $0xf0] sm:$0xff]  ;;  %v3524_v51 = vld [vmem:[%s3692_s22 + $0x700] ss:$8 sps:$4 sm:$0xff]  }
  0x9f   : > { %2180 = vmatpush1.bf16.msra.mxu1 %v3443_v52  ;;  %v3529_v52 = vld [vmem:[%s3692_s22 + $0x314] ss:$8 sps:$4 sm:$0xff]   ;;  %v2879_v45 = vcombine.high %v361_v48, %v369_v49  ;;  %v3530_v47 = vld [vmem:[%s3692_s22 + $0x710] ss:$8 sps:$4 sm:$0xff]  }
  0xa0   : > { %2392 = vmatpush1.bf16.msra.mxu0 %v3446_v53  ;;  %2181 = vmatprep.subr.bf16.mxu1 %v3451_v54  ;;  %v3532_v53 = vld [vmem:[%s3692_s22 + $0x714] ss:$8 sps:$4 sm:$0xff]   ;;  %v3535_v54 = vld [vmem:[%s3692_s22 + $0x324] ss:$8 sps:$4 sm:$0xff]  }
  0xa1   : > { %2393 = vmatprep.subr.bf16.mxu0 %v3454_v55  ;;  %v3538_v55 = vld [vmem:[%s3692_s22 + $0x724] ss:$8 sps:$4 sm:$0xff]  }
  0xa3   : > { %2182 = vmatpush1.bf16.msra.mxu1 %v3449_v56  ;;  %v3959_v56 = vld [vmem:[%s3742_s26 + $0x18] sm:$0xff] }
  0xa4   : > { %2394 = vmatpush1.bf16.msra.mxu0 %v3452_v57  ;;  %2183 = vmatprep.subr.bf16.mxu1 %v3457_v58  ;;  %v2870_v57 = vcombine.low %v357_v40, %v365_v44  ;;  %v2878_v58 = vcombine.low %v361_v48, %v369_v49  ;;  %v3593_v40 = vld [vmem:[%s3692_s22 + $0x3c0] ss:$8 sps:$4 sm:$0xff]   ;;  %v3604_v44 = vld [vmem:[%s3692_s22 + $0x7d4] ss:$8 sps:$4 sm:$0xff]   ;;  %v3599_v48 = vld [vmem:[%s3692_s22 + $0x3d0] ss:$8 sps:$4 sm:$0xff]  }
  0xa5   : > { %2395 = vmatprep.subr.bf16.mxu0 %v3460_v59  ;;  %v3962_v59 = vld [vmem:[%s3742_s26 + $0x58] sm:$0xff] }
  0xa6   : > { %v3602_v49 = vld [vmem:[%s3692_s22 + $0x7d0] ss:$8 sps:$4 sm:$0xff]  }
  0xa7   : > { %2184 = vmatpush1.bf16.msra.mxu1 %v3455_v60  ;;  %v3965_v60 = vld [vmem:[%s3742_s26 + $0x38] sm:$0xff] }
  0xa8   : > { %2396 = vmatpush1.bf16.msra.mxu0 %v3458_v61  ;;  %2185 = vmatprep.subr.bf16.mxu1 %v3463_v62  ;;  %v3968_v61 = vld [vmem:[%s3742_s26 + $0x78] sm:$0xff]  ;;  %v3533_v62 = vld [vmem:[%s3692_s22 + $0x320] ss:$8 sps:$4 sm:$0xff]  }
  0xa9   : > { %2397 = vmatprep.subr.bf16.mxu0 %v3466_v63  ;;  %v3536_v63 = vld [vmem:[%s3692_s22 + $0x720] ss:$8 sps:$4 sm:$0xff]  }
  0xab   : > { %2186 = vmatpush1.bf16.msra.mxu1 %v3461_v0  ;;  %v3541_v0 = vld [vmem:[%s3692_s22 + $0x334] ss:$8 sps:$4 sm:$0xff]  }
  0xac   : > { %2398 = vmatpush1.bf16.msra.mxu0 %v3464_v1  ;;  %2187 = vmatprep.subr.bf16.mxu1 %v3469_v2  ;;  %v3544_v1 = vld [vmem:[%s3692_s22 + $0x734] ss:$8 sps:$4 sm:$0xff]   ;;  %v2857_v2 = vcombine.high %v3959_v56, %v3962_v59 }
  0xad   : > { %2399 = vmatprep.subr.bf16.mxu0 %v3472_v3  ;;  %v2865_v3 = vcombine.high %v3965_v60, %v3968_v61 }
  0xaf   : > { %2188 = vmatpush1.bf16.msra.mxu1 %v3467_v4  ;;  %v3539_v4 = vld [vmem:[%s3692_s22 + $0x330] ss:$8 sps:$4 sm:$0xff]  }
  0xb0   : > { %2400 = vmatpush1.bf16.msra.mxu0 %v3470_v5  ;;  %2189 = vmatprep.subr.bf16.mxu1 %v3475_v6  ;;  %v3542_v5 = vld [vmem:[%s3692_s22 + $0x730] ss:$8 sps:$4 sm:$0xff]   ;;  %v3547_v6 = vld [vmem:[%s3692_s22 + $0x344] ss:$8 sps:$4 sm:$0xff]  }
  0xb1   : > { %2401 = vmatprep.subr.bf16.mxu0 %v3478_v7  ;;  %v3550_v7 = vld [vmem:[%s3692_s22 + $0x744] ss:$8 sps:$4 sm:$0xff]  }
  0xb3   : > { %2190 = vmatpush1.bf16.msra.mxu1 %v3473_v8  ;;  %v3545_v8 = vld [vmem:[%s3692_s22 + $0x340] ss:$8 sps:$4 sm:$0xff]  }
  0xb4   : > { %2402 = vmatpush1.bf16.msra.mxu0 %v3476_v9  ;;  %2191 = vmatprep.subr.bf16.mxu1 %v3481_v10  ;;  %v3548_v9 = vld [vmem:[%s3692_s22 + $0x740] ss:$8 sps:$4 sm:$0xff]   ;;  %v3553_v10 = vld [vmem:[%s3692_s22 + $0x354] ss:$8 sps:$4 sm:$0xff]  }
  0xb5   : > { %2403 = vmatprep.subr.bf16.mxu0 %v3484_v11  ;;  %v3556_v11 = vld [vmem:[%s3692_s22 + $0x754] ss:$8 sps:$4 sm:$0xff]  }
  0xb7   : > { %2192 = vmatpush1.bf16.msra.mxu1 %v3479_v12  ;;  %v3551_v12 = vld [vmem:[%s3692_s22 + $0x350] ss:$8 sps:$4 sm:$0xff]  }
  0xb8   : > { %2404 = vmatpush1.bf16.msra.mxu0 %v3482_v13  ;;  %2193 = vmatprep.subr.bf16.mxu1 %v3487_v14  ;;  %v3554_v13 = vld [vmem:[%s3692_s22 + $0x750] ss:$8 sps:$4 sm:$0xff]   ;;  %v3559_v14 = vld [vmem:[%s3692_s22 + $0x364] ss:$8 sps:$4 sm:$0xff]  }
  0xb9   : > { %2405 = vmatprep.subr.bf16.mxu0 %v3490_v15  ;;  %v3562_v15 = vld [vmem:[%s3692_s22 + $0x764] ss:$8 sps:$4 sm:$0xff]  }
  0xbb   : > { %2194 = vmatpush1.bf16.msra.mxu1 %v3485_v16  ;;  %v3557_v16 = vld [vmem:[%s3692_s22 + $0x360] ss:$8 sps:$4 sm:$0xff]  }
  0xbc   : > { %2406 = vmatpush1.bf16.msra.mxu0 %v3488_v17  ;;  %2195 = vmatprep.subr.bf16.mxu1 %v3493_v18  ;;  %v3560_v17 = vld [vmem:[%s3692_s22 + $0x760] ss:$8 sps:$4 sm:$0xff]   ;;  %v3565_v18 = vld [vmem:[%s3692_s22 + $0x374] ss:$8 sps:$4 sm:$0xff]  }
  0xbd   : > { %2407 = vmatprep.subr.bf16.mxu0 %v3496_v19  ;;  %v3568_v19 = vld [vmem:[%s3692_s22 + $0x774] ss:$8 sps:$4 sm:$0xff]  }
  0xbf   : > { %2196 = vmatpush1.bf16.msra.mxu1 %v3491_v20  ;;  %v3563_v20 = vld [vmem:[%s3692_s22 + $0x370] ss:$8 sps:$4 sm:$0xff]  }
  0xc0   : > { %2408 = vmatpush1.bf16.msra.mxu0 %v3494_v21  ;;  %2197 = vmatprep.subr.bf16.mxu1 %v3499_v22  ;;  %v3566_v21 = vld [vmem:[%s3692_s22 + $0x770] ss:$8 sps:$4 sm:$0xff]   ;;  %v3571_v22 = vld [vmem:[%s3692_s22 + $0x384] ss:$8 sps:$4 sm:$0xff]  }
  0xc1   : > { %2409 = vmatprep.subr.bf16.mxu0 %v3502_v23  ;;  %v3574_v23 = vld [vmem:[%s3692_s22 + $0x784] ss:$8 sps:$4 sm:$0xff]  }
  0xc3   : > { %2198 = vmatpush1.bf16.msra.mxu1 %v3497_v24  ;;  %v3569_v24 = vld [vmem:[%s3692_s22 + $0x380] ss:$8 sps:$4 sm:$0xff]  }
  0xc4   : > { %2410 = vmatpush1.bf16.msra.mxu0 %v3500_v25  ;;  %2199 = vmatprep.subr.bf16.mxu1 %v3505_v26  ;;  %v3572_v25 = vld [vmem:[%s3692_s22 + $0x780] ss:$8 sps:$4 sm:$0xff]   ;;  %v3577_v26 = vld [vmem:[%s3692_s22 + $0x394] ss:$8 sps:$4 sm:$0xff]  }
  0xc5   : > { %2411 = vmatprep.subr.bf16.mxu0 %v3508_v27  ;;  %v3580_v27 = vld [vmem:[%s3692_s22 + $0x794] ss:$8 sps:$4 sm:$0xff]  }
  0xc7   : > { %2200 = vmatpush1.bf16.msra.mxu1 %v3503_v28  ;;  %v3575_v28 = vld [vmem:[%s3692_s22 + $0x390] ss:$8 sps:$4 sm:$0xff]  }
  0xc8   : > { %2412 = vmatpush1.bf16.msra.mxu0 %v3506_v29  ;;  %2201 = vmatprep.subr.bf16.mxu1 %v3511_v30  ;;  %v3578_v29 = vld [vmem:[%s3692_s22 + $0x790] ss:$8 sps:$4 sm:$0xff]   ;;  %v3583_v30 = vld [vmem:[%s3692_s22 + $0x3a4] ss:$8 sps:$4 sm:$0xff]  }
  0xc9   : > { %2413 = vmatprep.subr.bf16.mxu0 %v3514_v31  ;;  %v3586_v31 = vld [vmem:[%s3692_s22 + $0x7a4] ss:$8 sps:$4 sm:$0xff]  }
  0xcb   : > { %2202 = vmatpush1.bf16.msra.mxu1 %v3509_v32  ;;  %v3581_v32 = vld [vmem:[%s3692_s22 + $0x3a0] ss:$8 sps:$4 sm:$0xff]  }
  0xcc   : > { %2414 = vmatpush1.bf16.msra.mxu0 %v3512_v33  ;;  %2203 = vmatprep.subr.bf16.mxu1 %v3517_v34  ;;  %v3584_v33 = vld [vmem:[%s3692_s22 + $0x7a0] ss:$8 sps:$4 sm:$0xff]   ;;  %v3589_v34 = vld [vmem:[%s3692_s22 + $0x3b4] ss:$8 sps:$4 sm:$0xff]  }
  0xcd   : > { %2415 = vmatprep.subr.bf16.mxu0 %v3520_v35  ;;  %v3592_v35 = vld [vmem:[%s3692_s22 + $0x7b4] ss:$8 sps:$4 sm:$0xff]  }
  0xcf   : > { %2204 = vmatpush1.bf16.msra.mxu1 %v3515_v36  ;;  %v3587_v36 = vld [vmem:[%s3692_s22 + $0x3b0] ss:$8 sps:$4 sm:$0xff]  }
  0xd0   : > { %2416 = vmatpush1.bf16.msra.mxu0 %v3518_v37  ;;  %2226 = vmatprep.subr.bf16.mxu1 %v3523_v38  ;;  %v3590_v37 = vld [vmem:[%s3692_s22 + $0x7b0] ss:$8 sps:$4 sm:$0xff]   ;;  %v3595_v38 = vld [vmem:[%s3692_s22 + $0x3c4] ss:$8 sps:$4 sm:$0xff]  }
  0xd1   : > { %2438 = vmatprep.subr.bf16.mxu0 %v3526_v39  ;;  %v3598_v39 = vld [vmem:[%s3692_s22 + $0x7c4] ss:$8 sps:$4 sm:$0xff]  }
  0xd2   : > { %2206 = vmatmul.mubr.bf16.vlgmr.msra.gmra.mrb[0].mxu1 %v2854_v41  ;;  %v3596_v41 = vld [vmem:[%s3692_s22 + $0x7c0] ss:$8 sps:$4 sm:$0xff]  }
  0xd3   : > { %2418 = vmatmul.mubr.bf16.vlgmr.msra.gmra.mrb[0].mxu0 %v2862_v43  ;;  %2227 = vmatpush1.bf16.msra.mxu1 %v3521_v50  ;;  %v3601_v43 = vld [vmem:[%s3692_s22 + $0x3d4] ss:$8 sps:$4 sm:$0xff]   ;;  %v3607_v50 = vld [vmem:[%s3692_s22 + $0x3e4] ss:$8 sps:$4 sm:$0xff]  }
  0xd4   : > { %2439 = vmatpush1.bf16.msra.mxu0 %v3524_v51  ;;  %2228 = vmatprep.subr.bf16.mxu1 %v3529_v52  ;;  %v3610_v51 = vld [vmem:[%s3692_s22 + $0x7e4] ss:$8 sps:$4 sm:$0xff]   ;;  %v3605_v52 = vld [vmem:[%s3692_s22 + $0x3e0] ss:$8 sps:$4 sm:$0xff]  }
  0xd5   : > { %2440 = vmatprep.subr.bf16.mxu0 %v3532_v53  ;;  %2215 = vmatprep.mubr.bf16.mxu1 %v2871_v42  ;;  %v3608_v53 = vld [vmem:[%s3692_s22 + $0x7e0] ss:$8 sps:$4 sm:$0xff]   ;;  %v3613_v42 = vld [vmem:[%s3692_s22 + $0x3f4] ss:$8 sps:$4 sm:$0xff]  }
  0xd6   : > { %2427 = vmatprep.mubr.bf16.mxu0 %v2879_v45  ;;  %v3616_v45 = vld [vmem:[%s3692_s22 + $0x7f4] ss:$8 sps:$4 sm:$0xff]  }
  0xd7   : > { %2229 = vmatpush1.bf16.msra.mxu1 %v3527_v46  ;;  %v3611_v46 = vld [vmem:[%s3692_s22 + $0x3f0] ss:$8 sps:$4 sm:$0xff]  }
  0xd8   : > { %2441 = vmatpush1.bf16.msra.mxu0 %v3530_v47  ;;  %2230 = vmatprep.subr.bf16.mxu1 %v3535_v54  ;;  %v3614_v47 = vld [vmem:[%s3692_s22 + $0x7f0] ss:$8 sps:$4 sm:$0xff]  }
  0xd9   : > { %2442 = vmatprep.subr.bf16.mxu0 %v3538_v55  ;;  %v358_v54 = vld [vmem:[%s3742_s26 + $0x98] sm:$0xff] }
  0xda   : > { %2216 = vmatmul.mubr.bf16.gmra.mrb[4].mxu1 %v2870_v57  ;;  %v366_v55 = vld [vmem:[%s3742_s26 + $0xd8] sm:$0xff] }
  0xdb   : > { %2428 = vmatmul.mubr.bf16.gmra.mrb[4].mxu0 %v2878_v58  ;;  %2231 = vmatpush1.bf16.msra.mxu1 %v3533_v62  ;;  %v362_v57 = vld [vmem:[%s3742_s26 + $0xb8] sm:$0xff]  ;;  %v2856_v62 = vcombine.low %v3959_v56, %v3962_v59  ;;  %v3641_v59 = vmov 0.0  }
  0xdc   : > { %2443 = vmatpush1.bf16.msra.mxu0 %v3536_v63  ;;  %2232 = vmatprep.subr.bf16.mxu1 %v3541_v0  ;;  %v370_v58 = vld [vmem:[%s3742_s26 + $0xf8] sm:$0xff]  ;;  %v2864_v63 = vcombine.low %v3965_v60, %v3968_v61  ;;  %v2873_v0 = vcombine.high %v358_v54, %v366_v55 }
  0xdd   : > { %2444 = vmatprep.subr.bf16.mxu0 %v3544_v1  ;;  %2258 = vmatprep.mubr.bf16.mxu1 %v2857_v2  ;;  %v2881_v1 = vcombine.high %v362_v57, %v370_v58  ;;  %v2872_v2 = vcombine.low %v358_v54, %v366_v55 }
  0xde   : > { %2470 = vmatprep.mubr.bf16.mxu0 %v2865_v3  ;;  %v2880_v3 = vcombine.low %v362_v57, %v370_v58  ;;  %v3642_v57 = vmov 1966171168  }
  0xdf   : > { %2233 = vmatpush1.bf16.msra.mxu1 %v3539_v4  ;;  %v2523_v4 = vlaneseq  ;;  %v2552_v58 = vunpack.c.l.s4 %v3642_v57 }
  0xe0   : > { %2445 = vmatpush1.bf16.msra.mxu0 %v3542_v5  ;;  %2234 = vmatprep.subr.bf16.mxu1 %v3547_v6 }
  0xe1   : > { %2446 = vmatprep.subr.bf16.mxu0 %v3550_v7  ;;  %vm4043_vm0 = vcmp.lt.s32.totalorder %v2523_v4, 256 }
  0xe2   : > { %2527 = vst.msk [vmem:[%s4040_s30] sm:$0x3] %vm4043_vm0, %v3641_v59  ;;  %2528 = vst.msk [vmem:[%s4053_s7] sm:$0x3] %vm4043_vm0, %v3641_v59 }
  0xe3   : > { %2235 = vmatpush1.bf16.msra.mxu1 %v3545_v8 }
  0xe4   : > { %2447 = vmatpush1.bf16.msra.mxu0 %v3548_v9  ;;  %2236 = vmatprep.subr.bf16.mxu1 %v3553_v10 }
  0xe5   : > { %2448 = vmatprep.subr.bf16.mxu0 %v3556_v11 }
  0xe7   : > { %2237 = vmatpush1.bf16.msra.mxu1 %v3551_v12 }
  0xe8   : > { %2449 = vmatpush1.bf16.msra.mxu0 %v3554_v13  ;;  %2238 = vmatprep.subr.bf16.mxu1 %v3559_v14 }
  0xe9   : > { %2450 = vmatprep.subr.bf16.mxu0 %v3562_v15 }
  0xeb   : > { %2239 = vmatpush1.bf16.msra.mxu1 %v3557_v16 }
  0xec   : > { %2451 = vmatpush1.bf16.msra.mxu0 %v3560_v17  ;;  %2240 = vmatprep.subr.bf16.mxu1 %v3565_v18 }
  0xed   : > { %2452 = vmatprep.subr.bf16.mxu0 %v3568_v19 }
  0xef   : > { %2241 = vmatpush1.bf16.msra.mxu1 %v3563_v20 }
  0xf0   : > { %2453 = vmatpush1.bf16.msra.mxu0 %v3566_v21  ;;  %2242 = vmatprep.subr.bf16.mxu1 %v3571_v22 }
  0xf1   : > { %2454 = vmatprep.subr.bf16.mxu0 %v3574_v23 }
  0xf3   : > { %2243 = vmatpush1.bf16.msra.mxu1 %v3569_v24 }
  0xf4   : > { %2455 = vmatpush1.bf16.msra.mxu0 %v3572_v25  ;;  %2244 = vmatprep.subr.bf16.mxu1 %v3577_v26 }
  0xf5   : > { %2456 = vmatprep.subr.bf16.mxu0 %v3580_v27 }
  0xf7   : > { %2245 = vmatpush1.bf16.msra.mxu1 %v3575_v28 }
  0xf8   : > { %2457 = vmatpush1.bf16.msra.mxu0 %v3578_v29  ;;  %2246 = vmatprep.subr.bf16.mxu1 %v3583_v30 }
  0xf9   : > { %2458 = vmatprep.subr.bf16.mxu0 %v3586_v31 }
  0xfb   : > { %2247 = vmatpush1.bf16.msra.mxu1 %v3581_v32 }
  0xfc   : > { %2459 = vmatpush1.bf16.msra.mxu0 %v3584_v33  ;;  %2248 = vmatprep.subr.bf16.mxu1 %v3589_v34 }
  0xfd   : > { %2460 = vmatprep.subr.bf16.mxu0 %v3592_v35 }
  0xff   : > { %2249 = vmatpush1.bf16.msra.mxu1 %v3587_v36 }
 0x100   : > { %2461 = vmatpush1.bf16.msra.mxu0 %v3590_v37  ;;  %2250 = vmatprep.subr.bf16.mxu1 %v3595_v38 }
 0x101   : > { %2462 = vmatprep.subr.bf16.mxu0 %v3598_v39 }
 0x103   : > { %2251 = vmatpush1.bf16.msra.mxu1 %v3593_v40 }
 0x104   : > { %2463 = vmatpush1.bf16.msra.mxu0 %v3596_v41  ;;  %2252 = vmatprep.subr.bf16.mxu1 %v3601_v43 }
 0x105   : > { %2464 = vmatprep.subr.bf16.mxu0 %v3604_v44 }
 0x107   : > { %2253 = vmatpush1.bf16.msra.mxu1 %v3599_v48 }
 0x108   : > { %2465 = vmatpush1.bf16.msra.mxu0 %v3602_v49  ;;  %2254 = vmatprep.subr.bf16.mxu1 %v3607_v50 }
 0x109   : > { %2466 = vmatprep.subr.bf16.mxu0 %v3610_v51 }
 0x10b   : > { %2255 = vmatpush1.bf16.msra.mxu1 %v3605_v52 }
 0x10c   : > { %2467 = vmatpush1.bf16.msra.mxu0 %v3608_v53  ;;  %2256 = vmatprep.subr.bf16.mxu1 %v3613_v42 }
 0x10d   : > { %2468 = vmatprep.subr.bf16.mxu0 %v3616_v45 }
 0x10f   : > { %2257 = vmatpush1.bf16.msra.mxu1 %v3611_v46 }
 0x110   : > { %2469 = vmatpush1.bf16.msra.mxu0 %v3614_v47 }
 0x112   : > { %2259 = vmatmul.mubr.bf16.vlgmr.msra.gmra.mrb[0].mxu1 %v2856_v62 }
 0x113   : > { %2471 = vmatmul.mubr.bf16.vlgmr.msra.gmra.mrb[0].mxu0 %v2864_v63  ;;  %2268 = vmatprep.mubr.bf16.mxu1 %v2873_v0 }
 0x114   : > { %2480 = vmatprep.mubr.bf16.mxu0 %v2881_v1 }
 0x11a   : > { %2269 = vmatmul.mubr.bf16.gmra.mrb[4].mxu1 %v2872_v2 }
 0x11b   : > { %2481 = vmatmul.mubr.bf16.gmra.mrb[4].mxu0 %v2880_v3 }
 0x1e5   : > { %v2260_v60 = vpop.f32.mrb[0].mxu1 }
 0x1e6   : > { %v2472_v61 = vpop.f32.mrb[0].mxu0  ;;  %v2262_v6 = vpop.f32.mrb[1].mxu1 }
 0x1e7   : > { %v3151_v5 = vadd.f32 %v2472_v61, %v2260_v60  ;;  %v2474_v7 = vpop.f32.mrb[1].mxu0  ;;  %v2264_v9 = vpop.f32.mrb[2].mxu1  ;;  %v2553_v61 = vunpack.c.0.s8 %v2552_v58 }
 0x1e8   : > { %v3152_v8 = vadd.f32 %v2474_v7, %v2262_v6  ;;  %v2476_v10 = vpop.f32.mrb[2].mxu0  ;;  %v2266_v12 = vpop.f32.mrb[3].mxu1 }
 0x1e9   : > { %v3153_v11 = vadd.f32 %v2476_v10, %v2264_v9  ;;  %v2478_v13 = vpop.f32.mrb[3].mxu0  ;;  %v2573_v16 = vmul.f32 %v3151_v5, %v3151_v5 }
 0x1ea   : > { %v3147_v14 = vpack.c.bf16 %v3152_v8, %v3151_v5  ;;  %v3154_v15 = vadd.f32 %v2478_v13, %v2266_v12  ;;  %v2574_v19 = vmul.f32 %v3152_v8, %v3152_v8 }
 0x1eb   : > { %v2530_v17 = vadd.f32 %v3153_v11, %v3151_v5  ;;  %v2575_v18 = vmul.f32 %v3153_v11, %v3153_v11  ;;  %v2555_v5 = vshrl.u32 %v2523_v4, 7  ;;  %v2529_v4 = vld [vmem:[%s4040_s30] sm:$0x3] }
 0x1ec   : > { %2515 = vst [vmem:[%s4062_s11] sm:$0xff] %v3147_v14  ;;  %v3148_v20 = vpack.c.bf16 %v3154_v15, %v3153_v11  ;;  %v2539_v21 = vadd.f32 %v3154_v15, %v3152_v8  ;;  %v2576_v22 = vmul.f32 %v3154_v15, %v3154_v15 }
 0x1ed   : > { %v2581_v23 = vadd.f32 %v2575_v18, %v2573_v16  ;;  %v2270_v25 = vpop.f32.mrb[4].mxu1  ;;  %v2556_v14 = vsub.s32 %v2553_v61, %v2555_v5 }
 0x1ee   : > { %2516 = vst [vmem:[%s4062_s11 + $0x8] sm:$0xff] %v3148_v20  ;;  %v2590_v24 = vadd.f32 %v2576_v22, %v2574_v19  ;;  %v2482_v26 = vpop.f32.mrb[4].mxu0  ;;  %v2272_v28 = vpop.f32.mrb[5].mxu1 }
 0x1ef   : > { %v3155_v27 = vadd.f32 %v2482_v26, %v2270_v25  ;;  %v2484_v29 = vpop.f32.mrb[5].mxu0  ;;  %v2274_v31 = vpop.f32.mrb[6].mxu1 }
 0x1f0   : > { %v3156_v30 = vadd.f32 %v2484_v29, %v2272_v28  ;;  %v2486_v32 = vpop.f32.mrb[6].mxu0  ;;  %v2276_v36 = vpop.f32.mrb[7].mxu1 }
 0x1f1   : > { %v2531_v33 = vadd.f32 %v3155_v27, %v2530_v17  ;;  %v2577_v34 = vmul.f32 %v3155_v27, %v3155_v27  ;;  %v3157_v35 = vadd.f32 %v2486_v32, %v2274_v31  ;;  %v2488_v37 = vpop.f32.mrb[7].mxu0 }
 0x1f2   : > { %v3149_v38 = vpack.c.bf16 %v3156_v30, %v3155_v27  ;;  %v2540_v39 = vadd.f32 %v3156_v30, %v2539_v21  ;;  %v2578_v40 = vmul.f32 %v3156_v30, %v3156_v30  ;;  %v3158_v41 = vadd.f32 %v2488_v37, %v2276_v36 }
 0x1f3   : > { %v2582_v43 = vadd.f32 %v2581_v23, %v2577_v34  ;;  %v2532_v44 = vadd.f32 %v3157_v35, %v2531_v33  ;;  %v2579_v48 = vmul.f32 %v3157_v35, %v3157_v35  ;;  %v2572_v23 = vld [vmem:[%s4053_s7] sm:$0x3] }
 0x1f4   : > { %2517 = vst [vmem:[%s4062_s11 + $0x10] sm:$0xff] %v3149_v38  ;;  %v2591_v49 = vadd.f32 %v2590_v24, %v2578_v40  ;;  %v3150_v50 = vpack.c.bf16 %v3158_v41, %v3157_v35  ;;  %v2541_v51 = vadd.f32 %v3158_v41, %v2540_v39  ;;  %v2580_v52 = vmul.f32 %v3158_v41, %v3158_v41 }
 0x1f5   : > { %v2533_v53 = vrot.slane %v2532_v44, 4  ;;  %v2583_v42 = vadd.f32 %v2582_v43, %v2579_v48 }
 0x1f6   : > { %2518 = vst [vmem:[%s4062_s11 + $0x18] sm:$0xff] %v3150_v50  ;;  %v2542_v45 = vrot.slane %v2541_v51, 4  ;;  %v2592_v46 = vadd.f32 %v2591_v49, %v2580_v52 }
 0x1f7   : > { %v2534_v47 = vadd.f32 %v2533_v53, %v2532_v44  ;;  %v2584_v54 = vrot.slane %v2583_v42, 4 }
 0x1f8   : > { %v2543_v55 = vadd.f32 %v2542_v45, %v2541_v51  ;;  %v2593_v62 = vrot.slane %v2592_v46, 4 }
 0x1f9   : > { %v2535_v63 = vrot.slane %v2534_v47, 2  ;;  %v2585_v0 = vadd.f32 %v2584_v54, %v2583_v42 }
 0x1fa   : > { %v2544_v1 = vrot.slane %v2543_v55, 2  ;;  %v2594_v2 = vadd.f32 %v2593_v62, %v2592_v46 }
 0x1fb   : > { %v2536_v3 = vadd.f32 %v2535_v63, %v2534_v47  ;;  %v2586_v59 = vrot.slane %v2585_v0, 2 }
 0x1fc   : > { %v2545_v60 = vadd.f32 %v2544_v1, %v2543_v55  ;;  %v2595_v6 = vrot.slane %v2594_v2, 2 }
 0x1fd   : > { %v2537_v7 = vrot.slane %v2536_v3, 1  ;;  %v2587_v8 = vadd.f32 %v2586_v59, %v2585_v0 }
 0x1fe   : > { %v2546_v9 = vrot.slane %v2545_v60, 1  ;;  %v2596_v10 = vadd.f32 %v2595_v6, %v2594_v2 }
 0x1ff   : > { %v2538_v11 = vadd.f32 %v2537_v7, %v2536_v3  ;;  %v2588_v12 = vrot.slane %v2587_v8, 1 }
 0x200   : > { %v2547_v13 = vadd.f32 %v2546_v9, %v2545_v60  ;;  %v2597_v15 = vrot.slane %v2596_v10, 1 }
 0x201   : > { %v2589_v16 = vadd.f32 %v2588_v12, %v2587_v8 }
 0x202   : > { %v2550_v17 = vcombine.low %v2538_v11, %v2547_v13  ;;  %v2598_v18 = vadd.f32 %v2597_v15, %v2596_v10 }
 0x204   : > { %v2557_v19 = vrot.slane %v2550_v17, %v2556_v14  ;;  %v2601_v20 = vcombine.low %v2589_v16, %v2598_v18 }
 0x206   : > { %v2564_v21 = vrot.slane %v2557_v19, %v2556_v14  ;;  %v2608_v22 = vrot.slane %v2601_v20, %v2556_v14 }
 0x208   : > { %v2566_v24 = vadd.f32 %v2564_v21, %v2529_v4  ;;  %v2615_v25 = vrot.slane %v2608_v22, %v2556_v14 }
 0x20a   : > { %2571 = vst.msk [vmem:[%s4040_s30] sm:$0x3] %vm4043_vm0, %v2566_v24  ;;  %v2617_v26 = vadd.f32 %v2615_v25, %v2572_v23 }
 0x20c   : > { %2618 = vst.msk [vmem:[%s4053_s7] sm:$0x3] %vm4043_vm0, %v2617_v26 }
 0x20d PF: > { %s15_s17 = sadd.s32 1, %s3639_s17   ;;  %s4093_s15 = smov %s3635_s16 }
 0x20e   : > { %p12_p5 = scmp.ge.s32.totalorder %s15_s17, 6   ;;  %s4094_s16 = smov %s4096_s18 }
 0x210   :  { %14 = sbr.rel (!%p12_p5) target bundleno = 2 (0x2), region = 89 }

// kernel: generator_forward.7
= control target key start
LH: loop header
LB: loop body
LE: loop exit
PB: predicated region body
PF: predicated region fallthrough
CT: control target
= control target key end

     0   :  { %s2563_s15 = smov 0   ;;  %s2565_s16 = smov 0   ;;  %s2815_s0 = inlined_call_operand.vmem [shape: bf16[4,128,1024], index: 0, kind: input, shape index: {}]   ;;  %s2816_s1 = inlined_call_operand.vmem [shape: bf16[4,1024,128], index: 1, kind: input, shape index: {}]   ;;  %s2817_s2 = inlined_call_operand.vmem [shape: bf16[4,128,128], index: 2, kind: output, shape index: {0}]   ;;  %s2818_s3 = inlined_call_operand.vmem [shape: f32[4,1,128], index: 3, kind: output, shape index: {1}]   ;;  %s2819_s4 = inlined_call_operand.vmem [shape: f32[4,1,128], index: 4, kind: output, shape index: {2}]  }
   0x1   :  { %s2567_s17 = smov 0  }
   0x2 LB: > { %s34_s18 = sadd.s32 1, %s2531_s16  ;;  %p1949_p0 = scmp.ge.s32.totalorder %s2535_s17, 1  ;;  %s2535_s17 = sphi %s2567_s17, %s15_s17   ;;  %s2531_s16 = sphi %s2565_s16, %s2821_s16   ;;  %s2527_s15 = sphi %s2563_s15, %s2820_s15  }
   0x3   : > { %p36_p1 = scmp.ge.s32.totalorder %s34_s18, 4  ;;  %p217_p2 = scmp.lt.s32.totalorder %s2535_s17, 5 }
   0x5   : > { %s2823_s18 = smov (%p36_p1, %s34_s18), 0  ;;  %p218_p3 = pnand %p1949_p0, %p217_p2 }
   0x6   : > { %p276_p4 = scmp.lt.s32.totalorder (!%p218_p3), %s2527_s15, 3 }
   0x7   : > { %221 = sbr.rel (%p218_p3) target bundleno = 411 (0x19b), region = 28 }
   0xe   : > { %s2825_s15 = smov (!%p276_p4, %s2527_s15), 3 }
   0xf   : > { %s2102_s19 = sshll.u32 %s2825_s15, 9  ;;  %s2730_s28 = scalar_lea.vmem %s2818_s3, %s2825_s15 }
  0x10   : > { %s2589_s22 = scalar_lea.vmem %s2816_s1, %s2102_s19  ;;  %s2626_s25 = scalar_lea.vmem %s2815_s0, %s2102_s19 }
  0x11   : > { %v2449_v0 = vld [vmem:[%s2589_s22 + $0x40] sm:$0xff]   ;;  %v2453_v4 = vld [vmem:[%s2589_s22 + $0x48] sm:$0xff]   ;;  %v2457_v8 = vld [vmem:[%s2589_s22 + $0x50] sm:$0xff]   ;;  %s2736_s5 = scalar_lea.vmem %s2819_s4, %s2825_s15  ;;  %s2104_s6 = sshll.u32 %s2825_s15, 6 }
  0x12   : > { %v2450_v1 = vld [vmem:[%s2589_s22 + $0xc0] sm:$0xff]   ;;  %2168 = vmatprep.subr.bf16.mxu0 %v2449_v0  ;;  %v2454_v5 = vld [vmem:[%s2589_s22 + $0xc8] sm:$0xff]   ;;  %v2458_v9 = vld [vmem:[%s2589_s22 + $0xd0] sm:$0xff]   ;;  %s2778_s9 = scalar_lea.vmem %s2817_s2, %s2104_s6 }
  0x13   : > { %v2451_v2 = vld [vmem:[%s2589_s22] sm:$0xff]   ;;  %2232 = vmatprep.subr.bf16.mxu1 %v2450_v1  ;;  %v2455_v6 = vld [vmem:[%s2589_s22 + $0x8] sm:$0xff]   ;;  %v2459_v10 = vld [vmem:[%s2589_s22 + $0x10] sm:$0xff]  }
  0x14   : > { %v2452_v3 = vld [vmem:[%s2589_s22 + $0x80] sm:$0xff]   ;;  %2169 = vmatpush3.bf16.msra.mxu0 %v2451_v2  ;;  %v2456_v7 = vld [vmem:[%s2589_s22 + $0x88] sm:$0xff]   ;;  %v2460_v11 = vld [vmem:[%s2589_s22 + $0x90] sm:$0xff]  }
  0x15   : > { %2233 = vmatpush3.bf16.msra.mxu1 %v2452_v3  ;;  %2170 = vmatprep.subr.bf16.mxu0 %v2453_v4  ;;  %v2461_v12 = vld [vmem:[%s2589_s22 + $0x58] sm:$0xff]   ;;  %v2465_v16 = vld [vmem:[%s2589_s22 + $0x60] sm:$0xff]   ;;  %v2469_v20 = vld [vmem:[%s2589_s22 + $0x68] sm:$0xff]  }
  0x16   : > { %2234 = vmatprep.subr.bf16.mxu1 %v2454_v5  ;;  %v2462_v13 = vld [vmem:[%s2589_s22 + $0xd8] sm:$0xff]   ;;  %v2466_v17 = vld [vmem:[%s2589_s22 + $0xe0] sm:$0xff]   ;;  %v2470_v21 = vld [vmem:[%s2589_s22 + $0xe8] sm:$0xff]  }
  0x17   : > { %v2463_v14 = vld [vmem:[%s2589_s22 + $0x18] sm:$0xff]   ;;  %v2467_v18 = vld [vmem:[%s2589_s22 + $0x20] sm:$0xff]   ;;  %v2471_v22 = vld [vmem:[%s2589_s22 + $0x28] sm:$0xff]  }
  0x18   : > { %2171 = vmatpush3.bf16.msra.mxu0 %v2455_v6  ;;  %v2464_v15 = vld [vmem:[%s2589_s22 + $0x98] sm:$0xff]   ;;  %v2468_v19 = vld [vmem:[%s2589_s22 + $0xa0] sm:$0xff]   ;;  %v2472_v23 = vld [vmem:[%s2589_s22 + $0xa8] sm:$0xff]  }
  0x19   : > { %2235 = vmatpush3.bf16.msra.mxu1 %v2456_v7  ;;  %2172 = vmatprep.subr.bf16.mxu0 %v2457_v8  ;;  %v2473_v24 = vld [vmem:[%s2589_s22 + $0x70] sm:$0xff]   ;;  %v2477_v28 = vld [vmem:[%s2589_s22 + $0x78] sm:$0xff]   ;;  %v320_v32 = vld [vmem:[%s2626_s25] sm:$0xff] }
  0x1a   : > { %2236 = vmatprep.subr.bf16.mxu1 %v2458_v9  ;;  %v2474_v25 = vld [vmem:[%s2589_s22 + $0xf0] sm:$0xff]   ;;  %v2478_v29 = vld [vmem:[%s2589_s22 + $0xf8] sm:$0xff]   ;;  %v324_v33 = vld [vmem:[%s2626_s25 + $0x20] sm:$0xff] }
  0x1b   : > { %v2475_v26 = vld [vmem:[%s2589_s22 + $0x30] sm:$0xff]   ;;  %v2479_v30 = vld [vmem:[%s2589_s22 + $0x38] sm:$0xff]   ;;  %v321_v34 = vld [vmem:[%s2626_s25 + $0x8] sm:$0xff]  ;;  %v1956_v35 = vcombine.low %v320_v32, %v324_v33  ;;  %v1957_v36 = vcombine.high %v320_v32, %v324_v33 }
  0x1c   : > { %2173 = vmatpush3.bf16.msra.mxu0 %v2459_v10  ;;  %v2476_v27 = vld [vmem:[%s2589_s22 + $0xb0] sm:$0xff]   ;;  %v2480_v31 = vld [vmem:[%s2589_s22 + $0xb8] sm:$0xff]   ;;  %v325_v37 = vld [vmem:[%s2626_s25 + $0x28] sm:$0xff] }
  0x1d   : > { %2237 = vmatpush3.bf16.msra.mxu1 %v2460_v11  ;;  %2174 = vmatprep.subr.bf16.mxu0 %v2461_v12  ;;  %v1958_v38 = vcombine.low %v321_v34, %v325_v37  ;;  %v1959_v39 = vcombine.high %v321_v34, %v325_v37  ;;  %v2481_v40 = vld [vmem:[%s2589_s22 + $0x140] sm:$0xff]   ;;  %v329_v47 = vld [vmem:[%s2626_s25 + $0x48] sm:$0xff]  ;;  %v2489_v62 = vld [vmem:[%s2589_s22 + $0x150] sm:$0xff]  }
  0x1e   : > { %2238 = vmatprep.subr.bf16.mxu1 %v2462_v13  ;;  %1248 = vmatprep.mubr.bf16.mxu0 %v1957_v36  ;;  %v2482_v41 = vld [vmem:[%s2589_s22 + $0x100] sm:$0xff]   ;;  %v333_v48 = vld [vmem:[%s2626_s25 + $0x68] sm:$0xff]  ;;  %v2490_v63 = vld [vmem:[%s2589_s22 + $0x110] sm:$0xff]  }
  0x1f   : > { %1345 = vmatprep.mubr.bf16.mxu1 %v1959_v39  ;;  %v2483_v42 = vld [vmem:[%s2589_s22 + $0x1c0] sm:$0xff]   ;;  %v1967_v49 = vcombine.high %v329_v47, %v333_v48  ;;  %v2485_v50 = vld [vmem:[%s2589_s22 + $0x148] sm:$0xff]   ;;  %v1966_v53 = vcombine.low %v329_v47, %v333_v48  ;;  %v2491_v0 = vld [vmem:[%s2589_s22 + $0x1d0] sm:$0xff]  }
  0x20   : > { %2175 = vmatpush3.bf16.msra.mxu0 %v2463_v14  ;;  %v2484_v43 = vld [vmem:[%s2589_s22 + $0x180] sm:$0xff]   ;;  %v2486_v52 = vld [vmem:[%s2589_s22 + $0x108] sm:$0xff]   ;;  %v2492_v1 = vld [vmem:[%s2589_s22 + $0x190] sm:$0xff]  }
  0x21   : > { %2239 = vmatpush3.bf16.msra.mxu1 %v2464_v15  ;;  %2176 = vmatprep.subr.bf16.mxu0 %v2465_v16  ;;  %v328_v44 = vld [vmem:[%s2626_s25 + $0x40] sm:$0xff]  ;;  %v2487_v54 = vld [vmem:[%s2589_s22 + $0x1c8] sm:$0xff]   ;;  %v2493_v10 = vld [vmem:[%s2589_s22 + $0x158] sm:$0xff]  }
  0x22   : > { %2240 = vmatprep.subr.bf16.mxu1 %v2466_v17  ;;  %v332_v45 = vld [vmem:[%s2626_s25 + $0x60] sm:$0xff]  ;;  %v2488_v55 = vld [vmem:[%s2589_s22 + $0x188] sm:$0xff]   ;;  %v2494_v11 = vld [vmem:[%s2589_s22 + $0x118] sm:$0xff]  }
  0x23   : > { %v1965_v46 = vcombine.high %v328_v44, %v332_v45  ;;  %v1964_v51 = vcombine.low %v328_v44, %v332_v45  ;;  %v336_v56 = vld [vmem:[%s2626_s25 + $0x80] sm:$0xff]  ;;  %v337_v58 = vld [vmem:[%s2626_s25 + $0x88] sm:$0xff]  ;;  %v2495_v12 = vld [vmem:[%s2589_s22 + $0x1d8] sm:$0xff]  }
  0x24   : > { %2177 = vmatpush3.bf16.msra.mxu0 %v2467_v18  ;;  %v340_v57 = vld [vmem:[%s2626_s25 + $0xa0] sm:$0xff]  ;;  %v341_v59 = vld [vmem:[%s2626_s25 + $0xa8] sm:$0xff]  ;;  %v2496_v13 = vld [vmem:[%s2589_s22 + $0x198] sm:$0xff]  }
  0x25   : > { %2241 = vmatpush3.bf16.msra.mxu1 %v2468_v19  ;;  %2178 = vmatprep.subr.bf16.mxu0 %v2469_v20  ;;  %v1973_v60 = vcombine.high %v336_v56, %v340_v57  ;;  %v1975_v61 = vcombine.high %v337_v58, %v341_v59  ;;  %v1972_v2 = vcombine.low %v336_v56, %v340_v57  ;;  %v344_v3 = vld [vmem:[%s2626_s25 + $0xc0] sm:$0xff]  ;;  %v345_v5 = vld [vmem:[%s2626_s25 + $0xc8] sm:$0xff]  ;;  %v2506_v39 = vld [vmem:[%s2589_s22 + $0x130] sm:$0xff]  }
  0x26   : > { %2242 = vmatprep.subr.bf16.mxu1 %v2470_v21  ;;  %v348_v4 = vld [vmem:[%s2626_s25 + $0xe0] sm:$0xff]  ;;  %v1974_v6 = vcombine.low %v337_v58, %v341_v59  ;;  %v349_v8 = vld [vmem:[%s2626_s25 + $0xe8] sm:$0xff]  ;;  %v2510_v48 = vld [vmem:[%s2589_s22 + $0x138] sm:$0xff]  }
  0x27   : > { %v1981_v7 = vcombine.high %v344_v3, %v348_v4  ;;  %v1983_v9 = vcombine.high %v345_v5, %v349_v8  ;;  %v352_v14 = vld [vmem:[%s2626_s25 + $0x100] sm:$0xff]  ;;  %v353_v16 = vld [vmem:[%s2626_s25 + $0x108] sm:$0xff]  ;;  %v1980_v19 = vcombine.low %v344_v3, %v348_v4  ;;  %v1982_v21 = vcombine.low %v345_v5, %v349_v8  ;;  %v331_v8 = vld [vmem:[%s2626_s25 + $0x58] sm:$0xff] }
  0x28   : > { %2179 = vmatpush3.bf16.msra.mxu0 %v2471_v22  ;;  %v356_v15 = vld [vmem:[%s2626_s25 + $0x120] sm:$0xff]  ;;  %v357_v17 = vld [vmem:[%s2626_s25 + $0x128] sm:$0xff] }
  0x29   : > { %2243 = vmatpush3.bf16.msra.mxu1 %v2472_v23  ;;  %2180 = vmatprep.subr.bf16.mxu0 %v2473_v24  ;;  %v2497_v18 = vld [vmem:[%s2589_s22 + $0x160] sm:$0xff]   ;;  %v1989_v22 = vcombine.high %v352_v14, %v356_v15  ;;  %v1991_v24 = vcombine.high %v353_v16, %v357_v17  ;;  %v2503_v32 = vld [vmem:[%s2589_s22 + $0x1e8] sm:$0xff]   ;;  %v1988_v34 = vcombine.low %v352_v14, %v356_v15  ;;  %v338_v14 = vld [vmem:[%s2626_s25 + $0x90] sm:$0xff] }
  0x2a   : > { %2244 = vmatprep.subr.bf16.mxu1 %v2474_v25  ;;  %v2498_v20 = vld [vmem:[%s2589_s22 + $0x120] sm:$0xff]   ;;  %v2504_v33 = vld [vmem:[%s2589_s22 + $0x1a8] sm:$0xff]   ;;  %v342_v15 = vld [vmem:[%s2626_s25 + $0xb0] sm:$0xff] }
  0x2b   : > { %v2499_v23 = vld [vmem:[%s2589_s22 + $0x1e0] sm:$0xff]   ;;  %v369_v44 = vld [vmem:[%s2626_s25 + $0x188] sm:$0xff] }
  0x2c   : > { %2181 = vmatpush3.bf16.msra.mxu0 %v2475_v26  ;;  %v2500_v25 = vld [vmem:[%s2589_s22 + $0x1a0] sm:$0xff]   ;;  %v373_v45 = vld [vmem:[%s2626_s25 + $0x1a8] sm:$0xff] }
  0x2d   : > { %2245 = vmatpush3.bf16.msra.mxu1 %v2476_v27  ;;  %2182 = vmatprep.subr.bf16.mxu0 %v2477_v28  ;;  %v360_v26 = vld [vmem:[%s2626_s25 + $0x140] sm:$0xff]  ;;  %v2501_v28 = vld [vmem:[%s2589_s22 + $0x168] sm:$0xff]   ;;  %v2006_v59 = vcombine.low %v369_v44, %v373_v45 }
  0x2e   : > { %2246 = vmatprep.subr.bf16.mxu1 %v2478_v29  ;;  %v364_v27 = vld [vmem:[%s2626_s25 + $0x160] sm:$0xff]  ;;  %v361_v29 = vld [vmem:[%s2626_s25 + $0x148] sm:$0xff] }
  0x2f   : > { %v1997_v36 = vcombine.high %v360_v26, %v364_v27  ;;  %v1996_v47 = vcombine.low %v360_v26, %v364_v27  ;;  %v377_v56 = vld [vmem:[%s2626_s25 + $0x1c8] sm:$0xff]  ;;  %v1976_v26 = vcombine.low %v338_v14, %v342_v15 }
  0x30   : > { %2183 = vmatpush3.bf16.msra.mxu0 %v2479_v30  ;;  %v365_v30 = vld [vmem:[%s2626_s25 + $0x168] sm:$0xff] }
  0x31   : > { %2247 = vmatpush3.bf16.msra.mxu1 %v2480_v31  ;;  %2296 = vmatprep.subr.bf16.mxu0 %v2481_v40  ;;  %v2502_v31 = vld [vmem:[%s2589_s22 + $0x128] sm:$0xff]   ;;  %v1999_v37 = vcombine.high %v361_v29, %v365_v30  ;;  %v2507_v40 = vld [vmem:[%s2589_s22 + $0x1f0] sm:$0xff]  }
  0x32   : > { %2360 = vmatprep.subr.bf16.mxu1 %v2483_v42  ;;  %v372_v42 = vld [vmem:[%s2626_s25 + $0x1a0] sm:$0xff]  ;;  %v381_v57 = vld [vmem:[%s2626_s25 + $0x1e8] sm:$0xff] }
  0x33   : > { %1249 = vmatmul.mubr.bf16.vlgmr.msra.gmra.mrb[0].mxu0 %v1956_v35  ;;  %v1990_v35 = vcombine.low %v353_v16, %v357_v17  ;;  %v2014_v3 = vcombine.low %v377_v56, %v381_v57  ;;  %v339_v16 = vld [vmem:[%s2626_s25 + $0x98] sm:$0xff] }
  0x34   : > { %1346 = vmatmul.mubr.bf16.vlgmr.msra.gmra.mrb[0].mxu1 %v1958_v38  ;;  %2297 = vmatpush3.bf16.msra.mxu0 %v2482_v41  ;;  %v2505_v38 = vld [vmem:[%s2589_s22 + $0x170] sm:$0xff]   ;;  %v368_v41 = vld [vmem:[%s2626_s25 + $0x180] sm:$0xff]  ;;  %v343_v17 = vld [vmem:[%s2626_s25 + $0xb8] sm:$0xff] }
  0x35   : > { %2361 = vmatpush3.bf16.msra.mxu1 %v2484_v43  ;;  %1256 = vmatprep.mubr.bf16.mxu0 %v1965_v46  ;;  %v2508_v43 = vld [vmem:[%s2589_s22 + $0x1b0] sm:$0xff]   ;;  %v2509_v46 = vld [vmem:[%s2589_s22 + $0x178] sm:$0xff]   ;;  %v2004_v58 = vcombine.low %v368_v41, %v372_v42  ;;  %v1978_v27 = vcombine.low %v339_v16, %v343_v17 }
  0x36   : > { %1353 = vmatprep.mubr.bf16.mxu1 %v1967_v49  ;;  %2298 = vmatprep.subr.bf16.mxu0 %v2485_v50  ;;  %v1998_v49 = vcombine.low %v361_v29, %v365_v30  ;;  %v2005_v50 = vcombine.high %v368_v41, %v372_v42  ;;  %v354_v30 = vld [vmem:[%s2626_s25 + $0x110] sm:$0xff]  ;;  %v367_v41 = vld [vmem:[%s2626_s25 + $0x178] sm:$0xff] }
  0x37   : > { %2362 = vmatprep.subr.bf16.mxu1 %v2487_v54  ;;  %v376_v54 = vld [vmem:[%s2626_s25 + $0x1c0] sm:$0xff] }
  0x38   : > { %2299 = vmatpush3.bf16.msra.mxu0 %v2486_v52  ;;  %v2007_v52 = vcombine.high %v369_v44, %v373_v45 }
  0x39   : > { %2363 = vmatpush3.bf16.msra.mxu1 %v2488_v55  ;;  %2300 = vmatprep.subr.bf16.mxu0 %v2489_v62  ;;  %v380_v55 = vld [vmem:[%s2626_s25 + $0x1e0] sm:$0xff]  ;;  %v322_v62 = vld [vmem:[%s2626_s25 + $0x10] sm:$0xff] }
  0x3a   : > { %2364 = vmatprep.subr.bf16.mxu1 %v2491_v0  ;;  %v323_v0 = vld [vmem:[%s2626_s25 + $0x18] sm:$0xff] }
  0x3b   : > { %1257 = vmatmul.mubr.bf16.gmra.mrb[4].mxu0 %v1964_v51  ;;  %v2511_v51 = vld [vmem:[%s2589_s22 + $0x1f8] sm:$0xff]  }
  0x3c   : > { %1354 = vmatmul.mubr.bf16.gmra.mrb[4].mxu1 %v1966_v53  ;;  %1264 = vmatprep.mubr.bf16.mxu0 %v1973_v60  ;;  %v2512_v53 = vld [vmem:[%s2589_s22 + $0x1b8] sm:$0xff]   ;;  %v2013_v60 = vcombine.high %v376_v54, %v380_v55 }
  0x3d   : > { %1361 = vmatprep.mubr.bf16.mxu1 %v1975_v61  ;;  %2301 = vmatpush3.bf16.msra.mxu0 %v2490_v63  ;;  %v2015_v61 = vcombine.high %v377_v56, %v381_v57  ;;  %v326_v63 = vld [vmem:[%s2626_s25 + $0x30] sm:$0xff]  ;;  %v379_v56 = vld [vmem:[%s2626_s25 + $0x1d8] sm:$0xff] }
  0x3e   : > { %2365 = vmatpush3.bf16.msra.mxu1 %v2492_v1  ;;  %2302 = vmatprep.subr.bf16.mxu0 %v2493_v10  ;;  %v327_v1 = vld [vmem:[%s2626_s25 + $0x38] sm:$0xff]  ;;  %v1961_v4 = vcombine.high %v322_v62, %v326_v63  ;;  %v1960_v10 = vcombine.low %v322_v62, %v326_v63 }
  0x3f   : > { %2366 = vmatprep.subr.bf16.mxu1 %v2495_v12  ;;  %v1963_v5 = vcombine.high %v323_v0, %v327_v1  ;;  %v383_v57 = vld [vmem:[%s2626_s25 + $0x1f8] sm:$0xff] }
  0x40   : > { %v2018_v63 = vcombine.low %v379_v56, %v383_v57 }
  0x41   : > { %2303 = vmatpush3.bf16.msra.mxu0 %v2494_v11  ;;  %v1962_v11 = vcombine.low %v323_v0, %v327_v1 }
  0x42   : > { %2367 = vmatpush3.bf16.msra.mxu1 %v2496_v13  ;;  %2304 = vmatprep.subr.bf16.mxu0 %v2497_v18 }
  0x43   : > { %1265 = vmatmul.mubr.bf16.gmra.mrb[8].mxu0 %v1972_v2  ;;  %2368 = vmatprep.subr.bf16.mxu1 %v2499_v23  ;;  %v2012_v2 = vcombine.low %v376_v54, %v380_v55  ;;  %v350_v23 = vld [vmem:[%s2626_s25 + $0xf0] sm:$0xff] }
  0x44   : > { %1362 = vmatmul.mubr.bf16.gmra.mrb[8].mxu1 %v1974_v6  ;;  %1272 = vmatprep.mubr.bf16.mxu0 %v1981_v7  ;;  %v330_v6 = vld [vmem:[%s2626_s25 + $0x50] sm:$0xff] }
  0x45   : > { %1369 = vmatprep.mubr.bf16.mxu1 %v1983_v9  ;;  %2305 = vmatpush3.bf16.msra.mxu0 %v2498_v20  ;;  %v334_v7 = vld [vmem:[%s2626_s25 + $0x70] sm:$0xff]  ;;  %v335_v9 = vld [vmem:[%s2626_s25 + $0x78] sm:$0xff]  ;;  %v1977_v20 = vcombine.high %v338_v14, %v342_v15 }
  0x46   : > { %2369 = vmatpush3.bf16.msra.mxu1 %v2500_v25  ;;  %2306 = vmatprep.subr.bf16.mxu0 %v2501_v28  ;;  %v1969_v12 = vcombine.high %v330_v6, %v334_v7  ;;  %v1971_v13 = vcombine.high %v331_v8, %v335_v9  ;;  %v1968_v18 = vcombine.low %v330_v6, %v334_v7  ;;  %v351_v25 = vld [vmem:[%s2626_s25 + $0xf8] sm:$0xff]  ;;  %v378_v54 = vld [vmem:[%s2626_s25 + $0x1d0] sm:$0xff] }
  0x47   : > { %2370 = vmatprep.subr.bf16.mxu1 %v2503_v32  ;;  %v355_v32 = vld [vmem:[%s2626_s25 + $0x118] sm:$0xff]  ;;  %v382_v55 = vld [vmem:[%s2626_s25 + $0x1f0] sm:$0xff] }
  0x48   : > { %v2016_v62 = vcombine.low %v378_v54, %v382_v55 }
  0x49   : > { %2307 = vmatpush3.bf16.msra.mxu0 %v2502_v31  ;;  %v358_v31 = vld [vmem:[%s2626_s25 + $0x130] sm:$0xff] }
  0x4a   : > { %2371 = vmatpush3.bf16.msra.mxu1 %v2504_v33  ;;  %2308 = vmatprep.subr.bf16.mxu0 %v2505_v38  ;;  %v359_v33 = vld [vmem:[%s2626_s25 + $0x138] sm:$0xff]  ;;  %v362_v38 = vld [vmem:[%s2626_s25 + $0x150] sm:$0xff]  ;;  %v1992_v42 = vcombine.low %v354_v30, %v358_v31 }
  0x4b   : > { %1273 = vmatmul.mubr.bf16.gmra.mrb[12].mxu0 %v1980_v19  ;;  %2372 = vmatprep.subr.bf16.mxu1 %v2507_v40  ;;  %v1970_v19 = vcombine.low %v331_v8, %v335_v9  ;;  %v363_v40 = vld [vmem:[%s2626_s25 + $0x158] sm:$0xff] }
  0x4c   : > { %1370 = vmatmul.mubr.bf16.gmra.mrb[12].mxu1 %v1982_v21  ;;  %1280 = vmatprep.mubr.bf16.mxu0 %v1989_v22  ;;  %v1979_v21 = vcombine.high %v339_v16, %v343_v17  ;;  %v346_v22 = vld [vmem:[%s2626_s25 + $0xd0] sm:$0xff]  ;;  %v2003_v45 = vcombine.high %v363_v40, %v367_v41 }
  0x4d   : > { %1377 = vmatprep.mubr.bf16.mxu1 %v1991_v24  ;;  %2309 = vmatpush3.bf16.msra.mxu0 %v2506_v39  ;;  %v347_v24 = vld [vmem:[%s2626_s25 + $0xd8] sm:$0xff]  ;;  %v1985_v28 = vcombine.high %v346_v22, %v350_v23  ;;  %v366_v39 = vld [vmem:[%s2626_s25 + $0x170] sm:$0xff] }
  0x4e   : > { %2373 = vmatpush3.bf16.msra.mxu1 %v2508_v43  ;;  %2310 = vmatprep.subr.bf16.mxu0 %v2509_v46  ;;  %v1987_v29 = vcombine.high %v347_v24, %v351_v25  ;;  %v1994_v43 = vcombine.low %v355_v32, %v359_v33  ;;  %v2001_v44 = vcombine.high %v362_v38, %v366_v39  ;;  %v370_v46 = vld [vmem:[%s2626_s25 + $0x190] sm:$0xff] }
  0x4f   : > { %2374 = vmatprep.subr.bf16.mxu1 %v2511_v51  ;;  %v2002_v51 = vcombine.low %v363_v40, %v367_v41 }
  0x51   : > { %2311 = vmatpush3.bf16.msra.mxu0 %v2510_v48  ;;  %v371_v48 = vld [vmem:[%s2626_s25 + $0x198] sm:$0xff] }
  0x52   : > { %2375 = vmatpush3.bf16.msra.mxu1 %v2512_v53 }
  0x53   : > { %1281 = vmatmul.mubr.bf16.gmra.mrb[16].mxu0 %v1988_v34  ;;  %v1984_v34 = vcombine.low %v346_v22, %v350_v23 }
  0x54   : > { %1378 = vmatmul.mubr.bf16.gmra.mrb[16].mxu1 %v1990_v35  ;;  %1288 = vmatprep.mubr.bf16.mxu0 %v1997_v36  ;;  %v1986_v35 = vcombine.low %v347_v24, %v351_v25  ;;  %v1993_v36 = vcombine.high %v354_v30, %v358_v31 }
  0x55   : > { %1385 = vmatprep.mubr.bf16.mxu1 %v1999_v37  ;;  %v1995_v37 = vcombine.high %v355_v32, %v359_v33 }
  0x5b   : > { %1289 = vmatmul.mubr.bf16.gmra.mrb[20].mxu0 %v1996_v47  ;;  %v374_v47 = vld [vmem:[%s2626_s25 + $0x1b0] sm:$0xff] }
  0x5c   : > { %1386 = vmatmul.mubr.bf16.gmra.mrb[20].mxu1 %v1998_v49  ;;  %1296 = vmatprep.mubr.bf16.mxu0 %v2005_v50  ;;  %v375_v49 = vld [vmem:[%s2626_s25 + $0x1b8] sm:$0xff]  ;;  %v2000_v50 = vcombine.low %v362_v38, %v366_v39 }
  0x5d   : > { %1393 = vmatprep.mubr.bf16.mxu1 %v2007_v52  ;;  %v2009_v52 = vcombine.high %v370_v46, %v374_v47  ;;  %v2011_v53 = vcombine.high %v371_v48, %v375_v49 }
  0x63   : > { %1297 = vmatmul.mubr.bf16.gmra.mrb[24].mxu0 %v2004_v58  ;;  %v2008_v58 = vcombine.low %v370_v46, %v374_v47 }
  0x64   : > { %1394 = vmatmul.mubr.bf16.gmra.mrb[24].mxu1 %v2006_v59  ;;  %1304 = vmatprep.mubr.bf16.mxu0 %v2013_v60  ;;  %v2010_v59 = vcombine.low %v371_v48, %v375_v49  ;;  %v2017_v60 = vcombine.high %v378_v54, %v382_v55 }
  0x65   : > { %1401 = vmatprep.mubr.bf16.mxu1 %v2015_v61  ;;  %v2019_v61 = vcombine.high %v379_v56, %v383_v57 }
  0x6b   : > { %1305 = vmatmul.mubr.bf16.gmra.mrb[28].mxu0 %v2012_v2 }
  0x6c   : > { %1402 = vmatmul.mubr.bf16.gmra.mrb[28].mxu1 %v2014_v3  ;;  %1442 = vmatprep.mubr.bf16.mxu0 %v1961_v4 }
  0x6d   : > { %1539 = vmatprep.mubr.bf16.mxu1 %v1963_v5 }
  0x73   : > { %1443 = vmatmul.mubr.bf16.vlgmr.msra.gmra.mrb[32].mxu0 %v1960_v10 }
  0x74   : > { %1540 = vmatmul.mubr.bf16.vlgmr.msra.gmra.mrb[32].mxu1 %v1962_v11  ;;  %1450 = vmatprep.mubr.bf16.mxu0 %v1969_v12 }
  0x75   : > { %1547 = vmatprep.mubr.bf16.mxu1 %v1971_v13  ;;  %v2537_v13 = vmov 0.0  }
  0x76   : > { %1688 = vst [vmem:[%s2730_s28] sm:$0x1] %v2537_v13  ;;  %1689 = vst [vmem:[%s2736_s5] sm:$0x1] %v2537_v13 }
  0x7b   : > { %1451 = vmatmul.mubr.bf16.gmra.mrb[36].mxu0 %v1968_v18 }
  0x7c   : > { %1548 = vmatmul.mubr.bf16.gmra.mrb[36].mxu1 %v1970_v19  ;;  %1458 = vmatprep.mubr.bf16.mxu0 %v1977_v20 }
  0x7d   : > { %1555 = vmatprep.mubr.bf16.mxu1 %v1979_v21 }
  0x83   : > { %1459 = vmatmul.mubr.bf16.gmra.mrb[40].mxu0 %v1976_v26 }
  0x84   : > { %1556 = vmatmul.mubr.bf16.gmra.mrb[40].mxu1 %v1978_v27  ;;  %1466 = vmatprep.mubr.bf16.mxu0 %v1985_v28 }
  0x85   : > { %1563 = vmatprep.mubr.bf16.mxu1 %v1987_v29 }
  0x8b   : > { %1467 = vmatmul.mubr.bf16.gmra.mrb[44].mxu0 %v1984_v34 }
  0x8c   : > { %1564 = vmatmul.mubr.bf16.gmra.mrb[44].mxu1 %v1986_v35  ;;  %1474 = vmatprep.mubr.bf16.mxu0 %v1993_v36 }
  0x8d   : > { %1571 = vmatprep.mubr.bf16.mxu1 %v1995_v37 }
  0x93   : > { %1475 = vmatmul.mubr.bf16.gmra.mrb[48].mxu0 %v1992_v42 }
  0x94   : > { %1572 = vmatmul.mubr.bf16.gmra.mrb[48].mxu1 %v1994_v43  ;;  %1482 = vmatprep.mubr.bf16.mxu0 %v2001_v44 }
  0x95   : > { %1579 = vmatprep.mubr.bf16.mxu1 %v2003_v45 }
  0x9b   : > { %1483 = vmatmul.mubr.bf16.gmra.mrb[52].mxu0 %v2000_v50 }
  0x9c   : > { %1580 = vmatmul.mubr.bf16.gmra.mrb[52].mxu1 %v2002_v51  ;;  %1490 = vmatprep.mubr.bf16.mxu0 %v2009_v52 }
  0x9d   : > { %1587 = vmatprep.mubr.bf16.mxu1 %v2011_v53 }
  0xa3   : > { %1491 = vmatmul.mubr.bf16.gmra.mrb[56].mxu0 %v2008_v58 }
  0xa4   : > { %1588 = vmatmul.mubr.bf16.gmra.mrb[56].mxu1 %v2010_v59  ;;  %1498 = vmatprep.mubr.bf16.mxu0 %v2017_v60 }
  0xa5   : > { %1595 = vmatprep.mubr.bf16.mxu1 %v2019_v61 }
  0xab   : > { %1499 = vmatmul.mubr.bf16.gmra.mrb[60].mxu0 %v2016_v62 }
  0xac   : > { %1596 = vmatmul.mubr.bf16.gmra.mrb[60].mxu1 %v2018_v63 }
 0x106   : > { %v2184_v0 = vpop.f32.mrb[0].mxu0 }
 0x107   : > { %v2248_v1 = vpop.f32.mrb[0].mxu1  ;;  %v2185_v2 = vpop.f32.mrb[1].mxu0 }
 0x108   : > { %v2186_v3 = vadd.f32 %v2185_v2, %v2184_v0  ;;  %v2249_v4 = vpop.f32.mrb[1].mxu1  ;;  %v2187_v5 = vpop.f32.mrb[2].mxu0 }
 0x109   : > { %v2250_v6 = vadd.f32 %v2249_v4, %v2248_v1  ;;  %v2251_v7 = vpop.f32.mrb[2].mxu1  ;;  %v2188_v8 = vpop.f32.mrb[3].mxu0 }
 0x10a   : > { %v2189_v9 = vadd.f32 %v2188_v8, %v2187_v5  ;;  %v2252_v10 = vpop.f32.mrb[3].mxu1 }
 0x10b   : > { %v2738_v11 = vadd.f32 %v2250_v6, %v2186_v3  ;;  %v2253_v12 = vadd.f32 %v2252_v10, %v2251_v7 }
 0x10d   : > { %v2742_v14 = vadd.f32 %v2253_v12, %v2189_v9 }
 0x10e   : > { %v2190_v15 = vpop.f32.mrb[4].mxu0 }
 0x10f   : > { %v2254_v16 = vpop.f32.mrb[4].mxu1  ;;  %v2191_v17 = vpop.f32.mrb[5].mxu0 }
 0x110   : > { %v2192_v18 = vadd.f32 %v2191_v17, %v2190_v15  ;;  %v2255_v19 = vpop.f32.mrb[5].mxu1  ;;  %v2193_v20 = vpop.f32.mrb[6].mxu0 }
 0x111   : > { %v2256_v21 = vadd.f32 %v2255_v19, %v2254_v16  ;;  %v2257_v22 = vpop.f32.mrb[6].mxu1  ;;  %v2194_v23 = vpop.f32.mrb[7].mxu0 }
 0x112   : > { %v2195_v24 = vadd.f32 %v2194_v23, %v2193_v20  ;;  %v2258_v25 = vpop.f32.mrb[7].mxu1 }
 0x113   : > { %v2744_v26 = vadd.f32 %v2256_v21, %v2192_v18  ;;  %v2259_v27 = vadd.f32 %v2258_v25, %v2257_v22 }
 0x115   : > { %v2746_v28 = vadd.f32 %v2259_v27, %v2195_v24 }
 0x116   : > { %v2196_v29 = vpop.f32.mrb[8].mxu0 }
 0x117   : > { %v2260_v30 = vpop.f32.mrb[8].mxu1  ;;  %v2197_v31 = vpop.f32.mrb[9].mxu0 }
 0x118   : > { %v2198_v32 = vadd.f32 %v2197_v31, %v2196_v29  ;;  %v2261_v33 = vpop.f32.mrb[9].mxu1  ;;  %v2199_v34 = vpop.f32.mrb[10].mxu0 }
 0x119   : > { %v2262_v35 = vadd.f32 %v2261_v33, %v2260_v30  ;;  %v2263_v36 = vpop.f32.mrb[10].mxu1  ;;  %v2200_v37 = vpop.f32.mrb[11].mxu0 }
 0x11a   : > { %v2201_v38 = vadd.f32 %v2200_v37, %v2199_v34  ;;  %v2264_v39 = vpop.f32.mrb[11].mxu1 }
 0x11b   : > { %v2748_v40 = vadd.f32 %v2262_v35, %v2198_v32  ;;  %v2265_v41 = vadd.f32 %v2264_v39, %v2263_v36 }
 0x11d   : > { %v2750_v42 = vadd.f32 %v2265_v41, %v2201_v38 }
 0x11e   : > { %v2202_v43 = vpop.f32.mrb[12].mxu0 }
 0x11f   : > { %v2266_v44 = vpop.f32.mrb[12].mxu1  ;;  %v2203_v45 = vpop.f32.mrb[13].mxu0 }
 0x120   : > { %v2204_v46 = vadd.f32 %v2203_v45, %v2202_v43  ;;  %v2267_v47 = vpop.f32.mrb[13].mxu1  ;;  %v2205_v48 = vpop.f32.mrb[14].mxu0 }
 0x121   : > { %v2268_v49 = vadd.f32 %v2267_v47, %v2266_v44  ;;  %v2269_v50 = vpop.f32.mrb[14].mxu1  ;;  %v2206_v51 = vpop.f32.mrb[15].mxu0 }
 0x122   : > { %v2207_v52 = vadd.f32 %v2206_v51, %v2205_v48  ;;  %v2270_v53 = vpop.f32.mrb[15].mxu1 }
 0x123   : > { %v2752_v54 = vadd.f32 %v2268_v49, %v2204_v46  ;;  %v2271_v55 = vadd.f32 %v2270_v53, %v2269_v50 }
 0x125   : > { %v2754_v56 = vadd.f32 %v2271_v55, %v2207_v52 }
 0x126   : > { %v2208_v57 = vpop.f32.mrb[16].mxu0 }
 0x127   : > { %v2272_v58 = vpop.f32.mrb[16].mxu1  ;;  %v2209_v59 = vpop.f32.mrb[17].mxu0 }
 0x128   : > { %v2210_v60 = vadd.f32 %v2209_v59, %v2208_v57  ;;  %v2273_v61 = vpop.f32.mrb[17].mxu1  ;;  %v2211_v62 = vpop.f32.mrb[18].mxu0 }
 0x129   : > { %v2274_v63 = vadd.f32 %v2273_v61, %v2272_v58  ;;  %v2275_v0 = vpop.f32.mrb[18].mxu1  ;;  %v2212_v1 = vpop.f32.mrb[19].mxu0 }
 0x12a   : > { %v2213_v2 = vadd.f32 %v2212_v1, %v2211_v62  ;;  %v2276_v3 = vpop.f32.mrb[19].mxu1 }
 0x12b   : > { %v2756_v4 = vadd.f32 %v2274_v63, %v2210_v60  ;;  %v2277_v5 = vadd.f32 %v2276_v3, %v2275_v0 }
 0x12d   : > { %v2758_v6 = vadd.f32 %v2277_v5, %v2213_v2 }
 0x12e   : > { %v2214_v7 = vpop.f32.mrb[20].mxu0 }
 0x12f   : > { %v2278_v8 = vpop.f32.mrb[20].mxu1  ;;  %v2215_v9 = vpop.f32.mrb[21].mxu0 }
 0x130   : > { %v2216_v10 = vadd.f32 %v2215_v9, %v2214_v7  ;;  %v2279_v12 = vpop.f32.mrb[21].mxu1  ;;  %v2217_v13 = vpop.f32.mrb[22].mxu0 }
 0x131   : > { %v2280_v15 = vadd.f32 %v2279_v12, %v2278_v8  ;;  %v2281_v16 = vpop.f32.mrb[22].mxu1  ;;  %v2218_v17 = vpop.f32.mrb[23].mxu0 }
 0x132   : > { %v2219_v18 = vadd.f32 %v2218_v17, %v2217_v13  ;;  %v2282_v19 = vpop.f32.mrb[23].mxu1 }
 0x133   : > { %v2760_v20 = vadd.f32 %v2280_v15, %v2216_v10  ;;  %v2283_v21 = vadd.f32 %v2282_v19, %v2281_v16 }
 0x135   : > { %v2762_v22 = vadd.f32 %v2283_v21, %v2219_v18 }
 0x136   : > { %v2220_v23 = vpop.f32.mrb[24].mxu0 }
 0x137   : > { %v2284_v24 = vpop.f32.mrb[24].mxu1  ;;  %v2221_v25 = vpop.f32.mrb[25].mxu0 }
 0x138   : > { %v2222_v27 = vadd.f32 %v2221_v25, %v2220_v23  ;;  %v2285_v29 = vpop.f32.mrb[25].mxu1  ;;  %v2223_v30 = vpop.f32.mrb[26].mxu0 }
 0x139   : > { %v2286_v31 = vadd.f32 %v2285_v29, %v2284_v24  ;;  %v2287_v32 = vpop.f32.mrb[26].mxu1  ;;  %v2224_v33 = vpop.f32.mrb[27].mxu0 }
 0x13a   : > { %v2225_v34 = vadd.f32 %v2224_v33, %v2223_v30  ;;  %v2288_v35 = vpop.f32.mrb[27].mxu1 }
 0x13b   : > { %v2764_v36 = vadd.f32 %v2286_v31, %v2222_v27  ;;  %v2289_v37 = vadd.f32 %v2288_v35, %v2287_v32 }
 0x13d   : > { %v2766_v38 = vadd.f32 %v2289_v37, %v2225_v34 }
 0x13e   : > { %v2226_v39 = vpop.f32.mrb[28].mxu0 }
 0x13f   : > { %v2290_v41 = vpop.f32.mrb[28].mxu1  ;;  %v2227_v43 = vpop.f32.mrb[29].mxu0 }
 0x140   : > { %v2228_v44 = vadd.f32 %v2227_v43, %v2226_v39  ;;  %v2291_v45 = vpop.f32.mrb[29].mxu1  ;;  %v2229_v46 = vpop.f32.mrb[30].mxu0 }
 0x141   : > { %v2292_v47 = vadd.f32 %v2291_v45, %v2290_v41  ;;  %v2293_v48 = vpop.f32.mrb[30].mxu1  ;;  %v2230_v49 = vpop.f32.mrb[31].mxu0 }
 0x142   : > { %v2231_v50 = vadd.f32 %v2230_v49, %v2229_v46  ;;  %v2294_v51 = vpop.f32.mrb[31].mxu1 }
 0x143   : > { %v2768_v52 = vadd.f32 %v2292_v47, %v2228_v44  ;;  %v2295_v53 = vadd.f32 %v2294_v51, %v2293_v48 }
 0x145   : > { %v2770_v55 = vadd.f32 %v2295_v53, %v2231_v50 }
 0x146   : > { %v2312_v57 = vpop.f32.mrb[32].mxu0 }
 0x147   : > { %v2376_v58 = vpop.f32.mrb[32].mxu1  ;;  %v2313_v59 = vpop.f32.mrb[33].mxu0 }
 0x148   : > { %v2314_v60 = vadd.f32 %v2313_v59, %v2312_v57  ;;  %v2377_v61 = vpop.f32.mrb[33].mxu1  ;;  %v2315_v62 = vpop.f32.mrb[34].mxu0 }
 0x149   : > { %v2378_v63 = vadd.f32 %v2377_v61, %v2376_v58  ;;  %v2379_v0 = vpop.f32.mrb[34].mxu1  ;;  %v2316_v1 = vpop.f32.mrb[35].mxu0 }
 0x14a   : > { %v1445_v2 = vadd.f32 %v2314_v60, %v2738_v11  ;;  %v2317_v3 = vadd.f32 %v2316_v1, %v2315_v62  ;;  %v2380_v5 = vpop.f32.mrb[35].mxu1 }
 0x14b   : > { %v2381_v7 = vadd.f32 %v2380_v5, %v2379_v0 }
 0x14c   : > { %v1542_v8 = vadd.f32 %v2378_v63, %v1445_v2  ;;  %v1448_v9 = vadd.f32 %v2317_v3, %v2742_v14 }
 0x14e   : > { %v1545_v10 = vadd.f32 %v2381_v7, %v1448_v9  ;;  %v2318_v12 = vpop.f32.mrb[36].mxu0  ;;  %v1715_v13 = vmul.f32 %v1542_v8, %v1542_v8 }
 0x14f   : > { %v2382_v15 = vpop.f32.mrb[36].mxu1  ;;  %v2319_v16 = vpop.f32.mrb[37].mxu0 }
 0x150   : > { %v2124_v17 = vpack.c.bf16 %v1545_v10, %v1542_v8  ;;  %v1691_v11 = vadd.f32 %v1545_v10, %v1542_v8  ;;  %v1716_v18 = vmul.f32 %v1545_v10, %v1545_v10  ;;  %v2320_v19 = vadd.f32 %v2319_v16, %v2318_v12  ;;  %v2383_v21 = vpop.f32.mrb[37].mxu1  ;;  %v2321_v23 = vpop.f32.mrb[38].mxu0 }
 0x151   : > { %v2384_v24 = vadd.f32 %v2383_v21, %v2382_v15  ;;  %v2385_v14 = vpop.f32.mrb[38].mxu1  ;;  %v2322_v25 = vpop.f32.mrb[39].mxu0 }
 0x152   : > { %2125 = vst [vmem:[%s2778_s9] sm:$0xff] %v2124_v17   ;;  %v1731_v27 = vadd.f32 %v1716_v18, %v1715_v13  ;;  %v1453_v29 = vadd.f32 %v2320_v19, %v2744_v26  ;;  %v2323_v30 = vadd.f32 %v2322_v25, %v2321_v23  ;;  %v2386_v31 = vpop.f32.mrb[39].mxu1 }
 0x153   : > { %v2387_v32 = vadd.f32 %v2386_v31, %v2385_v14 }
 0x154   : > { %v1550_v33 = vadd.f32 %v2384_v24, %v1453_v29  ;;  %v1456_v34 = vadd.f32 %v2323_v30, %v2746_v28 }
 0x156   : > { %v1692_v35 = vadd.f32 %v1691_v11, %v1550_v33  ;;  %v1717_v37 = vmul.f32 %v1550_v33, %v1550_v33  ;;  %v1553_v39 = vadd.f32 %v2387_v32, %v1456_v34  ;;  %v2324_v41 = vpop.f32.mrb[40].mxu0 }
 0x157   : > { %v2388_v43 = vpop.f32.mrb[40].mxu1  ;;  %v2325_v44 = vpop.f32.mrb[41].mxu0 }
 0x158   : > { %v1732_v45 = vadd.f32 %v1731_v27, %v1717_v37  ;;  %v2129_v46 = vpack.c.bf16 %v1553_v39, %v1550_v33  ;;  %v1693_v47 = vadd.f32 %v1692_v35, %v1553_v39  ;;  %v1718_v48 = vmul.f32 %v1553_v39, %v1553_v39  ;;  %v2389_v49 = vpop.f32.mrb[41].mxu1  ;;  %v2327_v50 = vpop.f32.mrb[42].mxu0 }
 0x159   : > { %v2326_v26 = vadd.f32 %v2325_v44, %v2324_v41  ;;  %v2390_v51 = vadd.f32 %v2389_v49, %v2388_v43  ;;  %v2391_v53 = vpop.f32.mrb[42].mxu1  ;;  %v2328_v57 = vpop.f32.mrb[43].mxu0 }
 0x15a   : > { %2161 = vst [vmem:[%s2778_s9 + $0x8] sm:$0xff] %v2129_v46   ;;  %v1733_v58 = vadd.f32 %v1732_v45, %v1718_v48  ;;  %v2329_v28 = vadd.f32 %v2328_v57, %v2327_v50  ;;  %v2392_v59 = vpop.f32.mrb[43].mxu1 }
 0x15b   : > { %v1461_v60 = vadd.f32 %v2326_v26, %v2748_v40  ;;  %v2393_v61 = vadd.f32 %v2392_v59, %v2391_v53 }
 0x15c   : > { %v1464_v62 = vadd.f32 %v2329_v28, %v2750_v42 }
 0x15d   : > { %v1558_v63 = vadd.f32 %v2390_v51, %v1461_v60 }
 0x15e   : > { %v1561_v0 = vadd.f32 %v2393_v61, %v1464_v62  ;;  %v2330_v1 = vpop.f32.mrb[44].mxu0 }
 0x15f   : > { %v1694_v2 = vadd.f32 %v1693_v47, %v1558_v63  ;;  %v1719_v3 = vmul.f32 %v1558_v63, %v1558_v63  ;;  %v2394_v5 = vpop.f32.mrb[44].mxu1  ;;  %v2331_v7 = vpop.f32.mrb[45].mxu0 }
 0x160   : > { %v2134_v8 = vpack.c.bf16 %v1561_v0, %v1558_v63  ;;  %v1720_v9 = vmul.f32 %v1561_v0, %v1561_v0  ;;  %v2332_v10 = vadd.f32 %v2331_v7, %v2330_v1  ;;  %v2395_v12 = vpop.f32.mrb[45].mxu1  ;;  %v2333_v13 = vpop.f32.mrb[46].mxu0 }
 0x161   : > { %v1734_v15 = vadd.f32 %v1733_v58, %v1719_v3  ;;  %v1695_v16 = vadd.f32 %v1694_v2, %v1561_v0  ;;  %v2396_v17 = vadd.f32 %v2395_v12, %v2394_v5  ;;  %v2397_v40 = vpop.f32.mrb[46].mxu1  ;;  %v2334_v11 = vpop.f32.mrb[47].mxu0 }
 0x162   : > { %2162 = vst [vmem:[%s2778_s9 + $0x10] sm:$0xff] %v2134_v8   ;;  %v1469_v42 = vadd.f32 %v2332_v10, %v2752_v54  ;;  %v2335_v18 = vadd.f32 %v2334_v11, %v2333_v13  ;;  %v2398_v19 = vpop.f32.mrb[47].mxu1 }
 0x163   : > { %v1735_v21 = vadd.f32 %v1734_v15, %v1720_v9  ;;  %v2399_v23 = vadd.f32 %v2398_v19, %v2397_v40 }
 0x164   : > { %v1566_v24 = vadd.f32 %v2396_v17, %v1469_v42  ;;  %v1472_v14 = vadd.f32 %v2335_v18, %v2754_v56 }
 0x166   : > { %v1696_v25 = vadd.f32 %v1695_v16, %v1566_v24  ;;  %v1721_v27 = vmul.f32 %v1566_v24, %v1566_v24  ;;  %v1569_v29 = vadd.f32 %v2399_v23, %v1472_v14  ;;  %v2336_v30 = vpop.f32.mrb[48].mxu0 }
 0x167   : > { %v2400_v31 = vpop.f32.mrb[48].mxu1  ;;  %v2337_v32 = vpop.f32.mrb[49].mxu0 }
 0x168   : > { %v1736_v33 = vadd.f32 %v1735_v21, %v1721_v27  ;;  %v2139_v34 = vpack.c.bf16 %v1569_v29, %v1566_v24  ;;  %v1697_v35 = vadd.f32 %v1696_v25, %v1569_v29  ;;  %v1722_v37 = vmul.f32 %v1569_v29, %v1569_v29  ;;  %v2401_v39 = vpop.f32.mrb[49].mxu1  ;;  %v2339_v54 = vpop.f32.mrb[50].mxu0 }
 0x169   : > { %v2338_v41 = vadd.f32 %v2337_v32, %v2336_v30  ;;  %v2402_v43 = vadd.f32 %v2401_v39, %v2400_v31  ;;  %v2403_v44 = vpop.f32.mrb[50].mxu1  ;;  %v2340_v45 = vpop.f32.mrb[51].mxu0 }
 0x16a   : > { %2163 = vst [vmem:[%s2778_s9 + $0x18] sm:$0xff] %v2139_v34   ;;  %v1737_v46 = vadd.f32 %v1736_v33, %v1722_v37  ;;  %v2341_v56 = vadd.f32 %v2340_v45, %v2339_v54  ;;  %v2404_v47 = vpop.f32.mrb[51].mxu1 }
 0x16b   : > { %v1477_v48 = vadd.f32 %v2338_v41, %v2756_v4  ;;  %v2405_v49 = vadd.f32 %v2404_v47, %v2403_v44 }
 0x16c   : > { %v1480_v50 = vadd.f32 %v2341_v56, %v2758_v6 }
 0x16d   : > { %v1574_v26 = vadd.f32 %v2402_v43, %v1477_v48 }
 0x16e   : > { %v1577_v51 = vadd.f32 %v2405_v49, %v1480_v50  ;;  %v2342_v53 = vpop.f32.mrb[52].mxu0 }
 0x16f   : > { %v1698_v57 = vadd.f32 %v1697_v35, %v1574_v26  ;;  %v1723_v58 = vmul.f32 %v1574_v26, %v1574_v26  ;;  %v2406_v28 = vpop.f32.mrb[52].mxu1  ;;  %v2343_v59 = vpop.f32.mrb[53].mxu0 }
 0x170   : > { %v2144_v60 = vpack.c.bf16 %v1577_v51, %v1574_v26  ;;  %v1724_v61 = vmul.f32 %v1577_v51, %v1577_v51  ;;  %v2344_v62 = vadd.f32 %v2343_v59, %v2342_v53  ;;  %v2407_v63 = vpop.f32.mrb[53].mxu1  ;;  %v2345_v0 = vpop.f32.mrb[54].mxu0 }
 0x171   : > { %v1738_v1 = vadd.f32 %v1737_v46, %v1723_v58  ;;  %v1699_v2 = vadd.f32 %v1698_v57, %v1577_v51  ;;  %v2408_v3 = vadd.f32 %v2407_v63, %v2406_v28  ;;  %v2409_v4 = vpop.f32.mrb[54].mxu1  ;;  %v2346_v5 = vpop.f32.mrb[55].mxu0 }
 0x172   : > { %2164 = vst [vmem:[%s2778_s9 + $0x20] sm:$0xff] %v2144_v60   ;;  %v1485_v6 = vadd.f32 %v2344_v62, %v2760_v20  ;;  %v2347_v7 = vadd.f32 %v2346_v5, %v2345_v0  ;;  %v2410_v8 = vpop.f32.mrb[55].mxu1 }
 0x173   : > { %v1739_v9 = vadd.f32 %v1738_v1, %v1724_v61  ;;  %v2411_v10 = vadd.f32 %v2410_v8, %v2409_v4 }
 0x174   : > { %v1582_v12 = vadd.f32 %v2408_v3, %v1485_v6  ;;  %v1488_v13 = vadd.f32 %v2347_v7, %v2762_v22 }
 0x176   : > { %v1700_v15 = vadd.f32 %v1699_v2, %v1582_v12  ;;  %v1725_v16 = vmul.f32 %v1582_v12, %v1582_v12  ;;  %v1585_v17 = vadd.f32 %v2411_v10, %v1488_v13  ;;  %v2348_v40 = vpop.f32.mrb[56].mxu0  ;;  %v1690_v13 = vld [vmem:[%s2730_s28] sm:$0x1] }
 0x177   : > { %v2412_v11 = vpop.f32.mrb[56].mxu1  ;;  %v2349_v42 = vpop.f32.mrb[57].mxu0 }
 0x178   : > { %v1740_v18 = vadd.f32 %v1739_v9, %v1725_v16  ;;  %v2149_v19 = vpack.c.bf16 %v1585_v17, %v1582_v12  ;;  %v1701_v21 = vadd.f32 %v1700_v15, %v1585_v17  ;;  %v1726_v23 = vmul.f32 %v1585_v17, %v1585_v17  ;;  %v2413_v24 = vpop.f32.mrb[57].mxu1  ;;  %v2351_v20 = vpop.f32.mrb[58].mxu0  ;;  %v1714_v17 = vld [vmem:[%s2736_s5] sm:$0x1] }
 0x179   : > { %v2350_v14 = vadd.f32 %v2349_v42, %v2348_v40  ;;  %v2414_v25 = vadd.f32 %v2413_v24, %v2412_v11  ;;  %v2415_v27 = vpop.f32.mrb[58].mxu1  ;;  %v2352_v29 = vpop.f32.mrb[59].mxu0 }
 0x17a   : > { %2165 = vst [vmem:[%s2778_s9 + $0x28] sm:$0xff] %v2149_v19   ;;  %v1741_v30 = vadd.f32 %v1740_v18, %v1726_v23  ;;  %v2353_v22 = vadd.f32 %v2352_v29, %v2351_v20  ;;  %v2416_v31 = vpop.f32.mrb[59].mxu1 }
 0x17b   : > { %v1493_v32 = vadd.f32 %v2350_v14, %v2764_v36  ;;  %v2417_v33 = vadd.f32 %v2416_v31, %v2415_v27 }
 0x17c   : > { %v1496_v34 = vadd.f32 %v2353_v22, %v2766_v38 }
 0x17d   : > { %v1590_v35 = vadd.f32 %v2414_v25, %v1493_v32 }
 0x17e   : > { %v1593_v37 = vadd.f32 %v2417_v33, %v1496_v34  ;;  %v2354_v39 = vpop.f32.mrb[60].mxu0 }
 0x17f   : > { %v1702_v54 = vadd.f32 %v1701_v21, %v1590_v35  ;;  %v1727_v41 = vmul.f32 %v1590_v35, %v1590_v35  ;;  %v2418_v43 = vpop.f32.mrb[60].mxu1  ;;  %v2355_v44 = vpop.f32.mrb[61].mxu0 }
 0x180   : > { %v2154_v45 = vpack.c.bf16 %v1593_v37, %v1590_v35  ;;  %v1728_v46 = vmul.f32 %v1593_v37, %v1593_v37  ;;  %v2356_v56 = vadd.f32 %v2355_v44, %v2354_v39  ;;  %v2419_v47 = vpop.f32.mrb[61].mxu1  ;;  %v2357_v48 = vpop.f32.mrb[62].mxu0 }
 0x181   : > { %v1742_v49 = vadd.f32 %v1741_v30, %v1727_v41  ;;  %v1703_v50 = vadd.f32 %v1702_v54, %v1593_v37  ;;  %v2420_v26 = vadd.f32 %v2419_v47, %v2418_v43  ;;  %v2421_v36 = vpop.f32.mrb[62].mxu1  ;;  %v2358_v51 = vpop.f32.mrb[63].mxu0 }
 0x182   : > { %2166 = vst [vmem:[%s2778_s9 + $0x30] sm:$0xff] %v2154_v45   ;;  %v1501_v38 = vadd.f32 %v2356_v56, %v2768_v52  ;;  %v2359_v53 = vadd.f32 %v2358_v51, %v2357_v48  ;;  %v2422_v57 = vpop.f32.mrb[63].mxu1 }
 0x183   : > { %v1743_v58 = vadd.f32 %v1742_v49, %v1728_v46  ;;  %v2423_v28 = vadd.f32 %v2422_v57, %v2421_v36 }
 0x184   : > { %v1598_v59 = vadd.f32 %v2420_v26, %v1501_v38  ;;  %v1504_v60 = vadd.f32 %v2359_v53, %v2770_v55 }
 0x186   : > { %v1704_v61 = vadd.f32 %v1703_v50, %v1598_v59  ;;  %v1729_v62 = vmul.f32 %v1598_v59, %v1598_v59  ;;  %v1601_v63 = vadd.f32 %v2423_v28, %v1504_v60 }
 0x188   : > { %v1744_v0 = vadd.f32 %v1743_v58, %v1729_v62  ;;  %v2159_v1 = vpack.c.bf16 %v1601_v63, %v1598_v59  ;;  %v1705_v2 = vadd.f32 %v1704_v61, %v1601_v63  ;;  %v1730_v3 = vmul.f32 %v1601_v63, %v1601_v63 }
 0x18a   : > { %2167 = vst [vmem:[%s2778_s9 + $0x38] sm:$0xff] %v2159_v1   ;;  %v1706_v4 = vrot.slane %v1705_v2, 4  ;;  %v1745_v52 = vadd.f32 %v1744_v0, %v1730_v3 }
 0x18c   : > { %v1707_v5 = vadd.f32 %v1706_v4, %v1705_v2  ;;  %v1746_v6 = vrot.slane %v1745_v52, 4 }
 0x18e   : > { %v1708_v7 = vrot.slane %v1707_v5, 2  ;;  %v1747_v8 = vadd.f32 %v1746_v6, %v1745_v52 }
 0x190   : > { %v1709_v9 = vadd.f32 %v1708_v7, %v1707_v5  ;;  %v1748_v55 = vrot.slane %v1747_v8, 2 }
 0x192   : > { %v1710_v10 = vrot.slane %v1709_v9, 1  ;;  %v1749_v12 = vadd.f32 %v1748_v55, %v1747_v8 }
 0x194   : > { %v1711_v15 = vadd.f32 %v1710_v10, %v1709_v9  ;;  %v1750_v16 = vrot.slane %v1749_v12, 1 }
 0x196   : > { %v1712_v40 = vadd.f32 %v1711_v15, %v1690_v13  ;;  %v1751_v11 = vadd.f32 %v1750_v16, %v1749_v12 }
 0x198   : > { %1713 = vst [vmem:[%s2730_s28] sm:$0x1] %v1712_v40  ;;  %v1752_v42 = vadd.f32 %v1751_v11, %v1714_v17 }
 0x19a   : > { %1753 = vst [vmem:[%s2736_s5] sm:$0x1] %v1752_v42 }
 0x19b PF: > { %s15_s17 = sadd.s32 1, %s2535_s17   ;;  %s2820_s15 = smov %s2531_s16 }
 0x19c   : > { %p12_p5 = scmp.ge.s32.totalorder %s15_s17, 6   ;;  %s2821_s16 = smov %s2823_s18 }
 0x19e   :  { %14 = sbr.rel (!%p12_p5) target bundleno = 2 (0x2), region = 89 }

// kernel: generator_forward.8
= control target key start
LH: loop header
LB: loop body
LE: loop exit
PB: predicated region body
PF: predicated region fallthrough
CT: control target
= control target key end

     0   :  { %s3507_s15 = smov 0   ;;  %s3509_s16 = smov 0   ;;  %s3799_s0 = inlined_call_operand.vmem [shape: bf16[4,512,512], index: 0, kind: input, shape index: {}]   ;;  %s3800_s1 = inlined_call_operand.vmem [shape: bf16[4,512,128], index: 1, kind: input, shape index: {}]   ;;  %s3801_s2 = inlined_call_operand.vmem [shape: bf16[4,512,128], index: 2, kind: output, shape index: {0}]   ;;  %s3802_s3 = inlined_call_operand.vmem [shape: f32[4,1,128], index: 3, kind: output, shape index: {1}]   ;;  %s3803_s4 = inlined_call_operand.vmem [shape: f32[4,1,128], index: 4, kind: output, shape index: {2}]  }
   0x1   :  { %s3511_s17 = smov 0  }
   0x2 LB: > { %s34_s18 = sadd.s32 1, %s3474_s16  ;;  %p2651_p0 = scmp.ge.s32.totalorder %s3478_s17, 1  ;;  %s3478_s17 = sphi %s3511_s17, %s15_s17   ;;  %s3474_s16 = sphi %s3509_s16, %s3805_s16   ;;  %s3470_s15 = sphi %s3507_s15, %s3804_s15  }
   0x3   : > { %p36_p1 = scmp.ge.s32.totalorder %s34_s18, 4  ;;  %p217_p2 = scmp.lt.s32.totalorder %s3478_s17, 5 }
   0x5   : > { %s3807_s18 = smov (%p36_p1, %s34_s18), 0  ;;  %p218_p3 = pnand %p2651_p0, %p217_p2 }
   0x6   : > { %p276_p4 = scmp.lt.s32.totalorder (!%p218_p3), %s3470_s15, 3  ;;  %v3480_v0 = vmov (!%p218_p3), 0  }
   0x7   : > { %221 = sbr.rel (%p218_p3) target bundleno = 565 (0x235), region = 28  ;;  %1344 = vmatprep.subr.bf16.mxu1 (!%p218_p3), %v3480_v0  ;;  %1633 = vmatprep.subr.bf16.mxu0 (!%p218_p3), %v3480_v0 }
   0xe   : > { %s3809_s15 = smov (!%p276_p4, %s3470_s15), 3 }
   0xf   : > { %s2885_s19 = sshll.u32 %s3809_s15, 8  ;;  %s2884_s23 = sshll.u32 %s3809_s15, 10 }
  0x10   : > { %s3535_s22 = scalar_lea.vmem %s3800_s1, %s2885_s19  ;;  %s3571_s26 = scalar_lea.vmem %s3799_s0, %s2884_s23 }
  0x11   : > { %v3232_v1 = vld [vmem:[%s3535_s22] sm:$0xff]   ;;  %v3234_v3 = vld [vmem:[%s3535_s22 + $0x8] sm:$0xff]   ;;  %v3236_v5 = vld [vmem:[%s3535_s22 + $0x10] sm:$0xff]   ;;  %s3724_s29 = scalar_lea.vmem %s3801_s2, %s2885_s19  ;;  %s3759_s6 = scalar_lea.vmem %s3802_s3, %s3809_s15 }
  0x12   : > { %v3233_v2 = vld [vmem:[%s3535_s22 + $0x80] sm:$0xff]   ;;  %1345 = vmatpush1.bf16.msra.mxu1 %v3232_v1  ;;  %v3235_v4 = vld [vmem:[%s3535_s22 + $0x88] sm:$0xff]   ;;  %v3237_v6 = vld [vmem:[%s3535_s22 + $0x90] sm:$0xff]   ;;  %s3765_s9 = scalar_lea.vmem %s3803_s4, %s3809_s15 }
  0x13   : > { %1634 = vmatpush1.bf16.msra.mxu0 %v3233_v2  ;;  %1346 = vmatprep.subr.bf16.mxu1 %v3480_v0  ;;  %v3238_v7 = vld [vmem:[%s3535_s22 + $0x18] sm:$0xff]   ;;  %v3240_v9 = vld [vmem:[%s3535_s22 + $0x20] sm:$0xff]   ;;  %v3242_v11 = vld [vmem:[%s3535_s22 + $0x28] sm:$0xff]  }
  0x14   : > { %1635 = vmatprep.subr.bf16.mxu0 %v3480_v0  ;;  %v3239_v8 = vld [vmem:[%s3535_s22 + $0x98] sm:$0xff]   ;;  %v3241_v10 = vld [vmem:[%s3535_s22 + $0xa0] sm:$0xff]   ;;  %v3243_v12 = vld [vmem:[%s3535_s22 + $0xa8] sm:$0xff]  }
  0x15   : > { %v3244_v13 = vld [vmem:[%s3535_s22 + $0x30] sm:$0xff]   ;;  %v3246_v15 = vld [vmem:[%s3535_s22 + $0x38] sm:$0xff]   ;;  %v3248_v17 = vld [vmem:[%s3535_s22 + $0x40] sm:$0xff]  }
  0x16   : > { %1347 = vmatpush1.bf16.msra.mxu1 %v3234_v3  ;;  %v3245_v14 = vld [vmem:[%s3535_s22 + $0xb0] sm:$0xff]   ;;  %v3247_v16 = vld [vmem:[%s3535_s22 + $0xb8] sm:$0xff]   ;;  %v3249_v18 = vld [vmem:[%s3535_s22 + $0xc0] sm:$0xff]  }
  0x17   : > { %1636 = vmatpush1.bf16.msra.mxu0 %v3235_v4  ;;  %1348 = vmatprep.subr.bf16.mxu1 %v3480_v0  ;;  %v3266_v19 = vld [vmem:[%s3571_s26 + $0x4] ss:$16 sps:$4 sm:$0xff]   ;;  %v3250_v20 = vld [vmem:[%s3535_s22 + $0x48] sm:$0xff]   ;;  %v3254_v25 = vld [vmem:[%s3535_s22 + $0x58] sm:$0xff]  }
  0x18   : > { %1637 = vmatprep.subr.bf16.mxu0 %v3480_v0  ;;  %v3269_v21 = vld [vmem:[%s3571_s26 + $0xc] ss:$16 sps:$4 sm:$0xff]   ;;  %1376 = vmatprep.mubr.bf16.mxu1 %v3266_v19  ;;  %v3252_v23 = vld [vmem:[%s3535_s22 + $0x50] sm:$0xff]   ;;  %v3256_v27 = vld [vmem:[%s3535_s22 + $0x60] sm:$0xff]  }
  0x19   : > { %v3251_v22 = vld [vmem:[%s3535_s22 + $0xc8] sm:$0xff]   ;;  %1665 = vmatprep.mubr.bf16.mxu0 %v3269_v21  ;;  %v3253_v24 = vld [vmem:[%s3535_s22 + $0xd0] sm:$0xff]   ;;  %v3255_v26 = vld [vmem:[%s3535_s22 + $0xd8] sm:$0xff]  }
  0x1a   : > { %1349 = vmatpush1.bf16.msra.mxu1 %v3236_v5  ;;  %v3257_v28 = vld [vmem:[%s3535_s22 + $0xe0] sm:$0xff]   ;;  %v3258_v29 = vld [vmem:[%s3535_s22 + $0x68] sm:$0xff]   ;;  %v3260_v31 = vld [vmem:[%s3535_s22 + $0x70] sm:$0xff]  }
  0x1b   : > { %1638 = vmatpush1.bf16.msra.mxu0 %v3237_v6  ;;  %1350 = vmatprep.subr.bf16.mxu1 %v3480_v0  ;;  %v3259_v30 = vld [vmem:[%s3535_s22 + $0xe8] sm:$0xff]   ;;  %v3261_v32 = vld [vmem:[%s3535_s22 + $0xf0] sm:$0xff]   ;;  %v3262_v33 = vld [vmem:[%s3535_s22 + $0x78] sm:$0xff]  }
  0x1c   : > { %1639 = vmatprep.subr.bf16.mxu0 %v3480_v0  ;;  %v3263_v34 = vld [vmem:[%s3535_s22 + $0xf8] sm:$0xff]   ;;  %v3264_v35 = vld [vmem:[%s3571_s26] ss:$16 sps:$4 sm:$0xff]   ;;  %v3270_v37 = vld [vmem:[%s3571_s26 + $0x24] ss:$16 sps:$4 sm:$0xff]  }
  0x1d   : > { %v3267_v36 = vld [vmem:[%s3571_s26 + $0x8] ss:$16 sps:$4 sm:$0xff]   ;;  %v3272_v38 = vld [vmem:[%s3571_s26 + $0x2c] ss:$16 sps:$4 sm:$0xff]   ;;  %v3274_v39 = vld [vmem:[%s3571_s26 + $0x20] ss:$16 sps:$4 sm:$0xff]  }
  0x1e   : > { %1351 = vmatpush1.bf16.msra.mxu1 %v3238_v7  ;;  %v3275_v40 = vld [vmem:[%s3571_s26 + $0x28] ss:$16 sps:$4 sm:$0xff]   ;;  %v3276_v41 = vld [vmem:[%s3571_s26 + $0x44] ss:$16 sps:$4 sm:$0xff]   ;;  %v3278_v42 = vld [vmem:[%s3571_s26 + $0x4c] ss:$16 sps:$4 sm:$0xff]  }
  0x1f   : > { %1640 = vmatpush1.bf16.msra.mxu0 %v3239_v8  ;;  %1352 = vmatprep.subr.bf16.mxu1 %v3480_v0  ;;  %v3280_v43 = vld [vmem:[%s3571_s26 + $0x40] ss:$16 sps:$4 sm:$0xff]   ;;  %v3281_v44 = vld [vmem:[%s3571_s26 + $0x48] ss:$16 sps:$4 sm:$0xff]   ;;  %v3282_v45 = vld [vmem:[%s3571_s26 + $0x64] ss:$16 sps:$4 sm:$0xff]  }
  0x20   : > { %1641 = vmatprep.subr.bf16.mxu0 %v3480_v0  ;;  %v3284_v46 = vld [vmem:[%s3571_s26 + $0x6c] ss:$16 sps:$4 sm:$0xff]   ;;  %v3286_v47 = vld [vmem:[%s3571_s26 + $0x60] ss:$16 sps:$4 sm:$0xff]   ;;  %v3287_v48 = vld [vmem:[%s3571_s26 + $0x68] ss:$16 sps:$4 sm:$0xff]  }
  0x21   : > { %v3288_v49 = vld [vmem:[%s3571_s26 + $0x84] ss:$16 sps:$4 sm:$0xff]   ;;  %v3290_v50 = vld [vmem:[%s3571_s26 + $0x8c] ss:$16 sps:$4 sm:$0xff]   ;;  %v3292_v51 = vld [vmem:[%s3571_s26 + $0x80] ss:$16 sps:$4 sm:$0xff]  }
  0x22   : > { %1353 = vmatpush1.bf16.msra.mxu1 %v3240_v9  ;;  %v3293_v52 = vld [vmem:[%s3571_s26 + $0x88] ss:$16 sps:$4 sm:$0xff]   ;;  %v3294_v53 = vld [vmem:[%s3571_s26 + $0xa4] ss:$16 sps:$4 sm:$0xff]   ;;  %v3296_v54 = vld [vmem:[%s3571_s26 + $0xac] ss:$16 sps:$4 sm:$0xff]  }
  0x23   : > { %1642 = vmatpush1.bf16.msra.mxu0 %v3241_v10  ;;  %1354 = vmatprep.subr.bf16.mxu1 %v3480_v0  ;;  %v3298_v55 = vld [vmem:[%s3571_s26 + $0xa0] ss:$16 sps:$4 sm:$0xff]   ;;  %v3299_v56 = vld [vmem:[%s3571_s26 + $0xa8] ss:$16 sps:$4 sm:$0xff]   ;;  %v3300_v57 = vld [vmem:[%s3571_s26 + $0xc4] ss:$16 sps:$4 sm:$0xff]  }
  0x24   : > { %1643 = vmatprep.subr.bf16.mxu0 %v3480_v0  ;;  %v3302_v58 = vld [vmem:[%s3571_s26 + $0xcc] ss:$16 sps:$4 sm:$0xff]   ;;  %v3304_v59 = vld [vmem:[%s3571_s26 + $0xc0] ss:$16 sps:$4 sm:$0xff]   ;;  %v3305_v60 = vld [vmem:[%s3571_s26 + $0xc8] ss:$16 sps:$4 sm:$0xff]  }
  0x25   : > { %v3306_v61 = vld [vmem:[%s3571_s26 + $0xe4] ss:$16 sps:$4 sm:$0xff]   ;;  %v3308_v62 = vld [vmem:[%s3571_s26 + $0xec] ss:$16 sps:$4 sm:$0xff]   ;;  %v3310_v63 = vld [vmem:[%s3571_s26 + $0xe0] ss:$16 sps:$4 sm:$0xff]  }
  0x26   : > { %1355 = vmatpush1.bf16.msra.mxu1 %v3242_v11  ;;  %v3312_v1 = vld [vmem:[%s3571_s26 + $0x104] ss:$16 sps:$4 sm:$0xff]   ;;  %v3314_v2 = vld [vmem:[%s3571_s26 + $0x10c] ss:$16 sps:$4 sm:$0xff]   ;;  %v3316_v3 = vld [vmem:[%s3571_s26 + $0x100] ss:$16 sps:$4 sm:$0xff]  }
  0x27   : > { %1644 = vmatpush1.bf16.msra.mxu0 %v3243_v12  ;;  %1356 = vmatprep.subr.bf16.mxu1 %v3480_v0  ;;  %v3317_v4 = vld [vmem:[%s3571_s26 + $0x108] ss:$16 sps:$4 sm:$0xff]   ;;  %v3318_v5 = vld [vmem:[%s3571_s26 + $0x124] ss:$16 sps:$4 sm:$0xff]   ;;  %v3320_v6 = vld [vmem:[%s3571_s26 + $0x12c] ss:$16 sps:$4 sm:$0xff]  }
  0x28   : > { %1645 = vmatprep.subr.bf16.mxu0 %v3480_v0  ;;  %v3322_v7 = vld [vmem:[%s3571_s26 + $0x120] ss:$16 sps:$4 sm:$0xff]   ;;  %v3323_v8 = vld [vmem:[%s3571_s26 + $0x128] ss:$16 sps:$4 sm:$0xff]   ;;  %v3324_v9 = vld [vmem:[%s3571_s26 + $0x144] ss:$16 sps:$4 sm:$0xff]  }
  0x29   : > { %v3326_v10 = vld [vmem:[%s3571_s26 + $0x14c] ss:$16 sps:$4 sm:$0xff]   ;;  %v3328_v11 = vld [vmem:[%s3571_s26 + $0x140] ss:$16 sps:$4 sm:$0xff]   ;;  %v3329_v12 = vld [vmem:[%s3571_s26 + $0x148] ss:$16 sps:$4 sm:$0xff]  }
  0x2a   : > { %1357 = vmatpush1.bf16.msra.mxu1 %v3244_v13  ;;  %v3330_v13 = vld [vmem:[%s3571_s26 + $0x164] ss:$16 sps:$4 sm:$0xff]   ;;  %v3340_v19 = vld [vmem:[%s3571_s26 + $0x180] ss:$16 sps:$4 sm:$0xff]  }
  0x2b   : > { %1646 = vmatpush1.bf16.msra.mxu0 %v3245_v14  ;;  %1358 = vmatprep.subr.bf16.mxu1 %v3480_v0  ;;  %v3332_v14 = vld [vmem:[%s3571_s26 + $0x16c] ss:$16 sps:$4 sm:$0xff]   ;;  %v3342_v21 = vld [vmem:[%s3571_s26 + $0x1a4] ss:$16 sps:$4 sm:$0xff]  }
  0x2c   : > { %1647 = vmatprep.subr.bf16.mxu0 %v3480_v0 }
  0x2e   : > { %1359 = vmatpush1.bf16.msra.mxu1 %v3246_v15  ;;  %v3334_v15 = vld [vmem:[%s3571_s26 + $0x160] ss:$16 sps:$4 sm:$0xff]  }
  0x2f   : > { %1648 = vmatpush1.bf16.msra.mxu0 %v3247_v16  ;;  %1360 = vmatprep.subr.bf16.mxu1 %v3480_v0  ;;  %v3335_v16 = vld [vmem:[%s3571_s26 + $0x168] ss:$16 sps:$4 sm:$0xff]  }
  0x30   : > { %1649 = vmatprep.subr.bf16.mxu0 %v3480_v0 }
  0x32   : > { %1361 = vmatpush1.bf16.msra.mxu1 %v3248_v17  ;;  %v3336_v17 = vld [vmem:[%s3571_s26 + $0x184] ss:$16 sps:$4 sm:$0xff]  }
  0x33   : > { %1650 = vmatpush1.bf16.msra.mxu0 %v3249_v18  ;;  %1362 = vmatprep.subr.bf16.mxu1 %v3480_v0  ;;  %v3338_v18 = vld [vmem:[%s3571_s26 + $0x18c] ss:$16 sps:$4 sm:$0xff]  }
  0x34   : > { %1651 = vmatprep.subr.bf16.mxu0 %v3480_v0 }
  0x36   : > { %1363 = vmatpush1.bf16.msra.mxu1 %v3250_v20  ;;  %v3341_v20 = vld [vmem:[%s3571_s26 + $0x188] ss:$16 sps:$4 sm:$0xff]  }
  0x37   : > { %1652 = vmatpush1.bf16.msra.mxu0 %v3251_v22  ;;  %1364 = vmatprep.subr.bf16.mxu1 %v3480_v0  ;;  %v3344_v22 = vld [vmem:[%s3571_s26 + $0x1ac] ss:$16 sps:$4 sm:$0xff]  }
  0x38   : > { %1653 = vmatprep.subr.bf16.mxu0 %v3480_v0 }
  0x3a   : > { %1365 = vmatpush1.bf16.msra.mxu1 %v3252_v23  ;;  %v3346_v23 = vld [vmem:[%s3571_s26 + $0x1a0] ss:$16 sps:$4 sm:$0xff]  }
  0x3b   : > { %1654 = vmatpush1.bf16.msra.mxu0 %v3253_v24  ;;  %1366 = vmatprep.subr.bf16.mxu1 %v3480_v0  ;;  %v3347_v24 = vld [vmem:[%s3571_s26 + $0x1a8] ss:$16 sps:$4 sm:$0xff]  }
  0x3c   : > { %1655 = vmatprep.subr.bf16.mxu0 %v3480_v0 }
  0x3e   : > { %1367 = vmatpush1.bf16.msra.mxu1 %v3254_v25  ;;  %v3348_v25 = vld [vmem:[%s3571_s26 + $0x1c4] ss:$16 sps:$4 sm:$0xff]  }
  0x3f   : > { %1656 = vmatpush1.bf16.msra.mxu0 %v3255_v26  ;;  %1368 = vmatprep.subr.bf16.mxu1 %v3480_v0  ;;  %v3350_v26 = vld [vmem:[%s3571_s26 + $0x1cc] ss:$16 sps:$4 sm:$0xff]  }
  0x40   : > { %1657 = vmatprep.subr.bf16.mxu0 %v3480_v0 }
  0x42   : > { %1369 = vmatpush1.bf16.msra.mxu1 %v3256_v27  ;;  %v3352_v27 = vld [vmem:[%s3571_s26 + $0x1c0] ss:$16 sps:$4 sm:$0xff]  }
  0x43   : > { %1658 = vmatpush1.bf16.msra.mxu0 %v3257_v28  ;;  %1370 = vmatprep.subr.bf16.mxu1 %v3480_v0  ;;  %v3353_v28 = vld [vmem:[%s3571_s26 + $0x1c8] ss:$16 sps:$4 sm:$0xff]  }
  0x44   : > { %1659 = vmatprep.subr.bf16.mxu0 %v3480_v0 }
  0x46   : > { %1371 = vmatpush1.bf16.msra.mxu1 %v3258_v29  ;;  %v3354_v29 = vld [vmem:[%s3571_s26 + $0x1e4] ss:$16 sps:$4 sm:$0xff]  }
  0x47   : > { %1660 = vmatpush1.bf16.msra.mxu0 %v3259_v30  ;;  %1372 = vmatprep.subr.bf16.mxu1 %v3480_v0  ;;  %v3356_v30 = vld [vmem:[%s3571_s26 + $0x1ec] ss:$16 sps:$4 sm:$0xff]  }
  0x48   : > { %1661 = vmatprep.subr.bf16.mxu0 %v3480_v0 }
  0x4a   : > { %1373 = vmatpush1.bf16.msra.mxu1 %v3260_v31  ;;  %v3358_v31 = vld [vmem:[%s3571_s26 + $0x1e0] ss:$16 sps:$4 sm:$0xff]  }
  0x4b   : > { %1662 = vmatpush1.bf16.msra.mxu0 %v3261_v32  ;;  %1374 = vmatprep.subr.bf16.mxu1 %v3480_v0  ;;  %v3359_v32 = vld [vmem:[%s3571_s26 + $0x1e8] ss:$16 sps:$4 sm:$0xff]  }
  0x4c   : > { %1663 = vmatprep.subr.bf16.mxu0 %v3480_v0  ;;  %v3311_v0 = vld [vmem:[%s3571_s26 + $0xe8] ss:$16 sps:$4 sm:$0xff]  }
  0x4e   : > { %1375 = vmatpush1.bf16.msra.mxu1 %v3262_v33  ;;  %v3360_v33 = vld [vmem:[%s3571_s26 + $0x204] ss:$16 sps:$4 sm:$0xff]  }
  0x4f   : > { %1664 = vmatpush1.bf16.msra.mxu0 %v3263_v34  ;;  %v3362_v34 = vld [vmem:[%s3571_s26 + $0x20c] ss:$16 sps:$4 sm:$0xff]  }
  0x51   : > { %1377 = vmatmul.mubr.bf16.vlgmr.msra.gmra.mrb[0].mxu1 %v3264_v35  ;;  %v3364_v35 = vld [vmem:[%s3571_s26 + $0x200] ss:$16 sps:$4 sm:$0xff]  }
  0x52   : > { %1666 = vmatmul.mubr.bf16.vlgmr.msra.gmra.mrb[0].mxu0 %v3267_v36  ;;  %1384 = vmatprep.mubr.bf16.mxu1 %v3270_v37  ;;  %v3365_v36 = vld [vmem:[%s3571_s26 + $0x208] ss:$16 sps:$4 sm:$0xff]   ;;  %v3366_v37 = vld [vmem:[%s3571_s26 + $0x224] ss:$16 sps:$4 sm:$0xff]  }
  0x53   : > { %1673 = vmatprep.mubr.bf16.mxu0 %v3272_v38  ;;  %v3368_v38 = vld [vmem:[%s3571_s26 + $0x22c] ss:$16 sps:$4 sm:$0xff]  }
  0x59   : > { %1385 = vmatmul.mubr.bf16.gmra.mrb[4].mxu1 %v3274_v39  ;;  %v3370_v39 = vld [vmem:[%s3571_s26 + $0x220] ss:$16 sps:$4 sm:$0xff]  }
  0x5a   : > { %1674 = vmatmul.mubr.bf16.gmra.mrb[4].mxu0 %v3275_v40  ;;  %1392 = vmatprep.mubr.bf16.mxu1 %v3276_v41  ;;  %v3371_v40 = vld [vmem:[%s3571_s26 + $0x228] ss:$16 sps:$4 sm:$0xff]   ;;  %v3372_v41 = vld [vmem:[%s3571_s26 + $0x244] ss:$16 sps:$4 sm:$0xff]  }
  0x5b   : > { %1681 = vmatprep.mubr.bf16.mxu0 %v3278_v42  ;;  %v3374_v42 = vld [vmem:[%s3571_s26 + $0x24c] ss:$16 sps:$4 sm:$0xff]  }
  0x61   : > { %1393 = vmatmul.mubr.bf16.gmra.mrb[8].mxu1 %v3280_v43  ;;  %v3376_v43 = vld [vmem:[%s3571_s26 + $0x240] ss:$16 sps:$4 sm:$0xff]  }
  0x62   : > { %1682 = vmatmul.mubr.bf16.gmra.mrb[8].mxu0 %v3281_v44  ;;  %1400 = vmatprep.mubr.bf16.mxu1 %v3282_v45  ;;  %v3377_v44 = vld [vmem:[%s3571_s26 + $0x248] ss:$16 sps:$4 sm:$0xff]   ;;  %v3378_v45 = vld [vmem:[%s3571_s26 + $0x264] ss:$16 sps:$4 sm:$0xff]  }
  0x63   : > { %1689 = vmatprep.mubr.bf16.mxu0 %v3284_v46  ;;  %v3380_v46 = vld [vmem:[%s3571_s26 + $0x26c] ss:$16 sps:$4 sm:$0xff]  }
  0x69   : > { %1401 = vmatmul.mubr.bf16.gmra.mrb[12].mxu1 %v3286_v47  ;;  %v3382_v47 = vld [vmem:[%s3571_s26 + $0x260] ss:$16 sps:$4 sm:$0xff]  }
  0x6a   : > { %1690 = vmatmul.mubr.bf16.gmra.mrb[12].mxu0 %v3287_v48  ;;  %1408 = vmatprep.mubr.bf16.mxu1 %v3288_v49  ;;  %v3383_v48 = vld [vmem:[%s3571_s26 + $0x268] ss:$16 sps:$4 sm:$0xff]   ;;  %v3384_v49 = vld [vmem:[%s3571_s26 + $0x284] ss:$16 sps:$4 sm:$0xff]  }
  0x6b   : > { %1697 = vmatprep.mubr.bf16.mxu0 %v3290_v50  ;;  %v3386_v50 = vld [vmem:[%s3571_s26 + $0x28c] ss:$16 sps:$4 sm:$0xff]  }
  0x71   : > { %1409 = vmatmul.mubr.bf16.gmra.mrb[16].mxu1 %v3292_v51  ;;  %v3388_v51 = vld [vmem:[%s3571_s26 + $0x280] ss:$16 sps:$4 sm:$0xff]  }
  0x72   : > { %1698 = vmatmul.mubr.bf16.gmra.mrb[16].mxu0 %v3293_v52  ;;  %1416 = vmatprep.mubr.bf16.mxu1 %v3294_v53  ;;  %v3389_v52 = vld [vmem:[%s3571_s26 + $0x288] ss:$16 sps:$4 sm:$0xff]   ;;  %v3390_v53 = vld [vmem:[%s3571_s26 + $0x2a4] ss:$16 sps:$4 sm:$0xff]  }
  0x73   : > { %1705 = vmatprep.mubr.bf16.mxu0 %v3296_v54  ;;  %v3392_v54 = vld [vmem:[%s3571_s26 + $0x2ac] ss:$16 sps:$4 sm:$0xff]  }
  0x79   : > { %1417 = vmatmul.mubr.bf16.gmra.mrb[20].mxu1 %v3298_v55  ;;  %v3394_v55 = vld [vmem:[%s3571_s26 + $0x2a0] ss:$16 sps:$4 sm:$0xff]  }
  0x7a   : > { %1706 = vmatmul.mubr.bf16.gmra.mrb[20].mxu0 %v3299_v56  ;;  %1424 = vmatprep.mubr.bf16.mxu1 %v3300_v57  ;;  %v3395_v56 = vld [vmem:[%s3571_s26 + $0x2a8] ss:$16 sps:$4 sm:$0xff]   ;;  %v3396_v57 = vld [vmem:[%s3571_s26 + $0x2c4] ss:$16 sps:$4 sm:$0xff]  }
  0x7b   : > { %1713 = vmatprep.mubr.bf16.mxu0 %v3302_v58  ;;  %v3398_v58 = vld [vmem:[%s3571_s26 + $0x2cc] ss:$16 sps:$4 sm:$0xff]  }
  0x81   : > { %1425 = vmatmul.mubr.bf16.gmra.mrb[24].mxu1 %v3304_v59  ;;  %v3400_v59 = vld [vmem:[%s3571_s26 + $0x2c0] ss:$16 sps:$4 sm:$0xff]  }
  0x82   : > { %1714 = vmatmul.mubr.bf16.gmra.mrb[24].mxu0 %v3305_v60  ;;  %1432 = vmatprep.mubr.bf16.mxu1 %v3306_v61  ;;  %v3401_v60 = vld [vmem:[%s3571_s26 + $0x2c8] ss:$16 sps:$4 sm:$0xff]   ;;  %v3402_v61 = vld [vmem:[%s3571_s26 + $0x2e4] ss:$16 sps:$4 sm:$0xff]  }
  0x83   : > { %1721 = vmatprep.mubr.bf16.mxu0 %v3308_v62  ;;  %v3404_v62 = vld [vmem:[%s3571_s26 + $0x2ec] ss:$16 sps:$4 sm:$0xff]  }
  0x89   : > { %1433 = vmatmul.mubr.bf16.gmra.mrb[28].mxu1 %v3310_v63  ;;  %v3406_v63 = vld [vmem:[%s3571_s26 + $0x2e0] ss:$16 sps:$4 sm:$0xff]  }
  0x8a   : > { %1722 = vmatmul.mubr.bf16.gmra.mrb[28].mxu0 %v3311_v0  ;;  %1440 = vmatprep.mubr.bf16.mxu1 %v3312_v1  ;;  %v3407_v0 = vld [vmem:[%s3571_s26 + $0x2e8] ss:$16 sps:$4 sm:$0xff]   ;;  %v3408_v1 = vld [vmem:[%s3571_s26 + $0x304] ss:$16 sps:$4 sm:$0xff]  }
  0x8b   : > { %1729 = vmatprep.mubr.bf16.mxu0 %v3314_v2  ;;  %v3410_v2 = vld [vmem:[%s3571_s26 + $0x30c] ss:$16 sps:$4 sm:$0xff]  }
  0x91   : > { %1441 = vmatmul.mubr.bf16.gmra.mrb[32].mxu1 %v3316_v3  ;;  %v3412_v3 = vld [vmem:[%s3571_s26 + $0x300] ss:$16 sps:$4 sm:$0xff]  }
  0x92   : > { %1730 = vmatmul.mubr.bf16.gmra.mrb[32].mxu0 %v3317_v4  ;;  %1448 = vmatprep.mubr.bf16.mxu1 %v3318_v5  ;;  %v3413_v4 = vld [vmem:[%s3571_s26 + $0x308] ss:$16 sps:$4 sm:$0xff]   ;;  %v3414_v5 = vld [vmem:[%s3571_s26 + $0x324] ss:$16 sps:$4 sm:$0xff]  }
  0x93   : > { %1737 = vmatprep.mubr.bf16.mxu0 %v3320_v6  ;;  %v3416_v6 = vld [vmem:[%s3571_s26 + $0x32c] ss:$16 sps:$4 sm:$0xff]  }
  0x99   : > { %1449 = vmatmul.mubr.bf16.gmra.mrb[36].mxu1 %v3322_v7  ;;  %v3418_v7 = vld [vmem:[%s3571_s26 + $0x320] ss:$16 sps:$4 sm:$0xff]  }
  0x9a   : > { %1738 = vmatmul.mubr.bf16.gmra.mrb[36].mxu0 %v3323_v8  ;;  %1456 = vmatprep.mubr.bf16.mxu1 %v3324_v9  ;;  %v3419_v8 = vld [vmem:[%s3571_s26 + $0x328] ss:$16 sps:$4 sm:$0xff]   ;;  %v3420_v9 = vld [vmem:[%s3571_s26 + $0x344] ss:$16 sps:$4 sm:$0xff]  }
  0x9b   : > { %1745 = vmatprep.mubr.bf16.mxu0 %v3326_v10  ;;  %v3422_v10 = vld [vmem:[%s3571_s26 + $0x34c] ss:$16 sps:$4 sm:$0xff]  }
  0xa1   : > { %1457 = vmatmul.mubr.bf16.gmra.mrb[40].mxu1 %v3328_v11  ;;  %v3424_v11 = vld [vmem:[%s3571_s26 + $0x340] ss:$16 sps:$4 sm:$0xff]  }
  0xa2   : > { %1746 = vmatmul.mubr.bf16.gmra.mrb[40].mxu0 %v3329_v12  ;;  %1464 = vmatprep.mubr.bf16.mxu1 %v3330_v13  ;;  %v3425_v12 = vld [vmem:[%s3571_s26 + $0x348] ss:$16 sps:$4 sm:$0xff]   ;;  %v3426_v13 = vld [vmem:[%s3571_s26 + $0x364] ss:$16 sps:$4 sm:$0xff]  }
  0xa3   : > { %1753 = vmatprep.mubr.bf16.mxu0 %v3332_v14  ;;  %v3428_v14 = vld [vmem:[%s3571_s26 + $0x36c] ss:$16 sps:$4 sm:$0xff]  }
  0xa9   : > { %1465 = vmatmul.mubr.bf16.gmra.mrb[44].mxu1 %v3334_v15 }
  0xaa   : > { %1754 = vmatmul.mubr.bf16.gmra.mrb[44].mxu0 %v3335_v16  ;;  %1472 = vmatprep.mubr.bf16.mxu1 %v3336_v17 }
  0xab   : > { %1761 = vmatprep.mubr.bf16.mxu0 %v3338_v18  ;;  %v3430_v18 = vld [vmem:[%s3571_s26 + $0x360] ss:$16 sps:$4 sm:$0xff]  }
  0xb1   : > { %1473 = vmatmul.mubr.bf16.gmra.mrb[48].mxu1 %v3340_v19 }
  0xb2   : > { %1762 = vmatmul.mubr.bf16.gmra.mrb[48].mxu0 %v3341_v20  ;;  %1480 = vmatprep.mubr.bf16.mxu1 %v3342_v21 }
  0xb3   : > { %1769 = vmatprep.mubr.bf16.mxu0 %v3344_v22  ;;  %v3431_v22 = vld [vmem:[%s3571_s26 + $0x368] ss:$16 sps:$4 sm:$0xff]  }
  0xb9   : > { %1481 = vmatmul.mubr.bf16.gmra.mrb[52].mxu1 %v3346_v23  ;;  %v3432_v23 = vld [vmem:[%s3571_s26 + $0x384] ss:$16 sps:$4 sm:$0xff]  }
  0xba   : > { %1770 = vmatmul.mubr.bf16.gmra.mrb[52].mxu0 %v3347_v24  ;;  %1488 = vmatprep.mubr.bf16.mxu1 %v3348_v25 }
  0xbb   : > { %1777 = vmatprep.mubr.bf16.mxu0 %v3350_v26  ;;  %v3434_v26 = vld [vmem:[%s3571_s26 + $0x38c] ss:$16 sps:$4 sm:$0xff]  }
  0xc1   : > { %1489 = vmatmul.mubr.bf16.gmra.mrb[56].mxu1 %v3352_v27 }
  0xc2   : > { %1778 = vmatmul.mubr.bf16.gmra.mrb[56].mxu0 %v3353_v28  ;;  %1496 = vmatprep.mubr.bf16.mxu1 %v3354_v29 }
  0xc3   : > { %1785 = vmatprep.mubr.bf16.mxu0 %v3356_v30 }
  0xc9   : > { %1497 = vmatmul.mubr.bf16.gmra.mrb[60].mxu1 %v3358_v31 }
  0xca   : > { %1786 = vmatmul.mubr.bf16.gmra.mrb[60].mxu0 %v3359_v32  ;;  %1504 = vmatprep.mubr.bf16.mxu1 %v3360_v33 }
  0xcb   : > { %1793 = vmatprep.mubr.bf16.mxu0 %v3362_v34 }
  0xd1   : > { %1505 = vmatmul.mubr.bf16.gmra.mrb[64].mxu1 %v3364_v35 }
  0xd2   : > { %1794 = vmatmul.mubr.bf16.gmra.mrb[64].mxu0 %v3365_v36  ;;  %1512 = vmatprep.mubr.bf16.mxu1 %v3366_v37  ;;  %v3436_v37 = vld [vmem:[%s3571_s26 + $0x380] ss:$16 sps:$4 sm:$0xff]  }
  0xd3   : > { %1801 = vmatprep.mubr.bf16.mxu0 %v3368_v38 }
  0xd9   : > { %1513 = vmatmul.mubr.bf16.gmra.mrb[68].mxu1 %v3370_v39 }
  0xda   : > { %1802 = vmatmul.mubr.bf16.gmra.mrb[68].mxu0 %v3371_v40  ;;  %1520 = vmatprep.mubr.bf16.mxu1 %v3372_v41  ;;  %v3437_v41 = vld [vmem:[%s3571_s26 + $0x388] ss:$16 sps:$4 sm:$0xff]  }
  0xdb   : > { %1809 = vmatprep.mubr.bf16.mxu0 %v3374_v42 }
  0xe1   : > { %1521 = vmatmul.mubr.bf16.gmra.mrb[72].mxu1 %v3376_v43 }
  0xe2   : > { %1810 = vmatmul.mubr.bf16.gmra.mrb[72].mxu0 %v3377_v44  ;;  %1528 = vmatprep.mubr.bf16.mxu1 %v3378_v45  ;;  %v3438_v44 = vld [vmem:[%s3571_s26 + $0x3a4] ss:$16 sps:$4 sm:$0xff]   ;;  %v3440_v45 = vld [vmem:[%s3571_s26 + $0x3ac] ss:$16 sps:$4 sm:$0xff]  }
  0xe3   : > { %1817 = vmatprep.mubr.bf16.mxu0 %v3380_v46 }
  0xe9   : > { %1529 = vmatmul.mubr.bf16.gmra.mrb[76].mxu1 %v3382_v47 }
  0xea   : > { %1818 = vmatmul.mubr.bf16.gmra.mrb[76].mxu0 %v3383_v48  ;;  %1536 = vmatprep.mubr.bf16.mxu1 %v3384_v49 }
  0xeb   : > { %1825 = vmatprep.mubr.bf16.mxu0 %v3386_v50 }
  0xf1   : > { %1537 = vmatmul.mubr.bf16.gmra.mrb[80].mxu1 %v3388_v51 }
  0xf2   : > { %1826 = vmatmul.mubr.bf16.gmra.mrb[80].mxu0 %v3389_v52  ;;  %1544 = vmatprep.mubr.bf16.mxu1 %v3390_v53 }
  0xf3   : > { %1833 = vmatprep.mubr.bf16.mxu0 %v3392_v54 }
  0xf9   : > { %1545 = vmatmul.mubr.bf16.gmra.mrb[84].mxu1 %v3394_v55 }
  0xfa   : > { %1834 = vmatmul.mubr.bf16.gmra.mrb[84].mxu0 %v3395_v56  ;;  %1552 = vmatprep.mubr.bf16.mxu1 %v3396_v57 }
  0xfb   : > { %1841 = vmatprep.mubr.bf16.mxu0 %v3398_v58  ;;  %v3442_v58 = vld [vmem:[%s3571_s26 + $0x3a0] ss:$16 sps:$4 sm:$0xff]  }
 0x101   : > { %1553 = vmatmul.mubr.bf16.gmra.mrb[88].mxu1 %v3400_v59 }
 0x102   : > { %1842 = vmatmul.mubr.bf16.gmra.mrb[88].mxu0 %v3401_v60  ;;  %1560 = vmatprep.mubr.bf16.mxu1 %v3402_v61 }
 0x103   : > { %1849 = vmatprep.mubr.bf16.mxu0 %v3404_v62  ;;  %v3443_v62 = vld [vmem:[%s3571_s26 + $0x3a8] ss:$16 sps:$4 sm:$0xff]  }
 0x109   : > { %1561 = vmatmul.mubr.bf16.gmra.mrb[92].mxu1 %v3406_v63 }
 0x10a   : > { %1850 = vmatmul.mubr.bf16.gmra.mrb[92].mxu0 %v3407_v0  ;;  %1568 = vmatprep.mubr.bf16.mxu1 %v3408_v1  ;;  %v3444_v1 = vld [vmem:[%s3571_s26 + $0x3c4] ss:$16 sps:$4 sm:$0xff]  }
 0x10b   : > { %1857 = vmatprep.mubr.bf16.mxu0 %v3410_v2  ;;  %v3446_v2 = vld [vmem:[%s3571_s26 + $0x3cc] ss:$16 sps:$4 sm:$0xff]  }
 0x111   : > { %1569 = vmatmul.mubr.bf16.gmra.mrb[96].mxu1 %v3412_v3 }
 0x112   : > { %1858 = vmatmul.mubr.bf16.gmra.mrb[96].mxu0 %v3413_v4  ;;  %1576 = vmatprep.mubr.bf16.mxu1 %v3414_v5 }
 0x113   : > { %1865 = vmatprep.mubr.bf16.mxu0 %v3416_v6 }
 0x119   : > { %1577 = vmatmul.mubr.bf16.gmra.mrb[100].mxu1 %v3418_v7 }
 0x11a   : > { %1866 = vmatmul.mubr.bf16.gmra.mrb[100].mxu0 %v3419_v8  ;;  %1584 = vmatprep.mubr.bf16.mxu1 %v3420_v9 }
 0x11b   : > { %1873 = vmatprep.mubr.bf16.mxu0 %v3422_v10 }
 0x121   : > { %1585 = vmatmul.mubr.bf16.gmra.mrb[104].mxu1 %v3424_v11 }
 0x122   : > { %1874 = vmatmul.mubr.bf16.gmra.mrb[104].mxu0 %v3425_v12  ;;  %1592 = vmatprep.mubr.bf16.mxu1 %v3426_v13 }
 0x123   : > { %1881 = vmatprep.mubr.bf16.mxu0 %v3428_v14 }
 0x124   : > { %v1378_v15 = vpop.f32.mrb[0].mxu1 }
 0x125   : > { %v1667_v16 = vpop.f32.mrb[0].mxu0  ;;  %v1380_v17 = vpop.f32.mrb[1].mxu1 }
 0x126   : > { %v1668_v19 = vadd.f32 %v1667_v16, %v1378_v15  ;;  %v1669_v20 = vpop.f32.mrb[1].mxu0  ;;  %v1381_v21 = vpop.f32.mrb[2].mxu1  ;;  %v3448_v15 = vld [vmem:[%s3571_s26 + $0x3c0] ss:$16 sps:$4 sm:$0xff]  }
 0x127   : > { %v1670_v24 = vpop.f32.mrb[2].mxu0  ;;  %v1383_v25 = vpop.f32.mrb[3].mxu1 }
 0x128   : > { %v1671_v27 = vadd.f32 %v1670_v24, %v1381_v21  ;;  %v1672_v28 = vpop.f32.mrb[3].mxu0  ;;  %v2321_v29 = vmul.f32 %v1668_v19, %v1668_v19 }
 0x129   : > { %1593 = vmatmul.mubr.bf16.gmra.mrb[108].mxu1 %v3430_v18 }
 0x12a   : > { %v2954_v30 = vpack.c.bf16 %v1671_v27, %v1668_v19  ;;  %v2249_v31 = vadd.f32 %v1671_v27, %v1668_v19  ;;  %v2322_v32 = vmul.f32 %v1671_v27, %v1671_v27  ;;  %1882 = vmatmul.mubr.bf16.gmra.mrb[108].mxu0 %v3431_v22  ;;  %1600 = vmatprep.mubr.bf16.mxu1 %v3432_v23  ;;  %v3449_v19 = vld [vmem:[%s3571_s26 + $0x3c8] ss:$16 sps:$4 sm:$0xff]   ;;  %v3450_v22 = vld [vmem:[%s3571_s26 + $0x3e4] ss:$16 sps:$4 sm:$0xff]   ;;  %v3452_v23 = vld [vmem:[%s3571_s26 + $0x3ec] ss:$16 sps:$4 sm:$0xff]  }
 0x12b   : > { %1889 = vmatprep.mubr.bf16.mxu0 %v3434_v26 }
 0x12c   : > { %2955 = vst [vmem:[%s3724_s29] sm:$0xff] %v2954_v30   ;;  %v2385_v33 = vadd.f32 %v2322_v32, %v2321_v29  ;;  %v1386_v34 = vpop.f32.mrb[4].mxu1 }
 0x12d   : > { %v1675_v35 = vpop.f32.mrb[4].mxu0  ;;  %v1388_v36 = vpop.f32.mrb[5].mxu1 }
 0x12e   : > { %v1676_v38 = vadd.f32 %v1675_v35, %v1386_v34  ;;  %v1677_v39 = vpop.f32.mrb[5].mxu0  ;;  %v1389_v40 = vpop.f32.mrb[6].mxu1  ;;  %v3454_v36 = vld [vmem:[%s3571_s26 + $0x3e0] ss:$16 sps:$4 sm:$0xff]  }
 0x12f   : > { %v1678_v42 = vpop.f32.mrb[6].mxu0  ;;  %v1391_v43 = vpop.f32.mrb[7].mxu1 }
 0x130   : > { %v2250_v46 = vadd.f32 %v2249_v31, %v1676_v38  ;;  %v2323_v47 = vmul.f32 %v1676_v38, %v1676_v38  ;;  %v1679_v48 = vadd.f32 %v1678_v42, %v1389_v40  ;;  %v1680_v49 = vpop.f32.mrb[7].mxu0  ;;  %v3455_v40 = vld [vmem:[%s3571_s26 + $0x3e8] ss:$16 sps:$4 sm:$0xff]  }
 0x131   : > { %1601 = vmatmul.mubr.bf16.gmra.mrb[112].mxu1 %v3436_v37 }
 0x132   : > { %v2386_v50 = vadd.f32 %v2385_v33, %v2323_v47  ;;  %v2959_v51 = vpack.c.bf16 %v1679_v48, %v1676_v38  ;;  %v2251_v52 = vadd.f32 %v2250_v46, %v1679_v48  ;;  %v2324_v53 = vmul.f32 %v1679_v48, %v1679_v48  ;;  %1890 = vmatmul.mubr.bf16.gmra.mrb[112].mxu0 %v3437_v41 }
 0x133   : > { %1608 = vmatprep.mubr.bf16.mxu1 %v3438_v44  ;;  %1897 = vmatprep.mubr.bf16.mxu0 %v3440_v45 }
 0x134   : > { %3111 = vst [vmem:[%s3724_s29 + $0x8] sm:$0xff] %v2959_v51   ;;  %v2387_v54 = vadd.f32 %v2386_v50, %v2324_v53  ;;  %v1394_v55 = vpop.f32.mrb[8].mxu1 }
 0x135   : > { %v1683_v56 = vpop.f32.mrb[8].mxu0  ;;  %v1396_v57 = vpop.f32.mrb[9].mxu1 }
 0x136   : > { %v1684_v59 = vadd.f32 %v1683_v56, %v1394_v55  ;;  %v1685_v60 = vpop.f32.mrb[9].mxu0  ;;  %v1397_v61 = vpop.f32.mrb[10].mxu1 }
 0x137   : > { %v1686_v63 = vpop.f32.mrb[10].mxu0  ;;  %v1399_v0 = vpop.f32.mrb[11].mxu1 }
 0x138   : > { %v2252_v3 = vadd.f32 %v2251_v52, %v1684_v59  ;;  %v2325_v4 = vmul.f32 %v1684_v59, %v1684_v59  ;;  %v1687_v5 = vadd.f32 %v1686_v63, %v1397_v61  ;;  %v1688_v6 = vpop.f32.mrb[11].mxu0 }
 0x139   : > { %1609 = vmatmul.mubr.bf16.gmra.mrb[116].mxu1 %v3442_v58 }
 0x13a   : > { %v2388_v7 = vadd.f32 %v2387_v54, %v2325_v4  ;;  %v2964_v8 = vpack.c.bf16 %v1687_v5, %v1684_v59  ;;  %v2253_v9 = vadd.f32 %v2252_v3, %v1687_v5  ;;  %v2326_v10 = vmul.f32 %v1687_v5, %v1687_v5  ;;  %1898 = vmatmul.mubr.bf16.gmra.mrb[116].mxu0 %v3443_v62 }
 0x13b   : > { %1616 = vmatprep.mubr.bf16.mxu1 %v3444_v1  ;;  %1905 = vmatprep.mubr.bf16.mxu0 %v3446_v2 }
 0x13c   : > { %3112 = vst [vmem:[%s3724_s29 + $0x10] sm:$0xff] %v2964_v8   ;;  %v2389_v11 = vadd.f32 %v2388_v7, %v2326_v10  ;;  %v1402_v12 = vpop.f32.mrb[12].mxu1 }
 0x13d   : > { %v1691_v13 = vpop.f32.mrb[12].mxu0  ;;  %v1404_v14 = vpop.f32.mrb[13].mxu1 }
 0x13e   : > { %v1692_v16 = vadd.f32 %v1691_v13, %v1402_v12  ;;  %v1693_v17 = vpop.f32.mrb[13].mxu0  ;;  %v1405_v18 = vpop.f32.mrb[14].mxu1 }
 0x13f   : > { %v1694_v20 = vpop.f32.mrb[14].mxu0  ;;  %v1407_v21 = vpop.f32.mrb[15].mxu1 }
 0x140   : > { %v2254_v24 = vadd.f32 %v2253_v9, %v1692_v16  ;;  %v2327_v25 = vmul.f32 %v1692_v16, %v1692_v16  ;;  %v1695_v26 = vadd.f32 %v1694_v20, %v1405_v18  ;;  %v1696_v27 = vpop.f32.mrb[15].mxu0 }
 0x141   : > { %1617 = vmatmul.mubr.bf16.gmra.mrb[120].mxu1 %v3448_v15 }
 0x142   : > { %v2390_v28 = vadd.f32 %v2389_v11, %v2327_v25  ;;  %v2969_v29 = vpack.c.bf16 %v1695_v26, %v1692_v16  ;;  %v2255_v30 = vadd.f32 %v2254_v24, %v1695_v26  ;;  %v2328_v31 = vmul.f32 %v1695_v26, %v1695_v26  ;;  %1906 = vmatmul.mubr.bf16.gmra.mrb[120].mxu0 %v3449_v19 }
 0x143   : > { %1624 = vmatprep.mubr.bf16.mxu1 %v3450_v22  ;;  %1913 = vmatprep.mubr.bf16.mxu0 %v3452_v23 }
 0x144   : > { %3113 = vst [vmem:[%s3724_s29 + $0x18] sm:$0xff] %v2969_v29   ;;  %v2391_v32 = vadd.f32 %v2390_v28, %v2328_v31  ;;  %v1410_v33 = vpop.f32.mrb[16].mxu1 }
 0x145   : > { %v1699_v34 = vpop.f32.mrb[16].mxu0  ;;  %v1412_v35 = vpop.f32.mrb[17].mxu1 }
 0x146   : > { %v1700_v37 = vadd.f32 %v1699_v34, %v1410_v33  ;;  %v1701_v38 = vpop.f32.mrb[17].mxu0  ;;  %v1413_v39 = vpop.f32.mrb[18].mxu1 }
 0x147   : > { %v1702_v41 = vpop.f32.mrb[18].mxu0  ;;  %v1415_v42 = vpop.f32.mrb[19].mxu1 }
 0x148   : > { %v2256_v43 = vadd.f32 %v2255_v30, %v1700_v37  ;;  %v2329_v44 = vmul.f32 %v1700_v37, %v1700_v37  ;;  %v1703_v45 = vadd.f32 %v1702_v41, %v1413_v39  ;;  %v1704_v46 = vpop.f32.mrb[19].mxu0 }
 0x149   : > { %1625 = vmatmul.mubr.bf16.gmra.mrb[124].mxu1 %v3454_v36 }
 0x14a   : > { %v2392_v47 = vadd.f32 %v2391_v32, %v2329_v44  ;;  %v2974_v48 = vpack.c.bf16 %v1703_v45, %v1700_v37  ;;  %v2257_v49 = vadd.f32 %v2256_v43, %v1703_v45  ;;  %v2330_v50 = vmul.f32 %v1703_v45, %v1703_v45  ;;  %1914 = vmatmul.mubr.bf16.gmra.mrb[124].mxu0 %v3455_v40 }
 0x14c   : > { %3114 = vst [vmem:[%s3724_s29 + $0x20] sm:$0xff] %v2974_v48   ;;  %v2393_v51 = vadd.f32 %v2392_v47, %v2330_v50  ;;  %v1418_v52 = vpop.f32.mrb[20].mxu1 }
 0x14d   : > { %v1707_v53 = vpop.f32.mrb[20].mxu0  ;;  %v1420_v54 = vpop.f32.mrb[21].mxu1 }
 0x14e   : > { %v1708_v55 = vadd.f32 %v1707_v53, %v1418_v52  ;;  %v1709_v56 = vpop.f32.mrb[21].mxu0  ;;  %v1421_v57 = vpop.f32.mrb[22].mxu1 }
 0x14f   : > { %v1710_v58 = vpop.f32.mrb[22].mxu0  ;;  %v1423_v59 = vpop.f32.mrb[23].mxu1 }
 0x150   : > { %v2258_v60 = vadd.f32 %v2257_v49, %v1708_v55  ;;  %v2331_v61 = vmul.f32 %v1708_v55, %v1708_v55  ;;  %v1711_v62 = vadd.f32 %v1710_v58, %v1421_v57  ;;  %v1712_v63 = vpop.f32.mrb[23].mxu0 }
 0x152   : > { %v2394_v0 = vadd.f32 %v2393_v51, %v2331_v61  ;;  %v2979_v1 = vpack.c.bf16 %v1711_v62, %v1708_v55  ;;  %v2259_v2 = vadd.f32 %v2258_v60, %v1711_v62  ;;  %v2332_v3 = vmul.f32 %v1711_v62, %v1711_v62 }
 0x154   : > { %3115 = vst [vmem:[%s3724_s29 + $0x28] sm:$0xff] %v2979_v1   ;;  %v2395_v4 = vadd.f32 %v2394_v0, %v2332_v3  ;;  %v1426_v5 = vpop.f32.mrb[24].mxu1 }
 0x155   : > { %v1715_v6 = vpop.f32.mrb[24].mxu0  ;;  %v1428_v7 = vpop.f32.mrb[25].mxu1 }
 0x156   : > { %v1716_v8 = vadd.f32 %v1715_v6, %v1426_v5  ;;  %v1717_v9 = vpop.f32.mrb[25].mxu0  ;;  %v1429_v10 = vpop.f32.mrb[26].mxu1 }
 0x157   : > { %v1718_v11 = vpop.f32.mrb[26].mxu0  ;;  %v1431_v12 = vpop.f32.mrb[27].mxu1 }
 0x158   : > { %v2260_v13 = vadd.f32 %v2259_v2, %v1716_v8  ;;  %v2333_v14 = vmul.f32 %v1716_v8, %v1716_v8  ;;  %v1719_v15 = vadd.f32 %v1718_v11, %v1429_v10  ;;  %v1720_v16 = vpop.f32.mrb[27].mxu0 }
 0x15a   : > { %v2396_v17 = vadd.f32 %v2395_v4, %v2333_v14  ;;  %v2984_v18 = vpack.c.bf16 %v1719_v15, %v1716_v8  ;;  %v2261_v19 = vadd.f32 %v2260_v13, %v1719_v15  ;;  %v2334_v20 = vmul.f32 %v1719_v15, %v1719_v15 }
 0x15c   : > { %3116 = vst [vmem:[%s3724_s29 + $0x30] sm:$0xff] %v2984_v18   ;;  %v2397_v21 = vadd.f32 %v2396_v17, %v2334_v20  ;;  %v1434_v22 = vpop.f32.mrb[28].mxu1 }
 0x15d   : > { %v1723_v23 = vpop.f32.mrb[28].mxu0  ;;  %v1436_v24 = vpop.f32.mrb[29].mxu1 }
 0x15e   : > { %v1724_v25 = vadd.f32 %v1723_v23, %v1434_v22  ;;  %v1725_v26 = vpop.f32.mrb[29].mxu0  ;;  %v1437_v27 = vpop.f32.mrb[30].mxu1 }
 0x15f   : > { %v1726_v28 = vpop.f32.mrb[30].mxu0  ;;  %v1439_v29 = vpop.f32.mrb[31].mxu1 }
 0x160   : > { %v2262_v30 = vadd.f32 %v2261_v19, %v1724_v25  ;;  %v2335_v31 = vmul.f32 %v1724_v25, %v1724_v25  ;;  %v1727_v32 = vadd.f32 %v1726_v28, %v1437_v27  ;;  %v1728_v33 = vpop.f32.mrb[31].mxu0 }
 0x162   : > { %v2398_v34 = vadd.f32 %v2397_v21, %v2335_v31  ;;  %v2989_v35 = vpack.c.bf16 %v1727_v32, %v1724_v25  ;;  %v2263_v36 = vadd.f32 %v2262_v30, %v1727_v32  ;;  %v2336_v37 = vmul.f32 %v1727_v32, %v1727_v32 }
 0x164   : > { %3117 = vst [vmem:[%s3724_s29 + $0x38] sm:$0xff] %v2989_v35   ;;  %v2399_v38 = vadd.f32 %v2398_v34, %v2336_v37  ;;  %v1442_v39 = vpop.f32.mrb[32].mxu1 }
 0x165   : > { %v1731_v40 = vpop.f32.mrb[32].mxu0  ;;  %v1444_v41 = vpop.f32.mrb[33].mxu1 }
 0x166   : > { %v1732_v42 = vadd.f32 %v1731_v40, %v1442_v39  ;;  %v1733_v43 = vpop.f32.mrb[33].mxu0  ;;  %v1445_v44 = vpop.f32.mrb[34].mxu1 }
 0x167   : > { %v1734_v45 = vpop.f32.mrb[34].mxu0  ;;  %v1447_v46 = vpop.f32.mrb[35].mxu1 }
 0x168   : > { %v2264_v47 = vadd.f32 %v2263_v36, %v1732_v42  ;;  %v2337_v48 = vmul.f32 %v1732_v42, %v1732_v42  ;;  %v1735_v49 = vadd.f32 %v1734_v45, %v1445_v44  ;;  %v1736_v50 = vpop.f32.mrb[35].mxu0 }
 0x16a   : > { %v2400_v51 = vadd.f32 %v2399_v38, %v2337_v48  ;;  %v2994_v52 = vpack.c.bf16 %v1735_v49, %v1732_v42  ;;  %v2265_v53 = vadd.f32 %v2264_v47, %v1735_v49  ;;  %v2338_v54 = vmul.f32 %v1735_v49, %v1735_v49 }
 0x16c   : > { %3118 = vst [vmem:[%s3724_s29 + $0x40] sm:$0xff] %v2994_v52   ;;  %v2401_v55 = vadd.f32 %v2400_v51, %v2338_v54  ;;  %v1450_v56 = vpop.f32.mrb[36].mxu1 }
 0x16d   : > { %v1739_v57 = vpop.f32.mrb[36].mxu0  ;;  %v1452_v58 = vpop.f32.mrb[37].mxu1 }
 0x16e   : > { %v1740_v59 = vadd.f32 %v1739_v57, %v1450_v56  ;;  %v1741_v60 = vpop.f32.mrb[37].mxu0  ;;  %v1453_v61 = vpop.f32.mrb[38].mxu1 }
 0x16f   : > { %v1742_v62 = vpop.f32.mrb[38].mxu0  ;;  %v1455_v63 = vpop.f32.mrb[39].mxu1 }
 0x170   : > { %v2266_v0 = vadd.f32 %v2265_v53, %v1740_v59  ;;  %v2339_v1 = vmul.f32 %v1740_v59, %v1740_v59  ;;  %v1743_v2 = vadd.f32 %v1742_v62, %v1453_v61  ;;  %v1744_v3 = vpop.f32.mrb[39].mxu0 }
 0x172   : > { %v2402_v4 = vadd.f32 %v2401_v55, %v2339_v1  ;;  %v2999_v5 = vpack.c.bf16 %v1743_v2, %v1740_v59  ;;  %v2267_v6 = vadd.f32 %v2266_v0, %v1743_v2  ;;  %v2340_v7 = vmul.f32 %v1743_v2, %v1743_v2 }
 0x174   : > { %3119 = vst [vmem:[%s3724_s29 + $0x48] sm:$0xff] %v2999_v5   ;;  %v2403_v8 = vadd.f32 %v2402_v4, %v2340_v7  ;;  %v1458_v9 = vpop.f32.mrb[40].mxu1 }
 0x175   : > { %v1747_v10 = vpop.f32.mrb[40].mxu0  ;;  %v1460_v11 = vpop.f32.mrb[41].mxu1 }
 0x176   : > { %v1748_v12 = vadd.f32 %v1747_v10, %v1458_v9  ;;  %v1749_v13 = vpop.f32.mrb[41].mxu0  ;;  %v1461_v14 = vpop.f32.mrb[42].mxu1 }
 0x177   : > { %v1750_v15 = vpop.f32.mrb[42].mxu0  ;;  %v1463_v16 = vpop.f32.mrb[43].mxu1 }
 0x178   : > { %v2268_v17 = vadd.f32 %v2267_v6, %v1748_v12  ;;  %v2341_v18 = vmul.f32 %v1748_v12, %v1748_v12  ;;  %v1751_v19 = vadd.f32 %v1750_v15, %v1461_v14  ;;  %v1752_v20 = vpop.f32.mrb[43].mxu0 }
 0x17a   : > { %v2404_v21 = vadd.f32 %v2403_v8, %v2341_v18  ;;  %v3004_v22 = vpack.c.bf16 %v1751_v19, %v1748_v12  ;;  %v2269_v23 = vadd.f32 %v2268_v17, %v1751_v19  ;;  %v2342_v24 = vmul.f32 %v1751_v19, %v1751_v19 }
 0x17c   : > { %3120 = vst [vmem:[%s3724_s29 + $0x50] sm:$0xff] %v3004_v22   ;;  %v2405_v25 = vadd.f32 %v2404_v21, %v2342_v24  ;;  %v1466_v26 = vpop.f32.mrb[44].mxu1 }
 0x17d   : > { %v1755_v27 = vpop.f32.mrb[44].mxu0  ;;  %v1468_v28 = vpop.f32.mrb[45].mxu1 }
 0x17e   : > { %v1756_v29 = vadd.f32 %v1755_v27, %v1466_v26  ;;  %v1757_v30 = vpop.f32.mrb[45].mxu0  ;;  %v1469_v31 = vpop.f32.mrb[46].mxu1 }
 0x17f   : > { %v1758_v32 = vpop.f32.mrb[46].mxu0  ;;  %v1471_v33 = vpop.f32.mrb[47].mxu1 }
 0x180   : > { %v2270_v34 = vadd.f32 %v2269_v23, %v1756_v29  ;;  %v2343_v35 = vmul.f32 %v1756_v29, %v1756_v29  ;;  %v1759_v36 = vadd.f32 %v1758_v32, %v1469_v31  ;;  %v1760_v37 = vpop.f32.mrb[47].mxu0 }
 0x182   : > { %v2406_v38 = vadd.f32 %v2405_v25, %v2343_v35  ;;  %v3009_v39 = vpack.c.bf16 %v1759_v36, %v1756_v29  ;;  %v2271_v40 = vadd.f32 %v2270_v34, %v1759_v36  ;;  %v2344_v41 = vmul.f32 %v1759_v36, %v1759_v36 }
 0x184   : > { %3121 = vst [vmem:[%s3724_s29 + $0x58] sm:$0xff] %v3009_v39   ;;  %v2407_v42 = vadd.f32 %v2406_v38, %v2344_v41  ;;  %v1474_v43 = vpop.f32.mrb[48].mxu1 }
 0x185   : > { %v1763_v44 = vpop.f32.mrb[48].mxu0  ;;  %v1476_v45 = vpop.f32.mrb[49].mxu1 }
 0x186   : > { %v1764_v46 = vadd.f32 %v1763_v44, %v1474_v43  ;;  %v1765_v47 = vpop.f32.mrb[49].mxu0  ;;  %v1477_v48 = vpop.f32.mrb[50].mxu1 }
 0x187   : > { %v1766_v49 = vpop.f32.mrb[50].mxu0  ;;  %v1479_v50 = vpop.f32.mrb[51].mxu1 }
 0x188   : > { %v2272_v51 = vadd.f32 %v2271_v40, %v1764_v46  ;;  %v2345_v52 = vmul.f32 %v1764_v46, %v1764_v46  ;;  %v1767_v53 = vadd.f32 %v1766_v49, %v1477_v48  ;;  %v1768_v54 = vpop.f32.mrb[51].mxu0  ;;  %v3481_v50 = vmov 0.0  }
 0x189   : > { %2246 = vst [vmem:[%s3759_s6] sm:$0x1] %v3481_v50  ;;  %2247 = vst [vmem:[%s3765_s9] sm:$0x1] %v3481_v50 }
 0x18a   : > { %v2408_v55 = vadd.f32 %v2407_v42, %v2345_v52  ;;  %v3014_v56 = vpack.c.bf16 %v1767_v53, %v1764_v46  ;;  %v2273_v57 = vadd.f32 %v2272_v51, %v1767_v53  ;;  %v2346_v58 = vmul.f32 %v1767_v53, %v1767_v53 }
 0x18c   : > { %3122 = vst [vmem:[%s3724_s29 + $0x60] sm:$0xff] %v3014_v56   ;;  %v2409_v59 = vadd.f32 %v2408_v55, %v2346_v58  ;;  %v1482_v60 = vpop.f32.mrb[52].mxu1 }
 0x18d   : > { %v1771_v61 = vpop.f32.mrb[52].mxu0  ;;  %v1484_v62 = vpop.f32.mrb[53].mxu1 }
 0x18e   : > { %v1772_v63 = vadd.f32 %v1771_v61, %v1482_v60  ;;  %v1773_v0 = vpop.f32.mrb[53].mxu0  ;;  %v1485_v1 = vpop.f32.mrb[54].mxu1 }
 0x18f   : > { %v1774_v2 = vpop.f32.mrb[54].mxu0  ;;  %v1487_v3 = vpop.f32.mrb[55].mxu1 }
 0x190   : > { %v2274_v4 = vadd.f32 %v2273_v57, %v1772_v63  ;;  %v2347_v5 = vmul.f32 %v1772_v63, %v1772_v63  ;;  %v1775_v6 = vadd.f32 %v1774_v2, %v1485_v1  ;;  %v1776_v7 = vpop.f32.mrb[55].mxu0 }
 0x192   : > { %v2410_v8 = vadd.f32 %v2409_v59, %v2347_v5  ;;  %v3019_v9 = vpack.c.bf16 %v1775_v6, %v1772_v63  ;;  %v2275_v10 = vadd.f32 %v2274_v4, %v1775_v6  ;;  %v2348_v11 = vmul.f32 %v1775_v6, %v1775_v6 }
 0x194   : > { %3123 = vst [vmem:[%s3724_s29 + $0x68] sm:$0xff] %v3019_v9   ;;  %v2411_v12 = vadd.f32 %v2410_v8, %v2348_v11  ;;  %v1490_v13 = vpop.f32.mrb[56].mxu1 }
 0x195   : > { %v1779_v14 = vpop.f32.mrb[56].mxu0  ;;  %v1492_v15 = vpop.f32.mrb[57].mxu1 }
 0x196   : > { %v1780_v16 = vadd.f32 %v1779_v14, %v1490_v13  ;;  %v1781_v17 = vpop.f32.mrb[57].mxu0  ;;  %v1493_v18 = vpop.f32.mrb[58].mxu1 }
 0x197   : > { %v1782_v19 = vpop.f32.mrb[58].mxu0  ;;  %v1495_v20 = vpop.f32.mrb[59].mxu1 }
 0x198   : > { %v2276_v21 = vadd.f32 %v2275_v10, %v1780_v16  ;;  %v2349_v22 = vmul.f32 %v1780_v16, %v1780_v16  ;;  %v1783_v23 = vadd.f32 %v1782_v19, %v1493_v18  ;;  %v1784_v24 = vpop.f32.mrb[59].mxu0 }
 0x19a   : > { %v2412_v25 = vadd.f32 %v2411_v12, %v2349_v22  ;;  %v3024_v26 = vpack.c.bf16 %v1783_v23, %v1780_v16  ;;  %v2277_v27 = vadd.f32 %v2276_v21, %v1783_v23  ;;  %v2350_v28 = vmul.f32 %v1783_v23, %v1783_v23 }
 0x19c   : > { %3124 = vst [vmem:[%s3724_s29 + $0x70] sm:$0xff] %v3024_v26   ;;  %v2413_v29 = vadd.f32 %v2412_v25, %v2350_v28  ;;  %v1498_v30 = vpop.f32.mrb[60].mxu1 }
 0x19d   : > { %v1787_v31 = vpop.f32.mrb[60].mxu0  ;;  %v1500_v32 = vpop.f32.mrb[61].mxu1 }
 0x19e   : > { %v1788_v33 = vadd.f32 %v1787_v31, %v1498_v30  ;;  %v1789_v34 = vpop.f32.mrb[61].mxu0  ;;  %v1501_v35 = vpop.f32.mrb[62].mxu1 }
 0x19f   : > { %v1790_v36 = vpop.f32.mrb[62].mxu0  ;;  %v1503_v37 = vpop.f32.mrb[63].mxu1 }
 0x1a0   : > { %v2278_v38 = vadd.f32 %v2277_v27, %v1788_v33  ;;  %v2351_v39 = vmul.f32 %v1788_v33, %v1788_v33  ;;  %v1791_v40 = vadd.f32 %v1790_v36, %v1501_v35  ;;  %v1792_v41 = vpop.f32.mrb[63].mxu0 }
 0x1a2   : > { %v2414_v42 = vadd.f32 %v2413_v29, %v2351_v39  ;;  %v3029_v43 = vpack.c.bf16 %v1791_v40, %v1788_v33  ;;  %v2279_v44 = vadd.f32 %v2278_v38, %v1791_v40  ;;  %v2352_v45 = vmul.f32 %v1791_v40, %v1791_v40 }
 0x1a4   : > { %3125 = vst [vmem:[%s3724_s29 + $0x78] sm:$0xff] %v3029_v43   ;;  %v2415_v46 = vadd.f32 %v2414_v42, %v2352_v45  ;;  %v1506_v47 = vpop.f32.mrb[64].mxu1 }
 0x1a5   : > { %v1795_v48 = vpop.f32.mrb[64].mxu0  ;;  %v1508_v49 = vpop.f32.mrb[65].mxu1 }
 0x1a6   : > { %v1796_v51 = vadd.f32 %v1795_v48, %v1506_v47  ;;  %v1797_v52 = vpop.f32.mrb[65].mxu0  ;;  %v1509_v53 = vpop.f32.mrb[66].mxu1 }
 0x1a7   : > { %v1798_v54 = vpop.f32.mrb[66].mxu0  ;;  %v1511_v55 = vpop.f32.mrb[67].mxu1 }
 0x1a8   : > { %v2280_v56 = vadd.f32 %v2279_v44, %v1796_v51  ;;  %v2353_v57 = vmul.f32 %v1796_v51, %v1796_v51  ;;  %v1799_v58 = vadd.f32 %v1798_v54, %v1509_v53  ;;  %v1800_v59 = vpop.f32.mrb[67].mxu0 }
 0x1aa   : > { %v2416_v60 = vadd.f32 %v2415_v46, %v2353_v57  ;;  %v3034_v61 = vpack.c.bf16 %v1799_v58, %v1796_v51  ;;  %v2281_v62 = vadd.f32 %v2280_v56, %v1799_v58  ;;  %v2354_v63 = vmul.f32 %v1799_v58, %v1799_v58 }
 0x1ac   : > { %3126 = vst [vmem:[%s3724_s29 + $0x80] sm:$0xff] %v3034_v61   ;;  %v2417_v0 = vadd.f32 %v2416_v60, %v2354_v63  ;;  %v1514_v1 = vpop.f32.mrb[68].mxu1 }
 0x1ad   : > { %v1803_v2 = vpop.f32.mrb[68].mxu0  ;;  %v1516_v3 = vpop.f32.mrb[69].mxu1 }
 0x1ae   : > { %v1804_v4 = vadd.f32 %v1803_v2, %v1514_v1  ;;  %v1805_v5 = vpop.f32.mrb[69].mxu0  ;;  %v1517_v6 = vpop.f32.mrb[70].mxu1 }
 0x1af   : > { %v1806_v7 = vpop.f32.mrb[70].mxu0  ;;  %v1519_v8 = vpop.f32.mrb[71].mxu1 }
 0x1b0   : > { %v2282_v9 = vadd.f32 %v2281_v62, %v1804_v4  ;;  %v2355_v10 = vmul.f32 %v1804_v4, %v1804_v4  ;;  %v1807_v11 = vadd.f32 %v1806_v7, %v1517_v6  ;;  %v1808_v12 = vpop.f32.mrb[71].mxu0 }
 0x1b2   : > { %v2418_v13 = vadd.f32 %v2417_v0, %v2355_v10  ;;  %v3039_v14 = vpack.c.bf16 %v1807_v11, %v1804_v4  ;;  %v2283_v15 = vadd.f32 %v2282_v9, %v1807_v11  ;;  %v2356_v16 = vmul.f32 %v1807_v11, %v1807_v11 }
 0x1b4   : > { %3127 = vst [vmem:[%s3724_s29 + $0x88] sm:$0xff] %v3039_v14   ;;  %v2419_v17 = vadd.f32 %v2418_v13, %v2356_v16  ;;  %v1522_v18 = vpop.f32.mrb[72].mxu1 }
 0x1b5   : > { %v1811_v19 = vpop.f32.mrb[72].mxu0  ;;  %v1524_v20 = vpop.f32.mrb[73].mxu1 }
 0x1b6   : > { %v1812_v21 = vadd.f32 %v1811_v19, %v1522_v18  ;;  %v1813_v22 = vpop.f32.mrb[73].mxu0  ;;  %v1525_v23 = vpop.f32.mrb[74].mxu1 }
 0x1b7   : > { %v1814_v24 = vpop.f32.mrb[74].mxu0  ;;  %v1527_v25 = vpop.f32.mrb[75].mxu1 }
 0x1b8   : > { %v2284_v26 = vadd.f32 %v2283_v15, %v1812_v21  ;;  %v2357_v27 = vmul.f32 %v1812_v21, %v1812_v21  ;;  %v1815_v28 = vadd.f32 %v1814_v24, %v1525_v23  ;;  %v1816_v29 = vpop.f32.mrb[75].mxu0 }
 0x1ba   : > { %v2420_v30 = vadd.f32 %v2419_v17, %v2357_v27  ;;  %v3044_v31 = vpack.c.bf16 %v1815_v28, %v1812_v21  ;;  %v2285_v32 = vadd.f32 %v2284_v26, %v1815_v28  ;;  %v2358_v33 = vmul.f32 %v1815_v28, %v1815_v28 }
 0x1bc   : > { %3128 = vst [vmem:[%s3724_s29 + $0x90] sm:$0xff] %v3044_v31   ;;  %v2421_v34 = vadd.f32 %v2420_v30, %v2358_v33  ;;  %v1530_v35 = vpop.f32.mrb[76].mxu1 }
 0x1bd   : > { %v1819_v36 = vpop.f32.mrb[76].mxu0  ;;  %v1532_v37 = vpop.f32.mrb[77].mxu1 }
 0x1be   : > { %v1820_v38 = vadd.f32 %v1819_v36, %v1530_v35  ;;  %v1821_v39 = vpop.f32.mrb[77].mxu0  ;;  %v1533_v40 = vpop.f32.mrb[78].mxu1 }
 0x1bf   : > { %v1822_v41 = vpop.f32.mrb[78].mxu0  ;;  %v1535_v42 = vpop.f32.mrb[79].mxu1 }
 0x1c0   : > { %v2286_v43 = vadd.f32 %v2285_v32, %v1820_v38  ;;  %v2359_v44 = vmul.f32 %v1820_v38, %v1820_v38  ;;  %v1823_v45 = vadd.f32 %v1822_v41, %v1533_v40  ;;  %v1824_v46 = vpop.f32.mrb[79].mxu0 }
 0x1c2   : > { %v2422_v47 = vadd.f32 %v2421_v34, %v2359_v44  ;;  %v3049_v48 = vpack.c.bf16 %v1823_v45, %v1820_v38  ;;  %v2287_v49 = vadd.f32 %v2286_v43, %v1823_v45  ;;  %v2360_v50 = vmul.f32 %v1823_v45, %v1823_v45 }
 0x1c4   : > { %3129 = vst [vmem:[%s3724_s29 + $0x98] sm:$0xff] %v3049_v48   ;;  %v2423_v51 = vadd.f32 %v2422_v47, %v2360_v50  ;;  %v1538_v52 = vpop.f32.mrb[80].mxu1 }
 0x1c5   : > { %v1827_v53 = vpop.f32.mrb[80].mxu0  ;;  %v1540_v54 = vpop.f32.mrb[81].mxu1 }
 0x1c6   : > { %v1828_v55 = vadd.f32 %v1827_v53, %v1538_v52  ;;  %v1829_v56 = vpop.f32.mrb[81].mxu0  ;;  %v1541_v57 = vpop.f32.mrb[82].mxu1 }
 0x1c7   : > { %v1830_v58 = vpop.f32.mrb[82].mxu0  ;;  %v1543_v59 = vpop.f32.mrb[83].mxu1 }
 0x1c8   : > { %v2288_v60 = vadd.f32 %v2287_v49, %v1828_v55  ;;  %v2361_v61 = vmul.f32 %v1828_v55, %v1828_v55  ;;  %v1831_v62 = vadd.f32 %v1830_v58, %v1541_v57  ;;  %v1832_v63 = vpop.f32.mrb[83].mxu0 }
 0x1ca   : > { %v2424_v0 = vadd.f32 %v2423_v51, %v2361_v61  ;;  %v3054_v1 = vpack.c.bf16 %v1831_v62, %v1828_v55  ;;  %v2289_v2 = vadd.f32 %v2288_v60, %v1831_v62  ;;  %v2362_v3 = vmul.f32 %v1831_v62, %v1831_v62 }
 0x1cc   : > { %3130 = vst [vmem:[%s3724_s29 + $0xa0] sm:$0xff] %v3054_v1   ;;  %v2425_v4 = vadd.f32 %v2424_v0, %v2362_v3  ;;  %v1546_v5 = vpop.f32.mrb[84].mxu1 }
 0x1cd   : > { %v1835_v6 = vpop.f32.mrb[84].mxu0  ;;  %v1548_v7 = vpop.f32.mrb[85].mxu1 }
 0x1ce   : > { %v1836_v8 = vadd.f32 %v1835_v6, %v1546_v5  ;;  %v1837_v9 = vpop.f32.mrb[85].mxu0  ;;  %v1549_v10 = vpop.f32.mrb[86].mxu1 }
 0x1cf   : > { %v1838_v11 = vpop.f32.mrb[86].mxu0  ;;  %v1551_v12 = vpop.f32.mrb[87].mxu1 }
 0x1d0   : > { %v2290_v13 = vadd.f32 %v2289_v2, %v1836_v8  ;;  %v2363_v14 = vmul.f32 %v1836_v8, %v1836_v8  ;;  %v1839_v15 = vadd.f32 %v1838_v11, %v1549_v10  ;;  %v1840_v16 = vpop.f32.mrb[87].mxu0 }
 0x1d2   : > { %v2426_v17 = vadd.f32 %v2425_v4, %v2363_v14  ;;  %v3059_v18 = vpack.c.bf16 %v1839_v15, %v1836_v8  ;;  %v2291_v19 = vadd.f32 %v2290_v13, %v1839_v15  ;;  %v2364_v20 = vmul.f32 %v1839_v15, %v1839_v15 }
 0x1d4   : > { %3131 = vst [vmem:[%s3724_s29 + $0xa8] sm:$0xff] %v3059_v18   ;;  %v2427_v21 = vadd.f32 %v2426_v17, %v2364_v20  ;;  %v1554_v22 = vpop.f32.mrb[88].mxu1 }
 0x1d5   : > { %v1843_v23 = vpop.f32.mrb[88].mxu0  ;;  %v1556_v24 = vpop.f32.mrb[89].mxu1 }
 0x1d6   : > { %v1844_v25 = vadd.f32 %v1843_v23, %v1554_v22  ;;  %v1845_v26 = vpop.f32.mrb[89].mxu0  ;;  %v1557_v27 = vpop.f32.mrb[90].mxu1 }
 0x1d7   : > { %v1846_v28 = vpop.f32.mrb[90].mxu0  ;;  %v1559_v29 = vpop.f32.mrb[91].mxu1 }
 0x1d8   : > { %v2292_v30 = vadd.f32 %v2291_v19, %v1844_v25  ;;  %v2365_v31 = vmul.f32 %v1844_v25, %v1844_v25  ;;  %v1847_v32 = vadd.f32 %v1846_v28, %v1557_v27  ;;  %v1848_v33 = vpop.f32.mrb[91].mxu0 }
 0x1da   : > { %v2428_v34 = vadd.f32 %v2427_v21, %v2365_v31  ;;  %v3064_v35 = vpack.c.bf16 %v1847_v32, %v1844_v25  ;;  %v2293_v36 = vadd.f32 %v2292_v30, %v1847_v32  ;;  %v2366_v37 = vmul.f32 %v1847_v32, %v1847_v32 }
 0x1dc   : > { %3132 = vst [vmem:[%s3724_s29 + $0xb0] sm:$0xff] %v3064_v35   ;;  %v2429_v38 = vadd.f32 %v2428_v34, %v2366_v37  ;;  %v1562_v39 = vpop.f32.mrb[92].mxu1 }
 0x1dd   : > { %v1851_v40 = vpop.f32.mrb[92].mxu0  ;;  %v1564_v41 = vpop.f32.mrb[93].mxu1 }
 0x1de   : > { %v1852_v42 = vadd.f32 %v1851_v40, %v1562_v39  ;;  %v1853_v43 = vpop.f32.mrb[93].mxu0  ;;  %v1565_v44 = vpop.f32.mrb[94].mxu1 }
 0x1df   : > { %v1854_v45 = vpop.f32.mrb[94].mxu0  ;;  %v1567_v46 = vpop.f32.mrb[95].mxu1 }
 0x1e0   : > { %v2294_v47 = vadd.f32 %v2293_v36, %v1852_v42  ;;  %v2367_v48 = vmul.f32 %v1852_v42, %v1852_v42  ;;  %v1855_v49 = vadd.f32 %v1854_v45, %v1565_v44  ;;  %v1856_v50 = vpop.f32.mrb[95].mxu0 }
 0x1e2   : > { %v2430_v51 = vadd.f32 %v2429_v38, %v2367_v48  ;;  %v3069_v52 = vpack.c.bf16 %v1855_v49, %v1852_v42  ;;  %v2295_v53 = vadd.f32 %v2294_v47, %v1855_v49  ;;  %v2368_v54 = vmul.f32 %v1855_v49, %v1855_v49 }
 0x1e4   : > { %3133 = vst [vmem:[%s3724_s29 + $0xb8] sm:$0xff] %v3069_v52   ;;  %v2431_v55 = vadd.f32 %v2430_v51, %v2368_v54  ;;  %v1570_v56 = vpop.f32.mrb[96].mxu1 }
 0x1e5   : > { %v1859_v57 = vpop.f32.mrb[96].mxu0  ;;  %v1572_v58 = vpop.f32.mrb[97].mxu1 }
 0x1e6   : > { %v1860_v59 = vadd.f32 %v1859_v57, %v1570_v56  ;;  %v1861_v60 = vpop.f32.mrb[97].mxu0  ;;  %v1573_v61 = vpop.f32.mrb[98].mxu1 }
 0x1e7   : > { %v1862_v62 = vpop.f32.mrb[98].mxu0  ;;  %v1575_v63 = vpop.f32.mrb[99].mxu1 }
 0x1e8   : > { %v2296_v0 = vadd.f32 %v2295_v53, %v1860_v59  ;;  %v2369_v1 = vmul.f32 %v1860_v59, %v1860_v59  ;;  %v1863_v2 = vadd.f32 %v1862_v62, %v1573_v61  ;;  %v1864_v3 = vpop.f32.mrb[99].mxu0 }
 0x1ea   : > { %v2432_v4 = vadd.f32 %v2431_v55, %v2369_v1  ;;  %v3074_v5 = vpack.c.bf16 %v1863_v2, %v1860_v59  ;;  %v2297_v6 = vadd.f32 %v2296_v0, %v1863_v2  ;;  %v2370_v7 = vmul.f32 %v1863_v2, %v1863_v2 }
 0x1ec   : > { %3134 = vst [vmem:[%s3724_s29 + $0xc0] sm:$0xff] %v3074_v5   ;;  %v2433_v8 = vadd.f32 %v2432_v4, %v2370_v7  ;;  %v1578_v9 = vpop.f32.mrb[100].mxu1 }
 0x1ed   : > { %v1867_v10 = vpop.f32.mrb[100].mxu0  ;;  %v1580_v11 = vpop.f32.mrb[101].mxu1 }
 0x1ee   : > { %v1868_v12 = vadd.f32 %v1867_v10, %v1578_v9  ;;  %v1869_v13 = vpop.f32.mrb[101].mxu0  ;;  %v1581_v14 = vpop.f32.mrb[102].mxu1 }
 0x1ef   : > { %v1870_v15 = vpop.f32.mrb[102].mxu0  ;;  %v1583_v16 = vpop.f32.mrb[103].mxu1 }
 0x1f0   : > { %v2298_v17 = vadd.f32 %v2297_v6, %v1868_v12  ;;  %v2371_v18 = vmul.f32 %v1868_v12, %v1868_v12  ;;  %v1871_v19 = vadd.f32 %v1870_v15, %v1581_v14  ;;  %v1872_v20 = vpop.f32.mrb[103].mxu0 }
 0x1f2   : > { %v2434_v21 = vadd.f32 %v2433_v8, %v2371_v18  ;;  %v3079_v22 = vpack.c.bf16 %v1871_v19, %v1868_v12  ;;  %v2299_v23 = vadd.f32 %v2298_v17, %v1871_v19  ;;  %v2372_v24 = vmul.f32 %v1871_v19, %v1871_v19 }
 0x1f4   : > { %3135 = vst [vmem:[%s3724_s29 + $0xc8] sm:$0xff] %v3079_v22   ;;  %v2435_v25 = vadd.f32 %v2434_v21, %v2372_v24  ;;  %v1586_v26 = vpop.f32.mrb[104].mxu1 }
 0x1f5   : > { %v1875_v27 = vpop.f32.mrb[104].mxu0  ;;  %v1588_v28 = vpop.f32.mrb[105].mxu1 }
 0x1f6   : > { %v1876_v29 = vadd.f32 %v1875_v27, %v1586_v26  ;;  %v1877_v30 = vpop.f32.mrb[105].mxu0  ;;  %v1589_v31 = vpop.f32.mrb[106].mxu1 }
 0x1f7   : > { %v1878_v32 = vpop.f32.mrb[106].mxu0  ;;  %v1591_v33 = vpop.f32.mrb[107].mxu1 }
 0x1f8   : > { %v2300_v34 = vadd.f32 %v2299_v23, %v1876_v29  ;;  %v2373_v35 = vmul.f32 %v1876_v29, %v1876_v29  ;;  %v1879_v36 = vadd.f32 %v1878_v32, %v1589_v31  ;;  %v1880_v37 = vpop.f32.mrb[107].mxu0 }
 0x1fa   : > { %v2436_v38 = vadd.f32 %v2435_v25, %v2373_v35  ;;  %v3084_v39 = vpack.c.bf16 %v1879_v36, %v1876_v29  ;;  %v2301_v40 = vadd.f32 %v2300_v34, %v1879_v36  ;;  %v2374_v41 = vmul.f32 %v1879_v36, %v1879_v36 }
 0x1fc   : > { %3136 = vst [vmem:[%s3724_s29 + $0xd0] sm:$0xff] %v3084_v39   ;;  %v2437_v42 = vadd.f32 %v2436_v38, %v2374_v41  ;;  %v1594_v43 = vpop.f32.mrb[108].mxu1 }
 0x1fd   : > { %v1883_v44 = vpop.f32.mrb[108].mxu0  ;;  %v1596_v45 = vpop.f32.mrb[109].mxu1 }
 0x1fe   : > { %v1884_v46 = vadd.f32 %v1883_v44, %v1594_v43  ;;  %v1885_v47 = vpop.f32.mrb[109].mxu0  ;;  %v1597_v48 = vpop.f32.mrb[110].mxu1 }
 0x1ff   : > { %v1886_v49 = vpop.f32.mrb[110].mxu0  ;;  %v1599_v50 = vpop.f32.mrb[111].mxu1 }
 0x200   : > { %v2302_v51 = vadd.f32 %v2301_v40, %v1884_v46  ;;  %v2375_v52 = vmul.f32 %v1884_v46, %v1884_v46  ;;  %v1887_v53 = vadd.f32 %v1886_v49, %v1597_v48  ;;  %v1888_v54 = vpop.f32.mrb[111].mxu0 }
 0x202   : > { %v2438_v55 = vadd.f32 %v2437_v42, %v2375_v52  ;;  %v3089_v56 = vpack.c.bf16 %v1887_v53, %v1884_v46  ;;  %v2303_v57 = vadd.f32 %v2302_v51, %v1887_v53  ;;  %v2376_v58 = vmul.f32 %v1887_v53, %v1887_v53 }
 0x204   : > { %3137 = vst [vmem:[%s3724_s29 + $0xd8] sm:$0xff] %v3089_v56   ;;  %v2439_v59 = vadd.f32 %v2438_v55, %v2376_v58  ;;  %v1602_v60 = vpop.f32.mrb[112].mxu1 }
 0x205   : > { %v1891_v61 = vpop.f32.mrb[112].mxu0  ;;  %v1604_v62 = vpop.f32.mrb[113].mxu1 }
 0x206   : > { %v1892_v63 = vadd.f32 %v1891_v61, %v1602_v60  ;;  %v1893_v0 = vpop.f32.mrb[113].mxu0  ;;  %v1605_v1 = vpop.f32.mrb[114].mxu1 }
 0x207   : > { %v1894_v2 = vpop.f32.mrb[114].mxu0  ;;  %v1607_v3 = vpop.f32.mrb[115].mxu1 }
 0x208   : > { %v2304_v4 = vadd.f32 %v2303_v57, %v1892_v63  ;;  %v2377_v5 = vmul.f32 %v1892_v63, %v1892_v63  ;;  %v1895_v6 = vadd.f32 %v1894_v2, %v1605_v1  ;;  %v1896_v7 = vpop.f32.mrb[115].mxu0 }
 0x20a   : > { %v2440_v8 = vadd.f32 %v2439_v59, %v2377_v5  ;;  %v3094_v9 = vpack.c.bf16 %v1895_v6, %v1892_v63  ;;  %v2305_v10 = vadd.f32 %v2304_v4, %v1895_v6  ;;  %v2378_v11 = vmul.f32 %v1895_v6, %v1895_v6 }
 0x20c   : > { %3138 = vst [vmem:[%s3724_s29 + $0xe0] sm:$0xff] %v3094_v9   ;;  %v2441_v12 = vadd.f32 %v2440_v8, %v2378_v11  ;;  %v1610_v13 = vpop.f32.mrb[116].mxu1  ;;  %v2248_v9 = vld [vmem:[%s3759_s6] sm:$0x1] }
 0x20d   : > { %v1899_v14 = vpop.f32.mrb[116].mxu0  ;;  %v1612_v15 = vpop.f32.mrb[117].mxu1 }
 0x20e   : > { %v1900_v16 = vadd.f32 %v1899_v14, %v1610_v13  ;;  %v1901_v17 = vpop.f32.mrb[117].mxu0  ;;  %v1613_v18 = vpop.f32.mrb[118].mxu1 }
 0x20f   : > { %v1902_v19 = vpop.f32.mrb[118].mxu0  ;;  %v1615_v20 = vpop.f32.mrb[119].mxu1 }
 0x210   : > { %v2306_v21 = vadd.f32 %v2305_v10, %v1900_v16  ;;  %v2379_v22 = vmul.f32 %v1900_v16, %v1900_v16  ;;  %v1903_v23 = vadd.f32 %v1902_v19, %v1613_v18  ;;  %v1904_v24 = vpop.f32.mrb[119].mxu0 }
 0x212   : > { %v2442_v25 = vadd.f32 %v2441_v12, %v2379_v22  ;;  %v3099_v26 = vpack.c.bf16 %v1903_v23, %v1900_v16  ;;  %v2307_v27 = vadd.f32 %v2306_v21, %v1903_v23  ;;  %v2380_v28 = vmul.f32 %v1903_v23, %v1903_v23  ;;  %v2320_v12 = vld [vmem:[%s3765_s9] sm:$0x1] }
 0x214   : > { %3139 = vst [vmem:[%s3724_s29 + $0xe8] sm:$0xff] %v3099_v26   ;;  %v2443_v29 = vadd.f32 %v2442_v25, %v2380_v28  ;;  %v1618_v30 = vpop.f32.mrb[120].mxu1 }
 0x215   : > { %v1907_v31 = vpop.f32.mrb[120].mxu0  ;;  %v1620_v32 = vpop.f32.mrb[121].mxu1 }
 0x216   : > { %v1908_v33 = vadd.f32 %v1907_v31, %v1618_v30  ;;  %v1909_v34 = vpop.f32.mrb[121].mxu0  ;;  %v1621_v35 = vpop.f32.mrb[122].mxu1 }
 0x217   : > { %v1910_v36 = vpop.f32.mrb[122].mxu0  ;;  %v1623_v37 = vpop.f32.mrb[123].mxu1 }
 0x218   : > { %v2308_v38 = vadd.f32 %v2307_v27, %v1908_v33  ;;  %v2381_v39 = vmul.f32 %v1908_v33, %v1908_v33  ;;  %v1911_v40 = vadd.f32 %v1910_v36, %v1621_v35  ;;  %v1912_v41 = vpop.f32.mrb[123].mxu0 }
 0x21a   : > { %v2444_v42 = vadd.f32 %v2443_v29, %v2381_v39  ;;  %v3104_v43 = vpack.c.bf16 %v1911_v40, %v1908_v33  ;;  %v2309_v44 = vadd.f32 %v2308_v38, %v1911_v40  ;;  %v2382_v45 = vmul.f32 %v1911_v40, %v1911_v40 }
 0x21c   : > { %3140 = vst [vmem:[%s3724_s29 + $0xf0] sm:$0xff] %v3104_v43   ;;  %v2445_v46 = vadd.f32 %v2444_v42, %v2382_v45  ;;  %v1626_v47 = vpop.f32.mrb[124].mxu1 }
 0x21d   : > { %v1915_v48 = vpop.f32.mrb[124].mxu0  ;;  %v1628_v49 = vpop.f32.mrb[125].mxu1 }
 0x21e   : > { %v1916_v50 = vadd.f32 %v1915_v48, %v1626_v47  ;;  %v1917_v51 = vpop.f32.mrb[125].mxu0  ;;  %v1629_v52 = vpop.f32.mrb[126].mxu1 }
 0x21f   : > { %v1918_v53 = vpop.f32.mrb[126].mxu0  ;;  %v1631_v54 = vpop.f32.mrb[127].mxu1 }
 0x220   : > { %v2310_v55 = vadd.f32 %v2309_v44, %v1916_v50  ;;  %v2383_v56 = vmul.f32 %v1916_v50, %v1916_v50  ;;  %v1919_v57 = vadd.f32 %v1918_v53, %v1629_v52  ;;  %v1920_v58 = vpop.f32.mrb[127].mxu0 }
 0x222   : > { %v2446_v59 = vadd.f32 %v2445_v46, %v2383_v56  ;;  %v3109_v60 = vpack.c.bf16 %v1919_v57, %v1916_v50  ;;  %v2311_v61 = vadd.f32 %v2310_v55, %v1919_v57  ;;  %v2384_v62 = vmul.f32 %v1919_v57, %v1919_v57 }
 0x224   : > { %3141 = vst [vmem:[%s3724_s29 + $0xf8] sm:$0xff] %v3109_v60   ;;  %v2312_v63 = vrot.slane %v2311_v61, 4  ;;  %v2447_v0 = vadd.f32 %v2446_v59, %v2384_v62 }
 0x226   : > { %v2313_v1 = vadd.f32 %v2312_v63, %v2311_v61  ;;  %v2448_v2 = vrot.slane %v2447_v0, 4 }
 0x228   : > { %v2314_v3 = vrot.slane %v2313_v1, 2  ;;  %v2449_v4 = vadd.f32 %v2448_v2, %v2447_v0 }
 0x22a   : > { %v2315_v5 = vadd.f32 %v2314_v3, %v2313_v1  ;;  %v2450_v6 = vrot.slane %v2449_v4, 2 }
 0x22c   : > { %v2316_v7 = vrot.slane %v2315_v5, 1  ;;  %v2451_v8 = vadd.f32 %v2450_v6, %v2449_v4 }
 0x22e   : > { %v2317_v10 = vadd.f32 %v2316_v7, %v2315_v5  ;;  %v2452_v11 = vrot.slane %v2451_v8, 1 }
 0x230   : > { %v2318_v13 = vadd.f32 %v2317_v10, %v2248_v9  ;;  %v2453_v14 = vadd.f32 %v2452_v11, %v2451_v8 }
 0x232   : > { %2319 = vst [vmem:[%s3759_s6] sm:$0x1] %v2318_v13  ;;  %v2454_v15 = vadd.f32 %v2453_v14, %v2320_v12 }
 0x234   : > { %2455 = vst [vmem:[%s3765_s9] sm:$0x1] %v2454_v15 }
 0x235 PF: > { %s15_s17 = sadd.s32 1, %s3478_s17   ;;  %s3804_s15 = smov %s3474_s16 }
 0x236   : > { %p12_p5 = scmp.ge.s32.totalorder %s15_s17, 6   ;;  %s3805_s16 = smov %s3807_s18 }
 0x238   :  { %14 = sbr.rel (!%p12_p5) target bundleno = 2 (0x2), region = 89 }

// kernel: generator_forward.9
= control target key start
LH: loop header
LB: loop body
LE: loop exit
PB: predicated region body
PF: predicated region fallthrough
CT: control target
= control target key end

     0   :  { %s4116_s9 = smov 0   ;;  %s4118_s10 = smov 0   ;;  %s4726_s0 = inlined_call_operand.vmem [shape: bf16[4,2048,256], index: 0, kind: input, shape index: {}]   ;;  %s4727_s1 = inlined_call_operand.vmem [shape: bf16[4,256,128], index: 1, kind: input, shape index: {}]   ;;  %s4728_s2 = inlined_call_operand.vmem [shape: f32[4,2048,128], index: 2, kind: output, shape index: {}]  }
   0x1   :  { %s4120_s11 = smov 0  }
   0x2 LB: > { %s31_s12 = sadd.s32 1, %s4094_s10  ;;  %p3335_p0 = scmp.ge.s32.totalorder %s4098_s11, 1  ;;  %s4098_s11 = sphi %s4120_s11, %s12_s11   ;;  %s4094_s10 = sphi %s4118_s10, %s4730_s10   ;;  %s4090_s9 = sphi %s4116_s9, %s4729_s9  }
   0x3   : > { %p33_p1 = scmp.ge.s32.totalorder %s31_s12, 4  ;;  %p158_p2 = scmp.lt.s32.totalorder %s4098_s11, 5 }
   0x5   : > { %s4732_s12 = smov (%p33_p1, %s31_s12), 0  ;;  %p159_p3 = pnand %p3335_p0, %p158_p2 }
   0x6   : > { %p201_p4 = scmp.lt.s32.totalorder (!%p159_p3), %s4090_s9, 3  ;;  %v4100_v0 = vmov (!%p159_p3), 0  }
   0x7   : > { %162 = sbr.rel (%p159_p3) target bundleno = 800 (0x320), region = 28  ;;  %1897 = vmatprep.subr.bf16.mxu0 (!%p159_p3), %v4100_v0  ;;  %3619 = vmatprep.subr.bf16.mxu1 (!%p159_p3), %v4100_v0 }
   0xe   : > { %s4734_s9 = smov (!%p201_p4, %s4090_s9), 3 }
   0xf   : > { %s3617_s13 = sshll.u32 %s4734_s9, 7  ;;  %s3616_s17 = sshll.u32 %s4734_s9, 11 }
  0x10   : > { %s4142_s16 = scalar_lea.vmem %s4727_s1, %s3617_s13  ;;  %s4161_s20 = scalar_lea.vmem %s4726_s0, %s3616_s17 }
  0x11   : > { %v3676_v1 = vld [vmem:[%s4142_s16] sm:$0xff]   ;;  %v3677_v2 = vld [vmem:[%s4142_s16 + $0x8] sm:$0xff]   ;;  %v3678_v3 = vld [vmem:[%s4142_s16 + $0x10] sm:$0xff]   ;;  %s4313_s23 = scalar_lea.vmem %s4728_s2, %s3616_s17 }
  0x12   : > { %1898 = vmatpush1.bf16.msra.mxu0 %v3676_v1  ;;  %3635 = vmatpush1.bf16.msra.mxu1 %v3676_v1  ;;  %v3679_v4 = vld [vmem:[%s4142_s16 + $0x18] sm:$0xff]   ;;  %v3680_v5 = vld [vmem:[%s4142_s16 + $0x20] sm:$0xff]   ;;  %v3681_v7 = vld [vmem:[%s4142_s16 + $0x28] sm:$0xff]  }
  0x13   : > { %1899 = vmatprep.subr.bf16.mxu0 %v4100_v0  ;;  %3620 = vmatprep.subr.bf16.mxu1 %v4100_v0  ;;  %v3694_v6 = vld [vmem:[%s4161_s20 + $0x4] ss:$8 sps:$4 sm:$0xff]   ;;  %v3682_v9 = vld [vmem:[%s4142_s16 + $0x30] sm:$0xff]   ;;  %v3683_v10 = vld [vmem:[%s4142_s16 + $0x38] sm:$0xff]  }
  0x14   : > { %v3697_v8 = vld [vmem:[%s4161_s20 + $0x404] ss:$8 sps:$4 sm:$0xff]   ;;  %1929 = vmatprep.mubr.bf16.mxu0 %v3694_v6  ;;  %v3686_v13 = vld [vmem:[%s4142_s16 + $0x50] sm:$0xff]   ;;  %v3687_v14 = vld [vmem:[%s4142_s16 + $0x58] sm:$0xff]  }
  0x15   : > { %2441 = vmatprep.mubr.bf16.mxu1 %v3697_v8  ;;  %v3684_v11 = vld [vmem:[%s4142_s16 + $0x40] sm:$0xff]   ;;  %v3685_v12 = vld [vmem:[%s4142_s16 + $0x48] sm:$0xff]   ;;  %v3690_v17 = vld [vmem:[%s4142_s16 + $0x70] sm:$0xff]  }
  0x16   : > { %1900 = vmatpush1.bf16.msra.mxu0 %v3677_v2  ;;  %3636 = vmatpush1.bf16.msra.mxu1 %v3677_v2  ;;  %v3688_v15 = vld [vmem:[%s4142_s16 + $0x60] sm:$0xff]   ;;  %v3689_v16 = vld [vmem:[%s4142_s16 + $0x68] sm:$0xff]   ;;  %v3691_v18 = vld [vmem:[%s4142_s16 + $0x78] sm:$0xff]  }
  0x17   : > { %1901 = vmatprep.subr.bf16.mxu0 %v4100_v0  ;;  %3621 = vmatprep.subr.bf16.mxu1 %v4100_v0  ;;  %v3692_v19 = vld [vmem:[%s4161_s20] ss:$8 sps:$4 sm:$0xff]   ;;  %v3698_v21 = vld [vmem:[%s4161_s20 + $0x14] ss:$8 sps:$4 sm:$0xff]   ;;  %v3702_v23 = vld [vmem:[%s4161_s20 + $0x10] ss:$8 sps:$4 sm:$0xff]  }
  0x18   : > { %v3695_v20 = vld [vmem:[%s4161_s20 + $0x400] ss:$8 sps:$4 sm:$0xff]   ;;  %v3700_v22 = vld [vmem:[%s4161_s20 + $0x414] ss:$8 sps:$4 sm:$0xff]   ;;  %v3703_v24 = vld [vmem:[%s4161_s20 + $0x410] ss:$8 sps:$4 sm:$0xff]  }
  0x19   : > { %v3704_v25 = vld [vmem:[%s4161_s20 + $0x24] ss:$8 sps:$4 sm:$0xff]   ;;  %v3708_v27 = vld [vmem:[%s4161_s20 + $0x20] ss:$8 sps:$4 sm:$0xff]   ;;  %v3710_v29 = vld [vmem:[%s4161_s20 + $0x34] ss:$8 sps:$4 sm:$0xff]  }
  0x1a   : > { %1902 = vmatpush1.bf16.msra.mxu0 %v3678_v3  ;;  %3637 = vmatpush1.bf16.msra.mxu1 %v3678_v3  ;;  %v3706_v26 = vld [vmem:[%s4161_s20 + $0x424] ss:$8 sps:$4 sm:$0xff]   ;;  %v3709_v28 = vld [vmem:[%s4161_s20 + $0x420] ss:$8 sps:$4 sm:$0xff]   ;;  %v3712_v30 = vld [vmem:[%s4161_s20 + $0x434] ss:$8 sps:$4 sm:$0xff]  }
  0x1b   : > { %1903 = vmatprep.subr.bf16.mxu0 %v4100_v0  ;;  %3622 = vmatprep.subr.bf16.mxu1 %v4100_v0  ;;  %v3714_v31 = vld [vmem:[%s4161_s20 + $0x30] ss:$8 sps:$4 sm:$0xff]   ;;  %v3716_v33 = vld [vmem:[%s4161_s20 + $0x44] ss:$8 sps:$4 sm:$0xff]   ;;  %v3720_v35 = vld [vmem:[%s4161_s20 + $0x40] ss:$8 sps:$4 sm:$0xff]  }
  0x1c   : > { %v3715_v32 = vld [vmem:[%s4161_s20 + $0x430] ss:$8 sps:$4 sm:$0xff]   ;;  %v3718_v34 = vld [vmem:[%s4161_s20 + $0x444] ss:$8 sps:$4 sm:$0xff]   ;;  %v3721_v36 = vld [vmem:[%s4161_s20 + $0x440] ss:$8 sps:$4 sm:$0xff]  }
  0x1d   : > { %v3722_v37 = vld [vmem:[%s4161_s20 + $0x54] ss:$8 sps:$4 sm:$0xff]   ;;  %v3726_v39 = vld [vmem:[%s4161_s20 + $0x50] ss:$8 sps:$4 sm:$0xff]   ;;  %v3728_v41 = vld [vmem:[%s4161_s20 + $0x64] ss:$8 sps:$4 sm:$0xff]  }
  0x1e   : > { %1904 = vmatpush1.bf16.msra.mxu0 %v3679_v4  ;;  %3638 = vmatpush1.bf16.msra.mxu1 %v3679_v4  ;;  %v3724_v38 = vld [vmem:[%s4161_s20 + $0x454] ss:$8 sps:$4 sm:$0xff]   ;;  %v3727_v40 = vld [vmem:[%s4161_s20 + $0x450] ss:$8 sps:$4 sm:$0xff]   ;;  %v3730_v42 = vld [vmem:[%s4161_s20 + $0x464] ss:$8 sps:$4 sm:$0xff]  }
  0x1f   : > { %1905 = vmatprep.subr.bf16.mxu0 %v4100_v0  ;;  %3623 = vmatprep.subr.bf16.mxu1 %v4100_v0  ;;  %v3732_v43 = vld [vmem:[%s4161_s20 + $0x60] ss:$8 sps:$4 sm:$0xff]   ;;  %v3734_v45 = vld [vmem:[%s4161_s20 + $0x74] ss:$8 sps:$4 sm:$0xff]   ;;  %v3738_v47 = vld [vmem:[%s4161_s20 + $0x70] ss:$8 sps:$4 sm:$0xff]  }
  0x20   : > { %v3733_v44 = vld [vmem:[%s4161_s20 + $0x460] ss:$8 sps:$4 sm:$0xff]   ;;  %v3736_v46 = vld [vmem:[%s4161_s20 + $0x474] ss:$8 sps:$4 sm:$0xff]   ;;  %v3739_v48 = vld [vmem:[%s4161_s20 + $0x470] ss:$8 sps:$4 sm:$0xff]  }
  0x21   : > { %v3740_v49 = vld [vmem:[%s4161_s20 + $0x84] ss:$8 sps:$4 sm:$0xff]   ;;  %v3744_v51 = vld [vmem:[%s4161_s20 + $0x80] ss:$8 sps:$4 sm:$0xff]   ;;  %v3746_v53 = vld [vmem:[%s4161_s20 + $0x94] ss:$8 sps:$4 sm:$0xff]  }
  0x22   : > { %1906 = vmatpush1.bf16.msra.mxu0 %v3680_v5  ;;  %3639 = vmatpush1.bf16.msra.mxu1 %v3680_v5  ;;  %v3742_v50 = vld [vmem:[%s4161_s20 + $0x484] ss:$8 sps:$4 sm:$0xff]   ;;  %v3745_v52 = vld [vmem:[%s4161_s20 + $0x480] ss:$8 sps:$4 sm:$0xff]   ;;  %v3748_v54 = vld [vmem:[%s4161_s20 + $0x494] ss:$8 sps:$4 sm:$0xff]  }
  0x23   : > { %1907 = vmatprep.subr.bf16.mxu0 %v4100_v0  ;;  %3624 = vmatprep.subr.bf16.mxu1 %v4100_v0  ;;  %v3750_v55 = vld [vmem:[%s4161_s20 + $0x90] ss:$8 sps:$4 sm:$0xff]   ;;  %v3752_v57 = vld [vmem:[%s4161_s20 + $0xa4] ss:$8 sps:$4 sm:$0xff]   ;;  %v3756_v59 = vld [vmem:[%s4161_s20 + $0xa0] ss:$8 sps:$4 sm:$0xff]  }
  0x24   : > { %v3751_v56 = vld [vmem:[%s4161_s20 + $0x490] ss:$8 sps:$4 sm:$0xff]   ;;  %v3754_v58 = vld [vmem:[%s4161_s20 + $0x4a4] ss:$8 sps:$4 sm:$0xff]   ;;  %v3757_v60 = vld [vmem:[%s4161_s20 + $0x4a0] ss:$8 sps:$4 sm:$0xff]  }
  0x25   : > { %v3758_v61 = vld [vmem:[%s4161_s20 + $0xb4] ss:$8 sps:$4 sm:$0xff]   ;;  %v3762_v63 = vld [vmem:[%s4161_s20 + $0xb0] ss:$8 sps:$4 sm:$0xff]   ;;  %v3764_v1 = vld [vmem:[%s4161_s20 + $0xc4] ss:$8 sps:$4 sm:$0xff]  }
  0x26   : > { %1908 = vmatpush1.bf16.msra.mxu0 %v3681_v7  ;;  %3640 = vmatpush1.bf16.msra.mxu1 %v3681_v7  ;;  %v3760_v62 = vld [vmem:[%s4161_s20 + $0x4b4] ss:$8 sps:$4 sm:$0xff]   ;;  %v3766_v2 = vld [vmem:[%s4161_s20 + $0x4c4] ss:$8 sps:$4 sm:$0xff]   ;;  %v3768_v3 = vld [vmem:[%s4161_s20 + $0xc0] ss:$8 sps:$4 sm:$0xff]  }
  0x27   : > { %1909 = vmatprep.subr.bf16.mxu0 %v4100_v0  ;;  %3625 = vmatprep.subr.bf16.mxu1 %v4100_v0  ;;  %v3769_v4 = vld [vmem:[%s4161_s20 + $0x4c0] ss:$8 sps:$4 sm:$0xff]   ;;  %v3770_v5 = vld [vmem:[%s4161_s20 + $0xd4] ss:$8 sps:$4 sm:$0xff]   ;;  %v3774_v7 = vld [vmem:[%s4161_s20 + $0xd0] ss:$8 sps:$4 sm:$0xff]  }
  0x28   : > { %v3772_v6 = vld [vmem:[%s4161_s20 + $0x4d4] ss:$8 sps:$4 sm:$0xff]   ;;  %v3775_v8 = vld [vmem:[%s4161_s20 + $0x4d0] ss:$8 sps:$4 sm:$0xff]  }
  0x2a   : > { %1910 = vmatpush1.bf16.msra.mxu0 %v3682_v9  ;;  %3641 = vmatpush1.bf16.msra.mxu1 %v3682_v9  ;;  %v3776_v9 = vld [vmem:[%s4161_s20 + $0xe4] ss:$8 sps:$4 sm:$0xff]  }
  0x2b   : > { %1911 = vmatprep.subr.bf16.mxu0 %v4100_v0  ;;  %3626 = vmatprep.subr.bf16.mxu1 %v4100_v0 }
  0x2e   : > { %1912 = vmatpush1.bf16.msra.mxu0 %v3683_v10  ;;  %3642 = vmatpush1.bf16.msra.mxu1 %v3683_v10  ;;  %v3778_v10 = vld [vmem:[%s4161_s20 + $0x4e4] ss:$8 sps:$4 sm:$0xff]  }
  0x2f   : > { %1913 = vmatprep.subr.bf16.mxu0 %v4100_v0  ;;  %3627 = vmatprep.subr.bf16.mxu1 %v4100_v0 }
  0x32   : > { %1914 = vmatpush1.bf16.msra.mxu0 %v3684_v11  ;;  %3643 = vmatpush1.bf16.msra.mxu1 %v3684_v11  ;;  %v3780_v11 = vld [vmem:[%s4161_s20 + $0xe0] ss:$8 sps:$4 sm:$0xff]  }
  0x33   : > { %1915 = vmatprep.subr.bf16.mxu0 %v4100_v0  ;;  %3628 = vmatprep.subr.bf16.mxu1 %v4100_v0 }
  0x36   : > { %1916 = vmatpush1.bf16.msra.mxu0 %v3685_v12  ;;  %3644 = vmatpush1.bf16.msra.mxu1 %v3685_v12  ;;  %v3781_v12 = vld [vmem:[%s4161_s20 + $0x4e0] ss:$8 sps:$4 sm:$0xff]  }
  0x37   : > { %1917 = vmatprep.subr.bf16.mxu0 %v4100_v0  ;;  %3629 = vmatprep.subr.bf16.mxu1 %v4100_v0 }
  0x3a   : > { %1918 = vmatpush1.bf16.msra.mxu0 %v3686_v13  ;;  %3645 = vmatpush1.bf16.msra.mxu1 %v3686_v13  ;;  %v3782_v13 = vld [vmem:[%s4161_s20 + $0xf4] ss:$8 sps:$4 sm:$0xff]  }
  0x3b   : > { %1919 = vmatprep.subr.bf16.mxu0 %v4100_v0  ;;  %3630 = vmatprep.subr.bf16.mxu1 %v4100_v0 }
  0x3e   : > { %1920 = vmatpush1.bf16.msra.mxu0 %v3687_v14  ;;  %3646 = vmatpush1.bf16.msra.mxu1 %v3687_v14  ;;  %v3784_v14 = vld [vmem:[%s4161_s20 + $0x4f4] ss:$8 sps:$4 sm:$0xff]  }
  0x3f   : > { %1921 = vmatprep.subr.bf16.mxu0 %v4100_v0  ;;  %3631 = vmatprep.subr.bf16.mxu1 %v4100_v0 }
  0x42   : > { %1922 = vmatpush1.bf16.msra.mxu0 %v3688_v15  ;;  %3647 = vmatpush1.bf16.msra.mxu1 %v3688_v15  ;;  %v3786_v15 = vld [vmem:[%s4161_s20 + $0xf0] ss:$8 sps:$4 sm:$0xff]  }
  0x43   : > { %1923 = vmatprep.subr.bf16.mxu0 %v4100_v0  ;;  %3632 = vmatprep.subr.bf16.mxu1 %v4100_v0 }
  0x46   : > { %1924 = vmatpush1.bf16.msra.mxu0 %v3689_v16  ;;  %3648 = vmatpush1.bf16.msra.mxu1 %v3689_v16  ;;  %v3787_v16 = vld [vmem:[%s4161_s20 + $0x4f0] ss:$8 sps:$4 sm:$0xff]  }
  0x47   : > { %1925 = vmatprep.subr.bf16.mxu0 %v4100_v0  ;;  %3633 = vmatprep.subr.bf16.mxu1 %v4100_v0 }
  0x4a   : > { %1926 = vmatpush1.bf16.msra.mxu0 %v3690_v17  ;;  %3649 = vmatpush1.bf16.msra.mxu1 %v3690_v17  ;;  %v3788_v17 = vld [vmem:[%s4161_s20 + $0x104] ss:$8 sps:$4 sm:$0xff]  }
  0x4b   : > { %1927 = vmatprep.subr.bf16.mxu0 %v4100_v0  ;;  %3634 = vmatprep.subr.bf16.mxu1 %v4100_v0  ;;  %v3763_v0 = vld [vmem:[%s4161_s20 + $0x4b0] ss:$8 sps:$4 sm:$0xff]  }
  0x4e   : > { %1928 = vmatpush1.bf16.msra.mxu0 %v3691_v18  ;;  %3650 = vmatpush1.bf16.msra.mxu1 %v3691_v18  ;;  %v3790_v18 = vld [vmem:[%s4161_s20 + $0x504] ss:$8 sps:$4 sm:$0xff]  }
  0x51   : > { %1930 = vmatmul.mubr.bf16.vlgmr.msra.gmra.mrb[0].mxu0 %v3692_v19  ;;  %2442 = vmatmul.mubr.bf16.vlgmr.msra.gmra.mrb[0].mxu1 %v3695_v20  ;;  %v3792_v19 = vld [vmem:[%s4161_s20 + $0x100] ss:$8 sps:$4 sm:$0xff]  }
  0x52   : > { %1937 = vmatprep.mubr.bf16.mxu0 %v3698_v21  ;;  %2449 = vmatprep.mubr.bf16.mxu1 %v3700_v22  ;;  %v3793_v20 = vld [vmem:[%s4161_s20 + $0x500] ss:$8 sps:$4 sm:$0xff]   ;;  %v3794_v21 = vld [vmem:[%s4161_s20 + $0x114] ss:$8 sps:$4 sm:$0xff]  }
  0x53   : > { %v3796_v22 = vld [vmem:[%s4161_s20 + $0x514] ss:$8 sps:$4 sm:$0xff]  }
  0x59   : > { %1938 = vmatmul.mubr.bf16.gmra.mrb[4].mxu0 %v3702_v23  ;;  %2450 = vmatmul.mubr.bf16.gmra.mrb[4].mxu1 %v3703_v24  ;;  %v3798_v23 = vld [vmem:[%s4161_s20 + $0x110] ss:$8 sps:$4 sm:$0xff]  }
  0x5a   : > { %1945 = vmatprep.mubr.bf16.mxu0 %v3704_v25  ;;  %2457 = vmatprep.mubr.bf16.mxu1 %v3706_v26  ;;  %v3799_v24 = vld [vmem:[%s4161_s20 + $0x510] ss:$8 sps:$4 sm:$0xff]   ;;  %v3800_v25 = vld [vmem:[%s4161_s20 + $0x124] ss:$8 sps:$4 sm:$0xff]  }
  0x5b   : > { %v3802_v26 = vld [vmem:[%s4161_s20 + $0x524] ss:$8 sps:$4 sm:$0xff]  }
  0x61   : > { %1946 = vmatmul.mubr.bf16.gmra.mrb[8].mxu0 %v3708_v27  ;;  %2458 = vmatmul.mubr.bf16.gmra.mrb[8].mxu1 %v3709_v28  ;;  %v3804_v27 = vld [vmem:[%s4161_s20 + $0x120] ss:$8 sps:$4 sm:$0xff]  }
  0x62   : > { %1953 = vmatprep.mubr.bf16.mxu0 %v3710_v29  ;;  %2465 = vmatprep.mubr.bf16.mxu1 %v3712_v30  ;;  %v3805_v28 = vld [vmem:[%s4161_s20 + $0x520] ss:$8 sps:$4 sm:$0xff]   ;;  %v3806_v29 = vld [vmem:[%s4161_s20 + $0x134] ss:$8 sps:$4 sm:$0xff]  }
  0x63   : > { %v3808_v30 = vld [vmem:[%s4161_s20 + $0x534] ss:$8 sps:$4 sm:$0xff]  }
  0x69   : > { %1954 = vmatmul.mubr.bf16.gmra.mrb[12].mxu0 %v3714_v31  ;;  %2466 = vmatmul.mubr.bf16.gmra.mrb[12].mxu1 %v3715_v32  ;;  %v3810_v31 = vld [vmem:[%s4161_s20 + $0x130] ss:$8 sps:$4 sm:$0xff]  }
  0x6a   : > { %1961 = vmatprep.mubr.bf16.mxu0 %v3716_v33  ;;  %2473 = vmatprep.mubr.bf16.mxu1 %v3718_v34  ;;  %v3811_v32 = vld [vmem:[%s4161_s20 + $0x530] ss:$8 sps:$4 sm:$0xff]   ;;  %v3812_v33 = vld [vmem:[%s4161_s20 + $0x144] ss:$8 sps:$4 sm:$0xff]  }
  0x6b   : > { %v3814_v34 = vld [vmem:[%s4161_s20 + $0x544] ss:$8 sps:$4 sm:$0xff]  }
  0x71   : > { %1962 = vmatmul.mubr.bf16.gmra.mrb[16].mxu0 %v3720_v35  ;;  %2474 = vmatmul.mubr.bf16.gmra.mrb[16].mxu1 %v3721_v36  ;;  %v3816_v35 = vld [vmem:[%s4161_s20 + $0x140] ss:$8 sps:$4 sm:$0xff]  }
  0x72   : > { %1969 = vmatprep.mubr.bf16.mxu0 %v3722_v37  ;;  %2481 = vmatprep.mubr.bf16.mxu1 %v3724_v38  ;;  %v3817_v36 = vld [vmem:[%s4161_s20 + $0x540] ss:$8 sps:$4 sm:$0xff]   ;;  %v3818_v37 = vld [vmem:[%s4161_s20 + $0x154] ss:$8 sps:$4 sm:$0xff]  }
  0x73   : > { %v3820_v38 = vld [vmem:[%s4161_s20 + $0x554] ss:$8 sps:$4 sm:$0xff]  }
  0x79   : > { %1970 = vmatmul.mubr.bf16.gmra.mrb[20].mxu0 %v3726_v39  ;;  %2482 = vmatmul.mubr.bf16.gmra.mrb[20].mxu1 %v3727_v40  ;;  %v3822_v39 = vld [vmem:[%s4161_s20 + $0x150] ss:$8 sps:$4 sm:$0xff]  }
  0x7a   : > { %1977 = vmatprep.mubr.bf16.mxu0 %v3728_v41  ;;  %2489 = vmatprep.mubr.bf16.mxu1 %v3730_v42  ;;  %v3823_v40 = vld [vmem:[%s4161_s20 + $0x550] ss:$8 sps:$4 sm:$0xff]   ;;  %v3824_v41 = vld [vmem:[%s4161_s20 + $0x164] ss:$8 sps:$4 sm:$0xff]  }
  0x7b   : > { %v3826_v42 = vld [vmem:[%s4161_s20 + $0x564] ss:$8 sps:$4 sm:$0xff]  }
  0x81   : > { %1978 = vmatmul.mubr.bf16.gmra.mrb[24].mxu0 %v3732_v43  ;;  %2490 = vmatmul.mubr.bf16.gmra.mrb[24].mxu1 %v3733_v44  ;;  %v3828_v43 = vld [vmem:[%s4161_s20 + $0x160] ss:$8 sps:$4 sm:$0xff]  }
  0x82   : > { %1985 = vmatprep.mubr.bf16.mxu0 %v3734_v45  ;;  %2497 = vmatprep.mubr.bf16.mxu1 %v3736_v46  ;;  %v3829_v44 = vld [vmem:[%s4161_s20 + $0x560] ss:$8 sps:$4 sm:$0xff]   ;;  %v3830_v45 = vld [vmem:[%s4161_s20 + $0x174] ss:$8 sps:$4 sm:$0xff]  }
  0x83   : > { %v3832_v46 = vld [vmem:[%s4161_s20 + $0x574] ss:$8 sps:$4 sm:$0xff]  }
  0x89   : > { %1986 = vmatmul.mubr.bf16.gmra.mrb[28].mxu0 %v3738_v47  ;;  %2498 = vmatmul.mubr.bf16.gmra.mrb[28].mxu1 %v3739_v48  ;;  %v3834_v47 = vld [vmem:[%s4161_s20 + $0x170] ss:$8 sps:$4 sm:$0xff]  }
  0x8a   : > { %1993 = vmatprep.mubr.bf16.mxu0 %v3740_v49  ;;  %2505 = vmatprep.mubr.bf16.mxu1 %v3742_v50  ;;  %v3835_v48 = vld [vmem:[%s4161_s20 + $0x570] ss:$8 sps:$4 sm:$0xff]   ;;  %v3836_v49 = vld [vmem:[%s4161_s20 + $0x184] ss:$8 sps:$4 sm:$0xff]  }
  0x8b   : > { %v3838_v50 = vld [vmem:[%s4161_s20 + $0x584] ss:$8 sps:$4 sm:$0xff]  }
  0x91   : > { %1994 = vmatmul.mubr.bf16.gmra.mrb[32].mxu0 %v3744_v51  ;;  %2506 = vmatmul.mubr.bf16.gmra.mrb[32].mxu1 %v3745_v52  ;;  %v3840_v51 = vld [vmem:[%s4161_s20 + $0x180] ss:$8 sps:$4 sm:$0xff]  }
  0x92   : > { %2001 = vmatprep.mubr.bf16.mxu0 %v3746_v53  ;;  %2513 = vmatprep.mubr.bf16.mxu1 %v3748_v54  ;;  %v3841_v52 = vld [vmem:[%s4161_s20 + $0x580] ss:$8 sps:$4 sm:$0xff]   ;;  %v3842_v53 = vld [vmem:[%s4161_s20 + $0x194] ss:$8 sps:$4 sm:$0xff]  }
  0x93   : > { %v3844_v54 = vld [vmem:[%s4161_s20 + $0x594] ss:$8 sps:$4 sm:$0xff]  }
  0x99   : > { %2002 = vmatmul.mubr.bf16.gmra.mrb[36].mxu0 %v3750_v55  ;;  %2514 = vmatmul.mubr.bf16.gmra.mrb[36].mxu1 %v3751_v56  ;;  %v3846_v55 = vld [vmem:[%s4161_s20 + $0x190] ss:$8 sps:$4 sm:$0xff]  }
  0x9a   : > { %2009 = vmatprep.mubr.bf16.mxu0 %v3752_v57  ;;  %2521 = vmatprep.mubr.bf16.mxu1 %v3754_v58  ;;  %v3847_v56 = vld [vmem:[%s4161_s20 + $0x590] ss:$8 sps:$4 sm:$0xff]   ;;  %v3848_v57 = vld [vmem:[%s4161_s20 + $0x1a4] ss:$8 sps:$4 sm:$0xff]  }
  0x9b   : > { %v3850_v58 = vld [vmem:[%s4161_s20 + $0x5a4] ss:$8 sps:$4 sm:$0xff]  }
  0xa1   : > { %2010 = vmatmul.mubr.bf16.gmra.mrb[40].mxu0 %v3756_v59  ;;  %2522 = vmatmul.mubr.bf16.gmra.mrb[40].mxu1 %v3757_v60  ;;  %v3852_v59 = vld [vmem:[%s4161_s20 + $0x1a0] ss:$8 sps:$4 sm:$0xff]  }
  0xa2   : > { %2017 = vmatprep.mubr.bf16.mxu0 %v3758_v61  ;;  %2529 = vmatprep.mubr.bf16.mxu1 %v3760_v62  ;;  %v3853_v60 = vld [vmem:[%s4161_s20 + $0x5a0] ss:$8 sps:$4 sm:$0xff]   ;;  %v3854_v61 = vld [vmem:[%s4161_s20 + $0x1b4] ss:$8 sps:$4 sm:$0xff]  }
  0xa3   : > { %v3856_v62 = vld [vmem:[%s4161_s20 + $0x5b4] ss:$8 sps:$4 sm:$0xff]  }
  0xa9   : > { %2018 = vmatmul.mubr.bf16.gmra.mrb[44].mxu0 %v3762_v63  ;;  %2530 = vmatmul.mubr.bf16.gmra.mrb[44].mxu1 %v3763_v0 }
  0xaa   : > { %2025 = vmatprep.mubr.bf16.mxu0 %v3764_v1  ;;  %2537 = vmatprep.mubr.bf16.mxu1 %v3766_v2 }
  0xb1   : > { %2026 = vmatmul.mubr.bf16.gmra.mrb[48].mxu0 %v3768_v3  ;;  %2538 = vmatmul.mubr.bf16.gmra.mrb[48].mxu1 %v3769_v4  ;;  %v3858_v3 = vld [vmem:[%s4161_s20 + $0x1b0] ss:$8 sps:$4 sm:$0xff]  }
  0xb2   : > { %2033 = vmatprep.mubr.bf16.mxu0 %v3770_v5  ;;  %2545 = vmatprep.mubr.bf16.mxu1 %v3772_v6  ;;  %v3859_v4 = vld [vmem:[%s4161_s20 + $0x5b0] ss:$8 sps:$4 sm:$0xff]  }
  0xb9   : > { %2034 = vmatmul.mubr.bf16.gmra.mrb[52].mxu0 %v3774_v7  ;;  %2546 = vmatmul.mubr.bf16.gmra.mrb[52].mxu1 %v3775_v8  ;;  %v3860_v7 = vld [vmem:[%s4161_s20 + $0x1c4] ss:$8 sps:$4 sm:$0xff]  }
  0xba   : > { %2041 = vmatprep.mubr.bf16.mxu0 %v3776_v9  ;;  %2553 = vmatprep.mubr.bf16.mxu1 %v3778_v10  ;;  %v3862_v8 = vld [vmem:[%s4161_s20 + $0x5c4] ss:$8 sps:$4 sm:$0xff]  }
  0xc1   : > { %2042 = vmatmul.mubr.bf16.gmra.mrb[56].mxu0 %v3780_v11  ;;  %2554 = vmatmul.mubr.bf16.gmra.mrb[56].mxu1 %v3781_v12 }
  0xc2   : > { %2049 = vmatprep.mubr.bf16.mxu0 %v3782_v13  ;;  %2561 = vmatprep.mubr.bf16.mxu1 %v3784_v14 }
  0xc9   : > { %2050 = vmatmul.mubr.bf16.gmra.mrb[60].mxu0 %v3786_v15  ;;  %2562 = vmatmul.mubr.bf16.gmra.mrb[60].mxu1 %v3787_v16  ;;  %v3864_v15 = vld [vmem:[%s4161_s20 + $0x1c0] ss:$8 sps:$4 sm:$0xff]  }
  0xca   : > { %2057 = vmatprep.mubr.bf16.mxu0 %v3788_v17  ;;  %2569 = vmatprep.mubr.bf16.mxu1 %v3790_v18  ;;  %v3865_v16 = vld [vmem:[%s4161_s20 + $0x5c0] ss:$8 sps:$4 sm:$0xff]  }
  0xd1   : > { %2058 = vmatmul.mubr.bf16.gmra.mrb[64].mxu0 %v3792_v19  ;;  %2570 = vmatmul.mubr.bf16.gmra.mrb[64].mxu1 %v3793_v20  ;;  %v3866_v19 = vld [vmem:[%s4161_s20 + $0x1d4] ss:$8 sps:$4 sm:$0xff]  }
  0xd2   : > { %2065 = vmatprep.mubr.bf16.mxu0 %v3794_v21  ;;  %2577 = vmatprep.mubr.bf16.mxu1 %v3796_v22  ;;  %v3868_v20 = vld [vmem:[%s4161_s20 + $0x5d4] ss:$8 sps:$4 sm:$0xff]  }
  0xd9   : > { %2066 = vmatmul.mubr.bf16.gmra.mrb[68].mxu0 %v3798_v23  ;;  %2578 = vmatmul.mubr.bf16.gmra.mrb[68].mxu1 %v3799_v24 }
  0xda   : > { %2073 = vmatprep.mubr.bf16.mxu0 %v3800_v25  ;;  %2585 = vmatprep.mubr.bf16.mxu1 %v3802_v26 }
  0xe1   : > { %2074 = vmatmul.mubr.bf16.gmra.mrb[72].mxu0 %v3804_v27  ;;  %2586 = vmatmul.mubr.bf16.gmra.mrb[72].mxu1 %v3805_v28  ;;  %v3870_v27 = vld [vmem:[%s4161_s20 + $0x1d0] ss:$8 sps:$4 sm:$0xff]  }
  0xe2   : > { %2081 = vmatprep.mubr.bf16.mxu0 %v3806_v29  ;;  %2593 = vmatprep.mubr.bf16.mxu1 %v3808_v30  ;;  %v3871_v28 = vld [vmem:[%s4161_s20 + $0x5d0] ss:$8 sps:$4 sm:$0xff]  }
  0xe9   : > { %2082 = vmatmul.mubr.bf16.gmra.mrb[76].mxu0 %v3810_v31  ;;  %2594 = vmatmul.mubr.bf16.gmra.mrb[76].mxu1 %v3811_v32  ;;  %v3872_v31 = vld [vmem:[%s4161_s20 + $0x1e4] ss:$8 sps:$4 sm:$0xff]  }
  0xea   : > { %2089 = vmatprep.mubr.bf16.mxu0 %v3812_v33  ;;  %2601 = vmatprep.mubr.bf16.mxu1 %v3814_v34  ;;  %v3874_v32 = vld [vmem:[%s4161_s20 + $0x5e4] ss:$8 sps:$4 sm:$0xff]  }
  0xf1   : > { %2090 = vmatmul.mubr.bf16.gmra.mrb[80].mxu0 %v3816_v35  ;;  %2602 = vmatmul.mubr.bf16.gmra.mrb[80].mxu1 %v3817_v36 }
  0xf2   : > { %2097 = vmatprep.mubr.bf16.mxu0 %v3818_v37  ;;  %2609 = vmatprep.mubr.bf16.mxu1 %v3820_v38 }
  0xf9   : > { %2098 = vmatmul.mubr.bf16.gmra.mrb[84].mxu0 %v3822_v39  ;;  %2610 = vmatmul.mubr.bf16.gmra.mrb[84].mxu1 %v3823_v40  ;;  %v3876_v39 = vld [vmem:[%s4161_s20 + $0x1e0] ss:$8 sps:$4 sm:$0xff]  }
  0xfa   : > { %2105 = vmatprep.mubr.bf16.mxu0 %v3824_v41  ;;  %2617 = vmatprep.mubr.bf16.mxu1 %v3826_v42  ;;  %v3877_v40 = vld [vmem:[%s4161_s20 + $0x5e0] ss:$8 sps:$4 sm:$0xff]  }
 0x101   : > { %2106 = vmatmul.mubr.bf16.gmra.mrb[88].mxu0 %v3828_v43  ;;  %2618 = vmatmul.mubr.bf16.gmra.mrb[88].mxu1 %v3829_v44  ;;  %v3878_v43 = vld [vmem:[%s4161_s20 + $0x1f4] ss:$8 sps:$4 sm:$0xff]  }
 0x102   : > { %2113 = vmatprep.mubr.bf16.mxu0 %v3830_v45  ;;  %2625 = vmatprep.mubr.bf16.mxu1 %v3832_v46  ;;  %v3880_v44 = vld [vmem:[%s4161_s20 + $0x5f4] ss:$8 sps:$4 sm:$0xff]  }
 0x109   : > { %2114 = vmatmul.mubr.bf16.gmra.mrb[92].mxu0 %v3834_v47  ;;  %2626 = vmatmul.mubr.bf16.gmra.mrb[92].mxu1 %v3835_v48 }
 0x10a   : > { %2121 = vmatprep.mubr.bf16.mxu0 %v3836_v49  ;;  %2633 = vmatprep.mubr.bf16.mxu1 %v3838_v50 }
 0x111   : > { %2122 = vmatmul.mubr.bf16.gmra.mrb[96].mxu0 %v3840_v51  ;;  %2634 = vmatmul.mubr.bf16.gmra.mrb[96].mxu1 %v3841_v52  ;;  %v3882_v51 = vld [vmem:[%s4161_s20 + $0x1f0] ss:$8 sps:$4 sm:$0xff]  }
 0x112   : > { %2129 = vmatprep.mubr.bf16.mxu0 %v3842_v53  ;;  %2641 = vmatprep.mubr.bf16.mxu1 %v3844_v54  ;;  %v3883_v52 = vld [vmem:[%s4161_s20 + $0x5f0] ss:$8 sps:$4 sm:$0xff]  }
 0x119   : > { %2130 = vmatmul.mubr.bf16.gmra.mrb[100].mxu0 %v3846_v55  ;;  %2642 = vmatmul.mubr.bf16.gmra.mrb[100].mxu1 %v3847_v56  ;;  %v3884_v55 = vld [vmem:[%s4161_s20 + $0x204] ss:$8 sps:$4 sm:$0xff]  }
 0x11a   : > { %2137 = vmatprep.mubr.bf16.mxu0 %v3848_v57  ;;  %2649 = vmatprep.mubr.bf16.mxu1 %v3850_v58  ;;  %v3886_v56 = vld [vmem:[%s4161_s20 + $0x604] ss:$8 sps:$4 sm:$0xff]  }
 0x121   : > { %2138 = vmatmul.mubr.bf16.gmra.mrb[104].mxu0 %v3852_v59  ;;  %2650 = vmatmul.mubr.bf16.gmra.mrb[104].mxu1 %v3853_v60 }
 0x122   : > { %2145 = vmatprep.mubr.bf16.mxu0 %v3854_v61  ;;  %2657 = vmatprep.mubr.bf16.mxu1 %v3856_v62 }
 0x124   : > { %v1931_v63 = vpop.f32.mrb[0].mxu0  ;;  %v2443_v0 = vpop.f32.mrb[0].mxu1 }
 0x125   : > { %2954 = vst [vmem:[%s4313_s23] sm:$0xff] %v1931_v63  ;;  %3082 = vst [vmem:[%s4313_s23 + $0x400] sm:$0xff] %v2443_v0  ;;  %v1933_v1 = vpop.f32.mrb[1].mxu0  ;;  %v2445_v2 = vpop.f32.mrb[1].mxu1  ;;  %v3888_v63 = vld [vmem:[%s4161_s20 + $0x200] ss:$8 sps:$4 sm:$0xff]  }
 0x126   : > { %v1934_v5 = vpop.f32.mrb[2].mxu0  ;;  %v2446_v6 = vpop.f32.mrb[2].mxu1  ;;  %v3889_v0 = vld [vmem:[%s4161_s20 + $0x600] ss:$8 sps:$4 sm:$0xff]  }
 0x127   : > { %2955 = vst [vmem:[%s4313_s23 + $0x8] sm:$0xff] %v1934_v5  ;;  %3083 = vst [vmem:[%s4313_s23 + $0x408] sm:$0xff] %v2446_v6  ;;  %v1936_v9 = vpop.f32.mrb[3].mxu0  ;;  %v2448_v10 = vpop.f32.mrb[3].mxu1 }
 0x129   : > { %2146 = vmatmul.mubr.bf16.gmra.mrb[108].mxu0 %v3858_v3  ;;  %2658 = vmatmul.mubr.bf16.gmra.mrb[108].mxu1 %v3859_v4  ;;  %v3890_v3 = vld [vmem:[%s4161_s20 + $0x214] ss:$8 sps:$4 sm:$0xff]  }
 0x12a   : > { %2153 = vmatprep.mubr.bf16.mxu0 %v3860_v7  ;;  %2665 = vmatprep.mubr.bf16.mxu1 %v3862_v8  ;;  %v3892_v4 = vld [vmem:[%s4161_s20 + $0x614] ss:$8 sps:$4 sm:$0xff]  }
 0x12c   : > { %v1939_v11 = vpop.f32.mrb[4].mxu0  ;;  %v2451_v12 = vpop.f32.mrb[4].mxu1 }
 0x12d   : > { %2956 = vst [vmem:[%s4313_s23 + $0x10] sm:$0xff] %v1939_v11  ;;  %3084 = vst [vmem:[%s4313_s23 + $0x410] sm:$0xff] %v2451_v12  ;;  %v1941_v13 = vpop.f32.mrb[5].mxu0  ;;  %v2453_v14 = vpop.f32.mrb[5].mxu1  ;;  %v3894_v11 = vld [vmem:[%s4161_s20 + $0x210] ss:$8 sps:$4 sm:$0xff]  }
 0x12e   : > { %v1942_v17 = vpop.f32.mrb[6].mxu0  ;;  %v2454_v18 = vpop.f32.mrb[6].mxu1  ;;  %v3895_v12 = vld [vmem:[%s4161_s20 + $0x610] ss:$8 sps:$4 sm:$0xff]  }
 0x12f   : > { %2957 = vst [vmem:[%s4313_s23 + $0x18] sm:$0xff] %v1942_v17  ;;  %3085 = vst [vmem:[%s4313_s23 + $0x418] sm:$0xff] %v2454_v18  ;;  %v1944_v21 = vpop.f32.mrb[7].mxu0  ;;  %v2456_v22 = vpop.f32.mrb[7].mxu1 }
 0x131   : > { %2154 = vmatmul.mubr.bf16.gmra.mrb[112].mxu0 %v3864_v15  ;;  %2666 = vmatmul.mubr.bf16.gmra.mrb[112].mxu1 %v3865_v16  ;;  %v3896_v15 = vld [vmem:[%s4161_s20 + $0x224] ss:$8 sps:$4 sm:$0xff]  }
 0x132   : > { %2161 = vmatprep.mubr.bf16.mxu0 %v3866_v19  ;;  %2673 = vmatprep.mubr.bf16.mxu1 %v3868_v20  ;;  %v3898_v16 = vld [vmem:[%s4161_s20 + $0x624] ss:$8 sps:$4 sm:$0xff]  }
 0x134   : > { %v1947_v23 = vpop.f32.mrb[8].mxu0  ;;  %v2459_v24 = vpop.f32.mrb[8].mxu1 }
 0x135   : > { %2958 = vst [vmem:[%s4313_s23 + $0x20] sm:$0xff] %v1947_v23  ;;  %3086 = vst [vmem:[%s4313_s23 + $0x420] sm:$0xff] %v2459_v24  ;;  %v1949_v25 = vpop.f32.mrb[9].mxu0  ;;  %v2461_v26 = vpop.f32.mrb[9].mxu1  ;;  %v3900_v23 = vld [vmem:[%s4161_s20 + $0x220] ss:$8 sps:$4 sm:$0xff]  }
 0x136   : > { %v1950_v29 = vpop.f32.mrb[10].mxu0  ;;  %v2462_v30 = vpop.f32.mrb[10].mxu1  ;;  %v3901_v24 = vld [vmem:[%s4161_s20 + $0x620] ss:$8 sps:$4 sm:$0xff]  }
 0x137   : > { %2959 = vst [vmem:[%s4313_s23 + $0x28] sm:$0xff] %v1950_v29  ;;  %3087 = vst [vmem:[%s4313_s23 + $0x428] sm:$0xff] %v2462_v30  ;;  %v1952_v33 = vpop.f32.mrb[11].mxu0  ;;  %v2464_v34 = vpop.f32.mrb[11].mxu1 }
 0x139   : > { %2162 = vmatmul.mubr.bf16.gmra.mrb[116].mxu0 %v3870_v27  ;;  %2674 = vmatmul.mubr.bf16.gmra.mrb[116].mxu1 %v3871_v28  ;;  %v3902_v27 = vld [vmem:[%s4161_s20 + $0x234] ss:$8 sps:$4 sm:$0xff]  }
 0x13a   : > { %2169 = vmatprep.mubr.bf16.mxu0 %v3872_v31  ;;  %2681 = vmatprep.mubr.bf16.mxu1 %v3874_v32  ;;  %v3904_v28 = vld [vmem:[%s4161_s20 + $0x634] ss:$8 sps:$4 sm:$0xff]  }
 0x13c   : > { %v1955_v35 = vpop.f32.mrb[12].mxu0  ;;  %v2467_v36 = vpop.f32.mrb[12].mxu1 }
 0x13d   : > { %2960 = vst [vmem:[%s4313_s23 + $0x30] sm:$0xff] %v1955_v35  ;;  %3088 = vst [vmem:[%s4313_s23 + $0x430] sm:$0xff] %v2467_v36  ;;  %v1957_v37 = vpop.f32.mrb[13].mxu0  ;;  %v2469_v38 = vpop.f32.mrb[13].mxu1  ;;  %v3906_v35 = vld [vmem:[%s4161_s20 + $0x230] ss:$8 sps:$4 sm:$0xff]  }
 0x13e   : > { %v1958_v41 = vpop.f32.mrb[14].mxu0  ;;  %v2470_v42 = vpop.f32.mrb[14].mxu1  ;;  %v3907_v36 = vld [vmem:[%s4161_s20 + $0x630] ss:$8 sps:$4 sm:$0xff]  }
 0x13f   : > { %2961 = vst [vmem:[%s4313_s23 + $0x38] sm:$0xff] %v1958_v41  ;;  %3089 = vst [vmem:[%s4313_s23 + $0x438] sm:$0xff] %v2470_v42  ;;  %v1960_v45 = vpop.f32.mrb[15].mxu0  ;;  %v2472_v46 = vpop.f32.mrb[15].mxu1 }
 0x141   : > { %2170 = vmatmul.mubr.bf16.gmra.mrb[120].mxu0 %v3876_v39  ;;  %2682 = vmatmul.mubr.bf16.gmra.mrb[120].mxu1 %v3877_v40  ;;  %v3908_v39 = vld [vmem:[%s4161_s20 + $0x244] ss:$8 sps:$4 sm:$0xff]  }
 0x142   : > { %2177 = vmatprep.mubr.bf16.mxu0 %v3878_v43  ;;  %2689 = vmatprep.mubr.bf16.mxu1 %v3880_v44  ;;  %v3910_v40 = vld [vmem:[%s4161_s20 + $0x644] ss:$8 sps:$4 sm:$0xff]  }
 0x144   : > { %v1963_v47 = vpop.f32.mrb[16].mxu0  ;;  %v2475_v48 = vpop.f32.mrb[16].mxu1 }
 0x145   : > { %2962 = vst [vmem:[%s4313_s23 + $0x40] sm:$0xff] %v1963_v47  ;;  %3090 = vst [vmem:[%s4313_s23 + $0x440] sm:$0xff] %v2475_v48  ;;  %v1965_v49 = vpop.f32.mrb[17].mxu0  ;;  %v2477_v50 = vpop.f32.mrb[17].mxu1  ;;  %v3912_v47 = vld [vmem:[%s4161_s20 + $0x240] ss:$8 sps:$4 sm:$0xff]  }
 0x146   : > { %v1966_v53 = vpop.f32.mrb[18].mxu0  ;;  %v2478_v54 = vpop.f32.mrb[18].mxu1  ;;  %v3913_v48 = vld [vmem:[%s4161_s20 + $0x640] ss:$8 sps:$4 sm:$0xff]  }
 0x147   : > { %2963 = vst [vmem:[%s4313_s23 + $0x48] sm:$0xff] %v1966_v53  ;;  %3091 = vst [vmem:[%s4313_s23 + $0x448] sm:$0xff] %v2478_v54  ;;  %v1968_v57 = vpop.f32.mrb[19].mxu0  ;;  %v2480_v58 = vpop.f32.mrb[19].mxu1 }
 0x149   : > { %2178 = vmatmul.mubr.bf16.gmra.mrb[124].mxu0 %v3882_v51  ;;  %2690 = vmatmul.mubr.bf16.gmra.mrb[124].mxu1 %v3883_v52  ;;  %v3914_v51 = vld [vmem:[%s4161_s20 + $0x254] ss:$8 sps:$4 sm:$0xff]  }
 0x14a   : > { %2185 = vmatprep.mubr.bf16.mxu0 %v3884_v55  ;;  %2697 = vmatprep.mubr.bf16.mxu1 %v3886_v56  ;;  %v3916_v52 = vld [vmem:[%s4161_s20 + $0x654] ss:$8 sps:$4 sm:$0xff]  }
 0x14c   : > { %v1971_v59 = vpop.f32.mrb[20].mxu0  ;;  %v2483_v60 = vpop.f32.mrb[20].mxu1 }
 0x14d   : > { %2964 = vst [vmem:[%s4313_s23 + $0x50] sm:$0xff] %v1971_v59  ;;  %3092 = vst [vmem:[%s4313_s23 + $0x450] sm:$0xff] %v2483_v60  ;;  %v1973_v61 = vpop.f32.mrb[21].mxu0  ;;  %v2485_v62 = vpop.f32.mrb[21].mxu1  ;;  %v3918_v59 = vld [vmem:[%s4161_s20 + $0x250] ss:$8 sps:$4 sm:$0xff]  }
 0x14e   : > { %v1974_v1 = vpop.f32.mrb[22].mxu0  ;;  %v2486_v2 = vpop.f32.mrb[22].mxu1  ;;  %v3919_v60 = vld [vmem:[%s4161_s20 + $0x650] ss:$8 sps:$4 sm:$0xff]  }
 0x14f   : > { %2965 = vst [vmem:[%s4313_s23 + $0x58] sm:$0xff] %v1974_v1  ;;  %3093 = vst [vmem:[%s4313_s23 + $0x458] sm:$0xff] %v2486_v2  ;;  %v1976_v5 = vpop.f32.mrb[23].mxu0  ;;  %v2488_v6 = vpop.f32.mrb[23].mxu1 }
 0x151   : > { %2186 = vmatmul.mubr.bf16.gmra.mrb[128].mxu0 %v3888_v63  ;;  %2698 = vmatmul.mubr.bf16.gmra.mrb[128].mxu1 %v3889_v0  ;;  %v3920_v63 = vld [vmem:[%s4161_s20 + $0x264] ss:$8 sps:$4 sm:$0xff]  }
 0x152   : > { %2193 = vmatprep.mubr.bf16.mxu0 %v3890_v3  ;;  %2705 = vmatprep.mubr.bf16.mxu1 %v3892_v4  ;;  %v3922_v0 = vld [vmem:[%s4161_s20 + $0x664] ss:$8 sps:$4 sm:$0xff]  }
 0x154   : > { %v1979_v7 = vpop.f32.mrb[24].mxu0  ;;  %v2491_v8 = vpop.f32.mrb[24].mxu1 }
 0x155   : > { %2966 = vst [vmem:[%s4313_s23 + $0x60] sm:$0xff] %v1979_v7  ;;  %3094 = vst [vmem:[%s4313_s23 + $0x460] sm:$0xff] %v2491_v8  ;;  %v1981_v9 = vpop.f32.mrb[25].mxu0  ;;  %v2493_v10 = vpop.f32.mrb[25].mxu1  ;;  %v3924_v7 = vld [vmem:[%s4161_s20 + $0x260] ss:$8 sps:$4 sm:$0xff]  }
 0x156   : > { %v1982_v13 = vpop.f32.mrb[26].mxu0  ;;  %v2494_v14 = vpop.f32.mrb[26].mxu1  ;;  %v3925_v8 = vld [vmem:[%s4161_s20 + $0x660] ss:$8 sps:$4 sm:$0xff]  }
 0x157   : > { %2967 = vst [vmem:[%s4313_s23 + $0x68] sm:$0xff] %v1982_v13  ;;  %3095 = vst [vmem:[%s4313_s23 + $0x468] sm:$0xff] %v2494_v14  ;;  %v1984_v17 = vpop.f32.mrb[27].mxu0  ;;  %v2496_v18 = vpop.f32.mrb[27].mxu1 }
 0x159   : > { %2194 = vmatmul.mubr.bf16.gmra.mrb[132].mxu0 %v3894_v11  ;;  %2706 = vmatmul.mubr.bf16.gmra.mrb[132].mxu1 %v3895_v12  ;;  %v3926_v11 = vld [vmem:[%s4161_s20 + $0x274] ss:$8 sps:$4 sm:$0xff]  }
 0x15a   : > { %2201 = vmatprep.mubr.bf16.mxu0 %v3896_v15  ;;  %2713 = vmatprep.mubr.bf16.mxu1 %v3898_v16  ;;  %v3928_v12 = vld [vmem:[%s4161_s20 + $0x674] ss:$8 sps:$4 sm:$0xff]  }
 0x15c   : > { %v1987_v19 = vpop.f32.mrb[28].mxu0  ;;  %v2499_v20 = vpop.f32.mrb[28].mxu1 }
 0x15d   : > { %2968 = vst [vmem:[%s4313_s23 + $0x70] sm:$0xff] %v1987_v19  ;;  %3096 = vst [vmem:[%s4313_s23 + $0x470] sm:$0xff] %v2499_v20  ;;  %v1989_v21 = vpop.f32.mrb[29].mxu0  ;;  %v2501_v22 = vpop.f32.mrb[29].mxu1  ;;  %v3930_v19 = vld [vmem:[%s4161_s20 + $0x270] ss:$8 sps:$4 sm:$0xff]  }
 0x15e   : > { %v1990_v25 = vpop.f32.mrb[30].mxu0  ;;  %v2502_v26 = vpop.f32.mrb[30].mxu1  ;;  %v3931_v20 = vld [vmem:[%s4161_s20 + $0x670] ss:$8 sps:$4 sm:$0xff]  }
 0x15f   : > { %2969 = vst [vmem:[%s4313_s23 + $0x78] sm:$0xff] %v1990_v25  ;;  %3097 = vst [vmem:[%s4313_s23 + $0x478] sm:$0xff] %v2502_v26  ;;  %v1992_v29 = vpop.f32.mrb[31].mxu0  ;;  %v2504_v30 = vpop.f32.mrb[31].mxu1 }
 0x161   : > { %2202 = vmatmul.mubr.bf16.gmra.mrb[136].mxu0 %v3900_v23  ;;  %2714 = vmatmul.mubr.bf16.gmra.mrb[136].mxu1 %v3901_v24  ;;  %v3932_v23 = vld [vmem:[%s4161_s20 + $0x284] ss:$8 sps:$4 sm:$0xff]  }
 0x162   : > { %2209 = vmatprep.mubr.bf16.mxu0 %v3902_v27  ;;  %2721 = vmatprep.mubr.bf16.mxu1 %v3904_v28  ;;  %v3934_v24 = vld [vmem:[%s4161_s20 + $0x684] ss:$8 sps:$4 sm:$0xff]  }
 0x164   : > { %v1995_v31 = vpop.f32.mrb[32].mxu0  ;;  %v2507_v32 = vpop.f32.mrb[32].mxu1 }
 0x165   : > { %2970 = vst [vmem:[%s4313_s23 + $0x80] sm:$0xff] %v1995_v31  ;;  %3098 = vst [vmem:[%s4313_s23 + $0x480] sm:$0xff] %v2507_v32  ;;  %v1997_v33 = vpop.f32.mrb[33].mxu0  ;;  %v2509_v34 = vpop.f32.mrb[33].mxu1  ;;  %v3936_v31 = vld [vmem:[%s4161_s20 + $0x280] ss:$8 sps:$4 sm:$0xff]  }
 0x166   : > { %v1998_v37 = vpop.f32.mrb[34].mxu0  ;;  %v2510_v38 = vpop.f32.mrb[34].mxu1  ;;  %v3937_v32 = vld [vmem:[%s4161_s20 + $0x680] ss:$8 sps:$4 sm:$0xff]  }
 0x167   : > { %2971 = vst [vmem:[%s4313_s23 + $0x88] sm:$0xff] %v1998_v37  ;;  %3099 = vst [vmem:[%s4313_s23 + $0x488] sm:$0xff] %v2510_v38  ;;  %v2000_v41 = vpop.f32.mrb[35].mxu0  ;;  %v2512_v42 = vpop.f32.mrb[35].mxu1 }
 0x169   : > { %2210 = vmatmul.mubr.bf16.gmra.mrb[140].mxu0 %v3906_v35  ;;  %2722 = vmatmul.mubr.bf16.gmra.mrb[140].mxu1 %v3907_v36  ;;  %v3938_v35 = vld [vmem:[%s4161_s20 + $0x294] ss:$8 sps:$4 sm:$0xff]  }
 0x16a   : > { %2217 = vmatprep.mubr.bf16.mxu0 %v3908_v39  ;;  %2729 = vmatprep.mubr.bf16.mxu1 %v3910_v40  ;;  %v3940_v36 = vld [vmem:[%s4161_s20 + $0x694] ss:$8 sps:$4 sm:$0xff]  }
 0x16c   : > { %v2003_v43 = vpop.f32.mrb[36].mxu0  ;;  %v2515_v44 = vpop.f32.mrb[36].mxu1 }
 0x16d   : > { %2972 = vst [vmem:[%s4313_s23 + $0x90] sm:$0xff] %v2003_v43  ;;  %3100 = vst [vmem:[%s4313_s23 + $0x490] sm:$0xff] %v2515_v44  ;;  %v2005_v45 = vpop.f32.mrb[37].mxu0  ;;  %v2517_v46 = vpop.f32.mrb[37].mxu1  ;;  %v3942_v43 = vld [vmem:[%s4161_s20 + $0x290] ss:$8 sps:$4 sm:$0xff]  }
 0x16e   : > { %v2006_v49 = vpop.f32.mrb[38].mxu0  ;;  %v2518_v50 = vpop.f32.mrb[38].mxu1  ;;  %v3943_v44 = vld [vmem:[%s4161_s20 + $0x690] ss:$8 sps:$4 sm:$0xff]  }
 0x16f   : > { %2973 = vst [vmem:[%s4313_s23 + $0x98] sm:$0xff] %v2006_v49  ;;  %3101 = vst [vmem:[%s4313_s23 + $0x498] sm:$0xff] %v2518_v50  ;;  %v2008_v53 = vpop.f32.mrb[39].mxu0  ;;  %v2520_v54 = vpop.f32.mrb[39].mxu1 }
 0x171   : > { %2218 = vmatmul.mubr.bf16.gmra.mrb[144].mxu0 %v3912_v47  ;;  %2730 = vmatmul.mubr.bf16.gmra.mrb[144].mxu1 %v3913_v48  ;;  %v3944_v47 = vld [vmem:[%s4161_s20 + $0x2a4] ss:$8 sps:$4 sm:$0xff]  }
 0x172   : > { %2225 = vmatprep.mubr.bf16.mxu0 %v3914_v51  ;;  %2737 = vmatprep.mubr.bf16.mxu1 %v3916_v52  ;;  %v3946_v48 = vld [vmem:[%s4161_s20 + $0x6a4] ss:$8 sps:$4 sm:$0xff]  }
 0x174   : > { %v2011_v55 = vpop.f32.mrb[40].mxu0  ;;  %v2523_v56 = vpop.f32.mrb[40].mxu1 }
 0x175   : > { %2974 = vst [vmem:[%s4313_s23 + $0xa0] sm:$0xff] %v2011_v55  ;;  %3102 = vst [vmem:[%s4313_s23 + $0x4a0] sm:$0xff] %v2523_v56  ;;  %v2013_v57 = vpop.f32.mrb[41].mxu0  ;;  %v2525_v58 = vpop.f32.mrb[41].mxu1  ;;  %v3948_v55 = vld [vmem:[%s4161_s20 + $0x2a0] ss:$8 sps:$4 sm:$0xff]  }
 0x176   : > { %v2014_v61 = vpop.f32.mrb[42].mxu0  ;;  %v2526_v62 = vpop.f32.mrb[42].mxu1  ;;  %v3949_v56 = vld [vmem:[%s4161_s20 + $0x6a0] ss:$8 sps:$4 sm:$0xff]  }
 0x177   : > { %2975 = vst [vmem:[%s4313_s23 + $0xa8] sm:$0xff] %v2014_v61  ;;  %3103 = vst [vmem:[%s4313_s23 + $0x4a8] sm:$0xff] %v2526_v62  ;;  %v2016_v1 = vpop.f32.mrb[43].mxu0  ;;  %v2528_v2 = vpop.f32.mrb[43].mxu1 }
 0x179   : > { %2226 = vmatmul.mubr.bf16.gmra.mrb[148].mxu0 %v3918_v59  ;;  %2738 = vmatmul.mubr.bf16.gmra.mrb[148].mxu1 %v3919_v60  ;;  %v3950_v59 = vld [vmem:[%s4161_s20 + $0x2b4] ss:$8 sps:$4 sm:$0xff]  }
 0x17a   : > { %2233 = vmatprep.mubr.bf16.mxu0 %v3920_v63  ;;  %2745 = vmatprep.mubr.bf16.mxu1 %v3922_v0  ;;  %v3952_v60 = vld [vmem:[%s4161_s20 + $0x6b4] ss:$8 sps:$4 sm:$0xff]  }
 0x17c   : > { %v2019_v3 = vpop.f32.mrb[44].mxu0  ;;  %v2531_v4 = vpop.f32.mrb[44].mxu1 }
 0x17d   : > { %2976 = vst [vmem:[%s4313_s23 + $0xb0] sm:$0xff] %v2019_v3  ;;  %3104 = vst [vmem:[%s4313_s23 + $0x4b0] sm:$0xff] %v2531_v4  ;;  %v2021_v5 = vpop.f32.mrb[45].mxu0  ;;  %v2533_v6 = vpop.f32.mrb[45].mxu1  ;;  %v3954_v3 = vld [vmem:[%s4161_s20 + $0x2b0] ss:$8 sps:$4 sm:$0xff]  }
 0x17e   : > { %v2022_v9 = vpop.f32.mrb[46].mxu0  ;;  %v2534_v10 = vpop.f32.mrb[46].mxu1  ;;  %v3955_v4 = vld [vmem:[%s4161_s20 + $0x6b0] ss:$8 sps:$4 sm:$0xff]  }
 0x17f   : > { %2977 = vst [vmem:[%s4313_s23 + $0xb8] sm:$0xff] %v2022_v9  ;;  %3105 = vst [vmem:[%s4313_s23 + $0x4b8] sm:$0xff] %v2534_v10  ;;  %v2024_v13 = vpop.f32.mrb[47].mxu0  ;;  %v2536_v14 = vpop.f32.mrb[47].mxu1 }
 0x181   : > { %2234 = vmatmul.mubr.bf16.gmra.mrb[152].mxu0 %v3924_v7  ;;  %2746 = vmatmul.mubr.bf16.gmra.mrb[152].mxu1 %v3925_v8  ;;  %v3956_v7 = vld [vmem:[%s4161_s20 + $0x2c4] ss:$8 sps:$4 sm:$0xff]  }
 0x182   : > { %2241 = vmatprep.mubr.bf16.mxu0 %v3926_v11  ;;  %2753 = vmatprep.mubr.bf16.mxu1 %v3928_v12  ;;  %v3958_v8 = vld [vmem:[%s4161_s20 + $0x6c4] ss:$8 sps:$4 sm:$0xff]  }
 0x184   : > { %v2027_v15 = vpop.f32.mrb[48].mxu0  ;;  %v2539_v16 = vpop.f32.mrb[48].mxu1 }
 0x185   : > { %2978 = vst [vmem:[%s4313_s23 + $0xc0] sm:$0xff] %v2027_v15  ;;  %3106 = vst [vmem:[%s4313_s23 + $0x4c0] sm:$0xff] %v2539_v16  ;;  %v2029_v17 = vpop.f32.mrb[49].mxu0  ;;  %v2541_v18 = vpop.f32.mrb[49].mxu1  ;;  %v3960_v15 = vld [vmem:[%s4161_s20 + $0x2c0] ss:$8 sps:$4 sm:$0xff]  }
 0x186   : > { %v2030_v21 = vpop.f32.mrb[50].mxu0  ;;  %v2542_v22 = vpop.f32.mrb[50].mxu1  ;;  %v3961_v16 = vld [vmem:[%s4161_s20 + $0x6c0] ss:$8 sps:$4 sm:$0xff]  }
 0x187   : > { %2979 = vst [vmem:[%s4313_s23 + $0xc8] sm:$0xff] %v2030_v21  ;;  %3107 = vst [vmem:[%s4313_s23 + $0x4c8] sm:$0xff] %v2542_v22  ;;  %v2032_v25 = vpop.f32.mrb[51].mxu0  ;;  %v2544_v26 = vpop.f32.mrb[51].mxu1 }
 0x189   : > { %2242 = vmatmul.mubr.bf16.gmra.mrb[156].mxu0 %v3930_v19  ;;  %2754 = vmatmul.mubr.bf16.gmra.mrb[156].mxu1 %v3931_v20  ;;  %v3962_v19 = vld [vmem:[%s4161_s20 + $0x2d4] ss:$8 sps:$4 sm:$0xff]  }
 0x18a   : > { %2249 = vmatprep.mubr.bf16.mxu0 %v3932_v23  ;;  %2761 = vmatprep.mubr.bf16.mxu1 %v3934_v24  ;;  %v3964_v20 = vld [vmem:[%s4161_s20 + $0x6d4] ss:$8 sps:$4 sm:$0xff]  }
 0x18c   : > { %v2035_v27 = vpop.f32.mrb[52].mxu0  ;;  %v2547_v28 = vpop.f32.mrb[52].mxu1 }
 0x18d   : > { %2980 = vst [vmem:[%s4313_s23 + $0xd0] sm:$0xff] %v2035_v27  ;;  %3108 = vst [vmem:[%s4313_s23 + $0x4d0] sm:$0xff] %v2547_v28  ;;  %v2037_v29 = vpop.f32.mrb[53].mxu0  ;;  %v2549_v30 = vpop.f32.mrb[53].mxu1  ;;  %v3966_v27 = vld [vmem:[%s4161_s20 + $0x2d0] ss:$8 sps:$4 sm:$0xff]  }
 0x18e   : > { %v2038_v33 = vpop.f32.mrb[54].mxu0  ;;  %v2550_v34 = vpop.f32.mrb[54].mxu1  ;;  %v3967_v28 = vld [vmem:[%s4161_s20 + $0x6d0] ss:$8 sps:$4 sm:$0xff]  }
 0x18f   : > { %2981 = vst [vmem:[%s4313_s23 + $0xd8] sm:$0xff] %v2038_v33  ;;  %3109 = vst [vmem:[%s4313_s23 + $0x4d8] sm:$0xff] %v2550_v34  ;;  %v2040_v37 = vpop.f32.mrb[55].mxu0  ;;  %v2552_v38 = vpop.f32.mrb[55].mxu1 }
 0x191   : > { %2250 = vmatmul.mubr.bf16.gmra.mrb[160].mxu0 %v3936_v31  ;;  %2762 = vmatmul.mubr.bf16.gmra.mrb[160].mxu1 %v3937_v32  ;;  %v3968_v31 = vld [vmem:[%s4161_s20 + $0x2e4] ss:$8 sps:$4 sm:$0xff]  }
 0x192   : > { %2257 = vmatprep.mubr.bf16.mxu0 %v3938_v35  ;;  %2769 = vmatprep.mubr.bf16.mxu1 %v3940_v36  ;;  %v3970_v32 = vld [vmem:[%s4161_s20 + $0x6e4] ss:$8 sps:$4 sm:$0xff]  }
 0x194   : > { %v2043_v39 = vpop.f32.mrb[56].mxu0  ;;  %v2555_v40 = vpop.f32.mrb[56].mxu1 }
 0x195   : > { %2982 = vst [vmem:[%s4313_s23 + $0xe0] sm:$0xff] %v2043_v39  ;;  %3110 = vst [vmem:[%s4313_s23 + $0x4e0] sm:$0xff] %v2555_v40  ;;  %v2045_v41 = vpop.f32.mrb[57].mxu0  ;;  %v2557_v42 = vpop.f32.mrb[57].mxu1  ;;  %v3972_v39 = vld [vmem:[%s4161_s20 + $0x2e0] ss:$8 sps:$4 sm:$0xff]  }
 0x196   : > { %v2046_v45 = vpop.f32.mrb[58].mxu0  ;;  %v2558_v46 = vpop.f32.mrb[58].mxu1  ;;  %v3973_v40 = vld [vmem:[%s4161_s20 + $0x6e0] ss:$8 sps:$4 sm:$0xff]  }
 0x197   : > { %2983 = vst [vmem:[%s4313_s23 + $0xe8] sm:$0xff] %v2046_v45  ;;  %3111 = vst [vmem:[%s4313_s23 + $0x4e8] sm:$0xff] %v2558_v46  ;;  %v2048_v49 = vpop.f32.mrb[59].mxu0  ;;  %v2560_v50 = vpop.f32.mrb[59].mxu1 }
 0x199   : > { %2258 = vmatmul.mubr.bf16.gmra.mrb[164].mxu0 %v3942_v43  ;;  %2770 = vmatmul.mubr.bf16.gmra.mrb[164].mxu1 %v3943_v44  ;;  %v3974_v43 = vld [vmem:[%s4161_s20 + $0x2f4] ss:$8 sps:$4 sm:$0xff]  }
 0x19a   : > { %2265 = vmatprep.mubr.bf16.mxu0 %v3944_v47  ;;  %2777 = vmatprep.mubr.bf16.mxu1 %v3946_v48  ;;  %v3976_v44 = vld [vmem:[%s4161_s20 + $0x6f4] ss:$8 sps:$4 sm:$0xff]  }
 0x19c   : > { %v2051_v51 = vpop.f32.mrb[60].mxu0  ;;  %v2563_v52 = vpop.f32.mrb[60].mxu1 }
 0x19d   : > { %2984 = vst [vmem:[%s4313_s23 + $0xf0] sm:$0xff] %v2051_v51  ;;  %3112 = vst [vmem:[%s4313_s23 + $0x4f0] sm:$0xff] %v2563_v52  ;;  %v2053_v53 = vpop.f32.mrb[61].mxu0  ;;  %v2565_v54 = vpop.f32.mrb[61].mxu1  ;;  %v3978_v51 = vld [vmem:[%s4161_s20 + $0x2f0] ss:$8 sps:$4 sm:$0xff]  }
 0x19e   : > { %v2054_v57 = vpop.f32.mrb[62].mxu0  ;;  %v2566_v58 = vpop.f32.mrb[62].mxu1  ;;  %v3979_v52 = vld [vmem:[%s4161_s20 + $0x6f0] ss:$8 sps:$4 sm:$0xff]  }
 0x19f   : > { %2985 = vst [vmem:[%s4313_s23 + $0xf8] sm:$0xff] %v2054_v57  ;;  %3113 = vst [vmem:[%s4313_s23 + $0x4f8] sm:$0xff] %v2566_v58  ;;  %v2056_v61 = vpop.f32.mrb[63].mxu0  ;;  %v2568_v62 = vpop.f32.mrb[63].mxu1 }
 0x1a1   : > { %2266 = vmatmul.mubr.bf16.gmra.mrb[168].mxu0 %v3948_v55  ;;  %2778 = vmatmul.mubr.bf16.gmra.mrb[168].mxu1 %v3949_v56  ;;  %v3980_v55 = vld [vmem:[%s4161_s20 + $0x304] ss:$8 sps:$4 sm:$0xff]  }
 0x1a2   : > { %2273 = vmatprep.mubr.bf16.mxu0 %v3950_v59  ;;  %2785 = vmatprep.mubr.bf16.mxu1 %v3952_v60  ;;  %v3982_v56 = vld [vmem:[%s4161_s20 + $0x704] ss:$8 sps:$4 sm:$0xff]  }
 0x1a4   : > { %v2059_v63 = vpop.f32.mrb[64].mxu0  ;;  %v2571_v0 = vpop.f32.mrb[64].mxu1 }
 0x1a5   : > { %2986 = vst [vmem:[%s4313_s23 + $0x100] sm:$0xff] %v2059_v63  ;;  %3114 = vst [vmem:[%s4313_s23 + $0x500] sm:$0xff] %v2571_v0  ;;  %v2061_v1 = vpop.f32.mrb[65].mxu0  ;;  %v2573_v2 = vpop.f32.mrb[65].mxu1  ;;  %v3984_v63 = vld [vmem:[%s4161_s20 + $0x300] ss:$8 sps:$4 sm:$0xff]  }
 0x1a6   : > { %v2062_v5 = vpop.f32.mrb[66].mxu0  ;;  %v2574_v6 = vpop.f32.mrb[66].mxu1  ;;  %v3985_v0 = vld [vmem:[%s4161_s20 + $0x700] ss:$8 sps:$4 sm:$0xff]  }
 0x1a7   : > { %2987 = vst [vmem:[%s4313_s23 + $0x108] sm:$0xff] %v2062_v5  ;;  %3115 = vst [vmem:[%s4313_s23 + $0x508] sm:$0xff] %v2574_v6  ;;  %v2064_v9 = vpop.f32.mrb[67].mxu0  ;;  %v2576_v10 = vpop.f32.mrb[67].mxu1 }
 0x1a9   : > { %2274 = vmatmul.mubr.bf16.gmra.mrb[172].mxu0 %v3954_v3  ;;  %2786 = vmatmul.mubr.bf16.gmra.mrb[172].mxu1 %v3955_v4  ;;  %v3986_v3 = vld [vmem:[%s4161_s20 + $0x314] ss:$8 sps:$4 sm:$0xff]  }
 0x1aa   : > { %2281 = vmatprep.mubr.bf16.mxu0 %v3956_v7  ;;  %2793 = vmatprep.mubr.bf16.mxu1 %v3958_v8  ;;  %v3988_v4 = vld [vmem:[%s4161_s20 + $0x714] ss:$8 sps:$4 sm:$0xff]  }
 0x1ac   : > { %v2067_v11 = vpop.f32.mrb[68].mxu0  ;;  %v2579_v12 = vpop.f32.mrb[68].mxu1 }
 0x1ad   : > { %2988 = vst [vmem:[%s4313_s23 + $0x110] sm:$0xff] %v2067_v11  ;;  %3116 = vst [vmem:[%s4313_s23 + $0x510] sm:$0xff] %v2579_v12  ;;  %v2069_v13 = vpop.f32.mrb[69].mxu0  ;;  %v2581_v14 = vpop.f32.mrb[69].mxu1  ;;  %v3990_v11 = vld [vmem:[%s4161_s20 + $0x310] ss:$8 sps:$4 sm:$0xff]  }
 0x1ae   : > { %v2070_v17 = vpop.f32.mrb[70].mxu0  ;;  %v2582_v18 = vpop.f32.mrb[70].mxu1  ;;  %v3991_v12 = vld [vmem:[%s4161_s20 + $0x710] ss:$8 sps:$4 sm:$0xff]  }
 0x1af   : > { %2989 = vst [vmem:[%s4313_s23 + $0x118] sm:$0xff] %v2070_v17  ;;  %3117 = vst [vmem:[%s4313_s23 + $0x518] sm:$0xff] %v2582_v18  ;;  %v2072_v21 = vpop.f32.mrb[71].mxu0  ;;  %v2584_v22 = vpop.f32.mrb[71].mxu1 }
 0x1b1   : > { %2282 = vmatmul.mubr.bf16.gmra.mrb[176].mxu0 %v3960_v15  ;;  %2794 = vmatmul.mubr.bf16.gmra.mrb[176].mxu1 %v3961_v16  ;;  %v3992_v15 = vld [vmem:[%s4161_s20 + $0x324] ss:$8 sps:$4 sm:$0xff]  }
 0x1b2   : > { %2289 = vmatprep.mubr.bf16.mxu0 %v3962_v19  ;;  %2801 = vmatprep.mubr.bf16.mxu1 %v3964_v20  ;;  %v3994_v16 = vld [vmem:[%s4161_s20 + $0x724] ss:$8 sps:$4 sm:$0xff]  }
 0x1b4   : > { %v2075_v23 = vpop.f32.mrb[72].mxu0  ;;  %v2587_v24 = vpop.f32.mrb[72].mxu1 }
 0x1b5   : > { %2990 = vst [vmem:[%s4313_s23 + $0x120] sm:$0xff] %v2075_v23  ;;  %3118 = vst [vmem:[%s4313_s23 + $0x520] sm:$0xff] %v2587_v24  ;;  %v2077_v25 = vpop.f32.mrb[73].mxu0  ;;  %v2589_v26 = vpop.f32.mrb[73].mxu1  ;;  %v3996_v23 = vld [vmem:[%s4161_s20 + $0x320] ss:$8 sps:$4 sm:$0xff]  }
 0x1b6   : > { %v2078_v29 = vpop.f32.mrb[74].mxu0  ;;  %v2590_v30 = vpop.f32.mrb[74].mxu1  ;;  %v3997_v24 = vld [vmem:[%s4161_s20 + $0x720] ss:$8 sps:$4 sm:$0xff]  }
 0x1b7   : > { %2991 = vst [vmem:[%s4313_s23 + $0x128] sm:$0xff] %v2078_v29  ;;  %3119 = vst [vmem:[%s4313_s23 + $0x528] sm:$0xff] %v2590_v30  ;;  %v2080_v33 = vpop.f32.mrb[75].mxu0  ;;  %v2592_v34 = vpop.f32.mrb[75].mxu1 }
 0x1b9   : > { %2290 = vmatmul.mubr.bf16.gmra.mrb[180].mxu0 %v3966_v27  ;;  %2802 = vmatmul.mubr.bf16.gmra.mrb[180].mxu1 %v3967_v28  ;;  %v3998_v27 = vld [vmem:[%s4161_s20 + $0x334] ss:$8 sps:$4 sm:$0xff]  }
 0x1ba   : > { %2297 = vmatprep.mubr.bf16.mxu0 %v3968_v31  ;;  %2809 = vmatprep.mubr.bf16.mxu1 %v3970_v32  ;;  %v4000_v28 = vld [vmem:[%s4161_s20 + $0x734] ss:$8 sps:$4 sm:$0xff]  }
 0x1bc   : > { %v2083_v35 = vpop.f32.mrb[76].mxu0  ;;  %v2595_v36 = vpop.f32.mrb[76].mxu1 }
 0x1bd   : > { %2992 = vst [vmem:[%s4313_s23 + $0x130] sm:$0xff] %v2083_v35  ;;  %3120 = vst [vmem:[%s4313_s23 + $0x530] sm:$0xff] %v2595_v36  ;;  %v2085_v37 = vpop.f32.mrb[77].mxu0  ;;  %v2597_v38 = vpop.f32.mrb[77].mxu1  ;;  %v4002_v35 = vld [vmem:[%s4161_s20 + $0x330] ss:$8 sps:$4 sm:$0xff]  }
 0x1be   : > { %v2086_v41 = vpop.f32.mrb[78].mxu0  ;;  %v2598_v42 = vpop.f32.mrb[78].mxu1  ;;  %v4003_v36 = vld [vmem:[%s4161_s20 + $0x730] ss:$8 sps:$4 sm:$0xff]  }
 0x1bf   : > { %2993 = vst [vmem:[%s4313_s23 + $0x138] sm:$0xff] %v2086_v41  ;;  %3121 = vst [vmem:[%s4313_s23 + $0x538] sm:$0xff] %v2598_v42  ;;  %v2088_v45 = vpop.f32.mrb[79].mxu0  ;;  %v2600_v46 = vpop.f32.mrb[79].mxu1 }
 0x1c1   : > { %2298 = vmatmul.mubr.bf16.gmra.mrb[184].mxu0 %v3972_v39  ;;  %2810 = vmatmul.mubr.bf16.gmra.mrb[184].mxu1 %v3973_v40  ;;  %v4004_v39 = vld [vmem:[%s4161_s20 + $0x344] ss:$8 sps:$4 sm:$0xff]  }
 0x1c2   : > { %2305 = vmatprep.mubr.bf16.mxu0 %v3974_v43  ;;  %2817 = vmatprep.mubr.bf16.mxu1 %v3976_v44  ;;  %v4006_v40 = vld [vmem:[%s4161_s20 + $0x744] ss:$8 sps:$4 sm:$0xff]  }
 0x1c4   : > { %v2091_v47 = vpop.f32.mrb[80].mxu0  ;;  %v2603_v48 = vpop.f32.mrb[80].mxu1 }
 0x1c5   : > { %2994 = vst [vmem:[%s4313_s23 + $0x140] sm:$0xff] %v2091_v47  ;;  %3122 = vst [vmem:[%s4313_s23 + $0x540] sm:$0xff] %v2603_v48  ;;  %v2093_v49 = vpop.f32.mrb[81].mxu0  ;;  %v2605_v50 = vpop.f32.mrb[81].mxu1  ;;  %v4008_v47 = vld [vmem:[%s4161_s20 + $0x340] ss:$8 sps:$4 sm:$0xff]  }
 0x1c6   : > { %v2094_v53 = vpop.f32.mrb[82].mxu0  ;;  %v2606_v54 = vpop.f32.mrb[82].mxu1  ;;  %v4009_v48 = vld [vmem:[%s4161_s20 + $0x740] ss:$8 sps:$4 sm:$0xff]  }
 0x1c7   : > { %2995 = vst [vmem:[%s4313_s23 + $0x148] sm:$0xff] %v2094_v53  ;;  %3123 = vst [vmem:[%s4313_s23 + $0x548] sm:$0xff] %v2606_v54  ;;  %v2096_v57 = vpop.f32.mrb[83].mxu0  ;;  %v2608_v58 = vpop.f32.mrb[83].mxu1 }
 0x1c9   : > { %2306 = vmatmul.mubr.bf16.gmra.mrb[188].mxu0 %v3978_v51  ;;  %2818 = vmatmul.mubr.bf16.gmra.mrb[188].mxu1 %v3979_v52  ;;  %v4010_v51 = vld [vmem:[%s4161_s20 + $0x354] ss:$8 sps:$4 sm:$0xff]  }
 0x1ca   : > { %2313 = vmatprep.mubr.bf16.mxu0 %v3980_v55  ;;  %2825 = vmatprep.mubr.bf16.mxu1 %v3982_v56  ;;  %v4012_v52 = vld [vmem:[%s4161_s20 + $0x754] ss:$8 sps:$4 sm:$0xff]  }
 0x1cc   : > { %v2099_v59 = vpop.f32.mrb[84].mxu0  ;;  %v2611_v60 = vpop.f32.mrb[84].mxu1 }
 0x1cd   : > { %2996 = vst [vmem:[%s4313_s23 + $0x150] sm:$0xff] %v2099_v59  ;;  %3124 = vst [vmem:[%s4313_s23 + $0x550] sm:$0xff] %v2611_v60  ;;  %v2101_v61 = vpop.f32.mrb[85].mxu0  ;;  %v2613_v62 = vpop.f32.mrb[85].mxu1  ;;  %v4014_v59 = vld [vmem:[%s4161_s20 + $0x350] ss:$8 sps:$4 sm:$0xff]  }
 0x1ce   : > { %v2102_v1 = vpop.f32.mrb[86].mxu0  ;;  %v2614_v2 = vpop.f32.mrb[86].mxu1  ;;  %v4015_v60 = vld [vmem:[%s4161_s20 + $0x750] ss:$8 sps:$4 sm:$0xff]  }
 0x1cf   : > { %2997 = vst [vmem:[%s4313_s23 + $0x158] sm:$0xff] %v2102_v1  ;;  %3125 = vst [vmem:[%s4313_s23 + $0x558] sm:$0xff] %v2614_v2  ;;  %v2104_v5 = vpop.f32.mrb[87].mxu0  ;;  %v2616_v6 = vpop.f32.mrb[87].mxu1 }
 0x1d1   : > { %2314 = vmatmul.mubr.bf16.gmra.mrb[192].mxu0 %v3984_v63  ;;  %2826 = vmatmul.mubr.bf16.gmra.mrb[192].mxu1 %v3985_v0  ;;  %v4016_v63 = vld [vmem:[%s4161_s20 + $0x364] ss:$8 sps:$4 sm:$0xff]  }
 0x1d2   : > { %2321 = vmatprep.mubr.bf16.mxu0 %v3986_v3  ;;  %2833 = vmatprep.mubr.bf16.mxu1 %v3988_v4  ;;  %v4018_v0 = vld [vmem:[%s4161_s20 + $0x764] ss:$8 sps:$4 sm:$0xff]  }
 0x1d4   : > { %v2107_v7 = vpop.f32.mrb[88].mxu0  ;;  %v2619_v8 = vpop.f32.mrb[88].mxu1 }
 0x1d5   : > { %2998 = vst [vmem:[%s4313_s23 + $0x160] sm:$0xff] %v2107_v7  ;;  %3126 = vst [vmem:[%s4313_s23 + $0x560] sm:$0xff] %v2619_v8  ;;  %v2109_v9 = vpop.f32.mrb[89].mxu0  ;;  %v2621_v10 = vpop.f32.mrb[89].mxu1  ;;  %v4020_v7 = vld [vmem:[%s4161_s20 + $0x360] ss:$8 sps:$4 sm:$0xff]  }
 0x1d6   : > { %v2110_v13 = vpop.f32.mrb[90].mxu0  ;;  %v2622_v14 = vpop.f32.mrb[90].mxu1  ;;  %v4021_v8 = vld [vmem:[%s4161_s20 + $0x760] ss:$8 sps:$4 sm:$0xff]  }
 0x1d7   : > { %2999 = vst [vmem:[%s4313_s23 + $0x168] sm:$0xff] %v2110_v13  ;;  %3127 = vst [vmem:[%s4313_s23 + $0x568] sm:$0xff] %v2622_v14  ;;  %v2112_v17 = vpop.f32.mrb[91].mxu0  ;;  %v2624_v18 = vpop.f32.mrb[91].mxu1 }
 0x1d9   : > { %2322 = vmatmul.mubr.bf16.gmra.mrb[196].mxu0 %v3990_v11  ;;  %2834 = vmatmul.mubr.bf16.gmra.mrb[196].mxu1 %v3991_v12  ;;  %v4022_v11 = vld [vmem:[%s4161_s20 + $0x374] ss:$8 sps:$4 sm:$0xff]  }
 0x1da   : > { %2329 = vmatprep.mubr.bf16.mxu0 %v3992_v15  ;;  %2841 = vmatprep.mubr.bf16.mxu1 %v3994_v16  ;;  %v4024_v12 = vld [vmem:[%s4161_s20 + $0x774] ss:$8 sps:$4 sm:$0xff]  }
 0x1dc   : > { %v2115_v19 = vpop.f32.mrb[92].mxu0  ;;  %v2627_v20 = vpop.f32.mrb[92].mxu1 }
 0x1dd   : > { %3000 = vst [vmem:[%s4313_s23 + $0x170] sm:$0xff] %v2115_v19  ;;  %3128 = vst [vmem:[%s4313_s23 + $0x570] sm:$0xff] %v2627_v20  ;;  %v2117_v21 = vpop.f32.mrb[93].mxu0  ;;  %v2629_v22 = vpop.f32.mrb[93].mxu1  ;;  %v4026_v19 = vld [vmem:[%s4161_s20 + $0x370] ss:$8 sps:$4 sm:$0xff]  }
 0x1de   : > { %v2118_v25 = vpop.f32.mrb[94].mxu0  ;;  %v2630_v26 = vpop.f32.mrb[94].mxu1  ;;  %v4027_v20 = vld [vmem:[%s4161_s20 + $0x770] ss:$8 sps:$4 sm:$0xff]  }
 0x1df   : > { %3001 = vst [vmem:[%s4313_s23 + $0x178] sm:$0xff] %v2118_v25  ;;  %3129 = vst [vmem:[%s4313_s23 + $0x578] sm:$0xff] %v2630_v26  ;;  %v2120_v29 = vpop.f32.mrb[95].mxu0  ;;  %v2632_v30 = vpop.f32.mrb[95].mxu1 }
 0x1e1   : > { %2330 = vmatmul.mubr.bf16.gmra.mrb[200].mxu0 %v3996_v23  ;;  %2842 = vmatmul.mubr.bf16.gmra.mrb[200].mxu1 %v3997_v24  ;;  %v4028_v23 = vld [vmem:[%s4161_s20 + $0x384] ss:$8 sps:$4 sm:$0xff]  }
 0x1e2   : > { %2337 = vmatprep.mubr.bf16.mxu0 %v3998_v27  ;;  %2849 = vmatprep.mubr.bf16.mxu1 %v4000_v28  ;;  %v4030_v24 = vld [vmem:[%s4161_s20 + $0x784] ss:$8 sps:$4 sm:$0xff]  }
 0x1e4   : > { %v2123_v31 = vpop.f32.mrb[96].mxu0  ;;  %v2635_v32 = vpop.f32.mrb[96].mxu1 }
 0x1e5   : > { %3002 = vst [vmem:[%s4313_s23 + $0x180] sm:$0xff] %v2123_v31  ;;  %3130 = vst [vmem:[%s4313_s23 + $0x580] sm:$0xff] %v2635_v32  ;;  %v2125_v33 = vpop.f32.mrb[97].mxu0  ;;  %v2637_v34 = vpop.f32.mrb[97].mxu1  ;;  %v4032_v31 = vld [vmem:[%s4161_s20 + $0x380] ss:$8 sps:$4 sm:$0xff]  }
 0x1e6   : > { %v2126_v37 = vpop.f32.mrb[98].mxu0  ;;  %v2638_v38 = vpop.f32.mrb[98].mxu1  ;;  %v4033_v32 = vld [vmem:[%s4161_s20 + $0x780] ss:$8 sps:$4 sm:$0xff]  }
 0x1e7   : > { %3003 = vst [vmem:[%s4313_s23 + $0x188] sm:$0xff] %v2126_v37  ;;  %3131 = vst [vmem:[%s4313_s23 + $0x588] sm:$0xff] %v2638_v38  ;;  %v2128_v41 = vpop.f32.mrb[99].mxu0  ;;  %v2640_v42 = vpop.f32.mrb[99].mxu1 }
 0x1e9   : > { %2338 = vmatmul.mubr.bf16.gmra.mrb[204].mxu0 %v4002_v35  ;;  %2850 = vmatmul.mubr.bf16.gmra.mrb[204].mxu1 %v4003_v36  ;;  %v4034_v35 = vld [vmem:[%s4161_s20 + $0x394] ss:$8 sps:$4 sm:$0xff]  }
 0x1ea   : > { %2345 = vmatprep.mubr.bf16.mxu0 %v4004_v39  ;;  %2857 = vmatprep.mubr.bf16.mxu1 %v4006_v40  ;;  %v4036_v36 = vld [vmem:[%s4161_s20 + $0x794] ss:$8 sps:$4 sm:$0xff]  }
 0x1ec   : > { %v2131_v43 = vpop.f32.mrb[100].mxu0  ;;  %v2643_v44 = vpop.f32.mrb[100].mxu1 }
 0x1ed   : > { %3004 = vst [vmem:[%s4313_s23 + $0x190] sm:$0xff] %v2131_v43  ;;  %3132 = vst [vmem:[%s4313_s23 + $0x590] sm:$0xff] %v2643_v44  ;;  %v2133_v45 = vpop.f32.mrb[101].mxu0  ;;  %v2645_v46 = vpop.f32.mrb[101].mxu1  ;;  %v4038_v43 = vld [vmem:[%s4161_s20 + $0x390] ss:$8 sps:$4 sm:$0xff]  }
 0x1ee   : > { %v2134_v49 = vpop.f32.mrb[102].mxu0  ;;  %v2646_v50 = vpop.f32.mrb[102].mxu1  ;;  %v4039_v44 = vld [vmem:[%s4161_s20 + $0x790] ss:$8 sps:$4 sm:$0xff]  }
 0x1ef   : > { %3005 = vst [vmem:[%s4313_s23 + $0x198] sm:$0xff] %v2134_v49  ;;  %3133 = vst [vmem:[%s4313_s23 + $0x598] sm:$0xff] %v2646_v50  ;;  %v2136_v53 = vpop.f32.mrb[103].mxu0  ;;  %v2648_v54 = vpop.f32.mrb[103].mxu1 }
 0x1f1   : > { %2346 = vmatmul.mubr.bf16.gmra.mrb[208].mxu0 %v4008_v47  ;;  %2858 = vmatmul.mubr.bf16.gmra.mrb[208].mxu1 %v4009_v48  ;;  %v4040_v47 = vld [vmem:[%s4161_s20 + $0x3a4] ss:$8 sps:$4 sm:$0xff]  }
 0x1f2   : > { %2353 = vmatprep.mubr.bf16.mxu0 %v4010_v51  ;;  %2865 = vmatprep.mubr.bf16.mxu1 %v4012_v52  ;;  %v4042_v48 = vld [vmem:[%s4161_s20 + $0x7a4] ss:$8 sps:$4 sm:$0xff]  }
 0x1f4   : > { %v2139_v55 = vpop.f32.mrb[104].mxu0  ;;  %v2651_v56 = vpop.f32.mrb[104].mxu1 }
 0x1f5   : > { %3006 = vst [vmem:[%s4313_s23 + $0x1a0] sm:$0xff] %v2139_v55  ;;  %3134 = vst [vmem:[%s4313_s23 + $0x5a0] sm:$0xff] %v2651_v56  ;;  %v2141_v57 = vpop.f32.mrb[105].mxu0  ;;  %v2653_v58 = vpop.f32.mrb[105].mxu1  ;;  %v4044_v55 = vld [vmem:[%s4161_s20 + $0x3a0] ss:$8 sps:$4 sm:$0xff]  }
 0x1f6   : > { %v2142_v61 = vpop.f32.mrb[106].mxu0  ;;  %v2654_v62 = vpop.f32.mrb[106].mxu1  ;;  %v4045_v56 = vld [vmem:[%s4161_s20 + $0x7a0] ss:$8 sps:$4 sm:$0xff]  }
 0x1f7   : > { %3007 = vst [vmem:[%s4313_s23 + $0x1a8] sm:$0xff] %v2142_v61  ;;  %3135 = vst [vmem:[%s4313_s23 + $0x5a8] sm:$0xff] %v2654_v62  ;;  %v2144_v1 = vpop.f32.mrb[107].mxu0  ;;  %v2656_v2 = vpop.f32.mrb[107].mxu1 }
 0x1f9   : > { %2354 = vmatmul.mubr.bf16.gmra.mrb[212].mxu0 %v4014_v59  ;;  %2866 = vmatmul.mubr.bf16.gmra.mrb[212].mxu1 %v4015_v60  ;;  %v4046_v59 = vld [vmem:[%s4161_s20 + $0x3b4] ss:$8 sps:$4 sm:$0xff]  }
 0x1fa   : > { %2361 = vmatprep.mubr.bf16.mxu0 %v4016_v63  ;;  %2873 = vmatprep.mubr.bf16.mxu1 %v4018_v0  ;;  %v4048_v60 = vld [vmem:[%s4161_s20 + $0x7b4] ss:$8 sps:$4 sm:$0xff]  }
 0x1fc   : > { %v2147_v3 = vpop.f32.mrb[108].mxu0  ;;  %v2659_v4 = vpop.f32.mrb[108].mxu1 }
 0x1fd   : > { %3008 = vst [vmem:[%s4313_s23 + $0x1b0] sm:$0xff] %v2147_v3  ;;  %3136 = vst [vmem:[%s4313_s23 + $0x5b0] sm:$0xff] %v2659_v4  ;;  %v2149_v5 = vpop.f32.mrb[109].mxu0  ;;  %v2661_v6 = vpop.f32.mrb[109].mxu1  ;;  %v4050_v3 = vld [vmem:[%s4161_s20 + $0x3b0] ss:$8 sps:$4 sm:$0xff]  }
 0x1fe   : > { %v2150_v9 = vpop.f32.mrb[110].mxu0  ;;  %v2662_v10 = vpop.f32.mrb[110].mxu1  ;;  %v4051_v4 = vld [vmem:[%s4161_s20 + $0x7b0] ss:$8 sps:$4 sm:$0xff]  }
 0x1ff   : > { %3009 = vst [vmem:[%s4313_s23 + $0x1b8] sm:$0xff] %v2150_v9  ;;  %3137 = vst [vmem:[%s4313_s23 + $0x5b8] sm:$0xff] %v2662_v10  ;;  %v2152_v13 = vpop.f32.mrb[111].mxu0  ;;  %v2664_v14 = vpop.f32.mrb[111].mxu1 }
 0x201   : > { %2362 = vmatmul.mubr.bf16.gmra.mrb[216].mxu0 %v4020_v7  ;;  %2874 = vmatmul.mubr.bf16.gmra.mrb[216].mxu1 %v4021_v8  ;;  %v4052_v7 = vld [vmem:[%s4161_s20 + $0x3c4] ss:$8 sps:$4 sm:$0xff]  }
 0x202   : > { %2369 = vmatprep.mubr.bf16.mxu0 %v4022_v11  ;;  %2881 = vmatprep.mubr.bf16.mxu1 %v4024_v12  ;;  %v4054_v8 = vld [vmem:[%s4161_s20 + $0x7c4] ss:$8 sps:$4 sm:$0xff]  }
 0x204   : > { %v2155_v15 = vpop.f32.mrb[112].mxu0  ;;  %v2667_v16 = vpop.f32.mrb[112].mxu1 }
 0x205   : > { %3010 = vst [vmem:[%s4313_s23 + $0x1c0] sm:$0xff] %v2155_v15  ;;  %3138 = vst [vmem:[%s4313_s23 + $0x5c0] sm:$0xff] %v2667_v16  ;;  %v2157_v17 = vpop.f32.mrb[113].mxu0  ;;  %v2669_v18 = vpop.f32.mrb[113].mxu1  ;;  %v4056_v15 = vld [vmem:[%s4161_s20 + $0x3c0] ss:$8 sps:$4 sm:$0xff]  }
 0x206   : > { %v2158_v21 = vpop.f32.mrb[114].mxu0  ;;  %v2670_v22 = vpop.f32.mrb[114].mxu1  ;;  %v4057_v16 = vld [vmem:[%s4161_s20 + $0x7c0] ss:$8 sps:$4 sm:$0xff]  }
 0x207   : > { %3011 = vst [vmem:[%s4313_s23 + $0x1c8] sm:$0xff] %v2158_v21  ;;  %3139 = vst [vmem:[%s4313_s23 + $0x5c8] sm:$0xff] %v2670_v22  ;;  %v2160_v25 = vpop.f32.mrb[115].mxu0  ;;  %v2672_v26 = vpop.f32.mrb[115].mxu1 }
 0x209   : > { %2370 = vmatmul.mubr.bf16.gmra.mrb[220].mxu0 %v4026_v19  ;;  %2882 = vmatmul.mubr.bf16.gmra.mrb[220].mxu1 %v4027_v20  ;;  %v4058_v19 = vld [vmem:[%s4161_s20 + $0x3d4] ss:$8 sps:$4 sm:$0xff]  }
 0x20a   : > { %2377 = vmatprep.mubr.bf16.mxu0 %v4028_v23  ;;  %2889 = vmatprep.mubr.bf16.mxu1 %v4030_v24  ;;  %v4060_v20 = vld [vmem:[%s4161_s20 + $0x7d4] ss:$8 sps:$4 sm:$0xff]  }
 0x20c   : > { %v2163_v27 = vpop.f32.mrb[116].mxu0  ;;  %v2675_v28 = vpop.f32.mrb[116].mxu1 }
 0x20d   : > { %3012 = vst [vmem:[%s4313_s23 + $0x1d0] sm:$0xff] %v2163_v27  ;;  %3140 = vst [vmem:[%s4313_s23 + $0x5d0] sm:$0xff] %v2675_v28  ;;  %v2165_v29 = vpop.f32.mrb[117].mxu0  ;;  %v2677_v30 = vpop.f32.mrb[117].mxu1  ;;  %v4062_v27 = vld [vmem:[%s4161_s20 + $0x3d0] ss:$8 sps:$4 sm:$0xff]  }
 0x20e   : > { %v2166_v33 = vpop.f32.mrb[118].mxu0  ;;  %v2678_v34 = vpop.f32.mrb[118].mxu1  ;;  %v4063_v28 = vld [vmem:[%s4161_s20 + $0x7d0] ss:$8 sps:$4 sm:$0xff]  }
 0x20f   : > { %3013 = vst [vmem:[%s4313_s23 + $0x1d8] sm:$0xff] %v2166_v33  ;;  %3141 = vst [vmem:[%s4313_s23 + $0x5d8] sm:$0xff] %v2678_v34  ;;  %v2168_v37 = vpop.f32.mrb[119].mxu0  ;;  %v2680_v38 = vpop.f32.mrb[119].mxu1 }
 0x211   : > { %2378 = vmatmul.mubr.bf16.gmra.mrb[224].mxu0 %v4032_v31  ;;  %2890 = vmatmul.mubr.bf16.gmra.mrb[224].mxu1 %v4033_v32  ;;  %v4064_v31 = vld [vmem:[%s4161_s20 + $0x3e4] ss:$8 sps:$4 sm:$0xff]  }
 0x212   : > { %2385 = vmatprep.mubr.bf16.mxu0 %v4034_v35  ;;  %2897 = vmatprep.mubr.bf16.mxu1 %v4036_v36  ;;  %v4066_v32 = vld [vmem:[%s4161_s20 + $0x7e4] ss:$8 sps:$4 sm:$0xff]  }
 0x214   : > { %v2171_v39 = vpop.f32.mrb[120].mxu0  ;;  %v2683_v40 = vpop.f32.mrb[120].mxu1 }
 0x215   : > { %3014 = vst [vmem:[%s4313_s23 + $0x1e0] sm:$0xff] %v2171_v39  ;;  %3142 = vst [vmem:[%s4313_s23 + $0x5e0] sm:$0xff] %v2683_v40  ;;  %v2173_v41 = vpop.f32.mrb[121].mxu0  ;;  %v2685_v42 = vpop.f32.mrb[121].mxu1  ;;  %v4068_v39 = vld [vmem:[%s4161_s20 + $0x3e0] ss:$8 sps:$4 sm:$0xff]  }
 0x216   : > { %v2174_v45 = vpop.f32.mrb[122].mxu0  ;;  %v2686_v46 = vpop.f32.mrb[122].mxu1  ;;  %v4069_v40 = vld [vmem:[%s4161_s20 + $0x7e0] ss:$8 sps:$4 sm:$0xff]  }
 0x217   : > { %3015 = vst [vmem:[%s4313_s23 + $0x1e8] sm:$0xff] %v2174_v45  ;;  %3143 = vst [vmem:[%s4313_s23 + $0x5e8] sm:$0xff] %v2686_v46  ;;  %v2176_v49 = vpop.f32.mrb[123].mxu0  ;;  %v2688_v50 = vpop.f32.mrb[123].mxu1 }
 0x219   : > { %2386 = vmatmul.mubr.bf16.gmra.mrb[228].mxu0 %v4038_v43  ;;  %2898 = vmatmul.mubr.bf16.gmra.mrb[228].mxu1 %v4039_v44  ;;  %v4070_v43 = vld [vmem:[%s4161_s20 + $0x3f4] ss:$8 sps:$4 sm:$0xff]  }
 0x21a   : > { %2393 = vmatprep.mubr.bf16.mxu0 %v4040_v47  ;;  %2905 = vmatprep.mubr.bf16.mxu1 %v4042_v48  ;;  %v4072_v44 = vld [vmem:[%s4161_s20 + $0x7f4] ss:$8 sps:$4 sm:$0xff]  }
 0x21c   : > { %v2179_v51 = vpop.f32.mrb[124].mxu0  ;;  %v2691_v52 = vpop.f32.mrb[124].mxu1 }
 0x21d   : > { %3016 = vst [vmem:[%s4313_s23 + $0x1f0] sm:$0xff] %v2179_v51  ;;  %3144 = vst [vmem:[%s4313_s23 + $0x5f0] sm:$0xff] %v2691_v52  ;;  %v2181_v53 = vpop.f32.mrb[125].mxu0  ;;  %v2693_v54 = vpop.f32.mrb[125].mxu1  ;;  %v4074_v51 = vld [vmem:[%s4161_s20 + $0x3f0] ss:$8 sps:$4 sm:$0xff]  }
 0x21e   : > { %v2182_v57 = vpop.f32.mrb[126].mxu0  ;;  %v2694_v58 = vpop.f32.mrb[126].mxu1  ;;  %v4075_v52 = vld [vmem:[%s4161_s20 + $0x7f0] ss:$8 sps:$4 sm:$0xff]  }
 0x21f   : > { %3017 = vst [vmem:[%s4313_s23 + $0x1f8] sm:$0xff] %v2182_v57  ;;  %3145 = vst [vmem:[%s4313_s23 + $0x5f8] sm:$0xff] %v2694_v58  ;;  %v2184_v61 = vpop.f32.mrb[127].mxu0  ;;  %v2696_v62 = vpop.f32.mrb[127].mxu1 }
 0x221   : > { %2394 = vmatmul.mubr.bf16.gmra.mrb[232].mxu0 %v4044_v55  ;;  %2906 = vmatmul.mubr.bf16.gmra.mrb[232].mxu1 %v4045_v56 }
 0x222   : > { %2401 = vmatprep.mubr.bf16.mxu0 %v4046_v59  ;;  %2913 = vmatprep.mubr.bf16.mxu1 %v4048_v60 }
 0x224   : > { %v2187_v63 = vpop.f32.mrb[128].mxu0  ;;  %v2699_v0 = vpop.f32.mrb[128].mxu1 }
 0x225   : > { %3018 = vst [vmem:[%s4313_s23 + $0x200] sm:$0xff] %v2187_v63  ;;  %3146 = vst [vmem:[%s4313_s23 + $0x600] sm:$0xff] %v2699_v0  ;;  %v2189_v1 = vpop.f32.mrb[129].mxu0  ;;  %v2701_v2 = vpop.f32.mrb[129].mxu1 }
 0x226   : > { %v2190_v5 = vpop.f32.mrb[130].mxu0  ;;  %v2702_v6 = vpop.f32.mrb[130].mxu1 }
 0x227   : > { %3019 = vst [vmem:[%s4313_s23 + $0x208] sm:$0xff] %v2190_v5  ;;  %3147 = vst [vmem:[%s4313_s23 + $0x608] sm:$0xff] %v2702_v6  ;;  %v2192_v9 = vpop.f32.mrb[131].mxu0  ;;  %v2704_v10 = vpop.f32.mrb[131].mxu1 }
 0x229   : > { %2402 = vmatmul.mubr.bf16.gmra.mrb[236].mxu0 %v4050_v3  ;;  %2914 = vmatmul.mubr.bf16.gmra.mrb[236].mxu1 %v4051_v4 }
 0x22a   : > { %2409 = vmatprep.mubr.bf16.mxu0 %v4052_v7  ;;  %2921 = vmatprep.mubr.bf16.mxu1 %v4054_v8 }
 0x22c   : > { %v2195_v11 = vpop.f32.mrb[132].mxu0  ;;  %v2707_v12 = vpop.f32.mrb[132].mxu1 }
 0x22d   : > { %3020 = vst [vmem:[%s4313_s23 + $0x210] sm:$0xff] %v2195_v11  ;;  %3148 = vst [vmem:[%s4313_s23 + $0x610] sm:$0xff] %v2707_v12  ;;  %v2197_v13 = vpop.f32.mrb[133].mxu0  ;;  %v2709_v14 = vpop.f32.mrb[133].mxu1 }
 0x22e   : > { %v2198_v17 = vpop.f32.mrb[134].mxu0  ;;  %v2710_v18 = vpop.f32.mrb[134].mxu1 }
 0x22f   : > { %3021 = vst [vmem:[%s4313_s23 + $0x218] sm:$0xff] %v2198_v17  ;;  %3149 = vst [vmem:[%s4313_s23 + $0x618] sm:$0xff] %v2710_v18  ;;  %v2200_v21 = vpop.f32.mrb[135].mxu0  ;;  %v2712_v22 = vpop.f32.mrb[135].mxu1 }
 0x231   : > { %2410 = vmatmul.mubr.bf16.gmra.mrb[240].mxu0 %v4056_v15  ;;  %2922 = vmatmul.mubr.bf16.gmra.mrb[240].mxu1 %v4057_v16 }
 0x232   : > { %2417 = vmatprep.mubr.bf16.mxu0 %v4058_v19  ;;  %2929 = vmatprep.mubr.bf16.mxu1 %v4060_v20 }
 0x234   : > { %v2203_v23 = vpop.f32.mrb[136].mxu0  ;;  %v2715_v24 = vpop.f32.mrb[136].mxu1 }
 0x235   : > { %3022 = vst [vmem:[%s4313_s23 + $0x220] sm:$0xff] %v2203_v23  ;;  %3150 = vst [vmem:[%s4313_s23 + $0x620] sm:$0xff] %v2715_v24  ;;  %v2205_v25 = vpop.f32.mrb[137].mxu0  ;;  %v2717_v26 = vpop.f32.mrb[137].mxu1 }
 0x236   : > { %v2206_v29 = vpop.f32.mrb[138].mxu0  ;;  %v2718_v30 = vpop.f32.mrb[138].mxu1 }
 0x237   : > { %3023 = vst [vmem:[%s4313_s23 + $0x228] sm:$0xff] %v2206_v29  ;;  %3151 = vst [vmem:[%s4313_s23 + $0x628] sm:$0xff] %v2718_v30  ;;  %v2208_v33 = vpop.f32.mrb[139].mxu0  ;;  %v2720_v34 = vpop.f32.mrb[139].mxu1 }
 0x239   : > { %2418 = vmatmul.mubr.bf16.gmra.mrb[244].mxu0 %v4062_v27  ;;  %2930 = vmatmul.mubr.bf16.gmra.mrb[244].mxu1 %v4063_v28 }
 0x23a   : > { %2425 = vmatprep.mubr.bf16.mxu0 %v4064_v31  ;;  %2937 = vmatprep.mubr.bf16.mxu1 %v4066_v32 }
 0x23c   : > { %v2211_v35 = vpop.f32.mrb[140].mxu0  ;;  %v2723_v36 = vpop.f32.mrb[140].mxu1 }
 0x23d   : > { %3024 = vst [vmem:[%s4313_s23 + $0x230] sm:$0xff] %v2211_v35  ;;  %3152 = vst [vmem:[%s4313_s23 + $0x630] sm:$0xff] %v2723_v36  ;;  %v2213_v37 = vpop.f32.mrb[141].mxu0  ;;  %v2725_v38 = vpop.f32.mrb[141].mxu1 }
 0x23e   : > { %v2214_v41 = vpop.f32.mrb[142].mxu0  ;;  %v2726_v42 = vpop.f32.mrb[142].mxu1 }
 0x23f   : > { %3025 = vst [vmem:[%s4313_s23 + $0x238] sm:$0xff] %v2214_v41  ;;  %3153 = vst [vmem:[%s4313_s23 + $0x638] sm:$0xff] %v2726_v42  ;;  %v2216_v45 = vpop.f32.mrb[143].mxu0  ;;  %v2728_v46 = vpop.f32.mrb[143].mxu1 }
 0x241   : > { %2426 = vmatmul.mubr.bf16.gmra.mrb[248].mxu0 %v4068_v39  ;;  %2938 = vmatmul.mubr.bf16.gmra.mrb[248].mxu1 %v4069_v40 }
 0x242   : > { %2433 = vmatprep.mubr.bf16.mxu0 %v4070_v43  ;;  %2945 = vmatprep.mubr.bf16.mxu1 %v4072_v44 }
 0x244   : > { %v2219_v47 = vpop.f32.mrb[144].mxu0  ;;  %v2731_v48 = vpop.f32.mrb[144].mxu1 }
 0x245   : > { %3026 = vst [vmem:[%s4313_s23 + $0x240] sm:$0xff] %v2219_v47  ;;  %3154 = vst [vmem:[%s4313_s23 + $0x640] sm:$0xff] %v2731_v48  ;;  %v2221_v49 = vpop.f32.mrb[145].mxu0  ;;  %v2733_v50 = vpop.f32.mrb[145].mxu1 }
 0x246   : > { %v2222_v53 = vpop.f32.mrb[146].mxu0  ;;  %v2734_v54 = vpop.f32.mrb[146].mxu1 }
 0x247   : > { %3027 = vst [vmem:[%s4313_s23 + $0x248] sm:$0xff] %v2222_v53  ;;  %3155 = vst [vmem:[%s4313_s23 + $0x648] sm:$0xff] %v2734_v54  ;;  %v2224_v55 = vpop.f32.mrb[147].mxu0  ;;  %v2736_v56 = vpop.f32.mrb[147].mxu1 }
 0x249   : > { %2434 = vmatmul.mubr.bf16.gmra.mrb[252].mxu0 %v4074_v51  ;;  %2946 = vmatmul.mubr.bf16.gmra.mrb[252].mxu1 %v4075_v52 }
 0x24c   : > { %v2227_v57 = vpop.f32.mrb[148].mxu0  ;;  %v2739_v58 = vpop.f32.mrb[148].mxu1 }
 0x24d   : > { %3028 = vst [vmem:[%s4313_s23 + $0x250] sm:$0xff] %v2227_v57  ;;  %3156 = vst [vmem:[%s4313_s23 + $0x650] sm:$0xff] %v2739_v58  ;;  %v2229_v59 = vpop.f32.mrb[149].mxu0  ;;  %v2741_v60 = vpop.f32.mrb[149].mxu1 }
 0x24e   : > { %v2230_v61 = vpop.f32.mrb[150].mxu0  ;;  %v2742_v62 = vpop.f32.mrb[150].mxu1 }
 0x24f   : > { %3029 = vst [vmem:[%s4313_s23 + $0x258] sm:$0xff] %v2230_v61  ;;  %3157 = vst [vmem:[%s4313_s23 + $0x658] sm:$0xff] %v2742_v62  ;;  %v2232_v63 = vpop.f32.mrb[151].mxu0  ;;  %v2744_v0 = vpop.f32.mrb[151].mxu1 }
 0x254   : > { %v2235_v1 = vpop.f32.mrb[152].mxu0  ;;  %v2747_v2 = vpop.f32.mrb[152].mxu1 }
 0x255   : > { %3030 = vst [vmem:[%s4313_s23 + $0x260] sm:$0xff] %v2235_v1  ;;  %3158 = vst [vmem:[%s4313_s23 + $0x660] sm:$0xff] %v2747_v2  ;;  %v2237_v3 = vpop.f32.mrb[153].mxu0  ;;  %v2749_v4 = vpop.f32.mrb[153].mxu1 }
 0x256   : > { %v2238_v5 = vpop.f32.mrb[154].mxu0  ;;  %v2750_v6 = vpop.f32.mrb[154].mxu1 }
 0x257   : > { %3031 = vst [vmem:[%s4313_s23 + $0x268] sm:$0xff] %v2238_v5  ;;  %3159 = vst [vmem:[%s4313_s23 + $0x668] sm:$0xff] %v2750_v6  ;;  %v2240_v7 = vpop.f32.mrb[155].mxu0  ;;  %v2752_v8 = vpop.f32.mrb[155].mxu1 }
 0x25c   : > { %v2243_v9 = vpop.f32.mrb[156].mxu0  ;;  %v2755_v10 = vpop.f32.mrb[156].mxu1 }
 0x25d   : > { %3032 = vst [vmem:[%s4313_s23 + $0x270] sm:$0xff] %v2243_v9  ;;  %3160 = vst [vmem:[%s4313_s23 + $0x670] sm:$0xff] %v2755_v10  ;;  %v2245_v11 = vpop.f32.mrb[157].mxu0  ;;  %v2757_v12 = vpop.f32.mrb[157].mxu1 }
 0x25e   : > { %v2246_v13 = vpop.f32.mrb[158].mxu0  ;;  %v2758_v14 = vpop.f32.mrb[158].mxu1 }
 0x25f   : > { %3033 = vst [vmem:[%s4313_s23 + $0x278] sm:$0xff] %v2246_v13  ;;  %3161 = vst [vmem:[%s4313_s23 + $0x678] sm:$0xff] %v2758_v14  ;;  %v2248_v15 = vpop.f32.mrb[159].mxu0  ;;  %v2760_v16 = vpop.f32.mrb[159].mxu1 }
 0x264   : > { %v2251_v17 = vpop.f32.mrb[160].mxu0  ;;  %v2763_v18 = vpop.f32.mrb[160].mxu1 }
 0x265   : > { %3034 = vst [vmem:[%s4313_s23 + $0x280] sm:$0xff] %v2251_v17  ;;  %3162 = vst [vmem:[%s4313_s23 + $0x680] sm:$0xff] %v2763_v18  ;;  %v2253_v19 = vpop.f32.mrb[161].mxu0  ;;  %v2765_v20 = vpop.f32.mrb[161].mxu1 }
 0x266   : > { %v2254_v21 = vpop.f32.mrb[162].mxu0  ;;  %v2766_v22 = vpop.f32.mrb[162].mxu1 }
 0x267   : > { %3035 = vst [vmem:[%s4313_s23 + $0x288] sm:$0xff] %v2254_v21  ;;  %3163 = vst [vmem:[%s4313_s23 + $0x688] sm:$0xff] %v2766_v22  ;;  %v2256_v23 = vpop.f32.mrb[163].mxu0  ;;  %v2768_v24 = vpop.f32.mrb[163].mxu1 }
 0x26c   : > { %v2259_v25 = vpop.f32.mrb[164].mxu0  ;;  %v2771_v26 = vpop.f32.mrb[164].mxu1 }
 0x26d   : > { %3036 = vst [vmem:[%s4313_s23 + $0x290] sm:$0xff] %v2259_v25  ;;  %3164 = vst [vmem:[%s4313_s23 + $0x690] sm:$0xff] %v2771_v26  ;;  %v2261_v27 = vpop.f32.mrb[165].mxu0  ;;  %v2773_v28 = vpop.f32.mrb[165].mxu1 }
 0x26e   : > { %v2262_v29 = vpop.f32.mrb[166].mxu0  ;;  %v2774_v30 = vpop.f32.mrb[166].mxu1 }
 0x26f   : > { %3037 = vst [vmem:[%s4313_s23 + $0x298] sm:$0xff] %v2262_v29  ;;  %3165 = vst [vmem:[%s4313_s23 + $0x698] sm:$0xff] %v2774_v30  ;;  %v2264_v31 = vpop.f32.mrb[167].mxu0  ;;  %v2776_v32 = vpop.f32.mrb[167].mxu1 }
 0x274   : > { %v2267_v33 = vpop.f32.mrb[168].mxu0  ;;  %v2779_v34 = vpop.f32.mrb[168].mxu1 }
 0x275   : > { %3038 = vst [vmem:[%s4313_s23 + $0x2a0] sm:$0xff] %v2267_v33  ;;  %3166 = vst [vmem:[%s4313_s23 + $0x6a0] sm:$0xff] %v2779_v34  ;;  %v2269_v35 = vpop.f32.mrb[169].mxu0  ;;  %v2781_v36 = vpop.f32.mrb[169].mxu1 }
 0x276   : > { %v2270_v37 = vpop.f32.mrb[170].mxu0  ;;  %v2782_v38 = vpop.f32.mrb[170].mxu1 }
 0x277   : > { %3039 = vst [vmem:[%s4313_s23 + $0x2a8] sm:$0xff] %v2270_v37  ;;  %3167 = vst [vmem:[%s4313_s23 + $0x6a8] sm:$0xff] %v2782_v38  ;;  %v2272_v39 = vpop.f32.mrb[171].mxu0  ;;  %v2784_v40 = vpop.f32.mrb[171].mxu1 }
 0x27c   : > { %v2275_v41 = vpop.f32.mrb[172].mxu0  ;;  %v2787_v42 = vpop.f32.mrb[172].mxu1 }
 0x27d   : > { %3040 = vst [vmem:[%s4313_s23 + $0x2b0] sm:$0xff] %v2275_v41  ;;  %3168 = vst [vmem:[%s4313_s23 + $0x6b0] sm:$0xff] %v2787_v42  ;;  %v2277_v43 = vpop.f32.mrb[173].mxu0  ;;  %v2789_v44 = vpop.f32.mrb[173].mxu1 }
 0x27e   : > { %v2278_v45 = vpop.f32.mrb[174].mxu0  ;;  %v2790_v46 = vpop.f32.mrb[174].mxu1 }
 0x27f   : > { %3041 = vst [vmem:[%s4313_s23 + $0x2b8] sm:$0xff] %v2278_v45  ;;  %3169 = vst [vmem:[%s4313_s23 + $0x6b8] sm:$0xff] %v2790_v46  ;;  %v2280_v47 = vpop.f32.mrb[175].mxu0  ;;  %v2792_v48 = vpop.f32.mrb[175].mxu1 }
 0x284   : > { %v2283_v49 = vpop.f32.mrb[176].mxu0  ;;  %v2795_v50 = vpop.f32.mrb[176].mxu1 }
 0x285   : > { %3042 = vst [vmem:[%s4313_s23 + $0x2c0] sm:$0xff] %v2283_v49  ;;  %3170 = vst [vmem:[%s4313_s23 + $0x6c0] sm:$0xff] %v2795_v50  ;;  %v2285_v51 = vpop.f32.mrb[177].mxu0  ;;  %v2797_v52 = vpop.f32.mrb[177].mxu1 }
 0x286   : > { %v2286_v53 = vpop.f32.mrb[178].mxu0  ;;  %v2798_v54 = vpop.f32.mrb[178].mxu1 }
 0x287   : > { %3043 = vst [vmem:[%s4313_s23 + $0x2c8] sm:$0xff] %v2286_v53  ;;  %3171 = vst [vmem:[%s4313_s23 + $0x6c8] sm:$0xff] %v2798_v54  ;;  %v2288_v55 = vpop.f32.mrb[179].mxu0  ;;  %v2800_v56 = vpop.f32.mrb[179].mxu1 }
 0x28c   : > { %v2291_v57 = vpop.f32.mrb[180].mxu0  ;;  %v2803_v58 = vpop.f32.mrb[180].mxu1 }
 0x28d   : > { %3044 = vst [vmem:[%s4313_s23 + $0x2d0] sm:$0xff] %v2291_v57  ;;  %3172 = vst [vmem:[%s4313_s23 + $0x6d0] sm:$0xff] %v2803_v58  ;;  %v2293_v59 = vpop.f32.mrb[181].mxu0  ;;  %v2805_v60 = vpop.f32.mrb[181].mxu1 }
 0x28e   : > { %v2294_v61 = vpop.f32.mrb[182].mxu0  ;;  %v2806_v62 = vpop.f32.mrb[182].mxu1 }
 0x28f   : > { %3045 = vst [vmem:[%s4313_s23 + $0x2d8] sm:$0xff] %v2294_v61  ;;  %3173 = vst [vmem:[%s4313_s23 + $0x6d8] sm:$0xff] %v2806_v62  ;;  %v2296_v63 = vpop.f32.mrb[183].mxu0  ;;  %v2808_v0 = vpop.f32.mrb[183].mxu1 }
 0x294   : > { %v2299_v1 = vpop.f32.mrb[184].mxu0  ;;  %v2811_v2 = vpop.f32.mrb[184].mxu1 }
 0x295   : > { %3046 = vst [vmem:[%s4313_s23 + $0x2e0] sm:$0xff] %v2299_v1  ;;  %3174 = vst [vmem:[%s4313_s23 + $0x6e0] sm:$0xff] %v2811_v2  ;;  %v2301_v3 = vpop.f32.mrb[185].mxu0  ;;  %v2813_v4 = vpop.f32.mrb[185].mxu1 }
 0x296   : > { %v2302_v5 = vpop.f32.mrb[186].mxu0  ;;  %v2814_v6 = vpop.f32.mrb[186].mxu1 }
 0x297   : > { %3047 = vst [vmem:[%s4313_s23 + $0x2e8] sm:$0xff] %v2302_v5  ;;  %3175 = vst [vmem:[%s4313_s23 + $0x6e8] sm:$0xff] %v2814_v6  ;;  %v2304_v7 = vpop.f32.mrb[187].mxu0  ;;  %v2816_v8 = vpop.f32.mrb[187].mxu1 }
 0x29c   : > { %v2307_v9 = vpop.f32.mrb[188].mxu0  ;;  %v2819_v10 = vpop.f32.mrb[188].mxu1 }
 0x29d   : > { %3048 = vst [vmem:[%s4313_s23 + $0x2f0] sm:$0xff] %v2307_v9  ;;  %3176 = vst [vmem:[%s4313_s23 + $0x6f0] sm:$0xff] %v2819_v10  ;;  %v2309_v11 = vpop.f32.mrb[189].mxu0  ;;  %v2821_v12 = vpop.f32.mrb[189].mxu1 }
 0x29e   : > { %v2310_v13 = vpop.f32.mrb[190].mxu0  ;;  %v2822_v14 = vpop.f32.mrb[190].mxu1 }
 0x29f   : > { %3049 = vst [vmem:[%s4313_s23 + $0x2f8] sm:$0xff] %v2310_v13  ;;  %3177 = vst [vmem:[%s4313_s23 + $0x6f8] sm:$0xff] %v2822_v14  ;;  %v2312_v15 = vpop.f32.mrb[191].mxu0  ;;  %v2824_v16 = vpop.f32.mrb[191].mxu1 }
 0x2a4   : > { %v2315_v17 = vpop.f32.mrb[192].mxu0  ;;  %v2827_v18 = vpop.f32.mrb[192].mxu1 }
 0x2a5   : > { %3050 = vst [vmem:[%s4313_s23 + $0x300] sm:$0xff] %v2315_v17  ;;  %3178 = vst [vmem:[%s4313_s23 + $0x700] sm:$0xff] %v2827_v18  ;;  %v2317_v19 = vpop.f32.mrb[193].mxu0  ;;  %v2829_v20 = vpop.f32.mrb[193].mxu1 }
 0x2a6   : > { %v2318_v21 = vpop.f32.mrb[194].mxu0  ;;  %v2830_v22 = vpop.f32.mrb[194].mxu1 }
 0x2a7   : > { %3051 = vst [vmem:[%s4313_s23 + $0x308] sm:$0xff] %v2318_v21  ;;  %3179 = vst [vmem:[%s4313_s23 + $0x708] sm:$0xff] %v2830_v22  ;;  %v2320_v23 = vpop.f32.mrb[195].mxu0  ;;  %v2832_v24 = vpop.f32.mrb[195].mxu1 }
 0x2ac   : > { %v2323_v25 = vpop.f32.mrb[196].mxu0  ;;  %v2835_v26 = vpop.f32.mrb[196].mxu1 }
 0x2ad   : > { %3052 = vst [vmem:[%s4313_s23 + $0x310] sm:$0xff] %v2323_v25  ;;  %3180 = vst [vmem:[%s4313_s23 + $0x710] sm:$0xff] %v2835_v26  ;;  %v2325_v27 = vpop.f32.mrb[197].mxu0  ;;  %v2837_v28 = vpop.f32.mrb[197].mxu1 }
 0x2ae   : > { %v2326_v29 = vpop.f32.mrb[198].mxu0  ;;  %v2838_v30 = vpop.f32.mrb[198].mxu1 }
 0x2af   : > { %3053 = vst [vmem:[%s4313_s23 + $0x318] sm:$0xff] %v2326_v29  ;;  %3181 = vst [vmem:[%s4313_s23 + $0x718] sm:$0xff] %v2838_v30  ;;  %v2328_v31 = vpop.f32.mrb[199].mxu0  ;;  %v2840_v32 = vpop.f32.mrb[199].mxu1 }
 0x2b4   : > { %v2331_v33 = vpop.f32.mrb[200].mxu0  ;;  %v2843_v34 = vpop.f32.mrb[200].mxu1 }
 0x2b5   : > { %3054 = vst [vmem:[%s4313_s23 + $0x320] sm:$0xff] %v2331_v33  ;;  %3182 = vst [vmem:[%s4313_s23 + $0x720] sm:$0xff] %v2843_v34  ;;  %v2333_v35 = vpop.f32.mrb[201].mxu0  ;;  %v2845_v36 = vpop.f32.mrb[201].mxu1 }
 0x2b6   : > { %v2334_v37 = vpop.f32.mrb[202].mxu0  ;;  %v2846_v38 = vpop.f32.mrb[202].mxu1 }
 0x2b7   : > { %3055 = vst [vmem:[%s4313_s23 + $0x328] sm:$0xff] %v2334_v37  ;;  %3183 = vst [vmem:[%s4313_s23 + $0x728] sm:$0xff] %v2846_v38  ;;  %v2336_v39 = vpop.f32.mrb[203].mxu0  ;;  %v2848_v40 = vpop.f32.mrb[203].mxu1 }
 0x2bc   : > { %v2339_v41 = vpop.f32.mrb[204].mxu0  ;;  %v2851_v42 = vpop.f32.mrb[204].mxu1 }
 0x2bd   : > { %3056 = vst [vmem:[%s4313_s23 + $0x330] sm:$0xff] %v2339_v41  ;;  %3184 = vst [vmem:[%s4313_s23 + $0x730] sm:$0xff] %v2851_v42  ;;  %v2341_v43 = vpop.f32.mrb[205].mxu0  ;;  %v2853_v44 = vpop.f32.mrb[205].mxu1 }
 0x2be   : > { %v2342_v45 = vpop.f32.mrb[206].mxu0  ;;  %v2854_v46 = vpop.f32.mrb[206].mxu1 }
 0x2bf   : > { %3057 = vst [vmem:[%s4313_s23 + $0x338] sm:$0xff] %v2342_v45  ;;  %3185 = vst [vmem:[%s4313_s23 + $0x738] sm:$0xff] %v2854_v46  ;;  %v2344_v47 = vpop.f32.mrb[207].mxu0  ;;  %v2856_v48 = vpop.f32.mrb[207].mxu1 }
 0x2c4   : > { %v2347_v49 = vpop.f32.mrb[208].mxu0  ;;  %v2859_v50 = vpop.f32.mrb[208].mxu1 }
 0x2c5   : > { %3058 = vst [vmem:[%s4313_s23 + $0x340] sm:$0xff] %v2347_v49  ;;  %3186 = vst [vmem:[%s4313_s23 + $0x740] sm:$0xff] %v2859_v50  ;;  %v2349_v51 = vpop.f32.mrb[209].mxu0  ;;  %v2861_v52 = vpop.f32.mrb[209].mxu1 }
 0x2c6   : > { %v2350_v53 = vpop.f32.mrb[210].mxu0  ;;  %v2862_v54 = vpop.f32.mrb[210].mxu1 }
 0x2c7   : > { %3059 = vst [vmem:[%s4313_s23 + $0x348] sm:$0xff] %v2350_v53  ;;  %3187 = vst [vmem:[%s4313_s23 + $0x748] sm:$0xff] %v2862_v54  ;;  %v2352_v55 = vpop.f32.mrb[211].mxu0  ;;  %v2864_v56 = vpop.f32.mrb[211].mxu1 }
 0x2cc   : > { %v2355_v57 = vpop.f32.mrb[212].mxu0  ;;  %v2867_v58 = vpop.f32.mrb[212].mxu1 }
 0x2cd   : > { %3060 = vst [vmem:[%s4313_s23 + $0x350] sm:$0xff] %v2355_v57  ;;  %3188 = vst [vmem:[%s4313_s23 + $0x750] sm:$0xff] %v2867_v58  ;;  %v2357_v59 = vpop.f32.mrb[213].mxu0  ;;  %v2869_v60 = vpop.f32.mrb[213].mxu1 }
 0x2ce   : > { %v2358_v61 = vpop.f32.mrb[214].mxu0  ;;  %v2870_v62 = vpop.f32.mrb[214].mxu1 }
 0x2cf   : > { %3061 = vst [vmem:[%s4313_s23 + $0x358] sm:$0xff] %v2358_v61  ;;  %3189 = vst [vmem:[%s4313_s23 + $0x758] sm:$0xff] %v2870_v62  ;;  %v2360_v63 = vpop.f32.mrb[215].mxu0  ;;  %v2872_v0 = vpop.f32.mrb[215].mxu1 }
 0x2d4   : > { %v2363_v1 = vpop.f32.mrb[216].mxu0  ;;  %v2875_v2 = vpop.f32.mrb[216].mxu1 }
 0x2d5   : > { %3062 = vst [vmem:[%s4313_s23 + $0x360] sm:$0xff] %v2363_v1  ;;  %3190 = vst [vmem:[%s4313_s23 + $0x760] sm:$0xff] %v2875_v2  ;;  %v2365_v3 = vpop.f32.mrb[217].mxu0  ;;  %v2877_v4 = vpop.f32.mrb[217].mxu1 }
 0x2d6   : > { %v2366_v5 = vpop.f32.mrb[218].mxu0  ;;  %v2878_v6 = vpop.f32.mrb[218].mxu1 }
 0x2d7   : > { %3063 = vst [vmem:[%s4313_s23 + $0x368] sm:$0xff] %v2366_v5  ;;  %3191 = vst [vmem:[%s4313_s23 + $0x768] sm:$0xff] %v2878_v6  ;;  %v2368_v7 = vpop.f32.mrb[219].mxu0  ;;  %v2880_v8 = vpop.f32.mrb[219].mxu1 }
 0x2dc   : > { %v2371_v9 = vpop.f32.mrb[220].mxu0  ;;  %v2883_v10 = vpop.f32.mrb[220].mxu1 }
 0x2dd   : > { %3064 = vst [vmem:[%s4313_s23 + $0x370] sm:$0xff] %v2371_v9  ;;  %3192 = vst [vmem:[%s4313_s23 + $0x770] sm:$0xff] %v2883_v10  ;;  %v2373_v11 = vpop.f32.mrb[221].mxu0  ;;  %v2885_v12 = vpop.f32.mrb[221].mxu1 }
 0x2de   : > { %v2374_v13 = vpop.f32.mrb[222].mxu0  ;;  %v2886_v14 = vpop.f32.mrb[222].mxu1 }
 0x2df   : > { %3065 = vst [vmem:[%s4313_s23 + $0x378] sm:$0xff] %v2374_v13  ;;  %3193 = vst [vmem:[%s4313_s23 + $0x778] sm:$0xff] %v2886_v14  ;;  %v2376_v15 = vpop.f32.mrb[223].mxu0  ;;  %v2888_v16 = vpop.f32.mrb[223].mxu1 }
 0x2e4   : > { %v2379_v17 = vpop.f32.mrb[224].mxu0  ;;  %v2891_v18 = vpop.f32.mrb[224].mxu1 }
 0x2e5   : > { %3066 = vst [vmem:[%s4313_s23 + $0x380] sm:$0xff] %v2379_v17  ;;  %3194 = vst [vmem:[%s4313_s23 + $0x780] sm:$0xff] %v2891_v18  ;;  %v2381_v19 = vpop.f32.mrb[225].mxu0  ;;  %v2893_v20 = vpop.f32.mrb[225].mxu1 }
 0x2e6   : > { %v2382_v21 = vpop.f32.mrb[226].mxu0  ;;  %v2894_v22 = vpop.f32.mrb[226].mxu1 }
 0x2e7   : > { %3067 = vst [vmem:[%s4313_s23 + $0x388] sm:$0xff] %v2382_v21  ;;  %3195 = vst [vmem:[%s4313_s23 + $0x788] sm:$0xff] %v2894_v22  ;;  %v2384_v23 = vpop.f32.mrb[227].mxu0  ;;  %v2896_v24 = vpop.f32.mrb[227].mxu1 }
 0x2ec   : > { %v2387_v25 = vpop.f32.mrb[228].mxu0  ;;  %v2899_v26 = vpop.f32.mrb[228].mxu1 }
 0x2ed   : > { %3068 = vst [vmem:[%s4313_s23 + $0x390] sm:$0xff] %v2387_v25  ;;  %3196 = vst [vmem:[%s4313_s23 + $0x790] sm:$0xff] %v2899_v26  ;;  %v2389_v27 = vpop.f32.mrb[229].mxu0  ;;  %v2901_v28 = vpop.f32.mrb[229].mxu1 }
 0x2ee   : > { %v2390_v29 = vpop.f32.mrb[230].mxu0  ;;  %v2902_v30 = vpop.f32.mrb[230].mxu1 }
 0x2ef   : > { %3069 = vst [vmem:[%s4313_s23 + $0x398] sm:$0xff] %v2390_v29  ;;  %3197 = vst [vmem:[%s4313_s23 + $0x798] sm:$0xff] %v2902_v30  ;;  %v2392_v31 = vpop.f32.mrb[231].mxu0  ;;  %v2904_v32 = vpop.f32.mrb[231].mxu1 }
 0x2f4   : > { %v2395_v33 = vpop.f32.mrb[232].mxu0  ;;  %v2907_v34 = vpop.f32.mrb[232].mxu1 }
 0x2f5   : > { %3070 = vst [vmem:[%s4313_s23 + $0x3a0] sm:$0xff] %v2395_v33  ;;  %3198 = vst [vmem:[%s4313_s23 + $0x7a0] sm:$0xff] %v2907_v34  ;;  %v2397_v35 = vpop.f32.mrb[233].mxu0  ;;  %v2909_v36 = vpop.f32.mrb[233].mxu1 }
 0x2f6   : > { %v2398_v37 = vpop.f32.mrb[234].mxu0  ;;  %v2910_v38 = vpop.f32.mrb[234].mxu1 }
 0x2f7   : > { %3071 = vst [vmem:[%s4313_s23 + $0x3a8] sm:$0xff] %v2398_v37  ;;  %3199 = vst [vmem:[%s4313_s23 + $0x7a8] sm:$0xff] %v2910_v38  ;;  %v2400_v39 = vpop.f32.mrb[235].mxu0  ;;  %v2912_v40 = vpop.f32.mrb[235].mxu1 }
 0x2fc   : > { %v2403_v41 = vpop.f32.mrb[236].mxu0  ;;  %v2915_v42 = vpop.f32.mrb[236].mxu1 }
 0x2fd   : > { %3072 = vst [vmem:[%s4313_s23 + $0x3b0] sm:$0xff] %v2403_v41  ;;  %3200 = vst [vmem:[%s4313_s23 + $0x7b0] sm:$0xff] %v2915_v42  ;;  %v2405_v43 = vpop.f32.mrb[237].mxu0  ;;  %v2917_v44 = vpop.f32.mrb[237].mxu1 }
 0x2fe   : > { %v2406_v45 = vpop.f32.mrb[238].mxu0  ;;  %v2918_v46 = vpop.f32.mrb[238].mxu1 }
 0x2ff   : > { %3073 = vst [vmem:[%s4313_s23 + $0x3b8] sm:$0xff] %v2406_v45  ;;  %3201 = vst [vmem:[%s4313_s23 + $0x7b8] sm:$0xff] %v2918_v46  ;;  %v2408_v47 = vpop.f32.mrb[239].mxu0  ;;  %v2920_v48 = vpop.f32.mrb[239].mxu1 }
 0x304   : > { %v2411_v49 = vpop.f32.mrb[240].mxu0  ;;  %v2923_v50 = vpop.f32.mrb[240].mxu1 }
 0x305   : > { %3074 = vst [vmem:[%s4313_s23 + $0x3c0] sm:$0xff] %v2411_v49  ;;  %3202 = vst [vmem:[%s4313_s23 + $0x7c0] sm:$0xff] %v2923_v50  ;;  %v2413_v51 = vpop.f32.mrb[241].mxu0  ;;  %v2925_v52 = vpop.f32.mrb[241].mxu1 }
 0x306   : > { %v2414_v53 = vpop.f32.mrb[242].mxu0  ;;  %v2926_v54 = vpop.f32.mrb[242].mxu1 }
 0x307   : > { %3075 = vst [vmem:[%s4313_s23 + $0x3c8] sm:$0xff] %v2414_v53  ;;  %3203 = vst [vmem:[%s4313_s23 + $0x7c8] sm:$0xff] %v2926_v54  ;;  %v2416_v55 = vpop.f32.mrb[243].mxu0  ;;  %v2928_v56 = vpop.f32.mrb[243].mxu1 }
 0x30c   : > { %v2419_v57 = vpop.f32.mrb[244].mxu0  ;;  %v2931_v58 = vpop.f32.mrb[244].mxu1 }
 0x30d   : > { %3076 = vst [vmem:[%s4313_s23 + $0x3d0] sm:$0xff] %v2419_v57  ;;  %3204 = vst [vmem:[%s4313_s23 + $0x7d0] sm:$0xff] %v2931_v58  ;;  %v2421_v59 = vpop.f32.mrb[245].mxu0  ;;  %v2933_v60 = vpop.f32.mrb[245].mxu1 }
 0x30e   : > { %v2422_v61 = vpop.f32.mrb[246].mxu0  ;;  %v2934_v62 = vpop.f32.mrb[246].mxu1 }
 0x30f   : > { %3077 = vst [vmem:[%s4313_s23 + $0x3d8] sm:$0xff] %v2422_v61  ;;  %3205 = vst [vmem:[%s4313_s23 + $0x7d8] sm:$0xff] %v2934_v62  ;;  %v2424_v63 = vpop.f32.mrb[247].mxu0  ;;  %v2936_v0 = vpop.f32.mrb[247].mxu1 }
 0x314   : > { %v2427_v1 = vpop.f32.mrb[248].mxu0  ;;  %v2939_v2 = vpop.f32.mrb[248].mxu1 }
 0x315   : > { %3078 = vst [vmem:[%s4313_s23 + $0x3e0] sm:$0xff] %v2427_v1  ;;  %3206 = vst [vmem:[%s4313_s23 + $0x7e0] sm:$0xff] %v2939_v2  ;;  %v2429_v3 = vpop.f32.mrb[249].mxu0  ;;  %v2941_v4 = vpop.f32.mrb[249].mxu1 }
 0x316   : > { %v2430_v5 = vpop.f32.mrb[250].mxu0  ;;  %v2942_v6 = vpop.f32.mrb[250].mxu1 }
 0x317   : > { %3079 = vst [vmem:[%s4313_s23 + $0x3e8] sm:$0xff] %v2430_v5  ;;  %3207 = vst [vmem:[%s4313_s23 + $0x7e8] sm:$0xff] %v2942_v6  ;;  %v2432_v7 = vpop.f32.mrb[251].mxu0  ;;  %v2944_v8 = vpop.f32.mrb[251].mxu1 }
 0x31c   : > { %v2435_v9 = vpop.f32.mrb[252].mxu0  ;;  %v2947_v10 = vpop.f32.mrb[252].mxu1 }
 0x31d   : > { %3080 = vst [vmem:[%s4313_s23 + $0x3f0] sm:$0xff] %v2435_v9  ;;  %3208 = vst [vmem:[%s4313_s23 + $0x7f0] sm:$0xff] %v2947_v10  ;;  %v2437_v11 = vpop.f32.mrb[253].mxu0  ;;  %v2949_v12 = vpop.f32.mrb[253].mxu1 }
 0x31e   : > { %v2438_v13 = vpop.f32.mrb[254].mxu0  ;;  %v2950_v14 = vpop.f32.mrb[254].mxu1 }
 0x31f   : > { %3081 = vst [vmem:[%s4313_s23 + $0x3f8] sm:$0xff] %v2438_v13  ;;  %3209 = vst [vmem:[%s4313_s23 + $0x7f8] sm:$0xff] %v2950_v14  ;;  %v2440_v15 = vpop.f32.mrb[255].mxu0  ;;  %v2952_v16 = vpop.f32.mrb[255].mxu1 }
 0x320 PF: > { %s12_s11 = sadd.s32 1, %s4098_s11   ;;  %s4729_s9 = smov %s4094_s10 }
 0x321   : > { %p9_p5 = scmp.ge.s32.totalorder %s12_s11, 6   ;;  %s4730_s10 = smov %s4732_s12 }
 0x323   :  { %11 = sbr.rel (!%p9_p5) target bundleno = 2 (0x2), region = 61 }

</bundles_post_ra>
